<compile_context>
chip_gen: v7x
topology: tpu7x:2x2x1
jax: 0.10.0
libtpu: 0.0.40
codegen_flags: <defaults>
</compile_context>

<pallas_src>
import math

import jax
import jax.numpy as jnp
from jax.experimental import pallas as pl
from jax.experimental.pallas import tpu as pltpu

LANE = 128                       # TPU vreg lane width.
ACT_DTYPE = jnp.bfloat16         # inter-layer activation storage dtype.
W_DTYPE = jnp.bfloat16           # matmul weight dtype (MXU is bf16-native).
VMEM_LIMIT = 48 * 1024 * 1024    # explicit scoped-VMEM budget (v7x headroom).


def _round_up(v, m):
    return ((v + m - 1) // m) * m


# ----------------------------------------------------------------------------
# Fused Conv2d(3x3, padding=1) + bias + ReLU (+ optional MaxPool2d(2, 2))
# ----------------------------------------------------------------------------
def _make_conv_kernel(H, W, C, Cout, pool, x_dtype, out_dtype):
    HW = H * W
    Ho, Wo = (H // 2, W // 2) if pool else (H, W)
    taps = [(kh, kw) for kh in range(3) for kw in range(3)]

    def kernel(x_ref, w_ref, b_ref, o_ref, xp_ref):
        # x_ref : (1, H, W, C)       input tile (one image), bf16
        # w_ref : (9*C, Cout)        bf16 weights, im2col row order (kh, kw, ci)
        # b_ref : (1, Cout)          f32 bias
        # o_ref : (1, Ho, Wo, Cout)  bf16 output tile
        # xp_ref: VMEM (H+2, W+2, C) zero-halo copy of the input tile

        # ---- halo: zero ONLY the 1-pixel border, then copy the interior ----
        zrow = jnp.zeros((1, W + 2, C), x_dtype)
        xp_ref[pl.ds(0, 1), :, :] = zrow
        xp_ref[pl.ds(H + 1, 1), :, :] = zrow
        zcol = jnp.zeros((H + 2, 1, C), x_dtype)
        xp_ref[:, pl.ds(0, 1), :] = zcol
        xp_ref[:, pl.ds(W + 1, 1), :] = zcol
        xp_ref[pl.ds(1, H), pl.ds(1, W), :] = x_ref[0]

        # ---- 9 accumulated per-tap matmuls (no materialized im2col slab) ---
        # Each tap is a K = C matmul with bf16 operands and f32 accumulation.
        def tap_dot(t, kh, kw):
            tap = xp_ref[pl.ds(kh, H), pl.ds(kw, W), :].reshape(HW, C)
            w_t = w_ref[pl.ds(t * C, C), :]
            return jnp.dot(tap, w_t, preferred_element_type=jnp.float32)

        acc = tap_dot(0, 0, 0)
        for t, (kh, kw) in enumerate(taps[1:], start=1):
            acc = acc + tap_dot(t, kh, kw)

        # ---- fused bias + ReLU (f32 epilogue; v5e has no bf16 VPU) ---------
        acc = jnp.maximum(acc + b_ref[...], 0.0)                 # (HW, Cout)

        if not pool:
            o_ref[...] = acc.reshape(1, H, W, Cout).astype(out_dtype)
        else:
            # ---- fused MaxPool2d(2, 2) directly from the accumulator -------
            a5 = acc.reshape(Ho, 2, Wo, 2, Cout)
            r = jnp.maximum(a5[:, 0], a5[:, 1])                  # (Ho, Wo, 2, Cout)
            r = jnp.maximum(r[:, :, 0], r[:, :, 1])              # (Ho, Wo, Cout)
            o_ref[...] = r.reshape(1, Ho, Wo, Cout).astype(out_dtype)

    return kernel


def conv3x3_relu(x, w2, b, *, pool):
    """x: (N, H, W, C) NHWC bf16; w2: (9*C, Cout) bf16; b: (1, Cout) f32."""
    N, H, W, C = x.shape
    Cout = w2.shape[1]
    assert w2.shape[0] == 9 * C
    if pool:
        assert H % 2 == 0 and W % 2 == 0
    Ho, Wo = (H // 2, W // 2) if pool else (H, W)

    kernel = _make_conv_kernel(H, W, C, Cout, pool, x.dtype, ACT_DTYPE)

    return pl.pallas_call(
        kernel,
        out_shape=jax.ShapeDtypeStruct((N, Ho, Wo, Cout), ACT_DTYPE),
        grid=(N,),
        in_specs=[
            pl.BlockSpec((1, H, W, C), lambda n: (n, 0, 0, 0)),
            pl.BlockSpec((9 * C, Cout), lambda n: (0, 0)),     # resident weights
            pl.BlockSpec((1, Cout), lambda n: (0, 0)),         # resident bias
        ],
        out_specs=pl.BlockSpec((1, Ho, Wo, Cout), lambda n: (n, 0, 0, 0)),
        scratch_shapes=[pltpu.VMEM((H + 2, W + 2, C), x.dtype)],
        compiler_params=pltpu.CompilerParams(
            # Batch axis is parallel; with batch >= 2 both v7x TensorCores are
            # used.  TODO(synk): for batch-1 inference mark the (future)
            # row-tile axis parallel instead.
            dimension_semantics=("parallel",),
            vmem_limit_bytes=VMEM_LIMIT),
    )(x, w2, b)


# ----------------------------------------------------------------------------
# Standalone MaxPool2d(2, 2) (only used when an 'M' does not follow a conv)
# ----------------------------------------------------------------------------
def _make_pool_kernel(H, W, C, out_dtype):
    Ho, Wo = H // 2, W // 2

    def kernel(x_ref, o_ref):
        x = x_ref[0].astype(jnp.float32).reshape(Ho, 2, Wo, 2, C)
        r = jnp.maximum(x[:, 0], x[:, 1])
        r = jnp.maximum(r[:, :, 0], r[:, :, 1])
        o_ref[...] = r.reshape(1, Ho, Wo, C).astype(out_dtype)

    return kernel


def maxpool2x2(x):
    N, H, W, C = x.shape
    assert H % 2 == 0 and W % 2 == 0
    Ho, Wo = H // 2, W // 2
    return pl.pallas_call(
        _make_pool_kernel(H, W, C, x.dtype),
        out_shape=jax.ShapeDtypeStruct((N, Ho, Wo, C), x.dtype),
        grid=(N,),
        in_specs=[pl.BlockSpec((1, H, W, C), lambda n: (n, 0, 0, 0))],
        out_specs=pl.BlockSpec((1, Ho, Wo, C), lambda n: (n, 0, 0, 0)),
        compiler_params=pltpu.CompilerParams(
            dimension_semantics=("parallel",),
            vmem_limit_bytes=VMEM_LIMIT),
    )(x)


# ----------------------------------------------------------------------------
# Parameters (matching VGG._initialize_weights) and layer plan
# ----------------------------------------------------------------------------
def init_conv_params(key, cin, cout):
    # n = k*k*out_channels ; weight ~ N(0, sqrt(2/n)) ; bias = 0
    n = 3 * 3 * cout
    std = math.sqrt(2.0 / n)
    w = jax.random.normal(key, (3, 3, cin, cout), jnp.float32) * std
    b = jnp.zeros((cout,), jnp.float32)
    return w, b


def _pack_conv_params(w, b, cin_pad, cout_pad):
    """Zero-pad channels to the layer's padded widths; pack weights to bf16 in
    im2col row order (row = (kh*3 + kw) * cin_pad + ci)."""
    k, _, cin, cout = w.shape
    wp = jnp.zeros((k, k, cin_pad, cout_pad), jnp.float32)
    wp = wp.at[:, :, :cin, :cout].set(w)
    w2 = wp.reshape(k * k * cin_pad, cout_pad).astype(W_DTYPE)
    bp = jnp.zeros((1, cout_pad), jnp.float32).at[0, :cout].set(b)
    return w2, bp


def build_vgg(key, cfg, in_channels):
    """Builds the layer plan and padded/packed parameters for `features`."""
    plan, params = [], []
    c_true = in_channels
    # First conv reads the TRUE input channels (no 32-43x zero inflation of the
    # layer-1 DMA / halo / matmul K); later layers are lane-padded to 128.
    c_pad = in_channels
    i = 0
    while i < len(cfg):
        v = cfg[i]
        if v == "M":
            plan.append(("pool",))
            i += 1
            continue
        cout_true = v
        cout_pad = _round_up(cout_true, LANE)
        key, sub = jax.random.split(key)
        w, b = init_conv_params(sub, c_true, cout_true)
        params.append(_pack_conv_params(w, b, c_pad, cout_pad))
        fuse_pool = (i + 1 < len(cfg) and cfg[i + 1] == "M")
        plan.append(("conv", len(params) - 1, fuse_pool))
        c_true, c_pad = cout_true, cout_pad
        i += 2 if fuse_pool else 1
    return plan, params, c_true


def vgg_forward(x_nchw, plan, params, out_channels):
    """Equivalent of VGG.forward: x = self.features(x). NCHW in / NCHW out."""
    in_dtype = x_nchw.dtype
    # One-time boundary glue: NCHW -> NHWC, bf16 activations.  No channel
    # padding here -- the first conv consumes the true channel count.
    x = jnp.transpose(x_nchw, (0, 2, 3, 1)).astype(ACT_DTYPE)
    for layer in plan:
        if layer[0] == "conv":
            _, pidx, fuse_pool = layer
            w2, b = params[pidx]
            x = conv3x3_relu(x, w2, b, pool=fuse_pool)
        else:
            x = maxpool2x2(x)
    # Strip channel padding and return to the PyTorch NCHW layout / dtype.
    x = x[..., :out_channels].astype(in_dtype)
    return jnp.transpose(x, (0, 3, 1, 2))


if __name__ == "__main__":
    key = jax.random.PRNGKey(0)

    # Small VGG-style feature config: conv-conv-pool-conv-pool.
    cfg = [8, 8, "M", 16, "M"]
    in_channels = 4

    key, pkey, xkey = jax.random.split(key, 3)
    plan, params, out_channels = build_vgg(pkey, cfg, in_channels)

    # PyTorch-convention NCHW input.
    x = jax.random.normal(xkey, (2, in_channels, 16, 16), jnp.float32)

    fwd = jax.jit(lambda inp: vgg_forward(inp, plan, params, out_channels))
    out = fwd(x)
    jax.block_until_ready(out)

    assert out.shape == (2, 16, 4, 4), out.shape
    assert out.dtype == jnp.float32
    print("KERNEL_OK")
</pallas_src>

<mosaic_0001>
module attributes {stable_mosaic.version = 11 : i64} {
  func.func @kernel(%arg0: i32, %arg1: memref<1x16x16x4xbf16, #tpu.memory_space<vmem>>, %arg2: memref<36x128xbf16, #tpu.memory_space<vmem>>, %arg3: memref<1x128xf32, #tpu.memory_space<vmem>>, %arg4: memref<1x16x16x128xbf16, #tpu.memory_space<vmem>>, %arg5: memref<18x18x4xbf16, #tpu.memory_space<vmem>>) attributes {dimension_semantics = [#tpu.dimension_semantics<parallel>], iteration_bounds = array<i64: 2>, scalar_prefetch = 0 : i64, scratch_operands = 1 : i64, tpu.core_type = #tpu.core_type<tc>, window_params = [{transform_indices = @transform_0, window_bounds = array<i64: 1, 16, 16, 4>}, {pipeline_mode = #tpu.pipeline_mode<synchronous>, transform_indices = @transform_1, window_bounds = array<i64: 36, 128>}, {pipeline_mode = #tpu.pipeline_mode<synchronous>, transform_indices = @transform_2, window_bounds = array<i64: 1, 128>}, {transform_indices = @transform_3, window_bounds = array<i64: 1, 16, 16, 128>}]} {
    %cst = arith.constant 0.000000e+00 : bf16
    %0 = vector.broadcast %cst : bf16 to vector<1x18x4xbf16>
    %c0 = arith.constant 0 : index
    %c0_0 = arith.constant 0 : index
    %c0_1 = arith.constant 0 : index
    %1 = vector.load %arg5[%c0, %c0_0, %c0_1] : memref<18x18x4xbf16, #tpu.memory_space<vmem>>, vector<1x18x4xbf16>
    tpu.vector_store %arg5[%c0, %c0_0, %c0_1], %0 {strides = array<i32>} : memref<18x18x4xbf16, #tpu.memory_space<vmem>>, vector<1x18x4xbf16>,
    %c17 = arith.constant 17 : index
    %c0_2 = arith.constant 0 : index
    %c0_3 = arith.constant 0 : index
    %2 = vector.load %arg5[%c17, %c0_2, %c0_3] : memref<18x18x4xbf16, #tpu.memory_space<vmem>>, vector<1x18x4xbf16>
    tpu.vector_store %arg5[%c17, %c0_2, %c0_3], %0 {strides = array<i32>} : memref<18x18x4xbf16, #tpu.memory_space<vmem>>, vector<1x18x4xbf16>,
    %cst_4 = arith.constant 0.000000e+00 : bf16
    %3 = vector.broadcast %cst_4 : bf16 to vector<18x1x4xbf16>
    %c0_5 = arith.constant 0 : index
    %c0_6 = arith.constant 0 : index
    %c0_7 = arith.constant 0 : index
    %4 = vector.load %arg5[%c0_5, %c0_6, %c0_7] : memref<18x18x4xbf16, #tpu.memory_space<vmem>>, vector<18x1x4xbf16>
    tpu.vector_store %arg5[%c0_5, %c0_6, %c0_7], %3 {strides = array<i32>} : memref<18x18x4xbf16, #tpu.memory_space<vmem>>, vector<18x1x4xbf16>,
    %c0_8 = arith.constant 0 : index
    %c17_9 = arith.constant 17 : index
    %c0_10 = arith.constant 0 : index
    %5 = vector.load %arg5[%c0_8, %c17_9, %c0_10] : memref<18x18x4xbf16, #tpu.memory_space<vmem>>, vector<18x1x4xbf16>
    tpu.vector_store %arg5[%c0_8, %c17_9, %c0_10], %3 {strides = array<i32>} : memref<18x18x4xbf16, #tpu.memory_space<vmem>>, vector<18x1x4xbf16>,
    %c0_11 = arith.constant 0 : index
    %c0_12 = arith.constant 0 : index
    %c0_13 = arith.constant 0 : index
    %c0_14 = arith.constant 0 : index
    %6 = vector.load %arg1[%c0_11, %c0_12, %c0_13, %c0_14] : memref<1x16x16x4xbf16, #tpu.memory_space<vmem>>, vector<1x16x16x4xbf16>
    %7 = vector.shape_cast %6 : vector<1x16x16x4xbf16> to vector<16x16x4xbf16>
    %c1 = arith.constant 1 : index
    %c1_15 = arith.constant 1 : index
    %c0_16 = arith.constant 0 : index
    %8 = vector.load %arg5[%c1, %c1_15, %c0_16] : memref<18x18x4xbf16, #tpu.memory_space<vmem>>, vector<16x16x4xbf16>
    tpu.vector_store %arg5[%c1, %c1_15, %c0_16], %7 {strides = array<i32>} : memref<18x18x4xbf16, #tpu.memory_space<vmem>>, vector<16x16x4xbf16>,
    %c0_17 = arith.constant 0 : index
    %c0_18 = arith.constant 0 : index
    %c0_19 = arith.constant 0 : index
    %9 = vector.load %arg5[%c0_17, %c0_18, %c0_19] : memref<18x18x4xbf16, #tpu.memory_space<vmem>>, vector<16x16x4xbf16>
    %10 = vector.shape_cast %9 : vector<16x16x4xbf16> to vector<256x4xbf16>
    %c0_20 = arith.constant 0 : index
    %c0_21 = arith.constant 0 : index
    %11 = vector.load %arg2[%c0_20, %c0_21] : memref<36x128xbf16, #tpu.memory_space<vmem>>, vector<4x128xbf16>
    %cst_22 = arith.constant dense<0.000000e+00> : vector<256x128xf32>
    %12 = tpu.matmul %10, %11, %cst_22 {dimension_numbers = #tpu.dot_dimension_numbers<[1], [0], [0], [1], [0, 0, 1, 1], [], []>} : vector<256x4xbf16>, vector<4x128xbf16>, vector<256x128xf32> -> vector<256x128xf32>
    %c0_23 = arith.constant 0 : index
    %c1_24 = arith.constant 1 : index
    %c0_25 = arith.constant 0 : index
    %13 = vector.load %arg5[%c0_23, %c1_24, %c0_25] : memref<18x18x4xbf16, #tpu.memory_space<vmem>>, vector<16x16x4xbf16>
    %14 = vector.shape_cast %13 : vector<16x16x4xbf16> to vector<256x4xbf16>
    %c4 = arith.constant 4 : index
    %c0_26 = arith.constant 0 : index
    %15 = vector.load %arg2[%c4, %c0_26] : memref<36x128xbf16, #tpu.memory_space<vmem>>, vector<4x128xbf16>
    %cst_27 = arith.constant dense<0.000000e+00> : vector<256x128xf32>
    %16 = tpu.matmul %14, %15, %cst_27 {dimension_numbers = #tpu.dot_dimension_numbers<[1], [0], [0], [1], [0, 0, 1, 1], [], []>} : vector<256x4xbf16>, vector<4x128xbf16>, vector<256x128xf32> -> vector<256x128xf32>
    %17 = arith.addf %12, %16 : vector<256x128xf32>
    %c0_28 = arith.constant 0 : index
    %c2 = arith.constant 2 : index
    %c0_29 = arith.constant 0 : index
    %18 = vector.load %arg5[%c0_28, %c2, %c0_29] : memref<18x18x4xbf16, #tpu.memory_space<vmem>>, vector<16x16x4xbf16>
    %19 = vector.shape_cast %18 : vector<16x16x4xbf16> to vector<256x4xbf16>
    %c8 = arith.constant 8 : index
    %c0_30 = arith.constant 0 : index
    %20 = vector.load %arg2[%c8, %c0_30] : memref<36x128xbf16, #tpu.memory_space<vmem>>, vector<4x128xbf16>
    %cst_31 = arith.constant dense<0.000000e+00> : vector<256x128xf32>
    %21 = tpu.matmul %19, %20, %cst_31 {dimension_numbers = #tpu.dot_dimension_numbers<[1], [0], [0], [1], [0, 0, 1, 1], [], []>} : vector<256x4xbf16>, vector<4x128xbf16>, vector<256x128xf32> -> vector<256x128xf32>
    %22 = arith.addf %17, %21 : vector<256x128xf32>
    %c1_32 = arith.constant 1 : index
    %c0_33 = arith.constant 0 : index
    %c0_34 = arith.constant 0 : index
    %23 = vector.load %arg5[%c1_32, %c0_33, %c0_34] : memref<18x18x4xbf16, #tpu.memory_space<vmem>>, vector<16x16x4xbf16>
    %24 = vector.shape_cast %23 : vector<16x16x4xbf16> to vector<256x4xbf16>
    %c12 = arith.constant 12 : index
    %c0_35 = arith.constant 0 : index
    %25 = vector.load %arg2[%c12, %c0_35] : memref<36x128xbf16, #tpu.memory_space<vmem>>, vector<4x128xbf16>
    %cst_36 = arith.constant dense<0.000000e+00> : vector<256x128xf32>
    %26 = tpu.matmul %24, %25, %cst_36 {dimension_numbers = #tpu.dot_dimension_numbers<[1], [0], [0], [1], [0, 0, 1, 1], [], []>} : vector<256x4xbf16>, vector<4x128xbf16>, vector<256x128xf32> -> vector<256x128xf32>
    %27 = arith.addf %22, %26 : vector<256x128xf32>
    %c1_37 = arith.constant 1 : index
    %c1_38 = arith.constant 1 : index
    %c0_39 = arith.constant 0 : index
    %28 = vector.load %arg5[%c1_37, %c1_38, %c0_39] : memref<18x18x4xbf16, #tpu.memory_space<vmem>>, vector<16x16x4xbf16>
    %29 = vector.shape_cast %28 : vector<16x16x4xbf16> to vector<256x4xbf16>
    %c16 = arith.constant 16 : index
    %c0_40 = arith.constant 0 : index
    %30 = vector.load %arg2[%c16, %c0_40] : memref<36x128xbf16, #tpu.memory_space<vmem>>, vector<4x128xbf16>
    %cst_41 = arith.constant dense<0.000000e+00> : vector<256x128xf32>
    %31 = tpu.matmul %29, %30, %cst_41 {dimension_numbers = #tpu.dot_dimension_numbers<[1], [0], [0], [1], [0, 0, 1, 1], [], []>} : vector<256x4xbf16>, vector<4x128xbf16>, vector<256x128xf32> -> vector<256x128xf32>
    %32 = arith.addf %27, %31 : vector<256x128xf32>
    %c1_42 = arith.constant 1 : index
    %c2_43 = arith.constant 2 : index
    %c0_44 = arith.constant 0 : index
    %33 = vector.load %arg5[%c1_42, %c2_43, %c0_44] : memref<18x18x4xbf16, #tpu.memory_space<vmem>>, vector<16x16x4xbf16>
    %34 = vector.shape_cast %33 : vector<16x16x4xbf16> to vector<256x4xbf16>
    %c20 = arith.constant 20 : index
    %c0_45 = arith.constant 0 : index
    %35 = vector.load %arg2[%c20, %c0_45] : memref<36x128xbf16, #tpu.memory_space<vmem>>, vector<4x128xbf16>
    %cst_46 = arith.constant dense<0.000000e+00> : vector<256x128xf32>
    %36 = tpu.matmul %34, %35, %cst_46 {dimension_numbers = #tpu.dot_dimension_numbers<[1], [0], [0], [1], [0, 0, 1, 1], [], []>} : vector<256x4xbf16>, vector<4x128xbf16>, vector<256x128xf32> -> vector<256x128xf32>
    %37 = arith.addf %32, %36 : vector<256x128xf32>
    %c2_47 = arith.constant 2 : index
    %c0_48 = arith.constant 0 : index
    %c0_49 = arith.constant 0 : index
    %38 = vector.load %arg5[%c2_47, %c0_48, %c0_49] : memref<18x18x4xbf16, #tpu.memory_space<vmem>>, vector<16x16x4xbf16>
    %39 = vector.shape_cast %38 : vector<16x16x4xbf16> to vector<256x4xbf16>
    %c24 = arith.constant 24 : index
    %c0_50 = arith.constant 0 : index
    %40 = vector.load %arg2[%c24, %c0_50] : memref<36x128xbf16, #tpu.memory_space<vmem>>, vector<4x128xbf16>
    %cst_51 = arith.constant dense<0.000000e+00> : vector<256x128xf32>
    %41 = tpu.matmul %39, %40, %cst_51 {dimension_numbers = #tpu.dot_dimension_numbers<[1], [0], [0], [1], [0, 0, 1, 1], [], []>} : vector<256x4xbf16>, vector<4x128xbf16>, vector<256x128xf32> -> vector<256x128xf32>
    %42 = arith.addf %37, %41 : vector<256x128xf32>
    %c2_52 = arith.constant 2 : index
    %c1_53 = arith.constant 1 : index
    %c0_54 = arith.constant 0 : index
    %43 = vector.load %arg5[%c2_52, %c1_53, %c0_54] : memref<18x18x4xbf16, #tpu.memory_space<vmem>>, vector<16x16x4xbf16>
    %44 = vector.shape_cast %43 : vector<16x16x4xbf16> to vector<256x4xbf16>
    %c28 = arith.constant 28 : index
    %c0_55 = arith.constant 0 : index
    %45 = vector.load %arg2[%c28, %c0_55] : memref<36x128xbf16, #tpu.memory_space<vmem>>, vector<4x128xbf16>
    %cst_56 = arith.constant dense<0.000000e+00> : vector<256x128xf32>
    %46 = tpu.matmul %44, %45, %cst_56 {dimension_numbers = #tpu.dot_dimension_numbers<[1], [0], [0], [1], [0, 0, 1, 1], [], []>} : vector<256x4xbf16>, vector<4x128xbf16>, vector<256x128xf32> -> vector<256x128xf32>
    %47 = arith.addf %42, %46 : vector<256x128xf32>
    %c2_57 = arith.constant 2 : index
    %c2_58 = arith.constant 2 : index
    %c0_59 = arith.constant 0 : index
    %48 = vector.load %arg5[%c2_57, %c2_58, %c0_59] : memref<18x18x4xbf16, #tpu.memory_space<vmem>>, vector<16x16x4xbf16>
    %49 = vector.shape_cast %48 : vector<16x16x4xbf16> to vector<256x4xbf16>
    %c32 = arith.constant 32 : index
    %c0_60 = arith.constant 0 : index
    %50 = vector.load %arg2[%c32, %c0_60] : memref<36x128xbf16, #tpu.memory_space<vmem>>, vector<4x128xbf16>
    %cst_61 = arith.constant dense<0.000000e+00> : vector<256x128xf32>
    %51 = tpu.matmul %49, %50, %cst_61 {dimension_numbers = #tpu.dot_dimension_numbers<[1], [0], [0], [1], [0, 0, 1, 1], [], []>} : vector<256x4xbf16>, vector<4x128xbf16>, vector<256x128xf32> -> vector<256x128xf32>
    %52 = arith.addf %47, %51 : vector<256x128xf32>
    %c0_62 = arith.constant 0 : index
    %c0_63 = arith.constant 0 : index
    %53 = vector.load %arg3[%c0_62, %c0_63] : memref<1x128xf32, #tpu.memory_space<vmem>>, vector<1x128xf32>
    %54 = vector.broadcast %53 : vector<1x128xf32> to vector<256x128xf32>
    %55 = arith.addf %52, %54 : vector<256x128xf32>
    %cst_64 = arith.constant 0.000000e+00 : f32
    %56 = vector.broadcast %cst_64 : f32 to vector<256x128xf32>
    %57 = arith.maximumf %55, %56 : vector<256x128xf32>
    %58 = vector.shape_cast %57 : vector<256x128xf32> to vector<1x16x16x128xf32>
    %59 = arith.truncf %58 : vector<1x16x16x128xf32> to vector<1x16x16x128xbf16>
    %c0_65 = arith.constant 0 : index
    %c0_66 = arith.constant 0 : index
    %c0_67 = arith.constant 0 : index
    %c0_68 = arith.constant 0 : index
    %60 = vector.load %arg4[%c0_65, %c0_66, %c0_67, %c0_68] : memref<1x16x16x128xbf16, #tpu.memory_space<vmem>>, vector<1x16x16x128xbf16>
    tpu.vector_store %arg4[%c0_65, %c0_66, %c0_67, %c0_68], %59 {strides = array<i32>} : memref<1x16x16x128xbf16, #tpu.memory_space<vmem>>, vector<1x16x16x128xbf16>,
    return
  }
  func.func @transform_0(%arg0: i32) -> (i32, i32, i32, i32) {
    %c0_i32 = arith.constant 0 : i32
    %c0_i32_0 = arith.constant 0 : i32
    %c0_i32_1 = arith.constant 0 : i32
    %c0_i32_2 = arith.constant 0 : i32
    return %arg0, %c0_i32, %c0_i32_0, %c0_i32_1 : i32, i32, i32, i32
  }
  func.func @transform_1(%arg0: i32) -> (i32, i32) {
    %c0_i32 = arith.constant 0 : i32
    %c0_i32_0 = arith.constant 0 : i32
    %c0_i32_1 = arith.constant 0 : i32
    return %c0_i32, %c0_i32_0 : i32, i32
  }
  func.func @transform_2(%arg0: i32) -> (i32, i32) {
    %c0_i32 = arith.constant 0 : i32
    %c0_i32_0 = arith.constant 0 : i32
    %c0_i32_1 = arith.constant 0 : i32
    return %c0_i32, %c0_i32_0 : i32, i32
  }
  func.func @transform_3(%arg0: i32) -> (i32, i32, i32, i32) {
    %c0_i32 = arith.constant 0 : i32
    %c0_i32_0 = arith.constant 0 : i32
    %c0_i32_1 = arith.constant 0 : i32
    %c0_i32_2 = arith.constant 0 : i32
    return %arg0, %c0_i32, %c0_i32_0, %c0_i32_1 : i32, i32, i32, i32
  }
}

module attributes {stable_mosaic.version = 11 : i64} {
  func.func @kernel(%arg0: i32, %arg1: memref<1x8x8x128xbf16, #tpu.memory_space<vmem>>, %arg2: memref<1152x128xbf16, #tpu.memory_space<vmem>>, %arg3: memref<1x128xf32, #tpu.memory_space<vmem>>, %arg4: memref<1x4x4x128xbf16, #tpu.memory_space<vmem>>, %arg5: memref<10x10x128xbf16, #tpu.memory_space<vmem>>) attributes {dimension_semantics = [#tpu.dimension_semantics<parallel>], iteration_bounds = array<i64: 2>, scalar_prefetch = 0 : i64, scratch_operands = 1 : i64, tpu.core_type = #tpu.core_type<tc>, window_params = [{transform_indices = @transform_0, window_bounds = array<i64: 1, 8, 8, 128>}, {pipeline_mode = #tpu.pipeline_mode<synchronous>, transform_indices = @transform_1, window_bounds = array<i64: 1152, 128>}, {pipeline_mode = #tpu.pipeline_mode<synchronous>, transform_indices = @transform_2, window_bounds = array<i64: 1, 128>}, {transform_indices = @transform_3, window_bounds = array<i64: 1, 4, 4, 128>}]} {
    %cst = arith.constant 0.000000e+00 : bf16
    %0 = vector.broadcast %cst : bf16 to vector<1x10x128xbf16>
    %c0 = arith.constant 0 : index
    %c0_0 = arith.constant 0 : index
    %c0_1 = arith.constant 0 : index
    %1 = vector.load %arg5[%c0, %c0_0, %c0_1] : memref<10x10x128xbf16, #tpu.memory_space<vmem>>, vector<1x10x128xbf16>
    tpu.vector_store %arg5[%c0, %c0_0, %c0_1], %0 {strides = array<i32>} : memref<10x10x128xbf16, #tpu.memory_space<vmem>>, vector<1x10x128xbf16>,
    %c9 = arith.constant 9 : index
    %c0_2 = arith.constant 0 : index
    %c0_3 = arith.constant 0 : index
    %2 = vector.load %arg5[%c9, %c0_2, %c0_3] : memref<10x10x128xbf16, #tpu.memory_space<vmem>>, vector<1x10x128xbf16>
    tpu.vector_store %arg5[%c9, %c0_2, %c0_3], %0 {strides = array<i32>} : memref<10x10x128xbf16, #tpu.memory_space<vmem>>, vector<1x10x128xbf16>,
    %cst_4 = arith.constant 0.000000e+00 : bf16
    %3 = vector.broadcast %cst_4 : bf16 to vector<10x1x128xbf16>
    %c0_5 = arith.constant 0 : index
    %c0_6 = arith.constant 0 : index
    %c0_7 = arith.constant 0 : index
    %4 = vector.load %arg5[%c0_5, %c0_6, %c0_7] : memref<10x10x128xbf16, #tpu.memory_space<vmem>>, vector<10x1x128xbf16>
    tpu.vector_store %arg5[%c0_5, %c0_6, %c0_7], %3 {strides = array<i32>} : memref<10x10x128xbf16, #tpu.memory_space<vmem>>, vector<10x1x128xbf16>,
    %c0_8 = arith.constant 0 : index
    %c9_9 = arith.constant 9 : index
    %c0_10 = arith.constant 0 : index
    %5 = vector.load %arg5[%c0_8, %c9_9, %c0_10] : memref<10x10x128xbf16, #tpu.memory_space<vmem>>, vector<10x1x128xbf16>
    tpu.vector_store %arg5[%c0_8, %c9_9, %c0_10], %3 {strides = array<i32>} : memref<10x10x128xbf16, #tpu.memory_space<vmem>>, vector<10x1x128xbf16>,
    %c0_11 = arith.constant 0 : index
    %c0_12 = arith.constant 0 : index
    %c0_13 = arith.constant 0 : index
    %c0_14 = arith.constant 0 : index
    %6 = vector.load %arg1[%c0_11, %c0_12, %c0_13, %c0_14] : memref<1x8x8x128xbf16, #tpu.memory_space<vmem>>, vector<1x8x8x128xbf16>
    %7 = vector.shape_cast %6 : vector<1x8x8x128xbf16> to vector<8x8x128xbf16>
    %c1 = arith.constant 1 : index
    %c1_15 = arith.constant 1 : index
    %c0_16 = arith.constant 0 : index
    %8 = vector.load %arg5[%c1, %c1_15, %c0_16] : memref<10x10x128xbf16, #tpu.memory_space<vmem>>, vector<8x8x128xbf16>
    tpu.vector_store %arg5[%c1, %c1_15, %c0_16], %7 {strides = array<i32>} : memref<10x10x128xbf16, #tpu.memory_space<vmem>>, vector<8x8x128xbf16>,
    %c0_17 = arith.constant 0 : index
    %c0_18 = arith.constant 0 : index
    %c0_19 = arith.constant 0 : index
    %9 = vector.load %arg5[%c0_17, %c0_18, %c0_19] : memref<10x10x128xbf16, #tpu.memory_space<vmem>>, vector<8x8x128xbf16>
    %10 = vector.shape_cast %9 : vector<8x8x128xbf16> to vector<64x128xbf16>
    %c0_20 = arith.constant 0 : index
    %c0_21 = arith.constant 0 : index
    %11 = vector.load %arg2[%c0_20, %c0_21] : memref<1152x128xbf16, #tpu.memory_space<vmem>>, vector<128x128xbf16>
    %cst_22 = arith.constant dense<0.000000e+00> : vector<64x128xf32>
    %12 = tpu.matmul %10, %11, %cst_22 {dimension_numbers = #tpu.dot_dimension_numbers<[1], [0], [0], [1], [0, 0, 1, 1], [], []>} : vector<64x128xbf16>, vector<128x128xbf16>, vector<64x128xf32> -> vector<64x128xf32>
    %c0_23 = arith.constant 0 : index
    %c1_24 = arith.constant 1 : index
    %c0_25 = arith.constant 0 : index
    %13 = vector.load %arg5[%c0_23, %c1_24, %c0_25] : memref<10x10x128xbf16, #tpu.memory_space<vmem>>, vector<8x8x128xbf16>
    %14 = vector.shape_cast %13 : vector<8x8x128xbf16> to vector<64x128xbf16>
    %c128 = arith.constant 128 : index
    %c0_26 = arith.constant 0 : index
    %15 = vector.load %arg2[%c128, %c0_26] : memref<1152x128xbf16, #tpu.memory_space<vmem>>, vector<128x128xbf16>
    %cst_27 = arith.constant dense<0.000000e+00> : vector<64x128xf32>
    %16 = tpu.matmul %14, %15, %cst_27 {dimension_numbers = #tpu.dot_dimension_numbers<[1], [0], [0], [1], [0, 0, 1, 1], [], []>} : vector<64x128xbf16>, vector<128x128xbf16>, vector<64x128xf32> -> vector<64x128xf32>
    %17 = arith.addf %12, %16 : vector<64x128xf32>
    %c0_28 = arith.constant 0 : index
    %c2 = arith.constant 2 : index
    %c0_29 = arith.constant 0 : index
    %18 = vector.load %arg5[%c0_28, %c2, %c0_29] : memref<10x10x128xbf16, #tpu.memory_space<vmem>>, vector<8x8x128xbf16>
    %19 = vector.shape_cast %18 : vector<8x8x128xbf16> to vector<64x128xbf16>
    %c256 = arith.constant 256 : index
    %c0_30 = arith.constant 0 : index
    %20 = vector.load %arg2[%c256, %c0_30] : memref<1152x128xbf16, #tpu.memory_space<vmem>>, vector<128x128xbf16>
    %cst_31 = arith.constant dense<0.000000e+00> : vector<64x128xf32>
    %21 = tpu.matmul %19, %20, %cst_31 {dimension_numbers = #tpu.dot_dimension_numbers<[1], [0], [0], [1], [0, 0, 1, 1], [], []>} : vector<64x128xbf16>, vector<128x128xbf16>, vector<64x128xf32> -> vector<64x128xf32>
    %22 = arith.addf %17, %21 : vector<64x128xf32>
    %c1_32 = arith.constant 1 : index
    %c0_33 = arith.constant 0 : index
    %c0_34 = arith.constant 0 : index
    %23 = vector.load %arg5[%c1_32, %c0_33, %c0_34] : memref<10x10x128xbf16, #tpu.memory_space<vmem>>, vector<8x8x128xbf16>
    %24 = vector.shape_cast %23 : vector<8x8x128xbf16> to vector<64x128xbf16>
    %c384 = arith.constant 384 : index
    %c0_35 = arith.constant 0 : index
    %25 = vector.load %arg2[%c384, %c0_35] : memref<1152x128xbf16, #tpu.memory_space<vmem>>, vector<128x128xbf16>
    %cst_36 = arith.constant dense<0.000000e+00> : vector<64x128xf32>
    %26 = tpu.matmul %24, %25, %cst_36 {dimension_numbers = #tpu.dot_dimension_numbers<[1], [0], [0], [1], [0, 0, 1, 1], [], []>} : vector<64x128xbf16>, vector<128x128xbf16>, vector<64x128xf32> -> vector<64x128xf32>
    %27 = arith.addf %22, %26 : vector<64x128xf32>
    %c1_37 = arith.constant 1 : index
    %c1_38 = arith.constant 1 : index
    %c0_39 = arith.constant 0 : index
    %28 = vector.load %arg5[%c1_37, %c1_38, %c0_39] : memref<10x10x128xbf16, #tpu.memory_space<vmem>>, vector<8x8x128xbf16>
    %29 = vector.shape_cast %28 : vector<8x8x128xbf16> to vector<64x128xbf16>
    %c512 = arith.constant 512 : index
    %c0_40 = arith.constant 0 : index
    %30 = vector.load %arg2[%c512, %c0_40] : memref<1152x128xbf16, #tpu.memory_space<vmem>>, vector<128x128xbf16>
    %cst_41 = arith.constant dense<0.000000e+00> : vector<64x128xf32>
    %31 = tpu.matmul %29, %30, %cst_41 {dimension_numbers = #tpu.dot_dimension_numbers<[1], [0], [0], [1], [0, 0, 1, 1], [], []>} : vector<64x128xbf16>, vector<128x128xbf16>, vector<64x128xf32> -> vector<64x128xf32>
    %32 = arith.addf %27, %31 : vector<64x128xf32>
    %c1_42 = arith.constant 1 : index
    %c2_43 = arith.constant 2 : index
    %c0_44 = arith.constant 0 : index
    %33 = vector.load %arg5[%c1_42, %c2_43, %c0_44] : memref<10x10x128xbf16, #tpu.memory_space<vmem>>, vector<8x8x128xbf16>
    %34 = vector.shape_cast %33 : vector<8x8x128xbf16> to vector<64x128xbf16>
    %c640 = arith.constant 640 : index
    %c0_45 = arith.constant 0 : index
    %35 = vector.load %arg2[%c640, %c0_45] : memref<1152x128xbf16, #tpu.memory_space<vmem>>, vector<128x128xbf16>
    %cst_46 = arith.constant dense<0.000000e+00> : vector<64x128xf32>
    %36 = tpu.matmul %34, %35, %cst_46 {dimension_numbers = #tpu.dot_dimension_numbers<[1], [0], [0], [1], [0, 0, 1, 1], [], []>} : vector<64x128xbf16>, vector<128x128xbf16>, vector<64x128xf32> -> vector<64x128xf32>
    %37 = arith.addf %32, %36 : vector<64x128xf32>
    %c2_47 = arith.constant 2 : index
    %c0_48 = arith.constant 0 : index
    %c0_49 = arith.constant 0 : index
    %38 = vector.load %arg5[%c2_47, %c0_48, %c0_49] : memref<10x10x128xbf16, #tpu.memory_space<vmem>>, vector<8x8x128xbf16>
    %39 = vector.shape_cast %38 : vector<8x8x128xbf16> to vector<64x128xbf16>
    %c768 = arith.constant 768 : index
    %c0_50 = arith.constant 0 : index
    %40 = vector.load %arg2[%c768, %c0_50] : memref<1152x128xbf16, #tpu.memory_space<vmem>>, vector<128x128xbf16>
    %cst_51 = arith.constant dense<0.000000e+00> : vector<64x128xf32>
    %41 = tpu.matmul %39, %40, %cst_51 {dimension_numbers = #tpu.dot_dimension_numbers<[1], [0], [0], [1], [0, 0, 1, 1], [], []>} : vector<64x128xbf16>, vector<128x128xbf16>, vector<64x128xf32> -> vector<64x128xf32>
    %42 = arith.addf %37, %41 : vector<64x128xf32>
    %c2_52 = arith.constant 2 : index
    %c1_53 = arith.constant 1 : index
    %c0_54 = arith.constant 0 : index
    %43 = vector.load %arg5[%c2_52, %c1_53, %c0_54] : memref<10x10x128xbf16, #tpu.memory_space<vmem>>, vector<8x8x128xbf16>
    %44 = vector.shape_cast %43 : vector<8x8x128xbf16> to vector<64x128xbf16>
    %c896 = arith.constant 896 : index
    %c0_55 = arith.constant 0 : index
    %45 = vector.load %arg2[%c896, %c0_55] : memref<1152x128xbf16, #tpu.memory_space<vmem>>, vector<128x128xbf16>
    %cst_56 = arith.constant dense<0.000000e+00> : vector<64x128xf32>
    %46 = tpu.matmul %44, %45, %cst_56 {dimension_numbers = #tpu.dot_dimension_numbers<[1], [0], [0], [1], [0, 0, 1, 1], [], []>} : vector<64x128xbf16>, vector<128x128xbf16>, vector<64x128xf32> -> vector<64x128xf32>
    %47 = arith.addf %42, %46 : vector<64x128xf32>
    %c2_57 = arith.constant 2 : index
    %c2_58 = arith.constant 2 : index
    %c0_59 = arith.constant 0 : index
    %48 = vector.load %arg5[%c2_57, %c2_58, %c0_59] : memref<10x10x128xbf16, #tpu.memory_space<vmem>>, vector<8x8x128xbf16>
    %49 = vector.shape_cast %48 : vector<8x8x128xbf16> to vector<64x128xbf16>
    %c1024 = arith.constant 1024 : index
    %c0_60 = arith.constant 0 : index
    %50 = vector.load %arg2[%c1024, %c0_60] : memref<1152x128xbf16, #tpu.memory_space<vmem>>, vector<128x128xbf16>
    %cst_61 = arith.constant dense<0.000000e+00> : vector<64x128xf32>
    %51 = tpu.matmul %49, %50, %cst_61 {dimension_numbers = #tpu.dot_dimension_numbers<[1], [0], [0], [1], [0, 0, 1, 1], [], []>} : vector<64x128xbf16>, vector<128x128xbf16>, vector<64x128xf32> -> vector<64x128xf32>
    %52 = arith.addf %47, %51 : vector<64x128xf32>
    %c0_62 = arith.constant 0 : index
    %c0_63 = arith.constant 0 : index
    %53 = vector.load %arg3[%c0_62, %c0_63] : memref<1x128xf32, #tpu.memory_space<vmem>>, vector<1x128xf32>
    %54 = vector.broadcast %53 : vector<1x128xf32> to vector<64x128xf32>
    %55 = arith.addf %52, %54 : vector<64x128xf32>
    %cst_64 = arith.constant 0.000000e+00 : f32
    %56 = vector.broadcast %cst_64 : f32 to vector<64x128xf32>
    %57 = arith.maximumf %55, %56 : vector<64x128xf32>
    %58 = vector.shape_cast %57 : vector<64x128xf32> to vector<4x2x4x2x128xf32>
    %59 = vector.extract_strided_slice %58 {offsets = [0, 0, 0, 0, 0], sizes = [4, 1, 4, 2, 128], strides = [1, 1, 1, 1, 1]} : vector<4x2x4x2x128xf32> to vector<4x1x4x2x128xf32>
    %60 = vector.shape_cast %59 : vector<4x1x4x2x128xf32> to vector<4x4x2x128xf32>
    %61 = vector.extract_strided_slice %58 {offsets = [0, 1, 0, 0, 0], sizes = [4, 1, 4, 2, 128], strides = [1, 1, 1, 1, 1]} : vector<4x2x4x2x128xf32> to vector<4x1x4x2x128xf32>
    %62 = vector.shape_cast %61 : vector<4x1x4x2x128xf32> to vector<4x4x2x128xf32>
    %63 = arith.maximumf %60, %62 : vector<4x4x2x128xf32>
    %64 = vector.extract_strided_slice %63 {offsets = [0, 0, 0, 0], sizes = [4, 4, 1, 128], strides = [1, 1, 1, 1]} : vector<4x4x2x128xf32> to vector<4x4x1x128xf32>
    %65 = vector.shape_cast %64 : vector<4x4x1x128xf32> to vector<4x4x128xf32>
    %66 = vector.extract_strided_slice %63 {offsets = [0, 0, 1, 0], sizes = [4, 4, 1, 128], strides = [1, 1, 1, 1]} : vector<4x4x2x128xf32> to vector<4x4x1x128xf32>
    %67 = vector.shape_cast %66 : vector<4x4x1x128xf32> to vector<4x4x128xf32>
    %68 = arith.maximumf %65, %67 : vector<4x4x128xf32>
    %69 = vector.shape_cast %68 : vector<4x4x128xf32> to vector<1x4x4x128xf32>
    %70 = arith.truncf %69 : vector<1x4x4x128xf32> to vector<1x4x4x128xbf16>
    %c0_65 = arith.constant 0 : index
    %c0_66 = arith.constant 0 : index
    %c0_67 = arith.constant 0 : index
    %c0_68 = arith.constant 0 : index
    %71 = vector.load %arg4[%c0_65, %c0_66, %c0_67, %c0_68] : memref<1x4x4x128xbf16, #tpu.memory_space<vmem>>, vector<1x4x4x128xbf16>
    tpu.vector_store %arg4[%c0_65, %c0_66, %c0_67, %c0_68], %70 {strides = array<i32>} : memref<1x4x4x128xbf16, #tpu.memory_space<vmem>>, vector<1x4x4x128xbf16>,
    return
  }
  func.func @transform_0(%arg0: i32) -> (i32, i32, i32, i32) {
    %c0_i32 = arith.constant 0 : i32
    %c0_i32_0 = arith.constant 0 : i32
    %c0_i32_1 = arith.constant 0 : i32
    %c0_i32_2 = arith.constant 0 : i32
    return %arg0, %c0_i32, %c0_i32_0, %c0_i32_1 : i32, i32, i32, i32
  }
  func.func @transform_1(%arg0: i32) -> (i32, i32) {
    %c0_i32 = arith.constant 0 : i32
    %c0_i32_0 = arith.constant 0 : i32
    %c0_i32_1 = arith.constant 0 : i32
    return %c0_i32, %c0_i32_0 : i32, i32
  }
  func.func @transform_2(%arg0: i32) -> (i32, i32) {
    %c0_i32 = arith.constant 0 : i32
    %c0_i32_0 = arith.constant 0 : i32
    %c0_i32_1 = arith.constant 0 : i32
    return %c0_i32, %c0_i32_0 : i32, i32
  }
  func.func @transform_3(%arg0: i32) -> (i32, i32, i32, i32) {
    %c0_i32 = arith.constant 0 : i32
    %c0_i32_0 = arith.constant 0 : i32
    %c0_i32_1 = arith.constant 0 : i32
    %c0_i32_2 = arith.constant 0 : i32
    return %arg0, %c0_i32, %c0_i32_0, %c0_i32_1 : i32, i32, i32, i32
  }
}

module attributes {stable_mosaic.version = 11 : i64} {
  func.func @kernel(%arg0: i32, %arg1: memref<1x16x16x128xbf16, #tpu.memory_space<vmem>>, %arg2: memref<1152x128xbf16, #tpu.memory_space<vmem>>, %arg3: memref<1x128xf32, #tpu.memory_space<vmem>>, %arg4: memref<1x8x8x128xbf16, #tpu.memory_space<vmem>>, %arg5: memref<18x18x128xbf16, #tpu.memory_space<vmem>>) attributes {dimension_semantics = [#tpu.dimension_semantics<parallel>], iteration_bounds = array<i64: 2>, scalar_prefetch = 0 : i64, scratch_operands = 1 : i64, tpu.core_type = #tpu.core_type<tc>, window_params = [{transform_indices = @transform_0, window_bounds = array<i64: 1, 16, 16, 128>}, {pipeline_mode = #tpu.pipeline_mode<synchronous>, transform_indices = @transform_1, window_bounds = array<i64: 1152, 128>}, {pipeline_mode = #tpu.pipeline_mode<synchronous>, transform_indices = @transform_2, window_bounds = array<i64: 1, 128>}, {transform_indices = @transform_3, window_bounds = array<i64: 1, 8, 8, 128>}]} {
    %cst = arith.constant 0.000000e+00 : bf16
    %0 = vector.broadcast %cst : bf16 to vector<1x18x128xbf16>
    %c0 = arith.constant 0 : index
    %c0_0 = arith.constant 0 : index
    %c0_1 = arith.constant 0 : index
    %1 = vector.load %arg5[%c0, %c0_0, %c0_1] : memref<18x18x128xbf16, #tpu.memory_space<vmem>>, vector<1x18x128xbf16>
    tpu.vector_store %arg5[%c0, %c0_0, %c0_1], %0 {strides = array<i32>} : memref<18x18x128xbf16, #tpu.memory_space<vmem>>, vector<1x18x128xbf16>,
    %c17 = arith.constant 17 : index
    %c0_2 = arith.constant 0 : index
    %c0_3 = arith.constant 0 : index
    %2 = vector.load %arg5[%c17, %c0_2, %c0_3] : memref<18x18x128xbf16, #tpu.memory_space<vmem>>, vector<1x18x128xbf16>
    tpu.vector_store %arg5[%c17, %c0_2, %c0_3], %0 {strides = array<i32>} : memref<18x18x128xbf16, #tpu.memory_space<vmem>>, vector<1x18x128xbf16>,
    %cst_4 = arith.constant 0.000000e+00 : bf16
    %3 = vector.broadcast %cst_4 : bf16 to vector<18x1x128xbf16>
    %c0_5 = arith.constant 0 : index
    %c0_6 = arith.constant 0 : index
    %c0_7 = arith.constant 0 : index
    %4 = vector.load %arg5[%c0_5, %c0_6, %c0_7] : memref<18x18x128xbf16, #tpu.memory_space<vmem>>, vector<18x1x128xbf16>
    tpu.vector_store %arg5[%c0_5, %c0_6, %c0_7], %3 {strides = array<i32>} : memref<18x18x128xbf16, #tpu.memory_space<vmem>>, vector<18x1x128xbf16>,
    %c0_8 = arith.constant 0 : index
    %c17_9 = arith.constant 17 : index
    %c0_10 = arith.constant 0 : index
    %5 = vector.load %arg5[%c0_8, %c17_9, %c0_10] : memref<18x18x128xbf16, #tpu.memory_space<vmem>>, vector<18x1x128xbf16>
    tpu.vector_store %arg5[%c0_8, %c17_9, %c0_10], %3 {strides = array<i32>} : memref<18x18x128xbf16, #tpu.memory_space<vmem>>, vector<18x1x128xbf16>,
    %c0_11 = arith.constant 0 : index
    %c0_12 = arith.constant 0 : index
    %c0_13 = arith.constant 0 : index
    %c0_14 = arith.constant 0 : index
    %6 = vector.load %arg1[%c0_11, %c0_12, %c0_13, %c0_14] : memref<1x16x16x128xbf16, #tpu.memory_space<vmem>>, vector<1x16x16x128xbf16>
    %7 = vector.shape_cast %6 : vector<1x16x16x128xbf16> to vector<16x16x128xbf16>
    %c1 = arith.constant 1 : index
    %c1_15 = arith.constant 1 : index
    %c0_16 = arith.constant 0 : index
    %8 = vector.load %arg5[%c1, %c1_15, %c0_16] : memref<18x18x128xbf16, #tpu.memory_space<vmem>>, vector<16x16x128xbf16>
    tpu.vector_store %arg5[%c1, %c1_15, %c0_16], %7 {strides = array<i32>} : memref<18x18x128xbf16, #tpu.memory_space<vmem>>, vector<16x16x128xbf16>,
    %c0_17 = arith.constant 0 : index
    %c0_18 = arith.constant 0 : index
    %c0_19 = arith.constant 0 : index
    %9 = vector.load %arg5[%c0_17, %c0_18, %c0_19] : memref<18x18x128xbf16, #tpu.memory_space<vmem>>, vector<16x16x128xbf16>
    %10 = vector.shape_cast %9 : vector<16x16x128xbf16> to vector<256x128xbf16>
    %c0_20 = arith.constant 0 : index
    %c0_21 = arith.constant 0 : index
    %11 = vector.load %arg2[%c0_20, %c0_21] : memref<1152x128xbf16, #tpu.memory_space<vmem>>, vector<128x128xbf16>
    %cst_22 = arith.constant dense<0.000000e+00> : vector<256x128xf32>
    %12 = tpu.matmul %10, %11, %cst_22 {dimension_numbers = #tpu.dot_dimension_numbers<[1], [0], [0], [1], [0, 0, 1, 1], [], []>} : vector<256x128xbf16>, vector<128x128xbf16>, vector<256x128xf32> -> vector<256x128xf32>
    %c0_23 = arith.constant 0 : index
    %c1_24 = arith.constant 1 : index
    %c0_25 = arith.constant 0 : index
    %13 = vector.load %arg5[%c0_23, %c1_24, %c0_25] : memref<18x18x128xbf16, #tpu.memory_space<vmem>>, vector<16x16x128xbf16>
    %14 = vector.shape_cast %13 : vector<16x16x128xbf16> to vector<256x128xbf16>
    %c128 = arith.constant 128 : index
    %c0_26 = arith.constant 0 : index
    %15 = vector.load %arg2[%c128, %c0_26] : memref<1152x128xbf16, #tpu.memory_space<vmem>>, vector<128x128xbf16>
    %cst_27 = arith.constant dense<0.000000e+00> : vector<256x128xf32>
    %16 = tpu.matmul %14, %15, %cst_27 {dimension_numbers = #tpu.dot_dimension_numbers<[1], [0], [0], [1], [0, 0, 1, 1], [], []>} : vector<256x128xbf16>, vector<128x128xbf16>, vector<256x128xf32> -> vector<256x128xf32>
    %17 = arith.addf %12, %16 : vector<256x128xf32>
    %c0_28 = arith.constant 0 : index
    %c2 = arith.constant 2 : index
    %c0_29 = arith.constant 0 : index
    %18 = vector.load %arg5[%c0_28, %c2, %c0_29] : memref<18x18x128xbf16, #tpu.memory_space<vmem>>, vector<16x16x128xbf16>
    %19 = vector.shape_cast %18 : vector<16x16x128xbf16> to vector<256x128xbf16>
    %c256 = arith.constant 256 : index
    %c0_30 = arith.constant 0 : index
    %20 = vector.load %arg2[%c256, %c0_30] : memref<1152x128xbf16, #tpu.memory_space<vmem>>, vector<128x128xbf16>
    %cst_31 = arith.constant dense<0.000000e+00> : vector<256x128xf32>
    %21 = tpu.matmul %19, %20, %cst_31 {dimension_numbers = #tpu.dot_dimension_numbers<[1], [0], [0], [1], [0, 0, 1, 1], [], []>} : vector<256x128xbf16>, vector<128x128xbf16>, vector<256x128xf32> -> vector<256x128xf32>
    %22 = arith.addf %17, %21 : vector<256x128xf32>
    %c1_32 = arith.constant 1 : index
    %c0_33 = arith.constant 0 : index
    %c0_34 = arith.constant 0 : index
    %23 = vector.load %arg5[%c1_32, %c0_33, %c0_34] : memref<18x18x128xbf16, #tpu.memory_space<vmem>>, vector<16x16x128xbf16>
    %24 = vector.shape_cast %23 : vector<16x16x128xbf16> to vector<256x128xbf16>
    %c384 = arith.constant 384 : index
    %c0_35 = arith.constant 0 : index
    %25 = vector.load %arg2[%c384, %c0_35] : memref<1152x128xbf16, #tpu.memory_space<vmem>>, vector<128x128xbf16>
    %cst_36 = arith.constant dense<0.000000e+00> : vector<256x128xf32>
    %26 = tpu.matmul %24, %25, %cst_36 {dimension_numbers = #tpu.dot_dimension_numbers<[1], [0], [0], [1], [0, 0, 1, 1], [], []>} : vector<256x128xbf16>, vector<128x128xbf16>, vector<256x128xf32> -> vector<256x128xf32>
    %27 = arith.addf %22, %26 : vector<256x128xf32>
    %c1_37 = arith.constant 1 : index
    %c1_38 = arith.constant 1 : index
    %c0_39 = arith.constant 0 : index
    %28 = vector.load %arg5[%c1_37, %c1_38, %c0_39] : memref<18x18x128xbf16, #tpu.memory_space<vmem>>, vector<16x16x128xbf16>
    %29 = vector.shape_cast %28 : vector<16x16x128xbf16> to vector<256x128xbf16>
    %c512 = arith.constant 512 : index
    %c0_40 = arith.constant 0 : index
    %30 = vector.load %arg2[%c512, %c0_40] : memref<1152x128xbf16, #tpu.memory_space<vmem>>, vector<128x128xbf16>
    %cst_41 = arith.constant dense<0.000000e+00> : vector<256x128xf32>
    %31 = tpu.matmul %29, %30, %cst_41 {dimension_numbers = #tpu.dot_dimension_numbers<[1], [0], [0], [1], [0, 0, 1, 1], [], []>} : vector<256x128xbf16>, vector<128x128xbf16>, vector<256x128xf32> -> vector<256x128xf32>
    %32 = arith.addf %27, %31 : vector<256x128xf32>
    %c1_42 = arith.constant 1 : index
    %c2_43 = arith.constant 2 : index
    %c0_44 = arith.constant 0 : index
    %33 = vector.load %arg5[%c1_42, %c2_43, %c0_44] : memref<18x18x128xbf16, #tpu.memory_space<vmem>>, vector<16x16x128xbf16>
    %34 = vector.shape_cast %33 : vector<16x16x128xbf16> to vector<256x128xbf16>
    %c640 = arith.constant 640 : index
    %c0_45 = arith.constant 0 : index
    %35 = vector.load %arg2[%c640, %c0_45] : memref<1152x128xbf16, #tpu.memory_space<vmem>>, vector<128x128xbf16>
    %cst_46 = arith.constant dense<0.000000e+00> : vector<256x128xf32>
    %36 = tpu.matmul %34, %35, %cst_46 {dimension_numbers = #tpu.dot_dimension_numbers<[1], [0], [0], [1], [0, 0, 1, 1], [], []>} : vector<256x128xbf16>, vector<128x128xbf16>, vector<256x128xf32> -> vector<256x128xf32>
    %37 = arith.addf %32, %36 : vector<256x128xf32>
    %c2_47 = arith.constant 2 : index
    %c0_48 = arith.constant 0 : index
    %c0_49 = arith.constant 0 : index
    %38 = vector.load %arg5[%c2_47, %c0_48, %c0_49] : memref<18x18x128xbf16, #tpu.memory_space<vmem>>, vector<16x16x128xbf16>
    %39 = vector.shape_cast %38 : vector<16x16x128xbf16> to vector<256x128xbf16>
    %c768 = arith.constant 768 : index
    %c0_50 = arith.constant 0 : index
    %40 = vector.load %arg2[%c768, %c0_50] : memref<1152x128xbf16, #tpu.memory_space<vmem>>, vector<128x128xbf16>
    %cst_51 = arith.constant dense<0.000000e+00> : vector<256x128xf32>
    %41 = tpu.matmul %39, %40, %cst_51 {dimension_numbers = #tpu.dot_dimension_numbers<[1], [0], [0], [1], [0, 0, 1, 1], [], []>} : vector<256x128xbf16>, vector<128x128xbf16>, vector<256x128xf32> -> vector<256x128xf32>
    %42 = arith.addf %37, %41 : vector<256x128xf32>
    %c2_52 = arith.constant 2 : index
    %c1_53 = arith.constant 1 : index
    %c0_54 = arith.constant 0 : index
    %43 = vector.load %arg5[%c2_52, %c1_53, %c0_54] : memref<18x18x128xbf16, #tpu.memory_space<vmem>>, vector<16x16x128xbf16>
    %44 = vector.shape_cast %43 : vector<16x16x128xbf16> to vector<256x128xbf16>
    %c896 = arith.constant 896 : index
    %c0_55 = arith.constant 0 : index
    %45 = vector.load %arg2[%c896, %c0_55] : memref<1152x128xbf16, #tpu.memory_space<vmem>>, vector<128x128xbf16>
    %cst_56 = arith.constant dense<0.000000e+00> : vector<256x128xf32>
    %46 = tpu.matmul %44, %45, %cst_56 {dimension_numbers = #tpu.dot_dimension_numbers<[1], [0], [0], [1], [0, 0, 1, 1], [], []>} : vector<256x128xbf16>, vector<128x128xbf16>, vector<256x128xf32> -> vector<256x128xf32>
    %47 = arith.addf %42, %46 : vector<256x128xf32>
    %c2_57 = arith.constant 2 : index
    %c2_58 = arith.constant 2 : index
    %c0_59 = arith.constant 0 : index
    %48 = vector.load %arg5[%c2_57, %c2_58, %c0_59] : memref<18x18x128xbf16, #tpu.memory_space<vmem>>, vector<16x16x128xbf16>
    %49 = vector.shape_cast %48 : vector<16x16x128xbf16> to vector<256x128xbf16>
    %c1024 = arith.constant 1024 : index
    %c0_60 = arith.constant 0 : index
    %50 = vector.load %arg2[%c1024, %c0_60] : memref<1152x128xbf16, #tpu.memory_space<vmem>>, vector<128x128xbf16>
    %cst_61 = arith.constant dense<0.000000e+00> : vector<256x128xf32>
    %51 = tpu.matmul %49, %50, %cst_61 {dimension_numbers = #tpu.dot_dimension_numbers<[1], [0], [0], [1], [0, 0, 1, 1], [], []>} : vector<256x128xbf16>, vector<128x128xbf16>, vector<256x128xf32> -> vector<256x128xf32>
    %52 = arith.addf %47, %51 : vector<256x128xf32>
    %c0_62 = arith.constant 0 : index
    %c0_63 = arith.constant 0 : index
    %53 = vector.load %arg3[%c0_62, %c0_63] : memref<1x128xf32, #tpu.memory_space<vmem>>, vector<1x128xf32>
    %54 = vector.broadcast %53 : vector<1x128xf32> to vector<256x128xf32>
    %55 = arith.addf %52, %54 : vector<256x128xf32>
    %cst_64 = arith.constant 0.000000e+00 : f32
    %56 = vector.broadcast %cst_64 : f32 to vector<256x128xf32>
    %57 = arith.maximumf %55, %56 : vector<256x128xf32>
    %58 = vector.shape_cast %57 : vector<256x128xf32> to vector<8x2x8x2x128xf32>
    %59 = vector.extract_strided_slice %58 {offsets = [0, 0, 0, 0, 0], sizes = [8, 1, 8, 2, 128], strides = [1, 1, 1, 1, 1]} : vector<8x2x8x2x128xf32> to vector<8x1x8x2x128xf32>
    %60 = vector.shape_cast %59 : vector<8x1x8x2x128xf32> to vector<8x8x2x128xf32>
    %61 = vector.extract_strided_slice %58 {offsets = [0, 1, 0, 0, 0], sizes = [8, 1, 8, 2, 128], strides = [1, 1, 1, 1, 1]} : vector<8x2x8x2x128xf32> to vector<8x1x8x2x128xf32>
    %62 = vector.shape_cast %61 : vector<8x1x8x2x128xf32> to vector<8x8x2x128xf32>
    %63 = arith.maximumf %60, %62 : vector<8x8x2x128xf32>
    %64 = vector.extract_strided_slice %63 {offsets = [0, 0, 0, 0], sizes = [8, 8, 1, 128], strides = [1, 1, 1, 1]} : vector<8x8x2x128xf32> to vector<8x8x1x128xf32>
    %65 = vector.shape_cast %64 : vector<8x8x1x128xf32> to vector<8x8x128xf32>
    %66 = vector.extract_strided_slice %63 {offsets = [0, 0, 1, 0], sizes = [8, 8, 1, 128], strides = [1, 1, 1, 1]} : vector<8x8x2x128xf32> to vector<8x8x1x128xf32>
    %67 = vector.shape_cast %66 : vector<8x8x1x128xf32> to vector<8x8x128xf32>
    %68 = arith.maximumf %65, %67 : vector<8x8x128xf32>
    %69 = vector.shape_cast %68 : vector<8x8x128xf32> to vector<1x8x8x128xf32>
    %70 = arith.truncf %69 : vector<1x8x8x128xf32> to vector<1x8x8x128xbf16>
    %c0_65 = arith.constant 0 : index
    %c0_66 = arith.constant 0 : index
    %c0_67 = arith.constant 0 : index
    %c0_68 = arith.constant 0 : index
    %71 = vector.load %arg4[%c0_65, %c0_66, %c0_67, %c0_68] : memref<1x8x8x128xbf16, #tpu.memory_space<vmem>>, vector<1x8x8x128xbf16>
    tpu.vector_store %arg4[%c0_65, %c0_66, %c0_67, %c0_68], %70 {strides = array<i32>} : memref<1x8x8x128xbf16, #tpu.memory_space<vmem>>, vector<1x8x8x128xbf16>,
    return
  }
  func.func @transform_0(%arg0: i32) -> (i32, i32, i32, i32) {
    %c0_i32 = arith.constant 0 : i32
    %c0_i32_0 = arith.constant 0 : i32
    %c0_i32_1 = arith.constant 0 : i32
    %c0_i32_2 = arith.constant 0 : i32
    return %arg0, %c0_i32, %c0_i32_0, %c0_i32_1 : i32, i32, i32, i32
  }
  func.func @transform_1(%arg0: i32) -> (i32, i32) {
    %c0_i32 = arith.constant 0 : i32
    %c0_i32_0 = arith.constant 0 : i32
    %c0_i32_1 = arith.constant 0 : i32
    return %c0_i32, %c0_i32_0 : i32, i32
  }
  func.func @transform_2(%arg0: i32) -> (i32, i32) {
    %c0_i32 = arith.constant 0 : i32
    %c0_i32_0 = arith.constant 0 : i32
    %c0_i32_1 = arith.constant 0 : i32
    return %c0_i32, %c0_i32_0 : i32, i32
  }
  func.func @transform_3(%arg0: i32) -> (i32, i32, i32, i32) {
    %c0_i32 = arith.constant 0 : i32
    %c0_i32_0 = arith.constant 0 : i32
    %c0_i32_1 = arith.constant 0 : i32
    %c0_i32_2 = arith.constant 0 : i32
    return %arg0, %c0_i32, %c0_i32_0, %c0_i32_1 : i32, i32, i32, i32
  }
}

</mosaic_0001>

<bundles_post_ra>
// kernel: _lambda_.5
= control target key start
LH: loop header
LB: loop body
LE: loop exit
PB: predicated region body
PF: predicated region fallthrough
CT: control target
= control target key end

     0   :  { %s3724_s12 = smov 0   ;;  %s4472_s0 = inlined_call_operand.vmem [shape: bf16[2,8,8,128], index: 0, kind: input, shape index: {}]   ;;  %s4473_s1 = inlined_call_operand.vmem [shape: bf16[1152,128], index: 1, kind: input, shape index: {}]   ;;  %s4474_s2 = inlined_call_operand.vmem [shape: f32[1,128], index: 2, kind: input, shape index: {}]   ;;  %s4475_s3 = inlined_call_operand.vmem [shape: bf16[2,4,4,128], index: 3, kind: output, shape index: {}]  }
   0x1 LB: > { %s3030_s13 = sadd.s32 4294967295, %s3700_s12   ;;  %p3034_p0 = scmp.ge.s32.totalorder %s3700_s12, 1  ;;  %s3700_s12 = sphi %s3724_s12, %s13_s12  }
   0x2   : > { %p137_p1 = scmp.lt.s32.totalorder %s3700_s12, 3 }
   0x4   : > { %p138_p2 = pnand %p3034_p0, %p137_p1 }
   0x5   : > { %v3610_v0 = vld [vmem:[%s4473_s1 + $0x40] sm:$0xff] (!%p138_p2)   ;;  %v3612_v2 = vld [vmem:[%s4473_s1 + $0x48] sm:$0xff] (!%p138_p2)   ;;  %v3702_v3 = vmov (!%p138_p2), 0   ;;  %v3614_v5 = vld [vmem:[%s4473_s1 + $0x50] sm:$0xff] (!%p138_p2)   ;;  %p161_p3 = scmp.lt.s32.totalorder (!%p138_p2), %s3030_s13, 1  ;;  %vm177_vm0 = vcmask (!%p138_p2), 1040384  }
   0x6   : > { %141 = sbr.rel (%p138_p2) target bundleno = 466 (0x1d2), region = 32  ;;  %v3611_v1 = vld [vmem:[%s4473_s1 + $0x100] sm:$0xff] (!%p138_p2)   ;;  %3304 = vmatprep.subr.bf16.mxu1 (!%p138_p2), %v3610_v0  ;;  %172 = vst [vmem:[#allocation2] sm:$0xf] (!%p138_p2), %v3702_v3  ;;  %173 = vst [vmem:[#allocation2 + $0x4] sm:$0x1] (!%p138_p2), %v3702_v3 }
   0x7   : > { %175 = vst [vmem:[#allocation2 + $0x48] sm:$0xf] (!%p138_p2), %v3702_v3  ;;  %176 = vst [vmem:[#allocation2 + $0x4c] sm:$0x1] (!%p138_p2), %v3702_v3  ;;  %3400 = vmatprep.subr.bf16.mxu0 (!%p138_p2), %v3611_v1  ;;  %3305 = vmatpush3.bf16.msra.mxu1 (!%p138_p2), %v3610_v0  ;;  %v3613_v4 = vld [vmem:[%s4473_s1 + $0x108] sm:$0xff] (!%p138_p2)   ;;  %v3615_v6 = vld [vmem:[%s4473_s1 + $0x110] sm:$0xff] (!%p138_p2)  }
   0x8   : > { %3401 = vmatpush3.bf16.msra.mxu0 (!%p138_p2), %v3611_v1  ;;  %3306 = vmatprep.subr.bf16.mxu1 (!%p138_p2), %v3612_v2  ;;  %v3616_v7 = vld [vmem:[%s4473_s1 + $0x58] sm:$0xff] (!%p138_p2)   ;;  %v3618_v9 = vld [vmem:[%s4473_s1 + $0x60] sm:$0xff] (!%p138_p2)   ;;  %v3620_v11 = vld [vmem:[%s4473_s1 + $0x68] sm:$0xff] (!%p138_p2)   ;;  %vm178_vm1 = vsmask.f32 (!%p138_p2), 256  ;;  %vm331_vm5 = vcmask (!%p138_p2), 1043456  }
   0x9   : > { %3402 = vmatprep.subr.bf16.mxu0 (!%p138_p2), %v3613_v4  ;;  %v3617_v8 = vld [vmem:[%s4473_s1 + $0x118] sm:$0xff] (!%p138_p2)   ;;  %v3619_v10 = vld [vmem:[%s4473_s1 + $0x120] sm:$0xff] (!%p138_p2)   ;;  %v3621_v12 = vld [vmem:[%s4473_s1 + $0x128] sm:$0xff] (!%p138_p2)   ;;  %vm210_vm3 = vsmask.f32 (!%p138_p2), 7938  ;;  %vm834_vm10 = vcmask (!%p138_p2), 1042432  }
   0xa   : > { %v183_v14 = vld [vmem:[#allocation2 + $0x8] sm:$0x1] (!%p138_p2)  ;;  %vm3777_vm2 = vmand (!%p138_p2), %vm177_vm0, %vm178_vm1  ;;  %v215_v17 = vld [vmem:[#allocation2 + $0xc] sm:$0x1] (!%p138_p2)  ;;  %vm413_vm7 = vsmask.f32 (!%p138_p2), 3328 }
   0xb   : > { %3307 = vmatpush3.bf16.msra.mxu1 (!%p138_p2), %v3612_v2  ;;  %v184_v19 = vsel (!%p138_p2), %vm3777_vm2, 0, %v183_v14  ;;  %vm3787_vm4 = vmand (!%p138_p2), %vm177_vm0, %vm210_vm3  ;;  %v3622_v26 = vld [vmem:[%s4473_s1 + $0x70] sm:$0xff] (!%p138_p2)   ;;  %v3624_v31 = vld [vmem:[%s4473_s1 + $0x78] sm:$0xff] (!%p138_p2)   ;;  %vm414_vm8 = vsmask.f32 (!%p138_p2), 7440  ;;  %vm835_vm11 = vcmask (!%p138_p2), 1046532  }
   0xc   : > { %3403 = vmatpush3.bf16.msra.mxu0 (!%p138_p2), %v3613_v4  ;;  %3308 = vmatprep.subr.bf16.mxu1 (!%p138_p2), %v3614_v5  ;;  %185 = vst [vmem:[#allocation2 + $0x8] sm:$0x1] (!%p138_p2), %v184_v19  ;;  %v216_v23 = vsel (!%p138_p2), %vm3787_vm4, 0, %v215_v17  ;;  %v3623_v27 = vld [vmem:[%s4473_s1 + $0x130] sm:$0xff] (!%p138_p2)   ;;  %v3625_v35 = vld [vmem:[%s4473_s1 + $0x138] sm:$0xff] (!%p138_p2)   ;;  %vm3814_vm6 = vmand (!%p138_p2), %vm331_vm5, %vm210_vm3  ;;  %vm2909_vm13 = vcmask (!%p138_p2), 1041409  }
   0xd   : > { %s4487_s13 = smov (!%p161_p3, %s3030_s13), 1  ;;  %3404 = vmatprep.subr.bf16.mxu0 %v3615_v6  ;;  %v180_v13 = vld [vmem:[#allocation2] sm:$0x1]  ;;  %v212_v16 = vld [vmem:[#allocation2 + $0x4] sm:$0x1]  ;;  %vm3872_vm9 = vmor %vm413_vm7, %vm414_vm8  ;;  %vm2912_vm14 = vcmask 1042434  }
   0xe   : > { %s3194_s5 = sshll.u32 %s4487_s13, 5  ;;  %v181_v18 = vsel %vm3777_vm2, 0, %v180_v13  ;;  %v213_v22 = vsel %vm3787_vm4, 0, %v212_v16  ;;  %217 = vst [vmem:[#allocation2 + $0xc] sm:$0x1] %v216_v23  ;;  %v3839_v61 = vld [vmem:[%s4473_s1] sm:$0xff]   ;;  %vm4080_vm12 = vmor %vm834_vm10, %vm835_vm11 }
   0xf   : > { %3309 = vmatpush3.bf16.msra.mxu1 %v3614_v5  ;;  %s3774_s16 = scalar_lea.vmem %s4472_s0, %s3194_s5  ;;  %182 = vst [vmem:[#allocation2] sm:$0x1] %v181_v18  ;;  %214 = vst [vmem:[#allocation2 + $0x4] sm:$0x1] %v213_v22  ;;  %v186_v29 = vld [vmem:[#allocation2 + $0x10] sm:$0x1] }
  0x10   : > { %3405 = vmatpush3.bf16.msra.mxu0 %v3615_v6  ;;  %3310 = vmatprep.subr.bf16.mxu1 %v3616_v7  ;;  %v242_v21 = vld [vmem:[%s3774_s16] sm:$0xf]  ;;  %v218_v30 = vld [vmem:[#allocation2 + $0x14] sm:$0x1]  ;;  %v187_v32 = vsel %vm3777_vm2, 0, %v186_v29  ;;  %v3674_v20 = vld [vmem:[%s4473_s1 + $0xe8] sm:$0xff]  }
  0x11   : > { %3406 = vmatprep.subr.bf16.mxu0 %v3617_v8  ;;  %v251_v24 = vshrl.u32 %v242_v21, 16  ;;  %v254_v25 = vshll.u32 %v242_v21, 16  ;;  %v219_v33 = vsel %vm3787_vm4, 0, %v218_v30  ;;  %v243_v34 = vld [vmem:[%s3774_s16 + $0x4] sm:$0xf]  ;;  %vm2915_vm15 = vcmask 1043459  }
  0x12   : > { %188 = vst [vmem:[#allocation2 + $0x10] sm:$0x1] %v187_v32  ;;  %220 = vst [vmem:[#allocation2 + $0x14] sm:$0x1] %v219_v33  ;;  %v259_v39 = vshrl.u32 %v243_v34, 16  ;;  %v262_v40 = vshll.u32 %v243_v34, 16 }
  0x13   : > { %3311 = vmatpush3.bf16.msra.mxu1 %v3616_v7  ;;  %v253_v28 = vrot.slane %v251_v24, 7  ;;  %v189_v41 = vld [vmem:[#allocation2 + $0x18] sm:$0x1]  ;;  %v221_v42 = vld [vmem:[#allocation2 + $0x1c] sm:$0x1]  ;;  %v3844_v63 = vld [vmem:[%s4473_s1 + $0x140] sm:$0xff]  }
  0x14   : > { %3407 = vmatpush3.bf16.msra.mxu0 %v3617_v8  ;;  %3312 = vmatprep.subr.bf16.mxu1 %v3618_v9  ;;  %v244_v43 = vld [vmem:[%s3774_s16 + $0x8] sm:$0xf]  ;;  %v261_v44 = vrot.slane %v259_v39, 7  ;;  %v190_v45 = vsel %vm3777_vm2, 0, %v189_v41  ;;  %v222_v46 = vsel %vm3787_vm4, 0, %v221_v42  ;;  %v3690_v39 = vld [vmem:[%s4473_s1 + $0x220] sm:$0xff]  }
  0x15   : > { %3408 = vmatprep.subr.bf16.mxu0 %v3619_v10  ;;  %v256_v36 = vor.u32 %v254_v25, %v253_v28  ;;  %v257_v37 = vrot.slane %v253_v28, 4  ;;  %v267_v47 = vshrl.u32 %v244_v43, 16  ;;  %v192_v48 = vld [vmem:[#allocation2 + $0x20] sm:$0x1]  ;;  %v333_v49 = vld [vmem:[#allocation2 + $0x8] sm:$0xf] }
  0x16   : > { %v3823_v50 = vld [vmem:[#allocation2] sm:$0xf]  ;;  %191 = vst [vmem:[#allocation2 + $0x18] sm:$0x1] %v190_v45  ;;  %223 = vst [vmem:[#allocation2 + $0x1c] sm:$0x1] %v222_v46  ;;  %v264_v58 = vor.u32 %v262_v40, %v261_v44 }
  0x17   : > { %3313 = vmatpush3.bf16.msra.mxu1 %v3618_v9  ;;  %v270_v51 = vshll.u32 %v244_v43, 16  ;;  %v193_v52 = vsel %vm3777_vm2, 0, %v192_v48  ;;  %v334_v53 = vsel %vm3814_vm6, %v256_v36, %v333_v49  ;;  %v336_v54 = vld [vmem:[#allocation2 + $0xc] sm:$0x1]  ;;  %v3829_v55 = vld [vmem:[#allocation2 + $0x4] sm:$0x1] }
  0x18   : > { %3409 = vmatpush3.bf16.msra.mxu0 %v3619_v10  ;;  %3314 = vmatprep.subr.bf16.mxu1 %v3620_v11  ;;  %v417_v56 = vshrl.u32 %v3823_v50, 16  ;;  %v420_v57 = vshll.u32 %v3823_v50, 16  ;;  %194 = vst [vmem:[#allocation2 + $0x20] sm:$0x1] %v193_v52  ;;  %335 = vst [vmem:[#allocation2 + $0x8] sm:$0xf] %v334_v53  ;;  %v337_v59 = vsel %vm3777_vm2, %v257_v37, %v336_v54 }
  0x19   : > { %3410 = vmatprep.subr.bf16.mxu0 %v3621_v12  ;;  %v426_v60 = vshll.u32 %v3829_v55, 16  ;;  %v265_v62 = vrot.slane %v261_v44, 4  ;;  %v224_v0 = vld [vmem:[#allocation2 + $0x24] sm:$0x1]  ;;  %338 = vst [vmem:[#allocation2 + $0xc] sm:$0x1] %v337_v59 }
  0x1a   : > { %v419_v1 = vrot.slane %v417_v56, 4  ;;  %v422_v2 = vrot.slane %v420_v57, 5  ;;  %v269_v3 = vrot.slane %v267_v47, 7  ;;  %v225_v4 = vsel %vm3787_vm4, 0, %v224_v0  ;;  %v245_v5 = vld [vmem:[%s3774_s16 + $0xc] sm:$0xf] }
  0x1b   : > { %3315 = vmatpush3.bf16.msra.mxu1 %v3620_v11  ;;  %v339_v6 = vld [vmem:[#allocation2 + $0x10] sm:$0xf]  ;;  %v342_v7 = vld [vmem:[#allocation2 + $0x14] sm:$0x1]  ;;  %226 = vst [vmem:[#allocation2 + $0x24] sm:$0x1] %v225_v4 }
  0x1c   : > { %3411 = vmatpush3.bf16.msra.mxu0 %v3621_v12  ;;  %3316 = vmatprep.subr.bf16.mxu1 %v3622_v26  ;;  %v275_v8 = vshrl.u32 %v245_v5, 16  ;;  %v340_v9 = vsel %vm3814_vm6, %v264_v58, %v339_v6  ;;  %v343_v10 = vsel %vm3777_vm2, %v265_v62, %v342_v7  ;;  %v272_v11 = vor.u32 %v270_v51, %v269_v3  ;;  %s3195_s14 = sshll.u32 %s4487_s13, 3 }
  0x1d   : > { %3412 = vmatprep.subr.bf16.mxu0 %v3623_v27  ;;  %341 = vst [vmem:[#allocation2 + $0x10] sm:$0xf] %v340_v9  ;;  %344 = vst [vmem:[#allocation2 + $0x14] sm:$0x1] %v343_v10  ;;  %v273_v12 = vrot.slane %v269_v3, 4  ;;  %v278_v14 = vshll.u32 %v245_v5, 16  ;;  %v423_v16 = vor.u32 %v422_v2, %v419_v1  ;;  %s4423_s17 = scalar_lea.vmem %s4475_s3, %s3195_s14 }
  0x1e   : > { %v277_v13 = vrot.slane %v275_v8, 7  ;;  %v428_v17 = vrot.slane %v426_v60, 5  ;;  %v345_v18 = vld [vmem:[#allocation2 + $0x18] sm:$0xf]  ;;  %v348_v19 = vld [vmem:[#allocation2 + $0x1c] sm:$0x1] }
  0x1f   : > { %3317 = vmatpush3.bf16.msra.mxu1 %v3622_v26  ;;  %v346_v21 = vsel %vm3814_vm6, %v272_v11, %v345_v18  ;;  %v349_v22 = vsel %vm3777_vm2, %v273_v12, %v348_v19  ;;  %v351_v25 = vld [vmem:[#allocation2 + $0x20] sm:$0xf]  ;;  %v3859_v26 = vld [vmem:[#allocation2 + $0x8] sm:$0xf]  ;;  %v424_v33 = vrot.slane %v423_v16, 4 }
  0x20   : > { %3413 = vmatpush3.bf16.msra.mxu0 %v3623_v27  ;;  %3318 = vmatprep.subr.bf16.mxu1 %v3624_v31  ;;  %v280_v23 = vor.u32 %v278_v14, %v277_v13  ;;  %v281_v24 = vrot.slane %v277_v13, 4  ;;  %v1191_v27 = vld [vmem:[#allocation2 + $0x8] sm:$0xf]  ;;  %347 = vst [vmem:[#allocation2 + $0x18] sm:$0xf] %v346_v21  ;;  %v431_v29 = vshrl.u32 %v3859_v26, 16 }
  0x21   : > { %3414 = vmatprep.subr.bf16.mxu0 %v3625_v35  ;;  %350 = vst [vmem:[#allocation2 + $0x1c] sm:$0x1] %v349_v22  ;;  %v3861_v28 = vld [vmem:[#allocation2 + $0xc] sm:$0x1]  ;;  %v434_v30 = vshll.u32 %v3859_v26, 16  ;;  %v1211_v36 = vshll.u32 %v1191_v27, 16  ;;  %v429_v53 = vsel %vm3872_vm9, %v424_v33, %v428_v17 }
  0x22   : > { %v352_v32 = vsel %vm3814_vm6, %v280_v23, %v351_v25  ;;  %v440_v34 = vshll.u32 %v3861_v28, 16  ;;  %v354_v37 = vld [vmem:[#allocation2 + $0x24] sm:$0x1]  ;;  %v433_v40 = vrot.slane %v431_v29, 4 }
  0x23   : > { %3319 = vmatpush3.bf16.msra.mxu1 %v3624_v31  ;;  %v3865_v31 = vld [vmem:[#allocation2 + $0xc] sm:$0x1]  ;;  %353 = vst [vmem:[#allocation2 + $0x20] sm:$0xf] %v352_v32  ;;  %v436_v41 = vrot.slane %v434_v30, 5  ;;  %v355_v46 = vsel %vm3777_vm2, %v281_v24, %v354_v37  ;;  %v1213_v49 = vrot.slane %v1211_v36, 5 }
  0x24   : > { %3415 = vmatpush3.bf16.msra.mxu0 %v3625_v35  ;;  %3328 = vmatprep.subr.bf16.mxu1 %v3839_v61  ;;  %v1208_v35 = vshrl.u32 %v1191_v27, 16  ;;  %v1217_v42 = vshll.u32 %v3865_v31, 16  ;;  %v1193_v43 = vld [vmem:[#allocation2 + $0x10] sm:$0xf]  ;;  %v3877_v44 = vld [vmem:[#allocation2 + $0x14] sm:$0x1] }
  0x25   : > { %3424 = vmatprep.subr.bf16.mxu0 %v3844_v63  ;;  %v437_v47 = vor.u32 %v436_v41, %v433_v40  ;;  %v442_v48 = vrot.slane %v440_v34, 5  ;;  %v1222_v51 = vshrl.u32 %v1193_v43, 16  ;;  %v3881_v52 = vld [vmem:[#allocation2 + $0x10] sm:$0xf]  ;;  %356 = vst [vmem:[#allocation2 + $0x24] sm:$0x1] %v355_v46 }
  0x26   : > { %v1210_v45 = vrot.slane %v1208_v35, 4  ;;  %v1225_v54 = vshll.u32 %v1193_v43, 16  ;;  %v1231_v56 = vshll.u32 %v3877_v44, 16  ;;  %v3886_v57 = vld [vmem:[#allocation2 + $0x14] sm:$0x1]  ;;  %v445_v58 = vshrl.u32 %v3881_v52, 16 }
  0x27   : > { %v438_v59 = vrot.slane %v437_v47, 4  ;;  %v1219_v62 = vrot.slane %v1217_v42, 5  ;;  %v1224_v0 = vrot.slane %v1222_v51, 4  ;;  %v3889_v1 = vld [vmem:[#allocation2 + $0x18] sm:$0xf]  ;;  %v448_v6 = vshll.u32 %v3881_v52, 16 }
  0x28   : > { %v1214_v60 = vor.u32 %v1213_v49, %v1210_v45  ;;  %v1227_v2 = vrot.slane %v1225_v54, 5  ;;  %v1233_v3 = vrot.slane %v1231_v56, 5  ;;  %v3891_v4 = vld [vmem:[#allocation2 + $0x1c] sm:$0x1]  ;;  %v447_v5 = vrot.slane %v445_v58, 4  ;;  %v3628_v54 = vld [vmem:[%s4473_s1 + $0x8] sm:$0xff]  }
  0x29   : > { %v443_v7 = vsel %vm3872_vm9, %v438_v59, %v442_v48  ;;  %v454_v9 = vshll.u32 %v3886_v57, 16  ;;  %v459_v10 = vshrl.u32 %v3889_v1, 16  ;;  %v1195_v11 = vld [vmem:[#allocation2 + $0x18] sm:$0xf]  ;;  %v450_v14 = vrot.slane %v448_v6, 5 }
  0x2a   : > { %v1215_v8 = vrot.slane %v1214_v60, 4  ;;  %v3039_v12 = vcombine.low %v429_v53, %v443_v7  ;;  %v1228_v13 = vor.u32 %v1227_v2, %v1224_v0  ;;  %v462_v16 = vshll.u32 %v3889_v1, 16  ;;  %v3899_v17 = vld [vmem:[#allocation2 + $0x1c] sm:$0x1]  ;;  %v1197_v22 = vld [vmem:[#allocation2 + $0x20] sm:$0xf] }
  0x2b   : > { %v461_v19 = vrot.slane %v459_v10, 4  ;;  %v468_v21 = vshll.u32 %v3891_v4, 16  ;;  %v451_v24 = vor.u32 %v450_v14, %v447_v5  ;;  %v456_v25 = vrot.slane %v454_v9, 5  ;;  %v227_v5 = vld [vmem:[#allocation2 + $0x2c] sm:$0x1]  ;;  %v3630_v14 = vld [vmem:[%s4473_s1 + $0x10] sm:$0xff]  }
  0x2c   : > { %v1220_v18 = vsel %vm3872_vm9, %v1215_v8, %v1219_v62  ;;  %3320 = vmatprep.mubr.bf16.mxu1 %v3039_v12  ;;  %v1229_v23 = vrot.slane %v1228_v13, 4  ;;  %v464_v27 = vrot.slane %v462_v16, 5  ;;  %v3904_v29 = vld [vmem:[#allocation2 + $0x24] sm:$0x1]  ;;  %v1236_v32 = vshrl.u32 %v1195_v11, 16 }
  0x2d   : > { %v470_v30 = vrot.slane %v468_v21, 5  ;;  %v1239_v33 = vshll.u32 %v1195_v11, 16  ;;  %v452_v35 = vrot.slane %v451_v24, 4  ;;  %v1245_v37 = vshll.u32 %v3899_v17, 16  ;;  %v246_v8 = vld [vmem:[%s3774_s16 + $0x10] sm:$0xf] }
  0x2e   : > { %v1234_v34 = vsel %vm3872_vm9, %v1229_v23, %v1233_v3  ;;  %v465_v36 = vor.u32 %v464_v27, %v461_v19  ;;  %v1238_v41 = vrot.slane %v1236_v32, 4  ;;  %v1250_v43 = vshrl.u32 %v1197_v22, 16  ;;  %v195_v3 = vld [vmem:[#allocation2 + $0x28] sm:$0x1]  ;;  %v3923_v9 = vld [vmem:[#allocation2 + $0x20] sm:$0xf] }
  0x2f   : > { %v3095_v40 = vcombine.low %v1220_v18, %v1234_v34  ;;  %v1241_v42 = vrot.slane %v1239_v33, 5  ;;  %v457_v45 = vsel %vm3872_vm9, %v452_v35, %v456_v25  ;;  %v1253_v47 = vshll.u32 %v1197_v22, 16  ;;  %v198_v21 = vld [vmem:[#allocation2 + $0x30] sm:$0x1]  ;;  %v230_v22 = vld [vmem:[#allocation2 + $0x34] sm:$0x1] }
  0x30   : > { %v466_v46 = vrot.slane %v465_v36, 4  ;;  %v839_v48 = vrot.slane %v3829_v55, 5  ;;  %v1252_v51 = vrot.slane %v1250_v43, 4  ;;  %v1259_v53 = vshll.u32 %v3904_v29, 16  ;;  %v3629_v25 = vld [vmem:[%s4473_s1 + $0x148] sm:$0xff]   ;;  %v3632_v33 = vld [vmem:[%s4473_s1 + $0x18] sm:$0xff]  }
  0x31   : > { %3416 = vmatprep.mubr.bf16.mxu0 %v3095_v40  ;;  %v1242_v49 = vor.u32 %v1241_v42, %v1238_v41  ;;  %v1247_v58 = vrot.slane %v1245_v37, 5  ;;  %v1255_v59 = vrot.slane %v1253_v47, 5  ;;  %v196_v6 = vsel %vm3777_vm2, 0, %v195_v3  ;;  %v247_v32 = vld [vmem:[%s3774_s16 + $0x14] sm:$0xf] }
  0x32   : > { %v471_v56 = vsel %vm3872_vm9, %v466_v46, %v470_v30  ;;  %v1261_v0 = vrot.slane %v1259_v53, 5  ;;  %v228_v7 = vsel %vm3787_vm4, 0, %v227_v5  ;;  %197 = vst [vmem:[#allocation2 + $0x28] sm:$0x1] %v196_v6  ;;  %v283_v12 = vshrl.u32 %v246_v8, 16  ;;  %v3631_v40 = vld [vmem:[%s4473_s1 + $0x150] sm:$0xff]  }
  0x33   : > { %v3040_v60 = vcombine.low %v457_v45, %v471_v56  ;;  %v1243_v62 = vrot.slane %v1242_v49, 4  ;;  %v1256_v2 = vor.u32 %v1255_v59, %v1252_v51  ;;  %229 = vst [vmem:[#allocation2 + $0x2c] sm:$0x1] %v228_v7  ;;  %v286_v13 = vshll.u32 %v246_v8, 16  ;;  %v201_v43 = vld [vmem:[#allocation2 + $0x38] sm:$0x1] }
  0x34   : > { %v473_v16 = vshrl.u32 %v3923_v9, 16  ;;  %v843_v18 = vrot.slane %v3861_v28, 5  ;;  %v285_v19 = vrot.slane %v283_v12, 7  ;;  %v1498_v23 = vrot.slane %v3865_v31, 5  ;;  %v233_v47 = vld [vmem:[#allocation2 + $0x3c] sm:$0x1] }
  0x35   : > { %3321 = vmatmul.mubr.bf16.vlgmr.msra.gmra.mrb[0].mxu1 %v3040_v60  ;;  %v1248_v10 = vsel %vm3872_vm9, %v1243_v62, %v1247_v58  ;;  %v1257_v11 = vrot.slane %v1256_v2, 4  ;;  %v476_v27 = vshll.u32 %v3923_v9, 16  ;;  %v199_v30 = vsel %vm3777_vm2, 0, %v198_v21  ;;  %v248_v49 = vld [vmem:[%s3774_s16 + $0x18] sm:$0xf]  ;;  %v3634_v51 = vld [vmem:[%s4473_s1 + $0x20] sm:$0xff]  }
  0x36   : > { %3329 = vmatpush3.bf16.msra.mxu1 %v3839_v61  ;;  %v288_v34 = vor.u32 %v286_v13, %v285_v19  ;;  %v289_v35 = vrot.slane %v285_v19, 4  ;;  %200 = vst [vmem:[#allocation2 + $0x30] sm:$0x1] %v199_v30  ;;  %v231_v36 = vsel %vm3787_vm4, 0, %v230_v22  ;;  %v291_v37 = vshrl.u32 %v247_v32, 16  ;;  %v3636_v30 = vld [vmem:[%s4473_s1 + $0x28] sm:$0xff]  }
  0x37   : > { %3330 = vmatprep.subr.bf16.mxu1 %v3628_v54  ;;  %v1262_v61 = vsel %vm3872_vm9, %v1257_v11, %v1261_v0  ;;  %v475_v41 = vrot.slane %v473_v16, 4  ;;  %232 = vst [vmem:[#allocation2 + $0x34] sm:$0x1] %v231_v36  ;;  %v294_v42 = vshll.u32 %v247_v32, 16  ;;  %v202_v46 = vsel %vm3777_vm2, 0, %v201_v43  ;;  %v3633_v11 = vld [vmem:[%s4473_s1 + $0x158] sm:$0xff]  }
  0x38   : > { %v3096_v24 = vcombine.low %v1248_v10, %v1262_v61  ;;  %v293_v45 = vrot.slane %v291_v37, 7  ;;  %v478_v56 = vrot.slane %v476_v27, 5  ;;  %203 = vst [vmem:[#allocation2 + $0x38] sm:$0x1] %v202_v46  ;;  %v234_v58 = vsel %vm3787_vm4, 0, %v233_v47  ;;  %v3635_v27 = vld [vmem:[%s4473_s1 + $0x160] sm:$0xff]  }
  0x39   : > { %v357_v53 = vld [vmem:[#allocation2 + $0x28] sm:$0xf]  ;;  %v3964_v60 = vld [vmem:[#allocation2 + $0x24] sm:$0x1]  ;;  %235 = vst [vmem:[#allocation2 + $0x3c] sm:$0x1] %v234_v58 }
  0x3a   : > { %3331 = vmatpush3.bf16.msra.mxu1 %v3628_v54  ;;  %3417 = vmatmul.mubr.bf16.vlgmr.msra.gmra.mrb[0].mxu0 %v3096_v24  ;;  %v360_v54 = vld [vmem:[#allocation2 + $0x2c] sm:$0x1]  ;;  %v296_v62 = vor.u32 %v294_v42, %v293_v45  ;;  %v204_v0 = vld [vmem:[#allocation2 + $0x40] sm:$0x1]  ;;  %v236_v2 = vld [vmem:[#allocation2 + $0x44] sm:$0x1] }
  0x3b   : > { %3332 = vmatprep.subr.bf16.mxu1 %v3630_v14  ;;  %3425 = vmatpush3.bf16.msra.mxu0 %v3844_v63  ;;  %v358_v63 = vsel %vm3814_vm6, %v288_v34, %v357_v53  ;;  %v361_v59 = vsel %vm3777_vm2, %v289_v35, %v360_v54  ;;  %v297_v3 = vrot.slane %v293_v45, 4  ;;  %v299_v5 = vshrl.u32 %v248_v49, 16  ;;  %v249_v8 = vld [vmem:[%s3774_s16 + $0x1c] sm:$0xf]  ;;  %v3995_v43 = vld [vmem:[%s4473_s1 + $0x30] sm:$0xff]   ;;  %v3637_v58 = vld [vmem:[%s4473_s1 + $0x168] sm:$0xff]  }
  0x3c   : > { %3426 = vmatprep.subr.bf16.mxu0 %v3629_v25  ;;  %359 = vst [vmem:[#allocation2 + $0x28] sm:$0xf] %v358_v63  ;;  %362 = vst [vmem:[#allocation2 + $0x2c] sm:$0x1] %v361_v59  ;;  %v302_v6 = vshll.u32 %v248_v49, 16  ;;  %v205_v7 = vsel %vm3777_vm2, 0, %v204_v0 }
  0x3d   : > { %v1502_v10 = vrot.slane %v3877_v44, 5  ;;  %206 = vst [vmem:[#allocation2 + $0x40] sm:$0x1] %v205_v7  ;;  %v237_v12 = vsel %vm3787_vm4, 0, %v236_v2  ;;  %v307_v13 = vshrl.u32 %v249_v8, 16  ;;  %v482_v16 = vshll.u32 %v3964_v60, 16 }
  0x3e   : > { %3333 = vmatpush3.bf16.msra.mxu1 %v3630_v14  ;;  %v479_v14 = vor.u32 %v478_v56, %v475_v41  ;;  %v363_v61 = vld [vmem:[#allocation2 + $0x30] sm:$0xf]  ;;  %v301_v19 = vrot.slane %v299_v5, 7  ;;  %238 = vst [vmem:[#allocation2 + $0x44] sm:$0x1] %v237_v12  ;;  %v847_v35 = vrot.slane %v3886_v57, 5 }
  0x3f   : > { %3334 = vmatprep.subr.bf16.mxu1 %v3632_v33  ;;  %3427 = vmatpush3.bf16.msra.mxu0 %v3629_v25  ;;  %v364_v21 = vsel %vm3814_vm6, %v296_v62, %v363_v61  ;;  %v366_v22 = vld [vmem:[#allocation2 + $0x34] sm:$0x1]  ;;  %v309_v24 = vrot.slane %v307_v13, 7  ;;  %v310_v25 = vshll.u32 %v249_v8, 16  ;;  %v1506_v36 = vrot.slane %v3899_v17, 5  ;;  %v3650_v28 = vld [vmem:[%s4473_s1 + $0x98] sm:$0xff]  }
  0x40   : > { %3428 = vmatprep.subr.bf16.mxu0 %v3631_v40  ;;  %365 = vst [vmem:[#allocation2 + $0x30] sm:$0xf] %v364_v21  ;;  %v367_v32 = vsel %vm3777_vm2, %v297_v3, %v366_v22  ;;  %v305_v34 = vrot.slane %v301_v19, 4  ;;  %v369_v37 = vld [vmem:[#allocation2 + $0x38] sm:$0xf]  ;;  %v3988_v41 = vrot.slane %v479_v14, 4 }
  0x41   : > { %368 = vst [vmem:[#allocation2 + $0x34] sm:$0x1] %v367_v32  ;;  %v3990_v42 = vrot.slane %v482_v16, 5  ;;  %v372_v46 = vld [vmem:[#allocation2 + $0x3c] sm:$0x1]  ;;  %v313_v47 = vrot.slane %v309_v24, 4  ;;  %v312_v56 = vor.u32 %v310_v25, %v309_v24 }
  0x42   : > { %3335 = vmatpush3.bf16.msra.mxu1 %v3632_v33  ;;  %v304_v33 = vor.u32 %v302_v6, %v301_v19  ;;  %v373_v54 = vsel %vm3777_vm2, %v305_v34, %v372_v46  ;;  %v3640_v14 = vld [vmem:[%s4473_s1 + $0x38] sm:$0xff]   ;;  %v3648_v17 = vld [vmem:[%s4473_s1 + $0x90] sm:$0xff]  }
  0x43   : > { %3336 = vmatprep.subr.bf16.mxu1 %v3634_v51  ;;  %3429 = vmatpush3.bf16.msra.mxu0 %v3631_v40  ;;  %v3999_v49 = vld [vmem:[#allocation2 + $0x28] sm:$0xf]  ;;  %v4001_v40 = vld [vmem:[#allocation2 + $0x2c] sm:$0x1]  ;;  %374 = vst [vmem:[#allocation2 + $0x3c] sm:$0x1] %v373_v54  ;;  %v485_v24 = vsel %vm3872_vm9, %v3988_v41, %v3990_v42 }
  0x44   : > { %3430 = vmatprep.subr.bf16.mxu0 %v3633_v11  ;;  %v370_v45 = vsel %vm3814_vm6, %v304_v33, %v369_v37  ;;  %v1199_v53 = vld [vmem:[#allocation2 + $0x28] sm:$0xf]  ;;  %v487_v63 = vshrl.u32 %v3999_v49, 16  ;;  %v490_v59 = vshll.u32 %v3999_v49, 16  ;;  %v4011_v62 = vld [vmem:[#allocation2 + $0x2c] sm:$0x1] }
  0x45   : > { %371 = vst [vmem:[#allocation2 + $0x38] sm:$0xf] %v370_v45  ;;  %v1264_v0 = vshrl.u32 %v1199_v53, 16  ;;  %v1267_v2 = vshll.u32 %v1199_v53, 16  ;;  %v1273_v3 = vshll.u32 %v4011_v62, 16  ;;  %v3639_v45 = vld [vmem:[%s4473_s1 + $0x170] sm:$0xff]  }
  0x46   : > { %3337 = vmatpush3.bf16.msra.mxu1 %v3634_v51  ;;  %v496_v51 = vshll.u32 %v4001_v40, 16  ;;  %v375_v5 = vld [vmem:[#allocation2 + $0x40] sm:$0xf]  ;;  %v378_v6 = vld [vmem:[#allocation2 + $0x44] sm:$0x1]  ;;  %v489_v7 = vrot.slane %v487_v63, 4 }
  0x47   : > { %3338 = vmatprep.subr.bf16.mxu1 %v3636_v30  ;;  %3431 = vmatpush3.bf16.msra.mxu0 %v3633_v11  ;;  %v492_v8 = vrot.slane %v490_v59, 5  ;;  %v1266_v13 = vrot.slane %v1264_v0, 4  ;;  %v1201_v16 = vld [vmem:[#allocation2 + $0x30] sm:$0xf]  ;;  %v1269_v61 = vrot.slane %v1267_v2, 5  ;;  %v4017_v19 = vrot.slane %v1273_v3, 5 }
  0x48   : > { %3432 = vmatprep.subr.bf16.mxu0 %v3635_v27  ;;  %v498_v12 = vrot.slane %v496_v51, 5  ;;  %v4019_v11 = vld [vmem:[#allocation2 + $0x30] sm:$0xf]  ;;  %v376_v21 = vsel %vm3814_vm6, %v312_v56, %v375_v5  ;;  %v379_v22 = vsel %vm3777_vm2, %v313_v47, %v378_v6  ;;  %v1278_v32 = vshrl.u32 %v1201_v16, 16  ;;  %v4032_v34 = vld [vmem:[#allocation2 + $0x34] sm:$0x1] }
  0x49   : > { %v493_v25 = vor.u32 %v492_v8, %v489_v7  ;;  %v1281_v33 = vshll.u32 %v1201_v16, 16  ;;  %377 = vst [vmem:[#allocation2 + $0x40] sm:$0xf] %v376_v21  ;;  %380 = vst [vmem:[#allocation2 + $0x44] sm:$0x1] %v379_v22  ;;  %v1270_v38 = vor.u32 %v1269_v61, %v1266_v13  ;;  %v501_v41 = vshrl.u32 %v4019_v11, 16 }
  0x4a   : > { %3339 = vmatpush3.bf16.msra.mxu1 %v3636_v30  ;;  %v4030_v30 = vld [vmem:[#allocation2 + $0x34] sm:$0x1]  ;;  %v504_v42 = vshll.u32 %v4019_v11, 16  ;;  %v1280_v47 = vrot.slane %v1278_v32, 4  ;;  %v4043_v59 = vld [vmem:[#allocation2 + $0x3c] sm:$0x1] }
  0x4b   : > { %3340 = vmatprep.subr.bf16.mxu1 %v3995_v43  ;;  %3433 = vmatpush3.bf16.msra.mxu0 %v3635_v27  ;;  %v1287_v37 = vshll.u32 %v4030_v30, 16  ;;  %v494_v46 = vrot.slane %v493_v25, 4  ;;  %v1283_v53 = vrot.slane %v1281_v33, 5  ;;  %v510_v27 = vshll.u32 %v4032_v34, 16  ;;  %v4052_v8 = vld [vmem:[%s4473_s1 + $0x80] sm:$0xff]   ;;  %v3641_v21 = vld [vmem:[%s4473_s1 + $0x178] sm:$0xff]  }
  0x4c   : > { %3434 = vmatprep.subr.bf16.mxu0 %v3637_v58  ;;  %v4040_v54 = vld [vmem:[#allocation2 + $0x38] sm:$0xf]  ;;  %v1271_v56 = vrot.slane %v1270_v38, 4  ;;  %v503_v51 = vrot.slane %v501_v41, 4  ;;  %v506_v0 = vrot.slane %v504_v42, 5  ;;  %v524_v32 = vshll.u32 %v4043_v59, 16 }
  0x4d   : > { %v1289_v63 = vrot.slane %v1287_v37, 5  ;;  %v499_v2 = vsel %vm3872_vm9, %v494_v46, %v498_v12  ;;  %v1284_v3 = vor.u32 %v1283_v53, %v1280_v47  ;;  %v512_v5 = vrot.slane %v510_v27, 5  ;;  %v1203_v7 = vld [vmem:[#allocation2 + $0x38] sm:$0xf]  ;;  %v4058_v61 = vld [vmem:[#allocation2 + $0x3c] sm:$0x1] }
  0x4e   : > { %3341 = vmatpush3.bf16.msra.mxu1 %v3995_v43  ;;  %v515_v6 = vshrl.u32 %v4040_v54, 16  ;;  %v3041_v13 = vcombine.low %v485_v24, %v499_v2  ;;  %v1276_v43 = vsel %vm3872_vm9, %v1271_v56, %v4017_v19  ;;  %v507_v16 = vor.u32 %v506_v0, %v503_v51  ;;  %v1472_v24 = vld [vmem:[#allocation2 + $0x8] sm:$0xe]  ;;  %v1473_v47 = vld [vmem:[#allocation2 + $0x10] sm:$0xe]  ;;  %v4072_v53 = vld [vmem:[%s4473_s1 + $0x180] sm:$0xff]  }
  0x4f   : > { %3342 = vmatprep.subr.bf16.mxu1 %v3640_v14  ;;  %3435 = vmatpush3.bf16.msra.mxu0 %v3637_v58  ;;  %v518_v12 = vshll.u32 %v4040_v54, 16  ;;  %v1285_v22 = vrot.slane %v1284_v3, 4  ;;  %v1292_v58 = vshrl.u32 %v1203_v7, 16  ;;  %v1295_v46 = vshll.u32 %v1203_v7, 16  ;;  %v1475_v7 = vld [vmem:[#allocation2 + $0x20] sm:$0xe] }
  0x50   : > { %3436 = vmatprep.subr.bf16.mxu0 %v3639_v45  ;;  %v517_v25 = vrot.slane %v515_v6, 4  ;;  %3324 = vmatprep.mubr.bf16.mxu1 %v3041_v13  ;;  %v508_v33 = vrot.slane %v507_v16, 4  ;;  %v1205_v19 = vld [vmem:[#allocation2 + $0x40] sm:$0xf]  ;;  %v4064_v37 = vld [vmem:[#allocation2 + $0x44] sm:$0x1] }
  0x51   : > { %v520_v38 = vrot.slane %v518_v12, 5  ;;  %v1290_v41 = vsel %vm3872_vm9, %v1285_v22, %v1289_v63  ;;  %v1294_v42 = vrot.slane %v1292_v58, 4  ;;  %v526_v51 = vrot.slane %v524_v32, 5  ;;  %v1476_v44 = vld [vmem:[#allocation2 + $0x28] sm:$0xe]  ;;  %v3649_v55 = vld [vmem:[%s4473_s1 + $0x190] sm:$0xff]  }
  0x52   : > { %3343 = vmatpush3.bf16.msra.mxu1 %v3640_v14  ;;  %v3097_v27 = vcombine.low %v1276_v43, %v1290_v41  ;;  %v1301_v0 = vshll.u32 %v4058_v61, 16  ;;  %v1474_v14 = vld [vmem:[#allocation2 + $0x18] sm:$0xe]  ;;  %v1297_v2 = vrot.slane %v1295_v46, 5  ;;  %v1306_v3 = vshrl.u32 %v1205_v19, 16 }
  0x53   : > { %3352 = vmatprep.subr.bf16.mxu1 %v4052_v8  ;;  %v521_v56 = vor.u32 %v520_v38, %v517_v25  ;;  %3437 = vmatpush3.bf16.msra.mxu0 %v3639_v45  ;;  %v1309_v63 = vshll.u32 %v1205_v19, 16  ;;  %v1315_v6 = vshll.u32 %v4064_v37, 16  ;;  %v513_v13 = vsel %vm3872_vm9, %v508_v33, %v512_v5  ;;  %v1853_v15 = vld [vmem:[#allocation2 + $0x18] sm:$0xf] }
  0x54   : > { %3438 = vmatprep.subr.bf16.mxu0 %v3641_v21  ;;  %3420 = vmatprep.mubr.bf16.mxu0 %v3097_v27  ;;  %v3107_v12 = vrot.slane %v1472_v24, 9  ;;  %v3108_v43 = vrot.slane %v1473_v47, 9  ;;  %v1298_v22 = vor.u32 %v1297_v2, %v1294_v42  ;;  %v1303_v25 = vrot.slane %v1301_v0, 5  ;;  %v1477_v0 = vld [vmem:[#allocation2 + $0x30] sm:$0xe] }
  0x55   : > { %v522_v16 = vrot.slane %v521_v56, 4  ;;  %v1308_v32 = vrot.slane %v1306_v3, 4  ;;  %v1311_v58 = vrot.slane %v1309_v63, 5  ;;  %v1510_v38 = vrot.slane %v3904_v29, 5  ;;  %v3646_v63 = vld [vmem:[%s4473_s1 + $0x88] sm:$0xff]  }
  0x56   : > { %v1317_v41 = vrot.slane %v1315_v6, 5  ;;  %v3051_v5 = vcombine.low %v3823_v50, %v3859_v26  ;;  %v1299_v33 = vrot.slane %v1298_v22, 4  ;;  %v3109_v46 = vrot.slane %v1474_v14, 9  ;;  %v1479_v6 = vld [vmem:[#allocation2 + $0x40] sm:$0xe] }
  0x57   : > { %v527_v19 = vsel %vm3872_vm9, %v522_v16, %v526_v51  ;;  %3439 = vmatpush3.bf16.msra.mxu0 %v3641_v21  ;;  %v1312_v42 = vor.u32 %v1311_v58, %v1308_v32  ;;  %v1499_v47 = vsel %vm4080_vm12, %v3107_v12, %v1498_v23  ;;  %v1503_v29 = vsel %vm4080_vm12, %v3108_v43, %v1502_v10  ;;  %v811_v16 = vld [vmem:[#allocation2 + $0x8] sm:$0xe] }
  0x58   : > { %v3042_v24 = vcombine.low %v513_v13, %v527_v19  ;;  %3448 = vmatprep.subr.bf16.mxu0 %v4072_v53  ;;  %v3110_v21 = vrot.slane %v1475_v7, 9  ;;  %v1514_v27 = vrot.slane %v4011_v62, 5  ;;  %v1304_v50 = vsel %vm3872_vm9, %v1299_v33, %v1303_v25  ;;  %v810_v13 = vld [vmem:[#allocation2] sm:$0xe]  ;;  %v812_v19 = vld [vmem:[#allocation2 + $0x10] sm:$0xe] }
  0x59   : > { %v1313_v26 = vrot.slane %v1312_v42, 4  ;;  %v1518_v56 = vrot.slane %v4030_v30, 5  ;;  %v3115_v23 = vcombine.low %v1499_v47, %v1503_v29  ;;  %v3052_v10 = vcombine.low %v3881_v52, %v3889_v1  ;;  %v1478_v1 = vld [vmem:[#allocation2 + $0x38] sm:$0xe]  ;;  %v3653_v47 = vld [vmem:[%s4473_s1 + $0x1a0] sm:$0xff]   ;;  %v3655_v29 = vld [vmem:[%s4473_s1 + $0x1a8] sm:$0xff]  }
  0x5a   : > { %3325 = vmatmul.mubr.bf16.gmra.mrb[4].mxu1 %v3042_v24  ;;  %v3111_v14 = vrot.slane %v1476_v44, 9  ;;  %v3112_v62 = vrot.slane %v1477_v0, 9  ;;  %v851_v2 = vrot.slane %v3891_v4, 5  ;;  %v1507_v30 = vsel %vm4080_vm12, %v3109_v46, %v1506_v36  ;;  %v3651_v33 = vld [vmem:[%s4473_s1 + $0x198] sm:$0xff]   ;;  %v3654_v46 = vld [vmem:[%s4473_s1 + $0xa8] sm:$0xff]  }
  0x5b   : > { %3344 = vmatprep.mubr.bf16.mxu1 %v3051_v5  ;;  %v1318_v31 = vsel %vm3872_vm9, %v1313_v26, %v1317_v41  ;;  %v1511_v3 = vsel %vm4080_vm12, %v3110_v21, %v1510_v38  ;;  %v3053_v52 = vcombine.low %v3923_v9, %v3999_v49  ;;  %v3647_v9 = vld [vmem:[%s4473_s1 + $0x188] sm:$0xff]   ;;  %v1522_v49 = vrot.slane %v4058_v61, 5  ;;  %v813_v41 = vld [vmem:[#allocation2 + $0x18] sm:$0xe]  ;;  %v3657_v21 = vld [vmem:[%s4473_s1 + $0xb0] sm:$0xff]  }
  0x5c   : > { %v3098_v51 = vcombine.low %v1304_v50, %v1318_v31  ;;  %v3116_v4 = vcombine.low %v1507_v30, %v1511_v3  ;;  %v1515_v36 = vsel %vm4080_vm12, %v3111_v14, %v1514_v27  ;;  %v1519_v7 = vsel %vm4080_vm12, %v3112_v62, %v1518_v56  ;;  %v3663_v42 = vld [vmem:[#allocation2 + $0x10] ss:$8 sps:$4 sm:$0xff]   ;;  %v814_v27 = vld [vmem:[#allocation2 + $0x20] sm:$0xe]  ;;  %v815_v50 = vld [vmem:[#allocation2 + $0x28] sm:$0xe] }
  0x5d   : > { %v1526_v12 = vrot.slane %v4064_v37, 5  ;;  %v3063_v43 = vrot.slane %v810_v13, 9  ;;  %v3064_v22 = vrot.slane %v811_v16, 9  ;;  %v3113_v25 = vrot.slane %v1478_v1, 9  ;;  %v207_v26 = vld [vmem:[#allocation2 + $0x48] sm:$0x1] }
  0x5e   : > { %3421 = vmatmul.mubr.bf16.gmra.mrb[4].mxu0 %v3098_v51  ;;  %v3114_v32 = vrot.slane %v1479_v6, 9  ;;  %v3117_v58 = vcombine.low %v1515_v36, %v1519_v7  ;;  %v3054_v61 = vcombine.low %v4019_v11, %v4040_v54  ;;  %v3065_v5 = vrot.slane %v812_v19, 9  ;;  %v3660_v56 = vld [vmem:[%s4473_s1 + $0xb8] sm:$0xff]   ;;  %v816_v14 = vld [vmem:[#allocation2 + $0x30] sm:$0xe] }
  0x5f   : > { %3440 = vmatprep.mubr.bf16.mxu0 %v3115_v23  ;;  %v844_v38 = vsel %vm4080_vm12, %v3064_v22, %v843_v18  ;;  %v1523_v18 = vsel %vm4080_vm12, %v3113_v25, %v1522_v49  ;;  %v208_v31 = vsel %vm3777_vm2, 0, %v207_v26  ;;  %v3658_v23 = vld [vmem:[%s4473_s1 + $0x1b0] sm:$0xff]   ;;  %v855_v51 = vrot.slane %v3964_v60, 5  ;;  %v817_v62 = vld [vmem:[#allocation2 + $0x38] sm:$0xe]  ;;  %v3662_v60 = vld [vmem:[%s4473_s1 + $0xc0] sm:$0xff]  }
  0x60   : > { %v1527_v11 = vsel %vm4080_vm12, %v3114_v32, %v1526_v12  ;;  %v4156_v54 = vsel %vm4080_vm12, %v3065_v5, %v847_v35  ;;  %v3652_v35 = vld [vmem:[%s4473_s1 + $0xa0] sm:$0xff]   ;;  %v859_v44 = vrot.slane %v4001_v40, 5  ;;  %209 = vst [vmem:[#allocation2 + $0x48] sm:$0x1] %v208_v31  ;;  %v3067_v0 = vrot.slane %v814_v27, 9  ;;  %v3661_v6 = vld [vmem:[%s4473_s1 + $0x1b8] sm:$0xff]  }
  0x61   : > { %v3118_v57 = vcombine.low %v1523_v18, %v1527_v11  ;;  %v1885_v1 = vshll.u32 %v1853_v15, 16  ;;  %v3070_v36 = vrot.slane %v817_v62, 9  ;;  %v867_v7 = vrot.slane %v4043_v59, 5  ;;  %v4206_v22 = vld [vmem:[#allocation2 + $0x1c] sm:$0x1]  ;;  %v3666_v25 = vld [vmem:[%s4473_s1 + $0xc8] sm:$0xff]  }
  0x62   : > { %3345 = vmatmul.mubr.bf16.vlgmr.msra.gmra.mrb[0].mxu1 %v3052_v10  ;;  %v3068_v10 = vrot.slane %v815_v50, 9  ;;  %v856_v40 = vsel %vm4080_vm12, %v3067_v0, %v855_v51  ;;  %v1891_v19 = vshll.u32 %v4206_v22, 16  ;;  %v3676_v5 = vld [vmem:[#allocation2 + $0x30] ss:$8 sps:$4 sm:$0xff]   ;;  %v239_v27 = vld [vmem:[#allocation2 + $0x4c] sm:$0x1] }
  0x63   : > { %3353 = vmatpush3.bf16.msra.mxu1 %v4052_v8  ;;  %3348 = vmatprep.mubr.bf16.mxu1 %v3053_v52  ;;  %v840_v8 = vsel %vm4080_vm12, %v3063_v43, %v839_v48  ;;  %v3066_v48 = vrot.slane %v813_v41, 9  ;;  %v1887_v49 = vrot.slane %v1885_v1, 5  ;;  %v4204_v43 = vld [vmem:[#allocation2 + $0x14] sm:$0x1]  ;;  %v868_v32 = vsel %vm4080_vm12, %v3070_v36, %v867_v7  ;;  %v3667_v41 = vld [vmem:[%s4473_s1 + $0x1c8] sm:$0xff]   ;;  %v3672_v31 = vld [vmem:[%s4473_s1 + $0xe0] sm:$0xff]  }
  0x64   : > { %3354 = vmatprep.subr.bf16.mxu1 %v3646_v63  ;;  %v3071_v37 = vcombine.low %v840_v8, %v844_v38  ;;  %v860_v52 = vsel %vm4080_vm12, %v3068_v10, %v859_v44  ;;  %v1877_v8 = vshll.u32 %v4204_v43, 16  ;;  %v1893_v11 = vrot.slane %v1891_v19, 5  ;;  %v1859_v26 = vld [vmem:[#allocation2 + $0x30] sm:$0xf]  ;;  %v3671_v51 = vld [vmem:[%s4473_s1 + $0x1d8] sm:$0xff]  }
  0x65   : > { %v4160_v24 = vsel %vm4080_vm12, %v3066_v48, %v851_v2  ;;  %v1851_v2 = vld [vmem:[#allocation2 + $0x10] sm:$0xf]  ;;  %v3073_v12 = vcombine.low %v856_v40, %v860_v52  ;;  %v4255_v40 = vld [vmem:[#allocation2 + $0x2c] sm:$0x1]  ;;  %v4257_v52 = vld [vmem:[#allocation2 + $0x34] sm:$0x1] }
  0x66   : > { %3441 = vmatmul.mubr.bf16.vlgmr.msra.gmra.mrb[0].mxu0 %v3116_v4  ;;  %v1868_v30 = vshrl.u32 %v1851_v2, 16  ;;  %v1871_v3 = vshll.u32 %v1851_v2, 16  ;;  %v3069_v4 = vrot.slane %v816_v14, 9  ;;  %v1879_v48 = vrot.slane %v1877_v8, 5  ;;  %v1863_v7 = vld [vmem:[#allocation2 + $0x40] sm:$0xf] }
  0x67   : > { %3355 = vmatpush3.bf16.msra.mxu1 %v3646_v63  ;;  %3449 = vmatpush3.bf16.msra.mxu0 %v4072_v53  ;;  %v3072_v53 = vcombine.low %v4156_v54, %v4160_v24  ;;  %v1882_v63 = vshrl.u32 %v1853_v15, 16  ;;  %v1855_v54 = vld [vmem:[#allocation2 + $0x20] sm:$0xf]  ;;  %v3682_v24 = vld [vmem:[#allocation2 + $0x8] ss:$8 sps:$4 sm:$0xff]   ;;  %v1924_v2 = vshrl.u32 %v1859_v26, 16 }
  0x68   : > { %3356 = vmatprep.subr.bf16.mxu1 %v3648_v17  ;;  %3450 = vmatprep.subr.bf16.mxu0 %v3647_v9  ;;  %v1870_v13 = vrot.slane %v1868_v30, 4  ;;  %v1873_v16 = vrot.slane %v1871_v3, 5  ;;  %v3678_v50 = vld [vmem:[#allocation2 + $0x40] ss:$8 sps:$4 sm:$0xff]   ;;  %v1927_v15 = vshll.u32 %v1859_v26, 16  ;;  %v1952_v8 = vshrl.u32 %v1863_v7, 16 }
  0x69   : > { %3444 = vmatprep.mubr.bf16.mxu0 %v3117_v58  ;;  %v3673_v30 = vld [vmem:[%s4473_s1 + $0x1e0] sm:$0xff]   ;;  %v1926_v1 = vrot.slane %v1924_v2, 4  ;;  %v1955_v19 = vshll.u32 %v1863_v7, 16  ;;  %v2133_v7 = vld [vmem:[#allocation2 + $0x18] sm:$0xe] }
  0x6a   : > { %3349 = vmatmul.mubr.bf16.gmra.mrb[4].mxu1 %v3054_v61  ;;  %v1874_v58 = vor.u32 %v1873_v16, %v1870_v13  ;;  %v3665_v61 = vld [vmem:[#allocation2 + $0x20] ss:$8 sps:$4 sm:$0xff]   ;;  %v3677_v13 = vld [vmem:[%s4473_s1 + $0xf0] sm:$0xff]  }
  0x6b   : > { %3357 = vmatpush3.bf16.msra.mxu1 %v3648_v17  ;;  %3368 = vmatprep.mubr.bf16.mxu1 %v3071_v37  ;;  %v863_v17 = vrot.slane %v4032_v34, 5  ;;  %v3664_v34 = vld [vmem:[%s4473_s1 + $0x1c0] sm:$0xff]   ;;  %v3668_v37 = vld [vmem:[%s4473_s1 + $0xd0] sm:$0xff]   ;;  %v1865_v16 = vld [vmem:[#allocation2 + $0x48] sm:$0xf] }
  0x6c   : > { %3451 = vmatpush3.bf16.msra.mxu0 %v3647_v9  ;;  %3358 = vmatprep.subr.bf16.mxu1 %v3650_v28  ;;  %v1884_v9 = vrot.slane %v1882_v63, 4  ;;  %v3683_v26 = vld [vmem:[#allocation2 + $0x18] ss:$8 sps:$4 sm:$0xff]  }
  0x6d   : > { %3452 = vmatprep.subr.bf16.mxu0 %v3649_v55  ;;  %v864_v59 = vsel %vm4080_vm12, %v3069_v4, %v863_v17  ;;  %v4259_v4 = vld [vmem:[#allocation2 + $0x3c] sm:$0x1] }
  0x6e   : > { %3445 = vmatmul.mubr.bf16.gmra.mrb[4].mxu0 %v3118_v57  ;;  %v1888_v38 = vor.u32 %v1887_v49, %v1884_v9  ;;  %v3669_v57 = vld [vmem:[%s4473_s1 + $0x1d0] sm:$0xff]   ;;  %v3675_v9 = vld [vmem:[%s4473_s1 + $0x1e8] sm:$0xff]  }
  0x6f   : > { %3359 = vmatpush3.bf16.msra.mxu1 %v3650_v28  ;;  %3464 = vmatprep.mubr.bf16.mxu0 %v3663_v42  ;;  %v1875_v28 = vrot.slane %v1874_v58, 4  ;;  %v1899_v42 = vshll.u32 %v1855_v54, 16  ;;  %v1947_v58 = vshll.u32 %v4259_v4, 16 }
  0x70   : > { %3453 = vmatpush3.bf16.msra.mxu0 %v3649_v55  ;;  %3360 = vmatprep.subr.bf16.mxu1 %v3652_v35  ;;  %v3074_v55 = vcombine.low %v864_v59, %v868_v32  ;;  %v1889_v18 = vrot.slane %v1888_v38, 4  ;;  %v1933_v32 = vshll.u32 %v4257_v52, 16 }
  0x71   : > { %3454 = vmatprep.subr.bf16.mxu0 %v3651_v33  ;;  %v1901_v10 = vrot.slane %v1899_v42, 5 }
  0x73   : > { %3361 = vmatpush3.bf16.msra.mxu1 %v3652_v35  ;;  %v1896_v35 = vshrl.u32 %v1855_v54, 16  ;;  %v1935_v54 = vrot.slane %v1933_v32, 5 }
  0x74   : > { %3455 = vmatpush3.bf16.msra.mxu0 %v3651_v33  ;;  %3362 = vmatprep.subr.bf16.mxu1 %v3654_v46  ;;  %v3670_v33 = vld [vmem:[%s4473_s1 + $0xd8] sm:$0xff]  }
  0x75   : > { %3456 = vmatprep.subr.bf16.mxu0 %v3653_v47  ;;  %v1898_v0 = vrot.slane %v1896_v35, 4  ;;  %v1957_v35 = vrot.slane %v1955_v19, 5 }
  0x77   : > { %3363 = vmatpush3.bf16.msra.mxu1 %v3654_v46  ;;  %v1880_v46 = vsel %vm3872_vm9, %v1875_v28, %v1879_v48  ;;  %v1902_v49 = vor.u32 %v1901_v10, %v1898_v0 }
  0x78   : > { %3457 = vmatpush3.bf16.msra.mxu0 %v3653_v47  ;;  %3364 = vmatprep.subr.bf16.mxu1 %v3657_v21  ;;  %v1894_v47 = vsel %vm3872_vm9, %v1889_v18, %v1893_v11 }
  0x79   : > { %3458 = vmatprep.subr.bf16.mxu0 %v3655_v29  ;;  %v3139_v44 = vcombine.low %v1880_v46, %v1894_v47  ;;  %v3684_v47 = vld [vmem:[%s4473_s1 + $0x200] sm:$0xff]  }
  0x7b   : > { %3365 = vmatpush3.bf16.msra.mxu1 %v3657_v21 }
  0x7c   : > { %3459 = vmatpush3.bf16.msra.mxu0 %v3655_v29  ;;  %3366 = vmatprep.subr.bf16.mxu1 %v3660_v56 }
  0x7d   : > { %3460 = vmatprep.subr.bf16.mxu0 %v3658_v23 }
  0x7f   : > { %3367 = vmatpush3.bf16.msra.mxu1 %v3660_v56  ;;  %v240_v56 = vsel %vm3787_vm4, 0, %v239_v27  ;;  %v2136_v27 = vld [vmem:[#allocation2 + $0x30] sm:$0xe] }
  0x80   : > { %3461 = vmatpush3.bf16.msra.mxu0 %v3658_v23  ;;  %3376 = vmatprep.subr.bf16.mxu1 %v3662_v60  ;;  %v1861_v23 = vld [vmem:[#allocation2 + $0x38] sm:$0xf]  ;;  %241 = vst [vmem:[#allocation2 + $0x4c] sm:$0x1] %v240_v56  ;;  %v3155_v2 = vrot.slane %v2136_v27, 9 }
  0x81   : > { %3462 = vmatprep.subr.bf16.mxu0 %v3661_v6  ;;  %v1938_v3 = vshrl.u32 %v1861_v23, 16  ;;  %v1941_v63 = vshll.u32 %v1861_v23, 16 }
  0x82   : > { %3369 = vmatmul.mubr.bf16.vlgmr.msra.gmra.mrb[0].mxu1 %v3072_v53  ;;  %v1857_v53 = vld [vmem:[#allocation2 + $0x28] sm:$0xf] }
  0x83   : > { %3377 = vmatpush3.bf16.msra.mxu1 %v3662_v60  ;;  %3372 = vmatprep.mubr.bf16.mxu1 %v3073_v12  ;;  %v1910_v29 = vshrl.u32 %v1857_v53, 16  ;;  %v1913_v21 = vshll.u32 %v1857_v53, 16  ;;  %v4253_v60 = vld [vmem:[#allocation2 + $0x24] sm:$0x1]  ;;  %v1940_v17 = vrot.slane %v1938_v3, 4  ;;  %v1943_v36 = vrot.slane %v1941_v63, 5 }
  0x84   : > { %3463 = vmatpush3.bf16.msra.mxu0 %v3661_v6  ;;  %3378 = vmatprep.subr.bf16.mxu1 %v3666_v25  ;;  %v1929_v6 = vrot.slane %v1927_v15, 5  ;;  %v1905_v12 = vshll.u32 %v4253_v60, 16  ;;  %v1954_v53 = vrot.slane %v1952_v8, 4  ;;  %v2174_v15 = vrot.slane %v4257_v52, 5 }
  0x85   : > { %3472 = vmatprep.subr.bf16.mxu0 %v3664_v34  ;;  %v1912_v14 = vrot.slane %v1910_v29, 4  ;;  %v1915_v62 = vrot.slane %v1913_v21, 5  ;;  %v1944_v38 = vor.u32 %v1943_v36, %v1940_v17  ;;  %v3681_v21 = vld [vmem:[%s4473_s1 + $0x1f8] sm:$0xff]   ;;  %v2178_v3 = vrot.slane %v4259_v4, 5  ;;  %v2132_v36 = vld [vmem:[#allocation2 + $0x10] sm:$0xe] }
  0x86   : > { %v1930_v59 = vor.u32 %v1929_v6, %v1926_v1  ;;  %v1907_v28 = vrot.slane %v1905_v12, 5  ;;  %v1958_v10 = vor.u32 %v1957_v35, %v1954_v53  ;;  %v2175_v52 = vsel %vm4080_vm12, %v3155_v2, %v2174_v15  ;;  %v2135_v53 = vld [vmem:[#allocation2 + $0x28] sm:$0xe] }
  0x87   : > { %3465 = vmatmul.mubr.bf16.vlgmr.msra.gmra.mrb[0].mxu0 %v3665_v61  ;;  %3379 = vmatpush3.bf16.msra.mxu1 %v3666_v25  ;;  %v1916_v25 = vor.u32 %v1915_v62, %v1912_v14  ;;  %v1966_v61 = vshrl.u32 %v1865_v16, 16  ;;  %v4282_v29 = vld [vmem:[#allocation2 + $0x4c] sm:$0x1]  ;;  %v3151_v12 = vrot.slane %v2132_v36, 9 }
  0x88   : > { %3473 = vmatpush3.bf16.msra.mxu0 %v3664_v34  ;;  %3380 = vmatprep.subr.bf16.mxu1 %v3668_v37  ;;  %v1919_v34 = vshll.u32 %v4255_v40, 16  ;;  %v1931_v11 = vrot.slane %v1930_v59, 4  ;;  %v1975_v14 = vshll.u32 %v4282_v29, 16  ;;  %v3685_v62 = vld [vmem:[%s4473_s1 + $0x208] sm:$0xff]   ;;  %v1959_v6 = vrot.slane %v1958_v10, 4 }
  0x89   : > { %3474 = vmatprep.subr.bf16.mxu0 %v3667_v41  ;;  %3468 = vmatprep.mubr.bf16.mxu0 %v3676_v5  ;;  %v3679_v5 = vld [vmem:[%s4473_s1 + $0x1f0] sm:$0xff]   ;;  %v1917_v48 = vrot.slane %v1916_v25, 4  ;;  %v1968_v42 = vrot.slane %v1966_v61, 4  ;;  %v2158_v25 = vrot.slane %v4204_v43, 5  ;;  %v2162_v59 = vrot.slane %v4206_v22, 5 }
  0x8a   : > { %3373 = vmatmul.mubr.bf16.gmra.mrb[4].mxu1 %v3074_v55  ;;  %v1903_v55 = vrot.slane %v1902_v49, 4  ;;  %v1921_v18 = vrot.slane %v1919_v34, 5  ;;  %v1936_v23 = vsel %vm3872_vm9, %v1931_v11, %v1935_v54  ;;  %v3687_v49 = vld [vmem:[#allocation2 + $0x38] ss:$8 sps:$4 sm:$0xff]   ;;  %v3152_v34 = vrot.slane %v2133_v7, 9 }
  0x8b   : > { %3381 = vmatpush3.bf16.msra.mxu1 %v3668_v37  ;;  %3392 = vmatprep.mubr.bf16.mxu1 %v3682_v24  ;;  %v1969_v37 = vshll.u32 %v1865_v16, 16  ;;  %v1949_v24 = vrot.slane %v1947_v58, 5  ;;  %v1977_v16 = vrot.slane %v1975_v14, 5  ;;  %v2159_v43 = vsel %vm4080_vm12, %v3151_v12, %v2158_v25  ;;  %v3693_v54 = vld [vmem:[%s4473_s1 + $0x238] sm:$0xff]  }
  0x8c   : > { %3475 = vmatpush3.bf16.msra.mxu0 %v3667_v41  ;;  %3382 = vmatprep.subr.bf16.mxu1 %v3670_v33  ;;  %v3680_v41 = vld [vmem:[%s4473_s1 + $0xf8] sm:$0xff]   ;;  %v1908_v56 = vsel %vm3872_vm9, %v1903_v55, %v1907_v28  ;;  %v2163_v22 = vsel %vm4080_vm12, %v3152_v34, %v2162_v59  ;;  %v2139_v55 = vld [vmem:[#allocation2 + $0x48] sm:$0xe] }
  0x8d   : > { %3476 = vmatprep.subr.bf16.mxu0 %v3669_v57  ;;  %v1971_v46 = vrot.slane %v1969_v37, 5  ;;  %v3159_v61 = vcombine.low %v2159_v43, %v2163_v22  ;;  %v3691_v37 = vld [vmem:[%s4473_s1 + $0x228] sm:$0xff]   ;;  %v3158_v11 = vrot.slane %v2139_v55, 9 }
  0x8f   : > { %3383 = vmatpush3.bf16.msra.mxu1 %v3670_v33  ;;  %3469 = vmatmul.mubr.bf16.gmra.mrb[4].mxu0 %v3678_v50  ;;  %v1945_v33 = vrot.slane %v1944_v38, 4  ;;  %v2137_v50 = vld [vmem:[#allocation2 + $0x38] sm:$0xe] }
  0x90   : > { %3477 = vmatpush3.bf16.msra.mxu0 %v3669_v57  ;;  %3384 = vmatprep.subr.bf16.mxu1 %v3672_v31  ;;  %v4277_v57 = vld [vmem:[#allocation2 + $0x44] sm:$0x1]  ;;  %v3689_v38 = vld [vmem:[%s4473_s1 + $0x218] sm:$0xff]  }
  0x91   : > { %3478 = vmatprep.subr.bf16.mxu0 %v3671_v51  ;;  %3488 = vmatprep.mubr.bf16.mxu0 %v3139_v44  ;;  %v3686_v44 = vld [vmem:[#allocation2 + $0x28] ss:$8 sps:$4 sm:$0xff]   ;;  %v1950_v0 = vsel %vm3872_vm9, %v1945_v33, %v1949_v24  ;;  %v2182_v28 = vrot.slane %v4277_v57, 5  ;;  %v2134_v24 = vld [vmem:[#allocation2 + $0x20] sm:$0xe] }
  0x92   : > { %v3141_v1 = vcombine.low %v1936_v23, %v1950_v0  ;;  %v3153_v35 = vrot.slane %v2134_v24, 9 }
  0x93   : > { %3385 = vmatpush3.bf16.msra.mxu1 %v3672_v31  ;;  %v1922_v31 = vsel %vm3872_vm9, %v1917_v48, %v1921_v18  ;;  %v2186_v48 = vrot.slane %v4282_v29, 5 }
  0x94   : > { %3479 = vmatpush3.bf16.msra.mxu0 %v3671_v51  ;;  %3386 = vmatprep.subr.bf16.mxu1 %v3674_v20  ;;  %v1961_v51 = vshll.u32 %v4277_v57, 16  ;;  %v3140_v63 = vcombine.low %v1908_v56, %v1922_v31 }
  0x95   : > { %3480 = vmatprep.subr.bf16.mxu0 %v3673_v30  ;;  %v2187_v57 = vsel %vm4080_vm12, %v3158_v11, %v2186_v48 }
  0x96   : > { %v1963_v17 = vrot.slane %v1961_v51, 5 }
  0x97   : > { %3387 = vmatpush3.bf16.msra.mxu1 %v3674_v20  ;;  %v1972_v20 = vor.u32 %v1971_v46, %v1968_v42  ;;  %v2166_v42 = vrot.slane %v4253_v60, 5  ;;  %v3154_v46 = vrot.slane %v2135_v53, 9 }
  0x98   : > { %3481 = vmatpush3.bf16.msra.mxu0 %v3673_v30  ;;  %3388 = vmatprep.subr.bf16.mxu1 %v3677_v13  ;;  %v3156_v30 = vrot.slane %v2137_v50, 9  ;;  %v1964_v58 = vsel %vm3872_vm9, %v1959_v6, %v1963_v17  ;;  %v4351_v17 = vld [vmem:[%s4474_s2] ss:$0 sm:$0xff] }
  0x99   : > { %3482 = vmatprep.subr.bf16.mxu0 %v3675_v9 }
  0x9a   : > { %v2179_v4 = vsel %vm4080_vm12, %v3156_v30, %v2178_v3  ;;  %v3703_v30 = vmov 1983009808  }
  0x9b   : > { %3389 = vmatpush3.bf16.msra.mxu1 %v3677_v13  ;;  %v1973_v13 = vrot.slane %v1972_v20, 4  ;;  %v3161_v32 = vcombine.low %v2175_v52, %v2179_v4  ;;  %v2374_v3 = vunpack.c.l.s4 %v3703_v30 }
  0x9c   : > { %3483 = vmatpush3.bf16.msra.mxu0 %v3675_v9  ;;  %3390 = vmatprep.subr.bf16.mxu1 %v3680_v41  ;;  %v3688_v9 = vld [vmem:[%s4473_s1 + $0x210] sm:$0xff]  }
  0x9d   : > { %3484 = vmatprep.subr.bf16.mxu0 %v3679_v5  ;;  %v1978_v8 = vsel %vm3872_vm9, %v1973_v13, %v1977_v16 }
  0x9e   : > { %v3142_v19 = vcombine.low %v1964_v58, %v1978_v8 }
  0x9f   : > { %3391 = vmatpush3.bf16.msra.mxu1 %v3680_v41  ;;  %v3692_v41 = vld [vmem:[%s4473_s1 + $0x230] sm:$0xff]  }
  0xa0   : > { %3485 = vmatpush3.bf16.msra.mxu0 %v3679_v5  ;;  %3520 = vmatprep.subr.bf16.mxu1 %v3684_v47  ;;  %v2138_v5 = vld [vmem:[#allocation2 + $0x40] sm:$0xe] }
  0xa1   : > { %3486 = vmatprep.subr.bf16.mxu0 %v3681_v21  ;;  %v3157_v18 = vrot.slane %v2138_v5, 9 }
  0xa2   : > { %3393 = vmatmul.mubr.bf16.vlgmr.msra.gmra.mrb[0].mxu1 %v3683_v26 }
  0xa3   : > { %3528 = vmatpush3.bf16.msra.mxu1 %v3684_v47  ;;  %3396 = vmatprep.mubr.bf16.mxu1 %v3686_v44  ;;  %v2183_v33 = vsel %vm4080_vm12, %v3157_v18, %v2182_v28 }
  0xa4   : > { %3487 = vmatpush3.bf16.msra.mxu0 %v3681_v21  ;;  %3521 = vmatprep.subr.bf16.mxu1 %v3685_v62  ;;  %v3162_v29 = vcombine.low %v2183_v33, %v2187_v57  ;;  %v2167_v21 = vsel %vm4080_vm12, %v3153_v35, %v2166_v42 }
  0xa5   : > { %3496 = vmatprep.subr.bf16.mxu0 %v3684_v47 }
  0xa7   : > { %3489 = vmatmul.mubr.bf16.vlgmr.msra.gmra.mrb[0].mxu0 %v3140_v63  ;;  %3529 = vmatpush3.bf16.msra.mxu1 %v3685_v62  ;;  %v2376_v63 = vlaneseq }
  0xa8   : > { %3497 = vmatpush3.bf16.msra.mxu0 %v3684_v47  ;;  %3492 = vmatprep.mubr.bf16.mxu0 %v3141_v1  ;;  %v2170_v47 = vrot.slane %v4255_v40, 5  ;;  %v2375_v1 = vunpack.c.0.s8 %v2374_v3 }
  0xa9   : > { %3498 = vmatprep.subr.bf16.mxu0 %v3685_v62  ;;  %3522 = vmatprep.subr.bf16.mxu1 %v3688_v9  ;;  %v2377_v6 = vshrl.u32 %v2376_v63, 7 }
  0xaa   : > { %3397 = vmatmul.mubr.bf16.gmra.mrb[4].mxu1 %v3687_v49  ;;  %v2171_v27 = vsel %vm4080_vm12, %v3154_v46, %v2170_v47 }
  0xab   : > { %3530 = vmatpush3.bf16.msra.mxu1 %v3688_v9  ;;  %3516 = vmatprep.mubr.bf16.mxu1 %v3161_v32  ;;  %v3160_v50 = vcombine.low %v2167_v21, %v2171_v27  ;;  %v4353_v4 = vsub.s32 %v2375_v1, %v2377_v6 }
  0xac   : > { %3499 = vmatpush3.bf16.msra.mxu0 %v3685_v62  ;;  %3523 = vmatprep.subr.bf16.mxu1 %v3689_v38 }
  0xad   : > { %3500 = vmatprep.subr.bf16.mxu0 %v3688_v9 }
  0xaf   : > { %3493 = vmatmul.mubr.bf16.gmra.mrb[4].mxu0 %v3142_v19  ;;  %3531 = vmatpush3.bf16.msra.mxu1 %v3689_v38 }
  0xb0   : > { %3501 = vmatpush3.bf16.msra.mxu0 %v3688_v9  ;;  %3524 = vmatprep.subr.bf16.mxu1 %v3690_v39 }
  0xb1   : > { %3502 = vmatprep.subr.bf16.mxu0 %v3689_v38  ;;  %3512 = vmatprep.mubr.bf16.mxu0 %v3159_v61 }
  0xb3   : > { %3532 = vmatpush3.bf16.msra.mxu1 %v3690_v39 }
  0xb4   : > { %3503 = vmatpush3.bf16.msra.mxu0 %v3689_v38  ;;  %3525 = vmatprep.subr.bf16.mxu1 %v3691_v37 }
  0xb5   : > { %3504 = vmatprep.subr.bf16.mxu0 %v3690_v39 }
  0xb7   : > { %3533 = vmatpush3.bf16.msra.mxu1 %v3691_v37 }
  0xb8   : > { %3505 = vmatpush3.bf16.msra.mxu0 %v3690_v39  ;;  %3526 = vmatprep.subr.bf16.mxu1 %v3692_v41 }
  0xb9   : > { %3506 = vmatprep.subr.bf16.mxu0 %v3691_v37 }
  0xbb   : > { %3534 = vmatpush3.bf16.msra.mxu1 %v3692_v41 }
  0xbc   : > { %3507 = vmatpush3.bf16.msra.mxu0 %v3691_v37  ;;  %3527 = vmatprep.subr.bf16.mxu1 %v3693_v54 }
  0xbd   : > { %3508 = vmatprep.subr.bf16.mxu0 %v3692_v41 }
  0xbf   : > { %3535 = vmatpush3.bf16.msra.mxu1 %v3693_v54 }
  0xc0   : > { %3509 = vmatpush3.bf16.msra.mxu0 %v3692_v41 }
  0xc1   : > { %3510 = vmatprep.subr.bf16.mxu0 %v3693_v54 }
  0xc2   : > { %3517 = vmatmul.mubr.bf16.vlgmr.msra.gmra.mrb[8].mxu1 %v3162_v29 }
  0xc4   : > { %3511 = vmatpush3.bf16.msra.mxu0 %v3693_v54 }
  0xc7   : > { %3513 = vmatmul.mubr.bf16.vlgmr.msra.gmra.mrb[0].mxu0 %v3160_v50 }
 0x175   : > { %v3394_v26 = vpop.f32.mrb[0].mxu1 }
 0x176   : > { %v1152_v60 = vpop.f32.mrb[1].mxu1 }
 0x177   : > { %v3395_v56 = vpop.f32.mrb[2].mxu1 }
 0x178   : > { %v4346_v31 = vpop.f32.mrb[3].mxu1 }
 0x17d   : > { %v3398_v40 = vpop.f32.mrb[4].mxu1 }
 0x17e   : > { %v1168_v23 = vpop.f32.mrb[5].mxu1 }
 0x17f   : > { %v3399_v51 = vpop.f32.mrb[6].mxu1 }
 0x180   : > { %v1171_v44 = vpop.f32.mrb[7].mxu1 }
 0x182   : > { %v3494_v0 = vpop.f32.mrb[4].mxu0 }
 0x183   : > { %v3540_v10 = vadd.f32 %v3494_v0, %v3398_v40  ;;  %v2109_v20 = vpop.f32.mrb[5].mxu0 }
 0x184   : > { %v3542_v14 = vadd.f32 %v2109_v20, %v1168_v23  ;;  %v3495_v45 = vpop.f32.mrb[6].mxu0 }
 0x185   : > { %v3544_v62 = vadd.f32 %v3495_v45, %v3399_v51  ;;  %v2112_v2 = vpop.f32.mrb[7].mxu0 }
 0x186   : > { %v3546_v15 = vadd.f32 %v2112_v2, %v1171_v44 }
 0x195   : > { %v3518_v36 = vpop.f32.mrb[8].mxu1 }
 0x196   : > { %v3541_v7 = vadd.f32 %v3540_v10, %v3518_v36  ;;  %v2318_v13 = vpop.f32.mrb[9].mxu1 }
 0x197   : > { %v3543_v16 = vadd.f32 %v3542_v14, %v2318_v13  ;;  %v3519_v52 = vpop.f32.mrb[10].mxu1 }
 0x198   : > { %v2354_v9 = vadd.f32 %v3541_v7, %v4351_v17  ;;  %v3545_v49 = vadd.f32 %v3544_v62, %v3519_v52  ;;  %v2321_v12 = vpop.f32.mrb[11].mxu1 }
 0x199   : > { %v2352_v25 = vadd.f32 %v3543_v16, %v4351_v17  ;;  %v3547_v34 = vadd.f32 %v3546_v15, %v2321_v12 }
 0x19a   : > { %v3514_v59 = vpop.f32.mrb[0].mxu0  ;;  %v2362_v32 = vmax.f32 %v2354_v9, 0.0  ;;  %v2355_v58 = vadd.f32 %v3545_v49, %v4351_v17 }
 0x19b   : > { %v3536_v8 = vadd.f32 %v3514_v59, %v3394_v26  ;;  %v2302_v38 = vpop.f32.mrb[1].mxu0  ;;  %v2360_v43 = vmax.f32 %v2352_v25, 0.0  ;;  %v4368_v24 = vadd.f32 %v3547_v34, %v4351_v17 }
 0x19c   : > { %v2474_v22 = vcombine.high %v2362_v32, %v2362_v32  ;;  %v2481_v19 = vrot.slane %v2362_v32, %v4353_v4  ;;  %v3537_v39 = vadd.f32 %v2302_v38, %v1152_v60  ;;  %v3515_v61 = vpop.f32.mrb[2].mxu0  ;;  %v2363_v37 = vmax.f32 %v2355_v58, 0.0 }
 0x19d   : > { %v2350_v41 = vadd.f32 %v3536_v8, %v4351_v17  ;;  %v2440_v5 = vcombine.high %v2360_v43, %v2360_v43  ;;  %v4361_v55 = vrot.slane %v2360_v43, %v4353_v4  ;;  %v3538_v28 = vadd.f32 %v3515_v61, %v3395_v56  ;;  %v4363_v48 = vpop.f32.mrb[3].mxu0 }
 0x19e   : > { %v2488_v18 = vrot.slane %v2474_v22, %v4353_v4  ;;  %v2348_v11 = vadd.f32 %v3537_v39, %v4351_v17  ;;  %v2491_v54 = vcombine.high %v2363_v37, %v2363_v37  ;;  %v2489_v33 = vcombine.high %v2481_v19, %v2481_v19 }
 0x19f   : > { %v2358_v53 = vmax.f32 %v2350_v41, 0.0  ;;  %v4371_v57 = vrot.slane %v2440_v5, %v4353_v4  ;;  %v2351_v35 = vadd.f32 %v3538_v28, %v4351_v17  ;;  %v2455_v46 = vcombine.high %v4361_v55, %v4361_v55 }
 0x1a0   : > { %v2356_v42 = vmax.f32 %v2348_v11, 0.0  ;;  %v2498_v47 = vrot.slane %v2363_v37, %v4353_v4  ;;  %v2505_v29 = vrot.slane %v2491_v54, %v4353_v4  ;;  %v2490_v50 = vcombine.high %v2488_v18, %v2488_v18 }
 0x1a1   : > { %v2406_v21 = vcombine.high %v2358_v53, %v2358_v53  ;;  %v2413_v27 = vrot.slane %v2358_v53, %v4353_v4  ;;  %v2359_v26 = vmax.f32 %v2351_v35, 0.0  ;;  %v2456_v44 = vcombine.high %v4371_v57, %v4371_v57 }
 0x1a2   : > { %v2372_v60 = vcombine.high %v2356_v42, %v2356_v42  ;;  %v4380_v56 = vrot.slane %v2356_v42, %v4353_v4  ;;  %v2506_v40 = vcombine.high %v2498_v47, %v2498_v47  ;;  %v2507_v23 = vcombine.high %v2505_v29, %v2505_v29 }
 0x1a3   : > { %v2420_v51 = vrot.slane %v2406_v21, %v4353_v4  ;;  %v2423_v0 = vcombine.high %v2359_v26, %v2359_v26  ;;  %v2430_v10 = vrot.slane %v2359_v26, %v4353_v4  ;;  %v2421_v20 = vcombine.high %v2413_v27, %v2413_v27 }
 0x1a4   : > { %v4387_v14 = vrot.slane %v2372_v60, %v4353_v4  ;;  %v2552_v45 = vmax.f32 %v2481_v19, %v2498_v47  ;;  %v2553_v62 = vmax.f32 %v2489_v33, %v2506_v40  ;;  %v2387_v2 = vcombine.high %v4380_v56, %v4380_v56 }
 0x1a5   : > { %v2437_v15 = vrot.slane %v2423_v0, %v4353_v4  ;;  %v2438_v30 = vcombine.high %v2430_v10, %v2430_v10  ;;  %v2544_v3 = vmax.f32 %v2413_v27, %v2430_v10  ;;  %v2422_v63 = vcombine.high %v2420_v51, %v2420_v51 }
 0x1a6   : > { %v2554_v1 = vmax.f32 %v2488_v18, %v2505_v29  ;;  %v2555_v6 = vmax.f32 %v2490_v50, %v2507_v23  ;;  %v3184_v36 = vrot.slane %v2552_v45, 9  ;;  %v3185_v9 = vrot.slane %v2553_v62, 9 }
 0x1a7   : > { %v2439_v7 = vcombine.high %v2437_v15, %v2437_v15  ;;  %v2545_v13 = vmax.f32 %v2421_v20, %v2438_v30  ;;  %v2546_v16 = vmax.f32 %v2420_v51, %v2437_v15  ;;  %v3176_v52 = vrot.slane %v2544_v3, 9 }
 0x1a8   : > { %v3186_v49 = vrot.slane %v2554_v1, 9  ;;  %v3187_v12 = vrot.slane %v2555_v6, 9  ;;  %v2632_v25 = vmax.f32 %v2552_v45, %v3184_v36  ;;  %v2633_v8 = vmax.f32 %v2553_v62, %v3185_v9 }
 0x1a9   : > { %v2547_v34 = vmax.f32 %v2422_v63, %v2439_v7  ;;  %v3177_v59 = vrot.slane %v2545_v13, 9  ;;  %v3178_v32 = vrot.slane %v2546_v16, 9  ;;  %v2624_v58 = vmax.f32 %v2544_v3, %v3176_v52 }
 0x1aa   : > { %v2634_v38 = vmax.f32 %v2554_v1, %v3186_v49  ;;  %v2635_v43 = vmax.f32 %v2555_v6, %v3187_v12  ;;  %v2648_v22 = vpack.c.bf16 %v2632_v25, %v2632_v25  ;;  %v2649_v41 = vpack.c.bf16 %v2633_v8, %v2633_v8 }
 0x1ab   : > { %v3179_v19 = vrot.slane %v2547_v34, 9  ;;  %v2625_v39 = vmax.f32 %v2545_v13, %v3177_v59  ;;  %v2626_v61 = vmax.f32 %v2546_v16, %v3178_v32  ;;  %v2640_v37 = vpack.c.bf16 %v2624_v58, %v2624_v58 }
 0x1ac   : > { %v2650_v5 = vpack.c.bf16 %v2634_v38, %v2634_v38  ;;  %v2651_v28 = vpack.c.bf16 %v2635_v43, %v2635_v43  ;;  %v2758_v18 = vrot.slane %v2648_v22, %v4353_v4  ;;  %v2765_v35 = vrot.slane %v2649_v41, %v4353_v4 }
 0x1ad   : > { %v2627_v11 = vmax.f32 %v2547_v34, %v3179_v19  ;;  %v2641_v54 = vpack.c.bf16 %v2625_v39, %v2625_v39  ;;  %v2642_v53 = vpack.c.bf16 %v2626_v61, %v2626_v61  ;;  %v2702_v33 = vrot.slane %v2640_v37, %v4353_v4 }
 0x1ae   : > { %v2772_v42 = vrot.slane %v2650_v5, %v4353_v4  ;;  %v2779_v47 = vrot.slane %v2651_v28, %v4353_v4  ;;  %v2870_v29 = vrot.slane %v2758_v18, %v4353_v4  ;;  %v2877_v60 = vrot.slane %v2765_v35, %v4353_v4 }
 0x1af   : > { %v2643_v21 = vpack.c.bf16 %v2627_v11, %v2627_v11  ;;  %v2709_v27 = vrot.slane %v2641_v54, %v4353_v4  ;;  %v2716_v50 = vrot.slane %v2642_v53, %v4353_v4  ;;  %v2814_v26 = vrot.slane %v2702_v33, %v4353_v4 }
 0x1b0   : > { %v2884_v40 = vrot.slane %v2772_v42, %v4353_v4  ;;  %v2891_v23 = vrot.slane %v2779_v47, %v4353_v4  ;;  %v2904_v51 = vunpack.c.l.b16 %v2870_v29  ;;  %v2905_v62 = vunpack.c.l.b16 %v2877_v60 }
 0x1b1   : > { %v2723_v0 = vrot.slane %v2643_v21, %v4353_v4  ;;  %v2821_v10 = vrot.slane %v2709_v27, %v4353_v4  ;;  %v2828_v20 = vrot.slane %v2716_v50, %v4353_v4  ;;  %v2896_v45 = vunpack.c.l.b16 %v2814_v26 }
 0x1b2   : > { %v2906_v15 = vunpack.c.l.b16 %v2884_v40  ;;  %v2907_v30 = vunpack.c.l.b16 %v2891_v23  ;;  %v3539_v3 = vadd.f32 %v4363_v48, %v4346_v31  ;;  %v2361_v36 = vmax.f32 %v4368_v24, 0.0 }
 0x1b3   : > { %v2835_v63 = vrot.slane %v2723_v0, %v4353_v4  ;;  %v2897_v1 = vunpack.c.l.b16 %v2821_v10  ;;  %v2898_v6 = vunpack.c.l.b16 %v2828_v20  ;;  %v2929_v7 = vrot.slane %v2905_v62, 7 }
 0x1b4   : > { %v2931_v13 = vrot.slane %v2906_v15, 6  ;;  %v2933_v16 = vrot.slane %v2907_v30, 5  ;;  %v2349_v52 = vadd.f32 %v3539_v3, %v4351_v17  ;;  %v2457_v25 = vcombine.high %v2361_v36, %v2361_v36 }
 0x1b5   : > { %v2899_v9 = vunpack.c.l.b16 %v2835_v63  ;;  %v2917_v49 = vrot.slane %v2897_v1, 7  ;;  %v2919_v12 = vrot.slane %v2898_v6, 6  ;;  %v2388_v34 = vcombine.high %v4387_v14, %v4387_v14 }
 0x1b6   : > { %v2930_v31 = vsel %vm2909_vm13, %v2929_v7, %v2904_v51  ;;  %v2357_v48 = vmax.f32 %v2349_v52, 0.0  ;;  %v2464_v59 = vrot.slane %v2361_v36, %v4353_v4  ;;  %v2471_v17 = vrot.slane %v2457_v25, %v4353_v4 }
 0x1b7   : > { %v2918_v24 = vsel %vm2909_vm13, %v2917_v49, %v2896_v45  ;;  %v2921_v32 = vrot.slane %v2899_v9, 5  ;;  %v2932_v58 = vsel %vm2912_vm14, %v2931_v13, %v2930_v31 }
 0x1b8   : > { %v2920_v8 = vsel %vm2912_vm14, %v2919_v12, %v2918_v24  ;;  %v2934_v38 = vsel %vm2915_vm15, %v2933_v16, %v2932_v58  ;;  %v2389_v43 = vcombine.high %v2357_v48, %v2357_v48  ;;  %v2396_v22 = vrot.slane %v2357_v48, %v4353_v4 }
 0x1b9   : > { %v2922_v19 = vsel %vm2915_vm15, %v2921_v32, %v2920_v8  ;;  %v2938_v39 = vpack.c.b16 %v2934_v38, %v2934_v38  ;;  %v2472_v61 = vcombine.high %v2464_v59, %v2464_v59  ;;  %v2473_v37 = vcombine.high %v2471_v17, %v2471_v17 }
 0x1ba   : > { %v2936_v41 = vpack.c.b16 %v2922_v19, %v2922_v19  ;;  %v2403_v5 = vrot.slane %v2389_v43, %v4353_v4  ;;  %v2404_v28 = vcombine.high %v2396_v22, %v2396_v22  ;;  %v2540_v18 = vmax.f32 %v4380_v56, %v2396_v22 }
 0x1bb   : > { %3191 = vst.sshfl [vmem:[%s4423_s17 + $0x6] sm:$0x3 pattern:$0x76325410] %v2938_v39  ;;  %v2548_v11 = vmax.f32 %v4361_v55, %v2464_v59  ;;  %v2549_v54 = vmax.f32 %v2455_v46, %v2472_v61  ;;  %v2550_v53 = vmax.f32 %v4371_v57, %v2471_v17  ;;  %v2551_v33 = vmax.f32 %v2456_v44, %v2473_v37 }
 0x1bc   : > { %3189 = vst.sshfl [vmem:[%s4423_s17 + $0x2] sm:$0x3 pattern:$0x76325410] %v2936_v41  ;;  %v2405_v35 = vcombine.high %v2403_v5, %v2403_v5  ;;  %v2541_v42 = vmax.f32 %v2387_v2, %v2404_v28  ;;  %v2542_v47 = vmax.f32 %v4387_v14, %v2403_v5  ;;  %v3172_v29 = vrot.slane %v2540_v18, 9 }
 0x1bd   : > { %v3180_v21 = vrot.slane %v2548_v11, 9  ;;  %v3181_v27 = vrot.slane %v2549_v54, 9  ;;  %v3182_v50 = vrot.slane %v2550_v53, 9  ;;  %v3183_v55 = vrot.slane %v2551_v33, 9 }
 0x1be   : > { %v2543_v46 = vmax.f32 %v2388_v34, %v2405_v35  ;;  %v3173_v26 = vrot.slane %v2541_v42, 9  ;;  %v3174_v60 = vrot.slane %v2542_v47, 9  ;;  %v2620_v40 = vmax.f32 %v2540_v18, %v3172_v29 }
 0x1bf   : > { %v2628_v23 = vmax.f32 %v2548_v11, %v3180_v21  ;;  %v2629_v57 = vmax.f32 %v2549_v54, %v3181_v27  ;;  %v2630_v44 = vmax.f32 %v2550_v53, %v3182_v50  ;;  %v2631_v51 = vmax.f32 %v2551_v33, %v3183_v55 }
 0x1c0   : > { %v3175_v0 = vrot.slane %v2543_v46, 9  ;;  %v2621_v10 = vmax.f32 %v2541_v42, %v3173_v26  ;;  %v2622_v20 = vmax.f32 %v2542_v47, %v3174_v60  ;;  %v2636_v56 = vpack.c.bf16 %v2620_v40, %v2620_v40 }
 0x1c1   : > { %v2644_v2 = vpack.c.bf16 %v2628_v23, %v2628_v23  ;;  %v2645_v45 = vpack.c.bf16 %v2629_v57, %v2629_v57  ;;  %v2646_v14 = vpack.c.bf16 %v2630_v44, %v2630_v44  ;;  %v2647_v62 = vpack.c.bf16 %v2631_v51, %v2631_v51 }
 0x1c2   : > { %v2623_v15 = vmax.f32 %v2543_v46, %v3175_v0  ;;  %v2637_v30 = vpack.c.bf16 %v2621_v10, %v2621_v10  ;;  %v2638_v3 = vpack.c.bf16 %v2622_v20, %v2622_v20  ;;  %v2674_v63 = vrot.slane %v2636_v56, %v4353_v4 }
 0x1c3   : > { %v2730_v1 = vrot.slane %v2644_v2, %v4353_v4  ;;  %v2737_v6 = vrot.slane %v2645_v45, %v4353_v4  ;;  %v2744_v36 = vrot.slane %v2646_v14, %v4353_v4  ;;  %v2751_v7 = vrot.slane %v2647_v62, %v4353_v4 }
 0x1c4   : > { %v2639_v13 = vpack.c.bf16 %v2623_v15, %v2623_v15  ;;  %v2681_v16 = vrot.slane %v2637_v30, %v4353_v4  ;;  %v2688_v52 = vrot.slane %v2638_v3, %v4353_v4  ;;  %v2786_v31 = vrot.slane %v2674_v63, %v4353_v4 }
 0x1c5   : > { %v2842_v9 = vrot.slane %v2730_v1, %v4353_v4  ;;  %v2849_v49 = vrot.slane %v2737_v6, %v4353_v4  ;;  %v2856_v12 = vrot.slane %v2744_v36, %v4353_v4  ;;  %v2863_v25 = vrot.slane %v2751_v7, %v4353_v4 }
 0x1c6   : > { %v2695_v34 = vrot.slane %v2639_v13, %v4353_v4  ;;  %v2793_v48 = vrot.slane %v2681_v16, %v4353_v4  ;;  %v2800_v59 = vrot.slane %v2688_v52, %v4353_v4  ;;  %v2892_v61 = vunpack.c.l.b16 %v2786_v31 }
 0x1c7   : > { %v2901_v24 = vunpack.c.l.b16 %v2849_v49  ;;  %v2902_v32 = vunpack.c.l.b16 %v2856_v12  ;;  %v2903_v58 = vunpack.c.l.b16 %v2863_v25  ;;  %v2900_v43 = vunpack.c.l.b16 %v2842_v9 }
 0x1c8   : > { %v2807_v17 = vrot.slane %v2695_v34, %v4353_v4  ;;  %v2893_v8 = vunpack.c.l.b16 %v2793_v48  ;;  %v2894_v38 = vunpack.c.l.b16 %v2800_v59 }
 0x1c9   : > { %v2923_v22 = vrot.slane %v2901_v24, 7  ;;  %v2925_v19 = vrot.slane %v2902_v32, 6  ;;  %v2927_v39 = vrot.slane %v2903_v58, 5 }
 0x1ca   : > { %v2895_v37 = vunpack.c.l.b16 %v2807_v17  ;;  %v2908_v41 = vrot.slane %v2893_v8, 7  ;;  %v2911_v5 = vrot.slane %v2894_v38, 6 }
 0x1cb   : > { %v2924_v28 = vsel %vm2909_vm13, %v2923_v22, %v2900_v43 }
 0x1cc   : > { %v2910_v18 = vsel %vm2909_vm13, %v2908_v41, %v2892_v61  ;;  %v2914_v11 = vrot.slane %v2895_v37, 5  ;;  %v2926_v54 = vsel %vm2912_vm14, %v2925_v19, %v2924_v28 }
 0x1cd   : > { %v2913_v4 = vsel %vm2912_vm14, %v2911_v5, %v2910_v18  ;;  %v2928_v53 = vsel %vm2915_vm15, %v2927_v39, %v2926_v54 }
 0x1ce   : > { %v2916_v33 = vsel %vm2915_vm15, %v2914_v11, %v2913_v4  ;;  %v2937_v35 = vpack.c.b16 %v2928_v53, %v2928_v53 }
 0x1cf   : > { %v2935_v42 = vpack.c.b16 %v2916_v33, %v2916_v33 }
 0x1d0   : > { %3190 = vst.sshfl [vmem:[%s4423_s17 + $0x4] sm:$0x3 pattern:$0x76325410] %v2937_v35 }
 0x1d1   : > { %3188 = vst.sshfl [vmem:[%s4423_s17] sm:$0x3 pattern:$0x76325410] %v2935_v42 }
 0x1d2 PF: > { %s13_s12 = sadd.s32 1, %s3700_s12  }
 0x1d3   : > { %p10_p4 = scmp.ge.s32.totalorder %s13_s12, 4  }
 0x1d5   :  { %12 = sbr.rel (!%p10_p4) target bundleno = 1 (0x1), region = 65 }

// kernel: _lambda_.3
= control target key start
LH: loop header
LB: loop body
LE: loop exit
PB: predicated region body
PF: predicated region fallthrough
CT: control target
= control target key end

     0   :  { %8 = vsyncpa [#allocation4], 0  ;;  %s7066_s12 = smov 0   ;;  %s8861_s0 = inlined_call_operand.vmem [shape: bf16[2,16,16,4], index: 0, kind: input, shape index: {}]   ;;  %s8862_s1 = inlined_call_operand.hbm [shape: bf16[36,128], index: 1, kind: input, shape index: {}]   ;;  %s8863_s2 = inlined_call_operand.vmem [shape: f32[1,128], index: 2, kind: input, shape index: {}]   ;;  %s8864_s3 = inlined_call_operand.vmem [shape: bf16[2,16,16,128], index: 3, kind: output, shape index: {}]  }
   0x1 LB: > { %s7072_s13 = sadd.s32 4294967295, %s7040_s12   ;;  %p5644_p0 = scmp.ge.s32.totalorder %s7040_s12, 1  ;;  %s7040_s12 = sphi %s7066_s12, %s14_s12  }
   0x2   : > { %p113_p1 = scmp.lt.s32.totalorder %s7040_s12, 3  ;;  %s7042_s14 = smov [#allocation3]  }
   0x3   : > { %s125_s15 = sshll.u32 %s7042_s14, 4  ;;  %p8865_p3 = scmp.eq.s32.totalorder %s7072_s13, 0  ;;  %s126_s15 = int_to_ptr.vmem [resolvable:$true] %s125_s15 }
   0x4   : > { %p7076_p2 = pnand %p5644_p0, %p113_p1  ;;  %s7002_s20 = scalar_lea.hbm %s8862_s1, 320 }
   0x5   : > { %p7003_p6 = scmp.ne.s32.totalorder %s8862_s1, %s7002_s20  ;;  %p7009_p10 = scmp.lt.u32.totalorder %s7002_s20, %s8862_s1 }
   0x6   : > { %s8883_s16 = scalar_select %p7076_p2, 1, 0 }
   0x7   : > { %p6888_p4 = pneg %p7076_p2 }
   0x9   : > { %p7085_p5 = pnand %p8865_p3, %p6888_p4 }
   0xb   : > { %p7004_p7 = pneg %p7085_p5 }
   0xd   : > { %p7005_p8 = pnand %p7004_p7, %p7003_p6 }
   0xf   : > { %p7006_p9 = pneg %p7005_p8 }
  0x11   : > { %p7011_p11 = pnand %p7009_p10, %p7006_p9 }
  0x13   : > { %7014 = shalt.err (!%p7011_p11)
}
  0x14   : > { %s7015_s25 = scalar_lea.vmem %s126_s15, 320  ;;  %p7023_p1 = scmp.lt.s32.totalorder %s126_s15, %s126_s15 }
  0x15   : > { %p7016_p12 = scmp.ne.s32.totalorder %s126_s15, %s7015_s25  ;;  %p7024_p4 = scmp.lt.s32.totalorder %s7015_s25, %s7015_s25 }
  0x17   : > { %p7018_p13 = pnand %p7016_p12, %p7004_p7  ;;  %p7025_p3 = por %p7024_p4, %p7023_p1 }
  0x19   : > { %p7019_p0 = pneg %p7018_p13 }
  0x1b   : > { %p7026_p2 = pnand %p7025_p3, %p7019_p0 }
  0x1d   : > { %7029 = shalt.err (!%p7026_p2)
}
  0x1e   : > { %s7043_s26 = smov 64   ;;  %s7044_s27 = smov 4  }
  0x1f   : > { %6891 = dma.hbm_to_vmem [thread:$0]  (!%p7085_p5), %s8862_s1, 320, %s126_s15, [#allocation4], %s7043_s26, %s7043_s26, %s7044_s27  }
  0x20   : > { %p8885_p6 = scmp.ne.s32.totalorder %s8883_s16, 0 }
  0x22   : > { %152 = sbr.rel (%p8885_p6) target bundleno = 695 (0x2b7), region = 32 }
  0x29   : > { %p8886_p8 = scmp.eq.s32.totalorder %s7072_s13, 0 }
  0x2b   : > { %7035 = dma.done.wait (%p8886_p8), [#allocation4], 320   ;;  %p8887_p7 = pmov %p8886_p8 }
  0x2c   : > { %vm187_vm0 = vcmask 27648   ;;  %vm190_vm1 = vcmask 24576   ;;  %v7045_v0 = vmov 0   ;;  %p176_p2 = scmp.lt.s32.totalorder %s7072_s13, 1  ;;  %vm197_vm2 = vsmask.f32 256 }
  0x2d   : > { %7037 = vsyncadd (%p8887_p7), [#allocation4], 4294966976  ;;  %188 = vst.msk [vmem:[#allocation2] sm:$0xf] %vm187_vm0, %v7045_v0  ;;  %vm253_vm3 = vsmask.f32 7938 }
  0x2e   : > { %189 = vst.msk [vmem:[#allocation2 + $0x4] sm:$0xf] %vm187_vm0, %v7045_v0  ;;  %193 = vst.msk [vmem:[#allocation2 + $0xcc] sm:$0xf] %vm187_vm0, %v7045_v0  ;;  %s8954_s13 = smov (!%p176_p2, %s7072_s13), 1  ;;  %vm1316_vm4 = vcmask 1041408  }
  0x2f   : > { %191 = vst.msk [vmem:[#allocation2 + $0x8] sm:$0x1] %vm190_vm1, %v7045_v0  ;;  %195 = vst.msk [vmem:[#allocation2 + $0xd4] sm:$0x1] %vm190_vm1, %v7045_v0  ;;  %s6028_s30 = sshll.u32 %s8954_s13, 7  ;;  %vm1267_vm13 = vcmask 31744  }
  0x30   : > { %194 = vst.msk [vmem:[#allocation2 + $0xd0] sm:$0xf] %vm187_vm0, %v7045_v0  ;;  %vm7123_vm5 = vmand %vm190_vm1, %vm197_vm2  ;;  %vm341_vm6 = vsmask.f32 4368  ;;  %v3022_v4 = vld [vmem:[#allocation3 + $0x8] sm:$0x3]  ;;  %s7139_s6 = scalar_lea.vmem %s8861_s0, %s6028_s30  ;;  %s8808_s11 = scalar_lea.vmem %s8864_s3, %s6028_s30 }
  0x31   : > { %v6906_v2 = vld [vmem:[#allocation3] ss:$0 sps:$4 sm:$0xcc]   ;;  %vm7130_vm7 = vmand %vm190_vm1, %vm253_vm3  ;;  %6878 = vmatprep.subr.msk.bf16.mxu0 %vm1316_vm4, %v3022_v4  ;;  %v7143_v8 = vsel %vm1316_vm4, %v3022_v4, 0  ;;  %v202_v14 = vld [vmem:[#allocation2 + $0xc] sm:$0x1] }
  0x32   : > { %v1266_v7 = vrot.slane %v6906_v2, 2  ;;  %8892 = vst [vmem:[#allocation6_spill] sm:$0xff] %v7143_v8  ;;  %6447 = vmatpush3.bf16.msra.mxu0 %v7143_v8  ;;  %v258_v15 = vld [vmem:[#allocation2 + $0x14] sm:$0x1]  ;;  %v203_v17 = vsel %vm7123_vm5, 0, %v202_v14  ;;  %vm7164_vm10 = vmor %vm197_vm2, %vm341_vm6  ;;  %vm1821_vm14 = vcmask 1042432  }
  0x33   : > { %v259_v18 = vsel %vm7130_vm7, 0, %v258_v15  ;;  %v309_v19 = vld [vmem:[%s7139_s6] sm:$0xf]  ;;  %204 = vst [vmem:[#allocation2 + $0xc] sm:$0x1] %v203_v17  ;;  %vm7171_vm11 = vmand %vm187_vm0, %vm253_vm3  ;;  %vm1822_vm15 = vcmask 1046532  }
  0x34   : > { %v199_v5 = vld [vmem:[#allocation2] sm:$0x1]  ;;  %6874 = vmatprep.subr.msk.bf16.mxu1 %vm1316_vm4, %v1266_v7  ;;  %v1318_v16 = vsel %vm1316_vm4, %v1266_v7, 0  ;;  %260 = vst [vmem:[#allocation2 + $0x14] sm:$0x1] %v259_v18  ;;  %v344_v23 = vshrl.u32 %v309_v19, 16  ;;  %vm7292_vm1 = vmor %vm1821_vm14, %vm1822_vm15 }
  0x35   : > { %v200_v9 = vsel %vm7123_vm5, 0, %v199_v5  ;;  %v779_v11 = vld [vmem:[#allocation2 + $0x4] sm:$0xf]  ;;  %6311 = vmatpush3.bf16.msra.mxu1 %v1318_v16  ;;  %v347_v24 = vshll.u32 %v309_v19, 16  ;;  %v810_v27 = vld [vmem:[#allocation3] sm:$0x3] }
  0x36   : > { %v255_v6 = vld [vmem:[#allocation2 + $0x8] sm:$0x1]  ;;  %201 = vst [vmem:[#allocation2] sm:$0x1] %v200_v9  ;;  %v840_v12 = vshll.u32 %v779_v11, 16  ;;  %v844_v13 = vshrl.u32 %v779_v11, 16  ;;  %6875 = vmatprep.subr.msk.bf16.mxu1 %vm1316_vm4, %v810_v27 }
  0x37   : > { %v256_v10 = vsel %vm7130_vm7, 0, %v255_v6  ;;  %v310_v22 = vld [vmem:[%s7139_s6 + $0x4] sm:$0xf]  ;;  %vm827_vm8 = vsmask.f32 3328  ;;  %v346_v29 = vrot.slane %v344_v23, 7 }
  0x38   : > { %257 = vst [vmem:[#allocation2 + $0x8] sm:$0x1] %v256_v10  ;;  %v7157_v20 = vrot.slane %v840_v12, 5  ;;  %v846_v21 = vrot.slane %v844_v13, 4  ;;  %v352_v25 = vshrl.u32 %v310_v22, 16  ;;  %v355_v26 = vshll.u32 %v310_v22, 16 }
  0x39   : > { %v6907_v30 = vld [vmem:[#allocation3 + $0x8] ss:$0 sps:$4 sm:$0xcc]   ;;  %vm828_vm9 = vsmask.f32 7440  ;;  %v349_v34 = vor.u32 %v347_v24, %v346_v29  ;;  %v350_v35 = vrot.slane %v346_v29, 4 }
  0x3a   : > { %v847_v28 = vor.u32 %v846_v21, %v7157_v20  ;;  %v354_v31 = vrot.slane %v352_v25, 7  ;;  %v205_v32 = vld [vmem:[#allocation2 + $0x18] sm:$0x1]  ;;  %v3543_v36 = vrot.slane %v6907_v30, 2  ;;  %v261_v37 = vld [vmem:[#allocation2 + $0x20] sm:$0x1]  ;;  %vm7188_vm12 = vmor %vm827_vm8, %vm828_vm9 }
  0x3b   : > { %v311_v38 = vld [vmem:[%s7139_s6 + $0x8] sm:$0xf]  ;;  %v206_v44 = vsel %vm7123_vm5, 0, %v205_v32  ;;  %v312_v49 = vld [vmem:[%s7139_s6 + $0xc] sm:$0xf]  ;;  %v262_v53 = vsel %vm7130_vm7, 0, %v261_v37 }
  0x3c   : > { %v357_v42 = vor.u32 %v355_v26, %v354_v31  ;;  %v359_v43 = vrot.slane %v354_v31, 4  ;;  %v848_v47 = vrot.slane %v847_v28, 4  ;;  %6880 = vmatprep.subr.msk.bf16.mxu0 %vm1316_vm4, %v3543_v36  ;;  %207 = vst [vmem:[#allocation2 + $0x18] sm:$0x1] %v206_v44  ;;  %v666_v51 = vld [vmem:[#allocation2 + $0xc] sm:$0xf] }
  0x3d   : > { %v778_v40 = vld [vmem:[#allocation2] sm:$0xf]  ;;  %v670_v52 = vld [vmem:[#allocation2 + $0x14] sm:$0x1]  ;;  %v361_v54 = vshrl.u32 %v311_v38, 16  ;;  %v667_v58 = vsel %vm7171_vm11, %v349_v34, %v666_v51  ;;  %v364_v63 = vshll.u32 %v311_v38, 16 }
  0x3e   : > { %v831_v45 = vshrl.u32 %v778_v40, 16  ;;  %v834_v46 = vshll.u32 %v778_v40, 16  ;;  %v358_v50 = vsel %vm7164_vm10, %v350_v35, %v357_v42  ;;  %263 = vst [vmem:[#allocation2 + $0x20] sm:$0x1] %v262_v53  ;;  %v208_v59 = vld [vmem:[#allocation2 + $0x24] sm:$0x1]  ;;  %v671_v61 = vsel %vm7123_vm5, %v359_v43, %v670_v52 }
  0x3f   : > { %v811_v41 = vld [vmem:[#allocation2 + $0x8] sm:$0x1]  ;;  %669 = vst.msk [vmem:[#allocation2 + $0x10] sm:$0xf] %vm187_vm0, %v358_v50  ;;  %668 = vst [vmem:[#allocation2 + $0xc] sm:$0xf] %v667_v58 }
  0x40   : > { %v850_v48 = vshll.u32 %v811_v41, 16  ;;  %v833_v55 = vrot.slane %v831_v45, 4  ;;  %v836_v56 = vrot.slane %v834_v46, 5  ;;  %v363_v62 = vrot.slane %v361_v54, 7  ;;  %v264_v2 = vld [vmem:[#allocation2 + $0x2c] sm:$0x1] }
  0x41   : > { %v369_v0 = vshrl.u32 %v312_v49, 16  ;;  %672 = vst [vmem:[#allocation2 + $0x14] sm:$0x1] %v671_v61  ;;  %v7195_v5 = vsel %vm1316_vm4, %v810_v27, 0  ;;  %v372_v6 = vshll.u32 %v312_v49, 16  ;;  %v209_v12 = vsel %vm7123_vm5, 0, %v208_v59 }
  0x42   : > { %v852_v57 = vrot.slane %v850_v48, 5  ;;  %v837_v4 = vor.u32 %v836_v56, %v833_v55  ;;  %v313_v7 = vld [vmem:[%s7139_s6 + $0x10] sm:$0xf]  ;;  %v366_v9 = vor.u32 %v364_v63, %v363_v62  ;;  %v367_v10 = vrot.slane %v363_v62, 4  ;;  %210 = vst [vmem:[#allocation2 + $0x24] sm:$0x1] %v209_v12 }
  0x43   : > { %v371_v11 = vrot.slane %v369_v0, 7  ;;  %v211_v13 = vld [vmem:[#allocation2 + $0x30] sm:$0x1]  ;;  %v7203_v16 = vsel %vm1316_vm4, %v3543_v36, 0  ;;  %v265_v17 = vsel %vm7130_vm7, 0, %v264_v2  ;;  %v378_v23 = vshrl.u32 %v313_v7, 16 }
  0x44   : > { %v838_v14 = vrot.slane %v837_v4, 4  ;;  %v853_v15 = vsel %vm7188_vm12, %v848_v47, %v852_v57  ;;  %v673_v21 = vld [vmem:[#allocation2 + $0x18] sm:$0xf]  ;;  %266 = vst [vmem:[#allocation2 + $0x2c] sm:$0x1] %v265_v17  ;;  %v381_v26 = vshll.u32 %v313_v7, 16 }
  0x45   : > { %v374_v18 = vor.u32 %v372_v6, %v371_v11  ;;  %v376_v19 = vrot.slane %v371_v11, 4  ;;  %v7208_v22 = vld [vmem:[%s7139_s6 + $0x14] sm:$0xf]  ;;  %v674_v25 = vsel %vm7171_vm11, %v366_v9, %v673_v21  ;;  %v212_v27 = vsel %vm7123_vm5, 0, %v211_v13  ;;  %v677_v32 = vld [vmem:[#allocation2 + $0x20] sm:$0x1] }
  0x46   : > { %v843_v24 = vsel %vm7188_vm12, %v838_v14, %v7157_v20  ;;  %v781_v29 = vld [vmem:[#allocation2 + $0x10] sm:$0xf]  ;;  %675 = vst [vmem:[#allocation2 + $0x18] sm:$0xf] %v674_v25  ;;  %213 = vst [vmem:[#allocation2 + $0x30] sm:$0x1] %v212_v27 }
  0x47   : > { %v5653_v28 = vcombine.low %v843_v24, %v853_v15  ;;  %v7217_v30 = vld [vmem:[#allocation2 + $0x10] sm:$0xf]  ;;  %v375_v31 = vsel %vm7164_vm10, %v367_v10, %v374_v18  ;;  %v780_v34 = vld [vmem:[#allocation2 + $0xc] sm:$0xf]  ;;  %v864_v35 = vshll.u32 %v781_v29, 16  ;;  %v868_v20 = vshrl.u32 %v781_v29, 16 }
  0x48   : > { %v2648_v36 = vshll.u32 %v7217_v30, 16  ;;  %676 = vst.msk [vmem:[#allocation2 + $0x1c] sm:$0xf] %vm187_vm0, %v375_v31  ;;  %v386_v37 = vshrl.u32 %v7208_v22, 16  ;;  %v812_v38 = vld [vmem:[#allocation2 + $0x14] sm:$0x1]  ;;  %v678_v43 = vsel %vm7123_vm5, %v376_v19, %v677_v32 }
  0x49   : > { %6312 = vmatprep.mubr.msk.bf16.mxu1 %vm1267_vm13, %v5653_v28  ;;  %v855_v40 = vshrl.u32 %v780_v34, 16  ;;  %v858_v41 = vshll.u32 %v780_v34, 16  ;;  %v2590_v42 = vld [vmem:[#allocation2 + $0xc] sm:$0xf]  ;;  %v866_v44 = vrot.slane %v864_v35, 5  ;;  %v870_v45 = vrot.slane %v868_v20, 4 }
  0x4a   : > { %v874_v46 = vshll.u32 %v812_v38, 16  ;;  %v7227_v47 = vld [vmem:[#allocation2 + $0x14] sm:$0x1]  ;;  %679 = vst [vmem:[#allocation2 + $0x20] sm:$0x1] %v678_v43  ;;  %v7229_v48 = vrot.slane %v378_v23, 7 }
  0x4b   : > { %v857_v49 = vrot.slane %v855_v40, 4  ;;  %v860_v50 = vrot.slane %v858_v41, 5  ;;  %v2639_v51 = vshrl.u32 %v2590_v42, 16  ;;  %v2642_v52 = vshll.u32 %v2590_v42, 16 }
  0x4c   : > { %v871_v53 = vor.u32 %v870_v45, %v866_v44  ;;  %v876_v54 = vrot.slane %v874_v46, 5  ;;  %v2650_v55 = vrot.slane %v2648_v36, 5  ;;  %v2652_v56 = vshrl.u32 %v7217_v30, 16 }
  0x4d   : > { %v861_v57 = vor.u32 %v860_v50, %v857_v49  ;;  %v2641_v58 = vrot.slane %v2639_v51, 4  ;;  %v2644_v59 = vrot.slane %v2642_v52, 5  ;;  %v2658_v61 = vshll.u32 %v7227_v47, 16  ;;  %v2593_v0 = vld [vmem:[#allocation2 + $0x18] sm:$0xf] }
  0x4e   : > { %v872_v62 = vrot.slane %v871_v53, 4  ;;  %v2654_v63 = vrot.slane %v2652_v56, 4  ;;  %v7234_v2 = vor.u32 %v381_v26, %v7229_v48  ;;  %v389_v4 = vshll.u32 %v7208_v22, 16  ;;  %v782_v17 = vld [vmem:[#allocation2 + $0x18] sm:$0xf] }
  0x4f   : > { %v862_v6 = vrot.slane %v861_v57, 4  ;;  %v2645_v7 = vor.u32 %v2644_v59, %v2641_v58  ;;  %v2660_v9 = vrot.slane %v2658_v61, 5  ;;  %v7237_v10 = vld [vmem:[#allocation2 + $0x1c] sm:$0xf]  ;;  %v2663_v11 = vshrl.u32 %v2593_v0, 16 }
  0x50   : > { %v877_v12 = vsel %vm7188_vm12, %v872_v62, %v876_v54  ;;  %v2655_v13 = vor.u32 %v2654_v63, %v2650_v55  ;;  %v2666_v14 = vshll.u32 %v2593_v0, 16  ;;  %v2672_v15 = vshll.u32 %v7237_v10, 16  ;;  %v783_v35 = vld [vmem:[#allocation2 + $0x1c] sm:$0xf]  ;;  %v680_v52 = vld [vmem:[#allocation2 + $0x24] sm:$0xf] }
  0x51   : > { %v867_v18 = vsel %vm7188_vm12, %v862_v6, %v866_v44  ;;  %v2646_v19 = vrot.slane %v2645_v7, 4  ;;  %v7244_v21 = vld [vmem:[#allocation2 + $0x20] sm:$0x1]  ;;  %v2665_v23 = vrot.slane %v2663_v11, 4  ;;  %v2676_v24 = vshrl.u32 %v7237_v10, 16 }
  0x52   : > { %v5654_v25 = vcombine.low %v867_v18, %v877_v12  ;;  %v2656_v26 = vrot.slane %v2655_v13, 4  ;;  %v2668_v27 = vrot.slane %v2666_v14, 5  ;;  %v2674_v28 = vrot.slane %v2672_v15, 5  ;;  %v813_v40 = vld [vmem:[#allocation2 + $0x20] sm:$0x1] }
  0x53   : > { %v2651_v29 = vsel %vm7188_vm12, %v2646_v19, %v2650_v55  ;;  %v2678_v31 = vrot.slane %v2676_v24, 4  ;;  %v2682_v32 = vshll.u32 %v7244_v21, 16  ;;  %v3388_v34 = vrot.slane %v7237_v10, 5  ;;  %v267_v56 = vld [vmem:[#allocation2 + $0x38] sm:$0x1] }
  0x54   : > { %6313 = vmatmul.mubr.msk.bf16.vlgmr.msra.gmra.mrb[0].mxu1 %vm1267_vm13, %v5654_v25  ;;  %v2661_v20 = vsel %vm7188_vm12, %v2656_v26, %v2660_v9  ;;  %v2669_v36 = vor.u32 %v2668_v27, %v2665_v23  ;;  %v3391_v38 = vrot.slane %v7244_v21, 5  ;;  %v879_v41 = vshrl.u32 %v782_v17, 16  ;;  %v315_v62 = vld [vmem:[%s7139_s6 + $0x18] sm:$0xf]  ;;  %v684_v7 = vld [vmem:[#allocation2 + $0x2c] sm:$0x1] }
  0x55   : > { %v5799_v42 = vcombine.low %v2651_v29, %v2661_v20  ;;  %6345 = vmatpush3.bf16.msra.mxu1 %v7195_v5  ;;  %v2679_v43 = vor.u32 %v2678_v31, %v2674_v28  ;;  %v2684_v44 = vrot.slane %v2682_v32, 5  ;;  %v7258_v45 = vrot.slane %v3388_v34, 4  ;;  %v316_v9 = vld [vmem:[%s7139_s6 + $0x1c] sm:$0xf]  ;;  %v317_v23 = vld [vmem:[%s7139_s6 + $0x20] sm:$0xf] }
  0x56   : > { %v2670_v46 = vrot.slane %v2669_v36, 4  ;;  %v881_v49 = vrot.slane %v879_v41, 4  ;;  %v882_v50 = vshll.u32 %v782_v17, 16  ;;  %v888_v51 = vshll.u32 %v783_v35, 16  ;;  %v214_v22 = vld [vmem:[#allocation2 + $0x3c] sm:$0x1] }
  0x57   : > { %6448 = vmatprep.mubr.msk.bf16.mxu0 %vm1267_vm13, %v5799_v42  ;;  %v2680_v53 = vrot.slane %v2679_v43, 4  ;;  %v892_v54 = vshrl.u32 %v783_v35, 16  ;;  %v898_v55 = vshll.u32 %v813_v40, 16  ;;  %v384_v5 = vrot.slane %v7229_v48, 4  ;;  %v687_v29 = vld [vmem:[#allocation2 + $0x30] sm:$0xf] }
  0x58   : > { %v2675_v57 = vsel %vm7188_vm12, %v2670_v46, %v2674_v28  ;;  %v884_v58 = vrot.slane %v882_v50, 5  ;;  %v890_v59 = vrot.slane %v888_v51, 5  ;;  %v388_v61 = vrot.slane %v386_v37, 7  ;;  %v270_v37 = vld [vmem:[#allocation2 + $0x44] sm:$0x1] }
  0x59   : > { %v2685_v63 = vsel %vm7188_vm12, %v2680_v53, %v2684_v44  ;;  %v894_v0 = vrot.slane %v892_v54, 4  ;;  %v900_v6 = vrot.slane %v898_v55, 5  ;;  %v681_v48 = vsel %vm7171_vm11, %v7234_v2, %v680_v52  ;;  %v318_v36 = vld [vmem:[%s7139_s6 + $0x24] sm:$0xf] }
  0x5a   : > { %v5800_v11 = vcombine.low %v2675_v57, %v2685_v63  ;;  %v885_v12 = vor.u32 %v884_v58, %v881_v49  ;;  %v391_v13 = vor.u32 %v389_v4, %v388_v61  ;;  %v393_v14 = vrot.slane %v388_v61, 4  ;;  %682 = vst [vmem:[#allocation2 + $0x24] sm:$0xf] %v681_v48 }
  0x5b   : > { %v895_v15 = vor.u32 %v894_v0, %v890_v59  ;;  %v268_v17 = vsel %vm7130_vm7, 0, %v267_v56  ;;  %v395_v18 = vshrl.u32 %v315_v62, 16  ;;  %v398_v19 = vshll.u32 %v315_v62, 16  ;;  %v7309_v62 = vld [vmem:[#allocation3 + $0xc] sm:$0x3] }
  0x5c   : > { %6449 = vmatmul.mubr.msk.bf16.vlgmr.msra.gmra.mrb[0].mxu0 %vm1267_vm13, %v5800_v11  ;;  %v886_v24 = vrot.slane %v885_v12, 4  ;;  %v392_v2 = vsel %vm7164_vm10, %v384_v5, %v391_v13  ;;  %v685_v4 = vsel %vm7123_vm5, %v393_v14, %v684_v7  ;;  %269 = vst [vmem:[#allocation2 + $0x38] sm:$0x1] %v268_v17  ;;  %v403_v25 = vshrl.u32 %v316_v9, 16 }
  0x5d   : > { %6481 = vmatpush3.bf16.msra.mxu0 %v7203_v16  ;;  %v896_v26 = vrot.slane %v895_v15, 4  ;;  %683 = vst.msk [vmem:[#allocation2 + $0x28] sm:$0xf] %vm187_vm0, %v392_v2  ;;  %686 = vst [vmem:[#allocation2 + $0x2c] sm:$0x1] %v685_v4  ;;  %v397_v27 = vrot.slane %v395_v18, 7  ;;  %v7306_v56 = vsel %vm7292_vm1, %v7258_v45, %v3391_v38 }
  0x5e   : > { %v406_v28 = vshll.u32 %v316_v9, 16  ;;  %v215_v31 = vsel %vm7123_vm5, 0, %v214_v22  ;;  %v891_v32 = vsel %vm7188_vm12, %v886_v24, %v890_v59  ;;  %v405_v35 = vrot.slane %v403_v25, 7  ;;  %6881 = vmatprep.subr.msk.bf16.mxu0 %vm1316_vm4, %v7309_v62 }
  0x5f   : > { %216 = vst [vmem:[#allocation2 + $0x3c] sm:$0x1] %v215_v31  ;;  %v271_v20 = vsel %vm7130_vm7, 0, %v270_v37  ;;  %v412_v16 = vshrl.u32 %v317_v23, 16  ;;  %v901_v41 = vsel %vm7188_vm12, %v896_v26, %v900_v6  ;;  %v400_v42 = vor.u32 %v398_v19, %v397_v27 }
  0x60   : > { %v401_v43 = vrot.slane %v397_v27, 4  ;;  %272 = vst [vmem:[#allocation2 + $0x44] sm:$0x1] %v271_v20  ;;  %v415_v44 = vshll.u32 %v317_v23, 16  ;;  %v5655_v46 = vcombine.low %v891_v32, %v901_v41  ;;  %v408_v49 = vor.u32 %v406_v28, %v405_v35 }
  0x61   : > { %v410_v50 = vrot.slane %v405_v35, 4  ;;  %v414_v51 = vrot.slane %v412_v16, 7  ;;  %v3381_v52 = vrot.slane %v7217_v30, 5  ;;  %v784_v53 = vld [vmem:[#allocation2 + $0x24] sm:$0xf]  ;;  %v688_v55 = vsel %vm7171_vm11, %v400_v42, %v687_v29 }
  0x62   : > { %v2596_v54 = vld [vmem:[#allocation2 + $0x24] sm:$0xf]  ;;  %v420_v5 = vshrl.u32 %v318_v36, 16  ;;  %6316 = vmatprep.mubr.msk.bf16.mxu1 %vm1267_vm13, %v5655_v46  ;;  %v903_v57 = vshrl.u32 %v784_v53, 16  ;;  %v906_v58 = vshll.u32 %v784_v53, 16  ;;  %v409_v63 = vsel %vm7164_vm10, %v401_v43, %v408_v49 }
  0x63   : > { %v2687_v59 = vshrl.u32 %v2596_v54, 16  ;;  %v2690_v61 = vshll.u32 %v2596_v54, 16  ;;  %689 = vst [vmem:[#allocation2 + $0x30] sm:$0xf] %v688_v55  ;;  %v691_v0 = vld [vmem:[#allocation2 + $0x38] sm:$0x1]  ;;  %v417_v12 = vor.u32 %v415_v44, %v414_v51 }
  0x64   : > { %v418_v6 = vrot.slane %v414_v51, 4  ;;  %v7313_v21 = vrot.slane %v420_v5, 7  ;;  %v423_v48 = vshll.u32 %v318_v36, 16  ;;  %v785_v38 = vld [vmem:[#allocation2 + $0x28] sm:$0xf]  ;;  %v905_v7 = vrot.slane %v903_v57, 4 }
  0x65   : > { %v814_v45 = vld [vmem:[#allocation2 + $0x2c] sm:$0x1]  ;;  %v908_v9 = vrot.slane %v906_v58, 5  ;;  %690 = vst.msk [vmem:[#allocation2 + $0x34] sm:$0xf] %vm187_vm0, %v409_v63  ;;  %v692_v11 = vsel %vm7123_vm5, %v410_v50, %v691_v0  ;;  %v912_v13 = vshll.u32 %v785_v38, 16 }
  0x66   : > { %v916_v14 = vshrl.u32 %v785_v38, 16  ;;  %v922_v22 = vshll.u32 %v814_v45, 16  ;;  %v7320_v37 = vld [vmem:[#allocation2 + $0x28] sm:$0xf]  ;;  %v2689_v15 = vrot.slane %v2687_v59, 4  ;;  %v2692_v19 = vrot.slane %v2690_v61, 5 }
  0x67   : > { %693 = vst [vmem:[#allocation2 + $0x38] sm:$0x1] %v692_v11  ;;  %v909_v17 = vor.u32 %v908_v9, %v905_v7  ;;  %v7322_v18 = vld [vmem:[#allocation2 + $0x2c] sm:$0x1]  ;;  %v2696_v23 = vshll.u32 %v7320_v37, 16  ;;  %v2700_v24 = vshrl.u32 %v7320_v37, 16  ;;  %v425_v16 = vor.u32 %v423_v48, %v7313_v21 }
  0x68   : > { %v914_v2 = vrot.slane %v912_v13, 5  ;;  %v918_v4 = vrot.slane %v916_v14, 4  ;;  %v924_v25 = vrot.slane %v922_v22, 5  ;;  %v2706_v26 = vshll.u32 %v7322_v18, 16  ;;  %v694_v32 = vld [vmem:[#allocation2 + $0x3c] sm:$0xf] }
  0x69   : > { %v910_v27 = vrot.slane %v909_v17, 4  ;;  %v2693_v28 = vor.u32 %v2692_v19, %v2689_v15  ;;  %v2698_v29 = vrot.slane %v2696_v23, 5  ;;  %v2702_v31 = vrot.slane %v2700_v24, 4  ;;  %v217_v17 = vld [vmem:[#allocation2 + $0x48] sm:$0x1] }
  0x6a   : > { %v919_v35 = vor.u32 %v918_v4, %v914_v2  ;;  %v2708_v20 = vrot.slane %v2706_v26, 5  ;;  %v2599_v36 = vld [vmem:[#allocation2 + $0x30] sm:$0xf]  ;;  %v427_v41 = vrot.slane %v7313_v21, 4  ;;  %v426_v54 = vsel %vm7164_vm10, %v418_v6, %v425_v16 }
  0x6b   : > { %v915_v42 = vsel %vm7188_vm12, %v910_v27, %v914_v2  ;;  %v2694_v43 = vrot.slane %v2693_v28, 4  ;;  %v2703_v44 = vor.u32 %v2702_v31, %v2698_v29  ;;  %v2711_v46 = vshrl.u32 %v2599_v36, 16  ;;  %v786_v53 = vld [vmem:[#allocation2 + $0x30] sm:$0xf]  ;;  %697 = vst.msk [vmem:[#allocation2 + $0x40] sm:$0xf] %vm187_vm0, %v426_v54 }
  0x6c   : > { %v920_v49 = vrot.slane %v919_v35, 4  ;;  %v7331_v50 = vld [vmem:[#allocation2 + $0x34] sm:$0xf]  ;;  %v2714_v51 = vshll.u32 %v2599_v36, 16  ;;  %v695_v55 = vsel %vm7171_vm11, %v417_v12, %v694_v32  ;;  %v927_v11 = vshrl.u32 %v786_v53, 16 }
  0x6d   : > { %v2699_v5 = vsel %vm7188_vm12, %v2694_v43, %v2698_v29  ;;  %v2704_v57 = vrot.slane %v2703_v44, 4  ;;  %v2713_v59 = vrot.slane %v2711_v46, 4  ;;  %v2720_v61 = vshll.u32 %v7331_v50, 16  ;;  %696 = vst [vmem:[#allocation2 + $0x3c] sm:$0xf] %v695_v55 }
  0x6e   : > { %v7339_v58 = vld [vmem:[#allocation2 + $0x38] sm:$0x1]  ;;  %v925_v63 = vsel %vm7188_vm12, %v920_v49, %v924_v25  ;;  %v2716_v0 = vrot.slane %v2714_v51, 5  ;;  %v2724_v6 = vshrl.u32 %v7331_v50, 16  ;;  %v787_v48 = vld [vmem:[#allocation2 + $0x34] sm:$0xf] }
  0x6f   : > { %v2730_v21 = vshll.u32 %v7339_v58, 16  ;;  %v5656_v38 = vcombine.low %v915_v42, %v925_v63  ;;  %v2709_v45 = vsel %vm7188_vm12, %v2704_v57, %v2708_v20  ;;  %v2722_v7 = vrot.slane %v2720_v61, 5  ;;  %v815_v9 = vld [vmem:[#allocation2 + $0x38] sm:$0x1]  ;;  %v698_v12 = vld [vmem:[#allocation2 + $0x44] sm:$0x1] }
  0x70   : > { %v5801_v13 = vcombine.low %v2699_v5, %v2709_v45  ;;  %v2717_v14 = vor.u32 %v2716_v0, %v2713_v59  ;;  %v2726_v22 = vrot.slane %v2724_v6, 4  ;;  %v929_v19 = vrot.slane %v927_v11, 4  ;;  %v273_v11 = vld [vmem:[#allocation2 + $0x50] sm:$0x1] }
  0x71   : > { %v2732_v15 = vrot.slane %v2730_v21, 5  ;;  %6317 = vmatmul.mubr.msk.bf16.gmra.mrb[4].mxu1 %vm1267_vm13, %v5656_v38  ;;  %v930_v23 = vshll.u32 %v786_v53, 16  ;;  %v936_v24 = vshll.u32 %v787_v48, 16  ;;  %v940_v2 = vshrl.u32 %v787_v48, 16 }
  0x72   : > { %6452 = vmatprep.mubr.msk.bf16.mxu0 %vm1267_vm13, %v5801_v13  ;;  %v2718_v4 = vrot.slane %v2717_v14, 4  ;;  %v2727_v25 = vor.u32 %v2726_v22, %v2722_v7  ;;  %v946_v26 = vshll.u32 %v815_v9, 16  ;;  %v699_v27 = vsel %vm7123_vm5, %v427_v41, %v698_v12  ;;  %v789_v42 = vld [vmem:[#allocation2 + $0x40] sm:$0xf]  ;;  %v319_v12 = vld [vmem:[%s7139_s6 + $0x28] sm:$0xf] }
  0x73   : > { %v932_v28 = vrot.slane %v930_v23, 5  ;;  %v938_v29 = vrot.slane %v936_v24, 5  ;;  %v942_v31 = vrot.slane %v940_v2, 4  ;;  %700 = vst [vmem:[#allocation2 + $0x44] sm:$0x1] %v699_v27  ;;  %v218_v32 = vsel %vm7123_vm5, 0, %v217_v17 }
  0x74   : > { %v2723_v35 = vsel %vm7188_vm12, %v2718_v4, %v2722_v7  ;;  %v2728_v20 = vrot.slane %v2727_v25, 4  ;;  %v948_v36 = vrot.slane %v946_v26, 5  ;;  %v788_v16 = vld [vmem:[#allocation2 + $0x3c] sm:$0xf]  ;;  %219 = vst [vmem:[#allocation2 + $0x48] sm:$0x1] %v218_v32 }
  0x75   : > { %v933_v43 = vor.u32 %v932_v28, %v929_v19  ;;  %v943_v44 = vor.u32 %v942_v31, %v938_v29  ;;  %v951_v46 = vshrl.u32 %v788_v16, 16  ;;  %v954_v49 = vshll.u32 %v788_v16, 16  ;;  %v2602_v41 = vld [vmem:[#allocation2 + $0x3c] sm:$0xf]  ;;  %v7359_v55 = vld [vmem:[#allocation2 + $0x40] sm:$0xf] }
  0x76   : > { %v2733_v51 = vsel %vm7188_vm12, %v2728_v20, %v2732_v15  ;;  %v960_v53 = vshll.u32 %v789_v42, 16  ;;  %v964_v54 = vshrl.u32 %v789_v42, 16  ;;  %v2735_v5 = vshrl.u32 %v2602_v41, 16  ;;  %v320_v25 = vld [vmem:[%s7139_s6 + $0x2c] sm:$0xf] }
  0x77   : > { %v5802_v57 = vcombine.low %v2723_v35, %v2733_v51  ;;  %v934_v59 = vrot.slane %v933_v43, 4  ;;  %v944_v61 = vrot.slane %v943_v44, 4  ;;  %v953_v63 = vrot.slane %v951_v46, 4  ;;  %v276_v46 = vld [vmem:[#allocation2 + $0x5c] sm:$0x1] }
  0x78   : > { %v956_v0 = vrot.slane %v954_v49, 5  ;;  %v962_v6 = vrot.slane %v960_v53, 5  ;;  %v966_v21 = vrot.slane %v964_v54, 4  ;;  %v2737_v48 = vrot.slane %v2735_v5, 4  ;;  %v321_v49 = vld [vmem:[%s7139_s6 + $0x30] sm:$0xf] }
  0x79   : > { %6453 = vmatmul.mubr.msk.bf16.gmra.mrb[4].mxu0 %vm1267_vm13, %v5802_v57  ;;  %v939_v38 = vsel %vm7188_vm12, %v934_v59, %v938_v29  ;;  %v949_v45 = vsel %vm7188_vm12, %v944_v61, %v948_v36  ;;  %v2738_v7 = vshll.u32 %v2602_v41, 16  ;;  %v2744_v9 = vshll.u32 %v7359_v55, 16  ;;  %v220_v36 = vld [vmem:[#allocation2 + $0x54] sm:$0x1]  ;;  %v6953_v33 = vld [vmem:[#allocation2 + $0x3c] sm:$0xf] }
  0x7a   : > { %v5657_v13 = vcombine.low %v939_v38, %v949_v45  ;;  %v816_v14 = vld [vmem:[#allocation2 + $0x44] sm:$0x1]  ;;  %v957_v22 = vor.u32 %v956_v0, %v953_v63  ;;  %v967_v15 = vor.u32 %v966_v21, %v962_v6  ;;  %v2748_v19 = vshrl.u32 %v7359_v55, 16  ;;  %v322_v5 = vld [vmem:[%s7139_s6 + $0x34] sm:$0xf] }
  0x7b   : > { %v7368_v17 = vld [vmem:[#allocation2 + $0x44] sm:$0x1]  ;;  %v970_v23 = vshll.u32 %v816_v14, 16  ;;  %v2740_v24 = vrot.slane %v2738_v7, 5  ;;  %v2746_v2 = vrot.slane %v2744_v9, 5  ;;  %v274_v29 = vsel %vm7130_vm7, 0, %v273_v11 }
  0x7c   : > { %v2754_v4 = vshll.u32 %v7368_v17, 16  ;;  %6320 = vmatprep.mubr.msk.bf16.mxu1 %vm1267_vm13, %v5657_v13  ;;  %v958_v26 = vrot.slane %v957_v22, 4  ;;  %v968_v27 = vrot.slane %v967_v15, 4  ;;  %v2750_v28 = vrot.slane %v2748_v19, 4  ;;  %275 = vst [vmem:[#allocation2 + $0x50] sm:$0x1] %v274_v29 }
  0x7d   : > { %v972_v31 = vrot.slane %v970_v23, 5  ;;  %v2741_v32 = vor.u32 %v2740_v24, %v2737_v48  ;;  %v429_v20 = vshrl.u32 %v319_v12, 16  ;;  %v432_v43 = vshll.u32 %v319_v12, 16  ;;  %v701_v63 = vld [vmem:[#allocation2 + $0x48] sm:$0xf] }
  0x7e   : > { %v2756_v35 = vrot.slane %v2754_v4, 5  ;;  %v963_v16 = vsel %vm7188_vm12, %v958_v26, %v962_v6  ;;  %v2751_v42 = vor.u32 %v2750_v28, %v2746_v2  ;;  %v437_v44 = vshrl.u32 %v320_v25, 16  ;;  %v223_v45 = vld [vmem:[#allocation2 + $0x60] sm:$0x1]  ;;  %v279_v7 = vld [vmem:[#allocation2 + $0x68] sm:$0x1] }
  0x7f   : > { %v973_v41 = vsel %vm7188_vm12, %v968_v27, %v972_v31  ;;  %v2742_v51 = vrot.slane %v2741_v32, 4  ;;  %v431_v53 = vrot.slane %v429_v20, 7  ;;  %v440_v54 = vshll.u32 %v320_v25, 16  ;;  %v7392_v14 = vld [vmem:[%s7139_s6 + $0x38] sm:$0xf] }
  0x80   : > { %v5658_v57 = vcombine.low %v963_v16, %v973_v41  ;;  %v2752_v59 = vrot.slane %v2751_v42, 4  ;;  %v439_v61 = vrot.slane %v437_v44, 7  ;;  %v221_v0 = vsel %vm7123_vm5, 0, %v220_v36  ;;  %v324_v22 = vld [vmem:[%s7139_s6 + $0x3c] sm:$0xf] }
  0x81   : > { %v2747_v6 = vsel %vm7188_vm12, %v2742_v51, %v2746_v2  ;;  %v434_v21 = vor.u32 %v432_v43, %v431_v53  ;;  %v435_v48 = vrot.slane %v431_v53, 4  ;;  %222 = vst [vmem:[#allocation2 + $0x54] sm:$0x1] %v221_v0  ;;  %v277_v38 = vsel %vm7130_vm7, 0, %v276_v46  ;;  %v226_v2 = vld [vmem:[#allocation2 + $0x6c] sm:$0x1] }
  0x82   : > { %6321 = vmatmul.mubr.msk.bf16.gmra.mrb[8].mxu1 %vm1267_vm13, %v5658_v57  ;;  %v2757_v9 = vsel %vm7188_vm12, %v2752_v59, %v2756_v35  ;;  %v442_v11 = vor.u32 %v440_v54, %v439_v61  ;;  %v444_v12 = vrot.slane %v439_v61, 4  ;;  %278 = vst [vmem:[#allocation2 + $0x5c] sm:$0x1] %v277_v38  ;;  %v446_v13 = vshrl.u32 %v321_v49, 16  ;;  %v282_v4 = vld [vmem:[#allocation2 + $0x74] sm:$0x1] }
  0x83   : > { %v5803_v15 = vcombine.low %v2747_v6, %v2757_v9  ;;  %v702_v19 = vsel %vm7171_vm11, %v434_v21, %v701_v63  ;;  %v449_v23 = vshll.u32 %v321_v49, 16  ;;  %v454_v24 = vshrl.u32 %v322_v5, 16  ;;  %v325_v25 = vld [vmem:[%s7139_s6 + $0x40] sm:$0xf]  ;;  %v705_v27 = vld [vmem:[#allocation2 + $0x50] sm:$0x1] }
  0x84   : > { %v443_v26 = vsel %vm7164_vm10, %v435_v48, %v442_v11  ;;  %703 = vst [vmem:[#allocation2 + $0x48] sm:$0xf] %v702_v19  ;;  %v448_v28 = vrot.slane %v446_v13, 7  ;;  %v457_v29 = vshll.u32 %v322_v5, 16  ;;  %v224_v31 = vsel %vm7123_vm5, 0, %v223_v45 }
  0x85   : > { %6456 = vmatprep.mubr.msk.bf16.mxu0 %vm1267_vm13, %v5803_v15  ;;  %704 = vst.msk [vmem:[#allocation2 + $0x4c] sm:$0xf] %vm187_vm0, %v443_v26  ;;  %v706_v32 = vsel %vm7123_vm5, %v444_v12, %v705_v27  ;;  %v456_v35 = vrot.slane %v454_v24, 7  ;;  %225 = vst [vmem:[#allocation2 + $0x60] sm:$0x1] %v224_v31  ;;  %v280_v20 = vsel %vm7130_vm7, 0, %v279_v7 }
  0x86   : > { %v463_v36 = vshrl.u32 %v7392_v14, 16  ;;  %v1936_v16 = vld [vmem:[#allocation3 + $0x4] sm:$0x3]  ;;  %v3384_v42 = vrot.slane %v7227_v47, 5  ;;  %707 = vst [vmem:[#allocation2 + $0x50] sm:$0x1] %v706_v32  ;;  %v451_v43 = vor.u32 %v449_v23, %v448_v28 }
  0x87   : > { %v452_v44 = vrot.slane %v448_v28, 4  ;;  %281 = vst [vmem:[#allocation2 + $0x68] sm:$0x1] %v280_v20  ;;  %v471_v46 = vshrl.u32 %v324_v22, 16  ;;  %6876 = vmatprep.subr.msk.bf16.mxu1 %vm1316_vm4, %v1936_v16  ;;  %v459_v49 = vor.u32 %v457_v29, %v456_v35  ;;  %v461_v41 = vrot.slane %v456_v35, 4 }
  0x88   : > { %v465_v51 = vrot.slane %v463_v36, 7  ;;  %v474_v53 = vshll.u32 %v324_v22, 16  ;;  %v7412_v54 = vld [vmem:[%s7139_s6 + $0x44] sm:$0xf]  ;;  %v708_v5 = vld [vmem:[#allocation2 + $0x54] sm:$0xf] }
  0x89   : > { %v473_v57 = vrot.slane %v471_v46, 7  ;;  %v227_v59 = vsel %vm7123_vm5, 0, %v226_v2  ;;  %v283_v61 = vsel %vm7130_vm7, 0, %v282_v4  ;;  %v480_v63 = vshrl.u32 %v325_v25, 16  ;;  %v712_v21 = vld [vmem:[#allocation2 + $0x5c] sm:$0x1] }
  0x8a   : > { %v460_v0 = vsel %vm7164_vm10, %v452_v44, %v459_v49  ;;  %v709_v6 = vsel %vm7171_vm11, %v451_v43, %v708_v5  ;;  %v466_v48 = vshll.u32 %v7392_v14, 16  ;;  %v469_v38 = vrot.slane %v465_v51, 4  ;;  %228 = vst [vmem:[#allocation2 + $0x6c] sm:$0x1] %v227_v59  ;;  %284 = vst [vmem:[#allocation2 + $0x74] sm:$0x1] %v283_v61 }
  0x8b   : > { %710 = vst [vmem:[#allocation2 + $0x54] sm:$0xf] %v709_v6  ;;  %711 = vst.msk [vmem:[#allocation2 + $0x58] sm:$0xf] %vm187_vm0, %v460_v0  ;;  %v713_v45 = vsel %vm7123_vm5, %v461_v41, %v712_v21  ;;  %v476_v7 = vor.u32 %v474_v53, %v473_v57  ;;  %v478_v9 = vrot.slane %v473_v57, 4  ;;  %v7426_v11 = vrot.slane %v480_v63, 7 }
  0x8c   : > { %v2605_v12 = vld [vmem:[#allocation2 + $0x48] sm:$0xf]  ;;  %714 = vst [vmem:[#allocation2 + $0x5c] sm:$0x1] %v713_v45  ;;  %v483_v22 = vshll.u32 %v325_v25, 16  ;;  %v488_v15 = vshrl.u32 %v7412_v54, 16  ;;  %v468_v29 = vor.u32 %v466_v48, %v465_v51 }
  0x8d   : > { %v790_v13 = vld [vmem:[#allocation2 + $0x48] sm:$0xf]  ;;  %v7429_v14 = vld [vmem:[#allocation2 + $0x4c] sm:$0xf]  ;;  %v2759_v19 = vshrl.u32 %v2605_v12, 16  ;;  %v2762_v23 = vshll.u32 %v2605_v12, 16  ;;  %v477_v2 = vsel %vm7164_vm10, %v469_v38, %v476_v7 }
  0x8e   : > { %v791_v24 = vld [vmem:[#allocation2 + $0x4c] sm:$0xf]  ;;  %v7433_v4 = vld [vmem:[#allocation2 + $0x50] sm:$0x1]  ;;  %v2768_v26 = vshll.u32 %v7429_v14, 16  ;;  %v2772_v27 = vshrl.u32 %v7429_v14, 16  ;;  %v7439_v25 = vor.u32 %v483_v22, %v7426_v11 }
  0x8f   : > { %v817_v28 = vld [vmem:[#allocation2 + $0x50] sm:$0x1]  ;;  %718 = vst.msk [vmem:[#allocation2 + $0x64] sm:$0xf] %vm187_vm0, %v477_v2  ;;  %v2761_v31 = vrot.slane %v2759_v19, 4  ;;  %v2764_v32 = vrot.slane %v2762_v23, 5 }
  0x90   : > { %v2778_v35 = vshll.u32 %v7433_v4, 16  ;;  %v975_v20 = vshrl.u32 %v790_v13, 16  ;;  %v715_v36 = vld [vmem:[#allocation2 + $0x60] sm:$0xf]  ;;  %v2770_v16 = vrot.slane %v2768_v26, 5  ;;  %v2774_v43 = vrot.slane %v2772_v27, 4 }
  0x91   : > { %v978_v44 = vshll.u32 %v790_v13, 16  ;;  %v984_v46 = vshll.u32 %v791_v24, 16  ;;  %v719_v49 = vld [vmem:[#allocation2 + $0x68] sm:$0x1]  ;;  %v2765_v41 = vor.u32 %v2764_v32, %v2761_v31  ;;  %v988_v51 = vshrl.u32 %v791_v24, 16 }
  0x92   : > { %v2780_v53 = vrot.slane %v2778_v35, 5  ;;  %v977_v5 = vrot.slane %v975_v20, 4  ;;  %v2775_v57 = vor.u32 %v2774_v43, %v2770_v16  ;;  %v994_v63 = vshll.u32 %v817_v28, 16  ;;  %v792_v0 = vld [vmem:[#allocation2 + $0x54] sm:$0xf] }
  0x93   : > { %v980_v59 = vrot.slane %v978_v44, 5  ;;  %v986_v61 = vrot.slane %v984_v46, 5  ;;  %v2766_v6 = vrot.slane %v2765_v41, 4  ;;  %v990_v21 = vrot.slane %v988_v51, 4  ;;  %v793_v48 = vld [vmem:[#allocation2 + $0x58] sm:$0xf] }
  0x94   : > { %v716_v38 = vsel %vm7171_vm11, %v468_v29, %v715_v36  ;;  %v720_v45 = vsel %vm7123_vm5, %v478_v9, %v719_v49  ;;  %v2776_v7 = vrot.slane %v2775_v57, 4  ;;  %v996_v13 = vrot.slane %v994_v63, 5  ;;  %v818_v24 = vld [vmem:[#allocation2 + $0x5c] sm:$0x1]  ;;  %v2608_v27 = vld [vmem:[#allocation2 + $0x54] sm:$0xf] }
  0x95   : > { %v981_v12 = vor.u32 %v980_v59, %v977_v5  ;;  %v999_v22 = vshrl.u32 %v792_v0, 16  ;;  %717 = vst [vmem:[#allocation2 + $0x60] sm:$0xf] %v716_v38  ;;  %721 = vst [vmem:[#allocation2 + $0x68] sm:$0x1] %v720_v45  ;;  %v2771_v19 = vsel %vm7188_vm12, %v2766_v6, %v2770_v16  ;;  %v991_v23 = vor.u32 %v990_v21, %v986_v61 }
  0x96   : > { %v1002_v2 = vshll.u32 %v792_v0, 16  ;;  %v1008_v26 = vshll.u32 %v793_v48, 16  ;;  %v2781_v28 = vsel %vm7188_vm12, %v2776_v7, %v2780_v53  ;;  %v1012_v9 = vshrl.u32 %v793_v48, 16  ;;  %v7450_v32 = vld [vmem:[#allocation2 + $0x58] sm:$0xf] }
  0x97   : > { %v982_v29 = vrot.slane %v981_v12, 4  ;;  %v1001_v31 = vrot.slane %v999_v22, 4  ;;  %v5804_v35 = vcombine.low %v2771_v19, %v2781_v28  ;;  %v992_v20 = vrot.slane %v991_v23, 4  ;;  %v7457_v5 = vld [vmem:[#allocation2 + $0x5c] sm:$0x1] }
  0x98   : > { %v1004_v36 = vrot.slane %v1002_v2, 5  ;;  %v1010_v43 = vrot.slane %v1008_v26, 5  ;;  %v1014_v44 = vrot.slane %v1012_v9, 4  ;;  %v1018_v46 = vshll.u32 %v818_v24, 16  ;;  %v7460_v21 = vld [vmem:[#allocation2 + $0x64] sm:$0xf] }
  0x99   : > { %v987_v16 = vsel %vm7188_vm12, %v982_v29, %v986_v61  ;;  %v2783_v49 = vshrl.u32 %v2608_v27, 16  ;;  %6457 = vmatmul.mubr.msk.bf16.gmra.mrb[8].mxu0 %vm1267_vm13, %v5804_v35  ;;  %v997_v41 = vsel %vm7188_vm12, %v992_v20, %v996_v13  ;;  %v2786_v51 = vshll.u32 %v2608_v27, 16  ;;  %v795_v20 = vld [vmem:[#allocation2 + $0x64] sm:$0xf]  ;;  %v7819_v39 = vld [vmem:[#allocation2 + $0x40] sm:$0xf] }
  0x9a   : > { %v1005_v53 = vor.u32 %v1004_v36, %v1001_v31  ;;  %v2792_v57 = vshll.u32 %v7450_v32, 16  ;;  %v5659_v59 = vcombine.low %v987_v16, %v997_v41  ;;  %v1015_v63 = vor.u32 %v1014_v44, %v1010_v43  ;;  %v7845_v1 = vld [vmem:[#allocation2 + $0x64] sm:$0xf] }
  0x9b   : > { %v1020_v0 = vrot.slane %v1018_v46, 5  ;;  %v2785_v6 = vrot.slane %v2783_v49, 4  ;;  %v2788_v48 = vrot.slane %v2786_v51, 5  ;;  %v2796_v45 = vshrl.u32 %v7450_v32, 16 }
  0x9c   : > { %v1006_v61 = vrot.slane %v1005_v53, 4  ;;  %v2794_v38 = vrot.slane %v2792_v57, 5  ;;  %v2611_v7 = vld [vmem:[#allocation2 + $0x60] sm:$0xf]  ;;  %6324 = vmatprep.mubr.msk.bf16.mxu1 %vm1267_vm13, %v5659_v59  ;;  %v1016_v12 = vrot.slane %v1015_v63, 4  ;;  %v2802_v13 = vshll.u32 %v7457_v5, 16 }
  0x9d   : > { %v2807_v22 = vshrl.u32 %v2611_v7, 16  ;;  %v2810_v19 = vshll.u32 %v2611_v7, 16  ;;  %v2789_v24 = vor.u32 %v2788_v48, %v2785_v6  ;;  %v2798_v2 = vrot.slane %v2796_v45, 4  ;;  %v7467_v26 = vld [vmem:[#allocation2 + $0x68] sm:$0x1] }
  0x9e   : > { %v1011_v23 = vsel %vm7188_vm12, %v1006_v61, %v1010_v43  ;;  %v2816_v27 = vshll.u32 %v7460_v21, 16  ;;  %v794_v28 = vld [vmem:[#allocation2 + $0x60] sm:$0xf]  ;;  %v1021_v29 = vsel %vm7188_vm12, %v1016_v12, %v1020_v0  ;;  %v2804_v31 = vrot.slane %v2802_v13, 5  ;;  %v819_v53 = vld [vmem:[#allocation2 + $0x68] sm:$0x1] }
  0x9f   : > { %v2809_v9 = vrot.slane %v2807_v22, 4  ;;  %v2812_v35 = vrot.slane %v2810_v19, 5  ;;  %v5660_v36 = vcombine.low %v1011_v23, %v1021_v29  ;;  %v2790_v16 = vrot.slane %v2789_v24, 4  ;;  %v722_v6 = vld [vmem:[#allocation2 + $0x6c] sm:$0xf] }
  0xa0   : > { %v2799_v44 = vor.u32 %v2798_v2, %v2794_v38  ;;  %v2818_v46 = vrot.slane %v2816_v27, 5  ;;  %v2820_v43 = vshrl.u32 %v7460_v21, 16  ;;  %v2826_v41 = vshll.u32 %v7467_v26, 16  ;;  %v3315_v12 = vld [vmem:[#allocation2 + $0xc] sm:$0xe] }
  0xa1   : > { %v2813_v49 = vor.u32 %v2812_v35, %v2809_v9  ;;  %v1023_v51 = vshrl.u32 %v794_v28, 16  ;;  %6325 = vmatmul.mubr.msk.bf16.gmra.mrb[12].mxu1 %vm1267_vm13, %v5660_v36  ;;  %v2795_v57 = vsel %vm7188_vm12, %v2790_v16, %v2794_v38  ;;  %v1026_v63 = vshll.u32 %v794_v28, 16  ;;  %v3316_v24 = vld [vmem:[#allocation2 + $0x18] sm:$0xe]  ;;  %v726_v29 = vld [vmem:[#allocation2 + $0x74] sm:$0x1] }
  0xa2   : > { %v2800_v59 = vrot.slane %v2799_v44, 4  ;;  %v1032_v0 = vshll.u32 %v795_v20, 16  ;;  %v2822_v48 = vrot.slane %v2820_v43, 4  ;;  %v2828_v45 = vrot.slane %v2826_v41, 5 }
  0xa3   : > { %v2814_v61 = vrot.slane %v2813_v49, 4  ;;  %v1025_v7 = vrot.slane %v1023_v51, 4  ;;  %v1028_v22 = vrot.slane %v1026_v63, 5  ;;  %v1036_v23 = vshrl.u32 %v795_v20, 16  ;;  %v285_v51 = vld [vmem:[#allocation2 + $0x80] sm:$0x1] }
  0xa4   : > { %v2805_v13 = vsel %vm7188_vm12, %v2800_v59, %v2804_v31  ;;  %v1034_v19 = vrot.slane %v1032_v0, 5  ;;  %v2823_v27 = vor.u32 %v2822_v48, %v2818_v46  ;;  %v1042_v28 = vshll.u32 %v819_v53, 16  ;;  %v229_v53 = vld [vmem:[#allocation2 + $0x78] sm:$0x1]  ;;  %v328_v0 = vld [vmem:[%s7139_s6 + $0x4c] sm:$0xf] }
  0xa5   : > { %v5805_v2 = vcombine.low %v2795_v57, %v2805_v13  ;;  %v2819_v38 = vsel %vm7188_vm12, %v2814_v61, %v2818_v46  ;;  %v1029_v9 = vor.u32 %v1028_v22, %v1025_v7  ;;  %v1038_v35 = vrot.slane %v1036_v23, 4  ;;  %v329_v13 = vld [vmem:[%s7139_s6 + $0x50] sm:$0xf] }
  0xa6   : > { %v486_v36 = vrot.slane %v7426_v11, 4  ;;  %v490_v16 = vrot.slane %v488_v15, 7  ;;  %v2824_v31 = vrot.slane %v2823_v27, 4  ;;  %v1044_v20 = vrot.slane %v1042_v28, 5  ;;  %v327_v15 = vld [vmem:[%s7139_s6 + $0x48] sm:$0xf] }
  0xa7   : > { %6460 = vmatprep.mubr.msk.bf16.mxu0 %vm1267_vm13, %v5805_v2  ;;  %v491_v44 = vshll.u32 %v7412_v54, 16  ;;  %v723_v46 = vsel %vm7171_vm11, %v7439_v25, %v722_v6  ;;  %v1030_v49 = vrot.slane %v1029_v9, 4  ;;  %v1039_v43 = vor.u32 %v1038_v35, %v1034_v19  ;;  %v232_v25 = vld [vmem:[#allocation2 + $0x84] sm:$0x1] }
  0xa8   : > { %v495_v41 = vrot.slane %v490_v16, 4  ;;  %724 = vst [vmem:[#allocation2 + $0x6c] sm:$0xf] %v723_v46  ;;  %v5831_v11 = vrot.slane %v3315_v12, 9  ;;  %v2829_v57 = vsel %vm7188_vm12, %v2824_v31, %v2828_v45  ;;  %v3383_v54 = vrot.slane %v3381_v52, 4 }
  0xa9   : > { %v493_v59 = vor.u32 %v491_v44, %v490_v16  ;;  %v5832_v63 = vrot.slane %v3316_v24, 9  ;;  %v5806_v6 = vcombine.low %v2819_v38, %v2829_v57  ;;  %v1035_v61 = vsel %vm7188_vm12, %v1030_v49, %v1034_v19  ;;  %v288_v12 = vld [vmem:[#allocation2 + $0x8c] sm:$0x1]  ;;  %v330_v24 = vld [vmem:[%s7139_s6 + $0x54] sm:$0xf] }
  0xaa   : > { %v1040_v48 = vrot.slane %v1039_v43, 4  ;;  %v727_v7 = vsel %vm7123_vm5, %v495_v41, %v726_v29  ;;  %v3382_v22 = vsel %vm7292_vm1, %v5831_v11, %v3381_v52  ;;  %v3385_v19 = vsel %vm7292_vm1, %v3383_v54, %v3384_v42 }
  0xab   : > { %v494_v45 = vsel %vm7164_vm10, %v486_v36, %v493_v59  ;;  %728 = vst [vmem:[#allocation2 + $0x74] sm:$0x1] %v727_v7  ;;  %v3389_v23 = vsel %vm7292_vm1, %v5832_v63, %v3388_v34  ;;  %6461 = vmatmul.mubr.msk.bf16.gmra.mrb[12].mxu0 %vm1267_vm13, %v5806_v6  ;;  %v5847_v30 = vcombine.low %v3382_v22, %v3385_v19  ;;  %v3951_v47 = vsel %vm1316_vm4, %v7309_v62, 0 }
  0xac   : > { %v1045_v2 = vsel %vm7188_vm12, %v1040_v48, %v1044_v20  ;;  %725 = vst.msk [vmem:[#allocation2 + $0x70] sm:$0xf] %vm187_vm0, %v494_v45  ;;  %v5848_v52 = vcombine.low %v3389_v23, %v7306_v56  ;;  %v230_v10 = vsel %vm7123_vm5, 0, %v229_v53  ;;  %v286_v34 = vsel %vm7130_vm7, 0, %v285_v51  ;;  %v3318_v45 = vld [vmem:[#allocation2 + $0x30] sm:$0xe] }
  0xad   : > { %v5661_v42 = vcombine.low %v1035_v61, %v1045_v2  ;;  %v497_v38 = vshrl.u32 %v327_v15, 16  ;;  %6482 = vmatprep.mubr.msk.bf16.mxu0 %vm1267_vm13, %v5847_v30  ;;  %231 = vst [vmem:[#allocation2 + $0x78] sm:$0x1] %v230_v10  ;;  %287 = vst [vmem:[#allocation2 + $0x80] sm:$0x1] %v286_v34  ;;  %v500_v27 = vshll.u32 %v327_v15, 16 }
  0xae   : > { %v505_v28 = vshrl.u32 %v328_v0, 16  ;;  %v508_v29 = vshll.u32 %v328_v0, 16  ;;  %v233_v56 = vsel %vm7123_vm5, 0, %v232_v25  ;;  %v289_v35 = vsel %vm7130_vm7, 0, %v288_v12  ;;  %v235_v30 = vld [vmem:[#allocation2 + $0x90] sm:$0x1] }
  0xaf   : > { %6328 = vmatprep.mubr.msk.bf16.mxu1 %vm1267_vm13, %v5661_v42  ;;  %v796_v62 = vld [vmem:[#allocation2 + $0x6c] sm:$0xf]  ;;  %v499_v9 = vrot.slane %v497_v38, 7  ;;  %234 = vst [vmem:[#allocation2 + $0x84] sm:$0x1] %v233_v56  ;;  %v514_v36 = vshrl.u32 %v329_v13, 16 }
  0xb0   : > { %v517_v16 = vshll.u32 %v329_v13, 16  ;;  %v1047_v31 = vshrl.u32 %v796_v62, 16  ;;  %v1050_v20 = vshll.u32 %v796_v62, 16  ;;  %v507_v44 = vrot.slane %v505_v28, 7  ;;  %290 = vst [vmem:[#allocation2 + $0x8c] sm:$0x1] %v289_v35 }
  0xb1   : > { %v522_v46 = vshrl.u32 %v330_v24, 16  ;;  %v502_v49 = vor.u32 %v500_v27, %v499_v9  ;;  %v503_v43 = vrot.slane %v499_v9, 4  ;;  %v516_v41 = vrot.slane %v514_v36, 7  ;;  %v3317_v13 = vld [vmem:[#allocation2 + $0x24] sm:$0xe] }
  0xb2   : > { %v525_v11 = vshll.u32 %v330_v24, 16  ;;  %v820_v53 = vld [vmem:[#allocation2 + $0x74] sm:$0x1]  ;;  %v1049_v51 = vrot.slane %v1047_v31, 4  ;;  %v1052_v15 = vrot.slane %v1050_v20, 5  ;;  %v510_v57 = vor.u32 %v508_v29, %v507_v44 }
  0xb3   : > { %v512_v59 = vrot.slane %v507_v44, 4  ;;  %v7532_v54 = vld [vmem:[#allocation2 + $0x70] sm:$0xf]  ;;  %v1066_v63 = vshll.u32 %v820_v53, 16  ;;  %v519_v0 = vor.u32 %v517_v16, %v516_v41  ;;  %v520_v25 = vrot.slane %v516_v41, 4  ;;  %6483 = vmatmul.mubr.msk.bf16.vlgmr.msra.gmra.mrb[0].mxu0 %vm1267_vm13, %v5848_v52 }
  0xb4   : > { %v524_v6 = vrot.slane %v522_v46, 7  ;;  %v1053_v61 = vor.u32 %v1052_v15, %v1049_v51  ;;  %v1056_v48 = vshll.u32 %v7532_v54, 16  ;;  %v1060_v7 = vshrl.u32 %v7532_v54, 16  ;;  %6515 = vmatpush3.bf16.msra.mxu0 %v3951_v47  ;;  %v729_v19 = vld [vmem:[#allocation2 + $0x78] sm:$0xf] }
  0xb5   : > { %v511_v12 = vsel %vm7164_vm10, %v503_v43, %v510_v57  ;;  %v1068_v22 = vrot.slane %v1066_v63, 5  ;;  %v733_v23 = vld [vmem:[#allocation2 + $0x80] sm:$0x1]  ;;  %v730_v52 = vsel %vm7171_vm11, %v502_v49, %v729_v19  ;;  %v291_v27 = vld [vmem:[#allocation2 + $0x98] sm:$0x1]  ;;  %v5833_v62 = vrot.slane %v3317_v13, 9 }
  0xb6   : > { %732 = vst.msk [vmem:[#allocation2 + $0x7c] sm:$0xf] %vm187_vm0, %v511_v12  ;;  %v527_v24 = vor.u32 %v525_v11, %v524_v6  ;;  %v529_v2 = vrot.slane %v524_v6, 4  ;;  %v1054_v42 = vrot.slane %v1053_v61, 4  ;;  %v1058_v10 = vrot.slane %v1056_v48, 5 }
  0xb7   : > { %v1062_v34 = vrot.slane %v1060_v7, 4  ;;  %v736_v38 = vld [vmem:[#allocation2 + $0x84] sm:$0xf]  ;;  %731 = vst [vmem:[#allocation2 + $0x78] sm:$0xf] %v730_v52  ;;  %v734_v47 = vsel %vm7123_vm5, %v512_v59, %v733_v23  ;;  %v3395_v16 = vrot.slane %v7320_v37, 5 }
  0xb8   : > { %v528_v28 = vsel %vm7164_vm10, %v520_v25, %v527_v24  ;;  %v737_v29 = vsel %vm7171_vm11, %v519_v0, %v736_v38  ;;  %v740_v56 = vld [vmem:[#allocation2 + $0x8c] sm:$0x1]  ;;  %v1059_v9 = vsel %vm7188_vm12, %v1054_v42, %v1058_v10  ;;  %735 = vst [vmem:[#allocation2 + $0x80] sm:$0x1] %v734_v47  ;;  %v331_v31 = vld [vmem:[%s7139_s6 + $0x58] sm:$0xf] }
  0xb9   : > { %v1063_v35 = vor.u32 %v1062_v34, %v1058_v10  ;;  %738 = vst [vmem:[#allocation2 + $0x84] sm:$0xf] %v737_v29  ;;  %739 = vst.msk [vmem:[#allocation2 + $0x88] sm:$0xf] %vm187_vm0, %v528_v28  ;;  %v741_v36 = vsel %vm7123_vm5, %v529_v2, %v740_v56  ;;  %v7556_v20 = vld [vmem:[%s7139_s6 + $0x5c] sm:$0xf]  ;;  %v3396_v11 = vsel %vm7292_vm1, %v5833_v62, %v3395_v16 }
  0xba   : > { %742 = vst [vmem:[#allocation2 + $0x8c] sm:$0x1] %v741_v36  ;;  %v3398_v44 = vrot.slane %v7322_v18, 5  ;;  %v5834_v46 = vrot.slane %v3318_v45, 9  ;;  %v3402_v49 = vrot.slane %v7331_v50, 5  ;;  %v3405_v43 = vrot.slane %v7339_v58, 5 }
  0xbb   : > { %v1064_v41 = vrot.slane %v1063_v35, 4  ;;  %v3397_v53 = vrot.slane %v3395_v16, 4  ;;  %v236_v51 = vsel %vm7123_vm5, 0, %v235_v30  ;;  %v292_v18 = vsel %vm7130_vm7, 0, %v291_v27 }
  0xbc   : > { %v3403_v37 = vsel %vm7292_vm1, %v5834_v46, %v3402_v49  ;;  %v3404_v15 = vrot.slane %v3402_v49, 4  ;;  %237 = vst [vmem:[#allocation2 + $0x90] sm:$0x1] %v236_v51  ;;  %v531_v57 = vshrl.u32 %v331_v31, 16  ;;  %293 = vst [vmem:[#allocation2 + $0x98] sm:$0x1] %v292_v18 }
  0xbd   : > { %v1069_v50 = vsel %vm7188_vm12, %v1064_v41, %v1068_v22  ;;  %v7571_v58 = vld [vmem:[#allocation2 + $0x7c] sm:$0xf]  ;;  %v3399_v59 = vsel %vm7292_vm1, %v3397_v53, %v3398_v44  ;;  %v534_v63 = vshll.u32 %v331_v31, 16  ;;  %v539_v0 = vshrl.u32 %v7556_v20, 16 }
  0xbe   : > { %v5662_v25 = vcombine.low %v1059_v9, %v1069_v50  ;;  %v1080_v6 = vshll.u32 %v7571_v58, 16  ;;  %v1084_v61 = vshrl.u32 %v7571_v58, 16  ;;  %v5849_v48 = vcombine.low %v3396_v11, %v3399_v59  ;;  %v7578_v7 = vld [vmem:[#allocation2 + $0x78] sm:$0xf]  ;;  %v238_v31 = vld [vmem:[#allocation2 + $0x9c] sm:$0x1] }
  0xbf   : > { %v3406_v12 = vsel %vm7292_vm1, %v3404_v15, %v3405_v43  ;;  %v533_v13 = vrot.slane %v531_v57, 7  ;;  %v541_v45 = vrot.slane %v539_v0, 7  ;;  %v542_v22 = vshll.u32 %v7556_v20, 16  ;;  %v821_v19 = vld [vmem:[#allocation2 + $0x80] sm:$0x1] }
  0xc0   : > { %6329 = vmatmul.mubr.msk.bf16.gmra.mrb[16].mxu1 %vm1267_vm13, %v5662_v25  ;;  %v1071_v23 = vshrl.u32 %v7578_v7, 16  ;;  %v1074_v24 = vshll.u32 %v7578_v7, 16  ;;  %v1082_v2 = vrot.slane %v1080_v6, 5  ;;  %v1086_v30 = vrot.slane %v1084_v61, 4  ;;  %6486 = vmatprep.mubr.msk.bf16.mxu0 %vm1267_vm13, %v5849_v48  ;;  %v7587_v10 = vld [vmem:[#allocation2 + $0x84] sm:$0xf] }
  0xc1   : > { %v1090_v42 = vshll.u32 %v821_v19, 16  ;;  %v7589_v34 = vld [vmem:[#allocation2 + $0x88] sm:$0xf]  ;;  %v5850_v52 = vcombine.low %v3403_v37, %v3406_v12  ;;  %v536_v38 = vor.u32 %v534_v63, %v533_v13  ;;  %v537_v27 = vrot.slane %v533_v13, 4  ;;  %v822_v56 = vld [vmem:[#allocation2 + $0x8c] sm:$0x1] }
  0xc2   : > { %v1073_v47 = vrot.slane %v1071_v23, 4  ;;  %v1076_v28 = vrot.slane %v1074_v24, 5  ;;  %v1087_v29 = vor.u32 %v1086_v30, %v1082_v2  ;;  %v1095_v62 = vshrl.u32 %v7587_v10, 16  ;;  %v294_v20 = vld [vmem:[#allocation2 + $0xa4] sm:$0x1] }
  0xc3   : > { %v1092_v9 = vrot.slane %v1090_v42, 5  ;;  %v1098_v35 = vshll.u32 %v7587_v10, 16  ;;  %v1104_v36 = vshll.u32 %v7589_v34, 16  ;;  %v1108_v16 = vshrl.u32 %v7589_v34, 16  ;;  %6487 = vmatmul.mubr.msk.bf16.gmra.mrb[4].mxu0 %vm1267_vm13, %v5850_v52  ;;  %v743_v41 = vld [vmem:[#allocation2 + $0x90] sm:$0xf] }
  0xc4   : > { %v1077_v44 = vor.u32 %v1076_v28, %v1073_v47  ;;  %v1088_v46 = vrot.slane %v1087_v29, 4  ;;  %v1097_v49 = vrot.slane %v1095_v62, 4  ;;  %v1114_v43 = vshll.u32 %v822_v56, 16  ;;  %v747_v15 = vld [vmem:[#allocation2 + $0x98] sm:$0x1] }
  0xc5   : > { %v1100_v11 = vrot.slane %v1098_v35, 5  ;;  %v1106_v53 = vrot.slane %v1104_v36, 5  ;;  %v1110_v51 = vrot.slane %v1108_v16, 4  ;;  %v544_v37 = vor.u32 %v542_v22, %v541_v45  ;;  %v333_v63 = vld [vmem:[%s7139_s6 + $0x60] sm:$0xf] }
  0xc6   : > { %v1078_v18 = vrot.slane %v1077_v44, 4  ;;  %v1093_v57 = vsel %vm7188_vm12, %v1088_v46, %v1092_v9  ;;  %v1116_v50 = vrot.slane %v1114_v43, 5  ;;  %v546_v59 = vrot.slane %v541_v45, 4  ;;  %v334_v48 = vld [vmem:[%s7139_s6 + $0x64] sm:$0xf] }
  0xc7   : > { %v1101_v0 = vor.u32 %v1100_v11, %v1097_v49  ;;  %v1111_v25 = vor.u32 %v1110_v51, %v1106_v53  ;;  %v545_v6 = vsel %vm7164_vm10, %v537_v27, %v544_v37  ;;  %v744_v61 = vsel %vm7171_vm11, %v536_v38, %v743_v41  ;;  %v3319_v12 = vld [vmem:[#allocation2 + $0x3c] sm:$0xe]  ;;  %v3320_v23 = vld [vmem:[#allocation2 + $0x48] sm:$0xe]  ;;  %v241_v16 = vld [vmem:[#allocation2 + $0xa8] sm:$0x1] }
  0xc8   : > { %v1083_v13 = vsel %vm7188_vm12, %v1078_v18, %v1082_v2  ;;  %745 = vst [vmem:[#allocation2 + $0x90] sm:$0xf] %v744_v61  ;;  %746 = vst.msk [vmem:[#allocation2 + $0x94] sm:$0xf] %vm187_vm0, %v545_v6  ;;  %v748_v45 = vsel %vm7123_vm5, %v546_v59, %v747_v15  ;;  %v239_v22 = vsel %vm7123_vm5, 0, %v238_v31  ;;  %v295_v19 = vsel %vm7130_vm7, 0, %v294_v20 }
  0xc9   : > { %v5663_v24 = vcombine.low %v1083_v13, %v1093_v57  ;;  %v1102_v30 = vrot.slane %v1101_v0, 4  ;;  %v1112_v42 = vrot.slane %v1111_v25, 4  ;;  %749 = vst [vmem:[#allocation2 + $0x98] sm:$0x1] %v748_v45  ;;  %240 = vst [vmem:[#allocation2 + $0x9c] sm:$0x1] %v239_v22 }
  0xca   : > { %296 = vst [vmem:[#allocation2 + $0xa4] sm:$0x1] %v295_v19  ;;  %v548_v2 = vshrl.u32 %v333_v63, 16  ;;  %v551_v52 = vshll.u32 %v333_v63, 16  ;;  %v556_v38 = vshrl.u32 %v334_v48, 16  ;;  %v559_v27 = vshll.u32 %v334_v48, 16 }
  0xcb   : > { %v5835_v47 = vrot.slane %v3319_v12, 9  ;;  %6332 = vmatprep.mubr.msk.bf16.mxu1 %vm1267_vm13, %v5663_v24  ;;  %v1107_v28 = vsel %vm7188_vm12, %v1102_v30, %v1106_v53  ;;  %v1117_v29 = vsel %vm7188_vm12, %v1112_v42, %v1116_v50  ;;  %v3409_v62 = vrot.slane %v7359_v55, 5  ;;  %v297_v31 = vld [vmem:[#allocation2 + $0xb0] sm:$0x1]  ;;  %v335_v57 = vld [vmem:[%s7139_s6 + $0x68] sm:$0xf] }
  0xcc   : > { %v550_v56 = vrot.slane %v548_v2, 7  ;;  %v5664_v9 = vcombine.low %v1107_v28, %v1117_v29  ;;  %v558_v35 = vrot.slane %v556_v38, 7  ;;  %v3412_v36 = vrot.slane %v7368_v17, 5  ;;  %v336_v0 = vld [vmem:[%s7139_s6 + $0x6c] sm:$0xf] }
  0xcd   : > { %v3410_v44 = vsel %vm7292_vm1, %v5835_v47, %v3409_v62  ;;  %v3411_v46 = vrot.slane %v3409_v62, 4  ;;  %v5836_v49 = vrot.slane %v3320_v23, 9  ;;  %v3416_v11 = vrot.slane %v7429_v14, 5  ;;  %v244_v24 = vld [vmem:[#allocation2 + $0xb4] sm:$0x1] }
  0xce   : > { %v554_v20 = vrot.slane %v550_v56, 4  ;;  %6333 = vmatmul.mubr.msk.bf16.gmra.mrb[20].mxu1 %vm1267_vm13, %v5664_v9  ;;  %v561_v43 = vor.u32 %v559_v27, %v558_v35  ;;  %v563_v41 = vrot.slane %v558_v35, 4  ;;  %v3419_v55 = vrot.slane %v7433_v4, 5  ;;  %v300_v38 = vld [vmem:[#allocation2 + $0xbc] sm:$0x1] }
  0xcf   : > { %v7625_v53 = vld [vmem:[#allocation2 + $0x90] sm:$0xf]  ;;  %v7627_v17 = vld [vmem:[#allocation2 + $0x94] sm:$0xf]  ;;  %v553_v51 = vor.u32 %v551_v52, %v550_v56  ;;  %v3413_v37 = vsel %vm7292_vm1, %v3411_v46, %v3412_v36  ;;  %v242_v15 = vsel %vm7123_vm5, 0, %v241_v16  ;;  %v298_v18 = vsel %vm7130_vm7, 0, %v297_v31 }
  0xd0   : > { %v823_v50 = vld [vmem:[#allocation2 + $0x98] sm:$0x1]  ;;  %v1119_v14 = vshrl.u32 %v7625_v53, 16  ;;  %v1122_v4 = vshll.u32 %v7625_v53, 16  ;;  %v1128_v59 = vshll.u32 %v7627_v17, 16  ;;  %v1132_v63 = vshrl.u32 %v7627_v17, 16 }
  0xd1   : > { %243 = vst [vmem:[#allocation2 + $0xa8] sm:$0x1] %v242_v15  ;;  %299 = vst [vmem:[#allocation2 + $0xb0] sm:$0x1] %v298_v18  ;;  %v1138_v25 = vshll.u32 %v823_v50, 16  ;;  %v562_v6 = vsel %vm7164_vm10, %v554_v20, %v561_v43  ;;  %v5851_v12 = vcombine.low %v3410_v44, %v3413_v37  ;;  %v3417_v13 = vsel %vm7292_vm1, %v5836_v49, %v3416_v11 }
  0xd2   : > { %v750_v61 = vld [vmem:[#allocation2 + $0x9c] sm:$0xf]  ;;  %v754_v48 = vld [vmem:[#allocation2 + $0xa4] sm:$0x1]  ;;  %v1121_v45 = vrot.slane %v1119_v14, 4  ;;  %v1124_v22 = vrot.slane %v1122_v4, 5 }
  0xd3   : > { %v1130_v19 = vrot.slane %v1128_v59, 5  ;;  %v1134_v23 = vrot.slane %v1132_v63, 4  ;;  %753 = vst.msk [vmem:[#allocation2 + $0xa0] sm:$0xf] %vm187_vm0, %v562_v6  ;;  %v1140_v30 = vrot.slane %v1138_v25, 5  ;;  %v751_v42 = vsel %vm7171_vm11, %v553_v51, %v750_v61  ;;  %6490 = vmatprep.mubr.msk.bf16.mxu0 %vm1267_vm13, %v5851_v12 }
  0xd4   : > { %v755_v2 = vsel %vm7123_vm5, %v563_v41, %v754_v48  ;;  %v3418_v52 = vrot.slane %v3416_v11, 4  ;;  %v1125_v27 = vor.u32 %v1124_v22, %v1121_v45  ;;  %752 = vst [vmem:[#allocation2 + $0x9c] sm:$0xf] %v751_v42  ;;  %v565_v28 = vshrl.u32 %v335_v57, 16  ;;  %v337_v44 = vld [vmem:[%s7139_s6 + $0x70] sm:$0xf] }
  0xd5   : > { %v1135_v47 = vor.u32 %v1134_v23, %v1130_v19  ;;  %756 = vst [vmem:[#allocation2 + $0xa4] sm:$0x1] %v755_v2  ;;  %v568_v29 = vshll.u32 %v335_v57, 16  ;;  %v573_v62 = vshrl.u32 %v336_v0, 16  ;;  %v576_v9 = vshll.u32 %v336_v0, 16 }
  0xd6   : > { %v3420_v56 = vsel %vm7292_vm1, %v3418_v52, %v3419_v55  ;;  %v245_v35 = vsel %vm7123_vm5, 0, %v244_v24  ;;  %v1126_v36 = vrot.slane %v1125_v27, 4  ;;  %v567_v20 = vrot.slane %v565_v28, 7  ;;  %v338_v15 = vld [vmem:[%s7139_s6 + $0x74] sm:$0xf] }
  0xd7   : > { %v1136_v16 = vrot.slane %v1135_v47, 4  ;;  %v5852_v31 = vcombine.low %v3417_v13, %v3420_v56  ;;  %246 = vst [vmem:[#allocation2 + $0xb4] sm:$0x1] %v245_v35  ;;  %v575_v46 = vrot.slane %v573_v62, 7  ;;  %v301_v43 = vsel %vm7130_vm7, 0, %v300_v38 }
  0xd8   : > { %v757_v49 = vld [vmem:[#allocation2 + $0xa8] sm:$0xf]  ;;  %v1131_v41 = vsel %vm7188_vm12, %v1126_v36, %v1130_v19  ;;  %v570_v55 = vor.u32 %v568_v29, %v567_v20  ;;  %v571_v51 = vrot.slane %v567_v20, 4  ;;  %v761_v37 = vld [vmem:[#allocation2 + $0xb0] sm:$0x1]  ;;  %v582_v4 = vshrl.u32 %v337_v44, 16 }
  0xd9   : > { %v1141_v11 = vsel %vm7188_vm12, %v1136_v16, %v1140_v30  ;;  %6491 = vmatmul.mubr.msk.bf16.gmra.mrb[8].mxu0 %vm1267_vm13, %v5852_v31  ;;  %302 = vst [vmem:[#allocation2 + $0xbc] sm:$0x1] %v301_v43  ;;  %v578_v50 = vor.u32 %v576_v9, %v575_v46  ;;  %v580_v14 = vrot.slane %v575_v46, 4  ;;  %v585_v25 = vshll.u32 %v337_v44, 16  ;;  %v3321_v30 = vld [vmem:[#allocation2 + $0x54] sm:$0xe] }
  0xda   : > { %v5665_v18 = vcombine.low %v1131_v41, %v1141_v11  ;;  %v7664_v57 = vld [vmem:[#allocation2 + $0xa0] sm:$0xf]  ;;  %v758_v0 = vsel %vm7171_vm11, %v570_v55, %v757_v49  ;;  %v584_v13 = vrot.slane %v582_v4, 7  ;;  %v590_v45 = vshrl.u32 %v338_v15, 16 }
  0xdb   : > { %v1152_v59 = vshll.u32 %v7664_v57, 16  ;;  %v1156_v63 = vshrl.u32 %v7664_v57, 16  ;;  %v7671_v6 = vld [vmem:[#allocation2 + $0x9c] sm:$0xf]  ;;  %v579_v48 = vsel %vm7164_vm10, %v571_v51, %v578_v50  ;;  %759 = vst [vmem:[#allocation2 + $0xa8] sm:$0xf] %v758_v0  ;;  %v762_v12 = vsel %vm7123_vm5, %v580_v14, %v761_v37 }
  0xdc   : > { %6336 = vmatprep.mubr.msk.bf16.mxu1 %vm1267_vm13, %v5665_v18  ;;  %v824_v61 = vld [vmem:[#allocation2 + $0xa4] sm:$0x1]  ;;  %v1143_v22 = vshrl.u32 %v7671_v6, 16  ;;  %v1146_v19 = vshll.u32 %v7671_v6, 16  ;;  %760 = vst.msk [vmem:[#allocation2 + $0xac] sm:$0xf] %vm187_vm0, %v579_v48  ;;  %v587_v2 = vor.u32 %v585_v25, %v584_v13 }
  0xdd   : > { %v1154_v23 = vrot.slane %v1152_v59, 5  ;;  %v1158_v24 = vrot.slane %v1156_v63, 4  ;;  %763 = vst [vmem:[#allocation2 + $0xb0] sm:$0x1] %v762_v12  ;;  %v1162_v42 = vshll.u32 %v824_v61, 16  ;;  %v588_v52 = vrot.slane %v584_v13, 4 }
  0xde   : > { %v592_v38 = vrot.slane %v590_v45, 7  ;;  %v764_v27 = vld [vmem:[#allocation2 + $0xb4] sm:$0xf]  ;;  %v1145_v47 = vrot.slane %v1143_v22, 4  ;;  %v1148_v28 = vrot.slane %v1146_v19, 5  ;;  %v593_v56 = vshll.u32 %v338_v15, 16 }
  0xdf   : > { %v1159_v29 = vor.u32 %v1158_v24, %v1154_v23  ;;  %v3322_v62 = vld [vmem:[#allocation2 + $0x60] sm:$0xe]  ;;  %v1164_v9 = vrot.slane %v1162_v42, 5  ;;  %v765_v36 = vsel %vm7171_vm11, %v587_v2, %v764_v27  ;;  %v5837_v31 = vrot.slane %v3321_v30, 9  ;;  %v3323_v50 = vld [vmem:[#allocation2 + $0x6c] sm:$0xe] }
  0xe0   : > { %v597_v35 = vrot.slane %v592_v38, 4  ;;  %v768_v16 = vld [vmem:[#allocation2 + $0xbc] sm:$0x1]  ;;  %v1149_v20 = vor.u32 %v1148_v28, %v1145_v47  ;;  %v595_v46 = vor.u32 %v593_v56, %v592_v38  ;;  %766 = vst [vmem:[#allocation2 + $0xb4] sm:$0xf] %v765_v36  ;;  %v3423_v43 = vrot.slane %v7450_v32, 5 }
  0xe1   : > { %v1160_v44 = vrot.slane %v1159_v29, 4  ;;  %v5838_v41 = vrot.slane %v3322_v62, 9  ;;  %v3430_v11 = vrot.slane %v7460_v21, 5  ;;  %v3426_v18 = vrot.slane %v7457_v5, 5  ;;  %v2615_v48 = vld [vmem:[#allocation2 + $0x70] sm:$0xf] }
  0xe2   : > { %v769_v49 = vsel %vm7123_vm5, %v597_v35, %v768_v16  ;;  %v1150_v55 = vrot.slane %v1149_v20, 4  ;;  %v7688_v37 = vld [vmem:[#allocation2 + $0xa8] sm:$0xf]  ;;  %v596_v15 = vsel %vm7164_vm10, %v588_v52, %v595_v46  ;;  %v3424_v59 = vsel %vm7292_vm1, %v5837_v31, %v3423_v43  ;;  %v2616_v19 = vld [vmem:[#allocation2 + $0x74] sm:$0x1] }
  0xe3   : > { %v1165_v51 = vsel %vm7188_vm12, %v1160_v44, %v1164_v9  ;;  %770 = vst [vmem:[#allocation2 + $0xbc] sm:$0x1] %v769_v49  ;;  %v7693_v14 = vld [vmem:[#allocation2 + $0xac] sm:$0xf]  ;;  %v1167_v32 = vshrl.u32 %v7688_v37, 16  ;;  %v1170_v21 = vshll.u32 %v7688_v37, 16  ;;  %v3431_v63 = vsel %vm7292_vm1, %v5838_v41, %v3430_v11 }
  0xe4   : > { %v825_v4 = vld [vmem:[#allocation2 + $0xb0] sm:$0x1]  ;;  %767 = vst.msk [vmem:[#allocation2 + $0xb8] sm:$0xf] %vm187_vm0, %v596_v15  ;;  %v1155_v0 = vsel %vm7188_vm12, %v1150_v55, %v1154_v23  ;;  %v1176_v5 = vshll.u32 %v7693_v14, 16  ;;  %v1180_v25 = vshrl.u32 %v7693_v14, 16 }
  0xe5   : > { %v1186_v61 = vshll.u32 %v825_v4, 16  ;;  %v5666_v12 = vcombine.low %v1155_v0, %v1165_v51  ;;  %v1169_v13 = vrot.slane %v1167_v32, 4  ;;  %v1172_v45 = vrot.slane %v1170_v21, 5  ;;  %v7728_v0 = vld [vmem:[#allocation2 + $0x7c] sm:$0xf] }
  0xe6   : > { %v3425_v22 = vrot.slane %v3423_v43, 4  ;;  %v1178_v24 = vrot.slane %v1176_v5, 5  ;;  %v1182_v30 = vrot.slane %v1180_v25, 4  ;;  %v3432_v2 = vrot.slane %v3430_v11, 4  ;;  %v7730_v25 = vld [vmem:[#allocation2 + $0x80] sm:$0x1] }
  0xe7   : > { %v1188_v42 = vrot.slane %v1186_v61, 5  ;;  %6337 = vmatmul.mubr.msk.bf16.gmra.mrb[24].mxu1 %vm1267_vm13, %v5666_v12  ;;  %v1173_v52 = vor.u32 %v1172_v45, %v1169_v13  ;;  %v7707_v38 = vld [vmem:[#allocation2 + $0xb4] sm:$0xf]  ;;  %v3433_v27 = vrot.slane %v7467_v26, 5  ;;  %v5839_v47 = vrot.slane %v3323_v50, 9 }
  0xe8   : > { %v3427_v23 = vsel %vm7292_vm1, %v3425_v22, %v3426_v18  ;;  %v1183_v28 = vor.u32 %v1182_v30, %v1178_v24  ;;  %v1191_v29 = vshrl.u32 %v7707_v38, 16  ;;  %v1194_v56 = vshll.u32 %v7707_v38, 16  ;;  %v3324_v50 = vld [vmem:[#allocation2 + $0x78] sm:$0xe]  ;;  %v2622_v45 = vld [vmem:[#allocation2 + $0x8c] sm:$0x1] }
  0xe9   : > { %v5853_v62 = vcombine.low %v3424_v59, %v3427_v23  ;;  %v1174_v9 = vrot.slane %v1173_v52, 4  ;;  %v3434_v36 = vsel %vm7292_vm1, %v3432_v2, %v3433_v27  ;;  %v3437_v16 = vrot.slane %v2615_v48, 5  ;;  %v3325_v22 = vld [vmem:[#allocation2 + $0x84] sm:$0xe]  ;;  %v2625_v30 = vld [vmem:[#allocation2 + $0x98] sm:$0x1] }
  0xea   : > { %v826_v35 = vld [vmem:[#allocation2 + $0xbc] sm:$0x1]  ;;  %v3440_v31 = vrot.slane %v2616_v19, 5  ;;  %v1184_v20 = vrot.slane %v1183_v28, 4  ;;  %v1193_v46 = vrot.slane %v1191_v29, 4  ;;  %v1196_v49 = vrot.slane %v1194_v56, 5 }
  0xeb   : > { %v7716_v44 = vld [vmem:[#allocation2 + $0xb8] sm:$0xf]  ;;  %v1210_v26 = vshll.u32 %v826_v35, 16  ;;  %6494 = vmatprep.mubr.msk.bf16.mxu0 %vm1267_vm13, %v5853_v62  ;;  %v1179_v43 = vsel %vm7188_vm12, %v1174_v9, %v1178_v24  ;;  %v5854_v55 = vcombine.low %v3431_v63, %v3434_v36  ;;  %v3438_v18 = vsel %vm7292_vm1, %v5839_v47, %v3437_v16  ;;  %v2621_v63 = vld [vmem:[#allocation2 + $0x88] sm:$0xf] }
  0xec   : > { %v1200_v41 = vshll.u32 %v7716_v44, 16  ;;  %v1204_v11 = vshrl.u32 %v7716_v44, 16  ;;  %v1189_v51 = vsel %vm7188_vm12, %v1184_v20, %v1188_v42  ;;  %v1197_v15 = vor.u32 %v1196_v49, %v1193_v46  ;;  %v2624_v24 = vld [vmem:[#allocation2 + $0x94] sm:$0xf]  ;;  %v3326_v27 = vld [vmem:[#allocation2 + $0x90] sm:$0xe] }
  0xed   : > { %v5667_v4 = vcombine.low %v1179_v43, %v1189_v51  ;;  %6495 = vmatmul.mubr.msk.bf16.gmra.mrb[12].mxu0 %vm1267_vm13, %v5854_v55  ;;  %v3439_v59 = vrot.slane %v3437_v16, 4  ;;  %v1212_v48 = vrot.slane %v1210_v26, 5  ;;  %v5840_v13 = vrot.slane %v3324_v50, 9  ;;  %v3327_v56 = vld [vmem:[#allocation2 + $0x9c] sm:$0xe] }
  0xee   : > { %v1202_v32 = vrot.slane %v1200_v41, 5  ;;  %v1206_v21 = vrot.slane %v1204_v11, 4  ;;  %v1198_v5 = vrot.slane %v1197_v15, 4  ;;  %v3444_v52 = vrot.slane %v7728_v0, 5  ;;  %v7742_v9 = vld [vmem:[#allocation2 + $0x4] sm:$0xf] }
  0xef   : > { %6340 = vmatprep.mubr.msk.bf16.mxu1 %vm1267_vm13, %v5667_v4  ;;  %v3441_v12 = vsel %vm7292_vm1, %v3439_v59, %v3440_v31  ;;  %v3447_v23 = vrot.slane %v7730_v25, 5  ;;  %v5841_v47 = vrot.slane %v3325_v22, 9  ;;  %v3451_v28 = vrot.slane %v2621_v63, 5  ;;  %v6943_v35 = vld [vmem:[#allocation2] sm:$0xf] }
  0xf0   : > { %v1207_v61 = vor.u32 %v1206_v21, %v1202_v32  ;;  %v5855_v19 = vcombine.low %v3438_v18, %v3441_v12  ;;  %v1203_v42 = vsel %vm7188_vm12, %v1198_v5, %v1202_v32  ;;  %v3454_v29 = vrot.slane %v2622_v45, 5  ;;  %v2627_v20 = vld [vmem:[#allocation2 + $0xa0] sm:$0xf]  ;;  %v2628_v46 = vld [vmem:[#allocation2 + $0xa4] sm:$0x1] }
  0xf1   : > { %v5686_v36 = vcombine.low %v6943_v35, %v7742_v9  ;;  %v3445_v16 = vsel %vm7292_vm1, %v5840_v13, %v3444_v52  ;;  %v3446_v31 = vrot.slane %v3444_v52, 4  ;;  %v3452_v26 = vsel %vm7292_vm1, %v5841_v47, %v3451_v28  ;;  %v2630_v21 = vld [vmem:[#allocation2 + $0xac] sm:$0xf]  ;;  %v247_v59 = vld [vmem:[#allocation2 + $0xc0] sm:$0x1] }
  0xf2   : > { %v1208_v2 = vrot.slane %v1207_v61, 4  ;;  %6498 = vmatprep.mubr.msk.bf16.mxu0 %vm1267_vm13, %v5855_v19  ;;  %v3453_v43 = vrot.slane %v3451_v28, 4  ;;  %v5842_v41 = vrot.slane %v3326_v27, 9  ;;  %v3458_v55 = vrot.slane %v2624_v24, 5  ;;  %v3328_v61 = vld [vmem:[#allocation2 + $0xa8] sm:$0xe] }
  0xf3   : > { %v3448_v11 = vsel %vm7292_vm1, %v3446_v31, %v3447_v23  ;;  %v3461_v51 = vrot.slane %v2625_v30, 5  ;;  %v5843_v15 = vrot.slane %v3327_v56, 9  ;;  %v3465_v4 = vrot.slane %v2627_v20, 5  ;;  %v303_v12 = vld [vmem:[#allocation2 + $0xc8] sm:$0x1] }
  0xf4   : > { %v1213_v62 = vsel %vm7188_vm12, %v1208_v2, %v1212_v48  ;;  %v5856_v18 = vcombine.low %v3445_v16, %v3448_v11  ;;  %v3455_v50 = vsel %vm7292_vm1, %v3453_v43, %v3454_v29  ;;  %v3468_v32 = vrot.slane %v2628_v46, 5  ;;  %v2633_v48 = vld [vmem:[#allocation2 + $0xb8] sm:$0xf]  ;;  %v7755_v13 = vld [vmem:[#allocation2 + $0x10] sm:$0xf] }
  0xf5   : > { %v5668_v49 = vcombine.low %v1203_v42, %v1213_v62  ;;  %v5857_v5 = vcombine.low %v3452_v26, %v3455_v50  ;;  %v3460_v63 = vrot.slane %v3458_v55, 4  ;;  %v6945_v45 = vld [vmem:[#allocation2 + $0xc] sm:$0xf]  ;;  %v3467_v19 = vrot.slane %v3465_v4, 4  ;;  %v2631_v24 = vld [vmem:[#allocation2 + $0xb0] sm:$0x1] }
  0xf6   : > { %v5687_v22 = vcombine.low %v6945_v45, %v7755_v13  ;;  %6499 = vmatmul.mubr.msk.bf16.gmra.mrb[16].mxu0 %vm1267_vm13, %v5856_v18  ;;  %v3329_v30 = vld [vmem:[#allocation2 + $0xb4] sm:$0xe]  ;;  %v6946_v42 = vld [vmem:[#allocation2 + $0x18] sm:$0xf]  ;;  %v7759_v2 = vld [vmem:[#allocation2 + $0x1c] sm:$0xf]  ;;  %v3459_v23 = vsel %vm7292_vm1, %v5842_v41, %v3458_v55  ;;  %v3466_v35 = vsel %vm7292_vm1, %v5843_v15, %v3465_v4 }
  0xf7   : > { %6341 = vmatmul.mubr.msk.bf16.gmra.mrb[28].mxu1 %vm1267_vm13, %v5668_v49  ;;  %v5688_v52 = vcombine.low %v6946_v42, %v7759_v2  ;;  %6502 = vmatprep.mubr.msk.bf16.mxu0 %vm1267_vm13, %v5857_v5  ;;  %v3462_v27 = vsel %vm7292_vm1, %v3460_v63, %v3461_v51  ;;  %v3472_v47 = vrot.slane %v2630_v21, 5  ;;  %v339_v28 = vld [vmem:[%s7139_s6 + $0x78] sm:$0xf]  ;;  %v340_v29 = vld [vmem:[%s7139_s6 + $0x7c] sm:$0xf]  ;;  %v3479_v16 = vrot.slane %v2633_v48, 5 }
  0xf8   : > { %6346 = vmatprep.mubr.msk.bf16.mxu1 %vm1267_vm13, %v5686_v36  ;;  %v6948_v56 = vld [vmem:[#allocation3 + $0x4] sm:$0x3]  ;;  %v3469_v36 = vsel %vm7292_vm1, %v3467_v19, %v3468_v32  ;;  %v7774_v31 = vld [vmem:[#allocation3 + $0xc] ss:$0 sps:$4 sm:$0xcc]   ;;  %v5844_v20 = vrot.slane %v3328_v61, 9  ;;  %v5858_v41 = vcombine.low %v3459_v23, %v3462_v27 }
  0xf9   : > { %v2034_v62 = vsel %vm1316_vm4, %v6948_v56, 0  ;;  %v3475_v46 = vrot.slane %v2631_v24, 5  ;;  %v2634_v49 = vld [vmem:[#allocation2 + $0xbc] sm:$0x1]  ;;  %v5845_v26 = vrot.slane %v3329_v30, 9  ;;  %v248_v43 = vsel %vm7123_vm5, 0, %v247_v59 }
  0xfa   : > { %249 = vst [vmem:[#allocation2 + $0xc0] sm:$0x1] %v248_v43  ;;  %v304_v11 = vsel %vm7130_vm7, 0, %v303_v12  ;;  %v599_v55 = vshrl.u32 %v339_v28, 16  ;;  %v602_v51 = vshll.u32 %v339_v28, 16  ;;  %v5859_v15 = vcombine.low %v3466_v35, %v3469_v36 }
  0xfb   : > { %v3474_v18 = vrot.slane %v3472_v47, 4  ;;  %305 = vst [vmem:[#allocation2 + $0xc8] sm:$0x1] %v304_v11  ;;  %v607_v50 = vshrl.u32 %v340_v29, 16  ;;  %v610_v4 = vshll.u32 %v340_v29, 16  ;;  %v3481_v21 = vrot.slane %v3479_v16, 4 }
  0xfc   : > { %v7780_v32 = vld [vmem:[#allocation3 + $0x4] ss:$0 sps:$4 sm:$0xcc]   ;;  %v3482_v5 = vrot.slane %v2634_v49, 5  ;;  %v601_v63 = vrot.slane %v599_v55, 7  ;;  %v4630_v59 = vrot.slane %v7774_v31, 2  ;;  %v3473_v45 = vsel %vm7292_vm1, %v5844_v20, %v3472_v47 }
  0xfd   : > { %v609_v61 = vrot.slane %v607_v50, 7  ;;  %v6949_v30 = vld [vmem:[#allocation2 + $0x24] sm:$0xf]  ;;  %v7794_v42 = vld [vmem:[#allocation2 + $0x28] sm:$0xf]  ;;  %v3480_v23 = vsel %vm7292_vm1, %v5845_v26, %v3479_v16  ;;  %v2345_v28 = vrot.slane %v7780_v32, 2  ;;  %v5691_v26 = vcombine.low %v6953_v33, %v7819_v39 }
  0xfe   : > { %6503 = vmatmul.mubr.msk.bf16.gmra.mrb[20].mxu0 %vm1267_vm13, %v5858_v41  ;;  %v604_v48 = vor.u32 %v602_v51, %v601_v63  ;;  %v605_v12 = vrot.slane %v601_v63, 4  ;;  %6882 = vmatprep.subr.msk.bf16.mxu0 %vm1316_vm4, %v4630_v59  ;;  %v3483_v27 = vsel %vm7292_vm1, %v3481_v21, %v3482_v5  ;;  %v6951_v29 = vld [vmem:[#allocation2 + $0x30] sm:$0xf]  ;;  %v7802_v47 = vld [vmem:[#allocation2 + $0x34] sm:$0xf]  ;;  %v2864_v43 = vshll.u32 %v7728_v0, 16 }
  0xff   : > { %6347 = vmatmul.mubr.msk.bf16.vlgmr.msra.gmra.mrb[0].mxu1 %vm1267_vm13, %v5687_v22  ;;  %6506 = vmatprep.mubr.msk.bf16.mxu0 %vm1267_vm13, %v5859_v15  ;;  %v3476_v22 = vsel %vm7292_vm1, %v3474_v18, %v3475_v46  ;;  %v612_v19 = vor.u32 %v610_v4, %v609_v61  ;;  %v614_v24 = vrot.slane %v609_v61, 4  ;;  %v5690_v56 = vcombine.low %v6951_v29, %v7802_v47  ;;  %v6955_v11 = vld [vmem:[#allocation2 + $0x48] sm:$0xf]  ;;  %v7824_v55 = vld [vmem:[#allocation2 + $0x4c] sm:$0xf] }
 0x100   : > { %6379 = vmatpush3.bf16.msra.mxu1 %v2034_v62  ;;  %6350 = vmatprep.mubr.msk.bf16.mxu1 %vm1267_vm13, %v5688_v52  ;;  %v5689_v52 = vcombine.low %v6949_v30, %v7794_v42  ;;  %v5860_v36 = vcombine.low %v3473_v45, %v3476_v22  ;;  %v5861_v46 = vcombine.low %v3480_v23, %v3483_v27  ;;  %v2868_v41 = vshrl.u32 %v7728_v0, 16  ;;  %v250_v5 = vld [vmem:[#allocation2 + $0xcc] sm:$0x1]  ;;  %v6957_v27 = vld [vmem:[#allocation2 + $0x54] sm:$0xf] }
 0x101   : > { %v613_v62 = vsel %vm7164_vm10, %v605_v12, %v612_v19  ;;  %v771_v35 = vld [vmem:[#allocation2 + $0xc0] sm:$0xf]  ;;  %6877 = vmatprep.subr.msk.bf16.mxu1 %vm1316_vm4, %v2345_v28  ;;  %v5692_v51 = vcombine.low %v6955_v11, %v7824_v55  ;;  %v1833_v45 = vrot.slane %v7755_v13, 5  ;;  %v6908_v19 = vld [vmem:[#allocation2 + $0x18] sm:$0xff]   ;;  %v2874_v23 = vshll.u32 %v7730_v25, 16 }
 0x102   : > { %v772_v20 = vsel %vm7171_vm11, %v604_v48, %v771_v35  ;;  %774 = vst.msk [vmem:[#allocation2 + $0xc4] sm:$0xf] %vm187_vm0, %v613_v62  ;;  %v775_v16 = vld [vmem:[#allocation2 + $0xc8] sm:$0x1]  ;;  %v7828_v48 = vrot.slane %v2864_v43, 5  ;;  %v2870_v12 = vrot.slane %v2868_v41, 4 }
 0x103   : > { %773 = vst [vmem:[#allocation2 + $0xc0] sm:$0xf] %v772_v20  ;;  %v776_v49 = vsel %vm7123_vm5, %v614_v24, %v775_v16  ;;  %v251_v24 = vsel %vm7123_vm5, 0, %v250_v5  ;;  %v7839_v29 = vld [vmem:[#allocation2 + $0x58] sm:$0xf]  ;;  %v1826_v62 = vrot.slane %v7742_v9, 5 }
 0x104   : > { %777 = vst [vmem:[#allocation2 + $0xc8] sm:$0x1] %v776_v49  ;;  %8901 = vst [vmem:[#allocation7_spill] sm:$0xff] %v7828_v48  ;;  %v1774_v13 = vld [vmem:[#allocation2 + $0xc] sm:$0xe]  ;;  %v2871_v35 = vor.u32 %v2870_v12, %v7828_v48  ;;  %v1840_v49 = vrot.slane %v7759_v2, 5  ;;  %v5696_v2 = vcombine.low %v7578_v7, %v7571_v58  ;;  %v5699_v58 = vcombine.low %v7671_v6, %v7664_v57 }
 0x105   : > { %252 = vst [vmem:[#allocation2 + $0xcc] sm:$0x1] %v251_v24  ;;  %v1775_v16 = vld [vmem:[#allocation2 + $0x18] sm:$0xe]  ;;  %v6962_v33 = vld [vmem:[#allocation2 + $0x14] sm:$0x1] }
 0x106   : > { %6507 = vmatmul.mubr.msk.bf16.gmra.mrb[24].mxu0 %vm1267_vm13, %v5860_v36  ;;  %v6959_v36 = vld [vmem:[#allocation2 + $0x60] sm:$0xf]  ;;  %v6963_v9 = vld [vmem:[#allocation2 + $0x6c] sm:$0xf]  ;;  %v6910_v41 = vld [vmem:[#allocation2 + $0x24] sm:$0xff]   ;;  %v7854_v5 = vrot.slane %v2871_v35, 4 }
 0x107   : > { %6351 = vmatmul.mubr.msk.bf16.gmra.mrb[4].mxu1 %vm1267_vm13, %v5689_v52  ;;  %6510 = vmatprep.mubr.msk.bf16.mxu0 %vm1267_vm13, %v5861_v46  ;;  %v1773_v52 = vld [vmem:[#allocation2] sm:$0xe]  ;;  %v5694_v20 = vcombine.low %v6959_v36, %v7845_v1  ;;  %v6961_v46 = vld [vmem:[#allocation2 + $0x8] sm:$0x1]  ;;  %v5695_v43 = vcombine.low %v6963_v9, %v7532_v54  ;;  %v5697_v54 = vcombine.low %v7587_v10, %v7589_v34  ;;  %v6911_v12 = vld [vmem:[#allocation2 + $0x30] sm:$0xff]  }
 0x108   : > { %6354 = vmatprep.mubr.msk.bf16.mxu1 %vm1267_vm13, %v5690_v56  ;;  %v5693_v56 = vcombine.low %v6957_v27, %v7839_v29  ;;  %v1829_v25 = vrot.slane %v6961_v46, 5  ;;  %v5718_v11 = vrot.slane %v1773_v52, 9  ;;  %8903 = vst [vmem:[#allocation9_spill] sm:$0xff] %v7854_v5  ;;  %v4680_v52 = vsel %vm1316_vm4, %v4630_v59, 0  ;;  %v6918_v57 = vld [vmem:[#allocation2 + $0x78] sm:$0xff]  }
 0x109   : > { %v2636_v15 = vld [vmem:[#allocation2 + $0xc4] sm:$0xf] }
 0x10a   : > { %v3330_v18 = vld [vmem:[#allocation2 + $0xc0] sm:$0xe]  ;;  %v3486_v50 = vrot.slane %v2636_v15, 5  ;;  %v7851_v15 = vrot.slane %v2874_v23, 5  ;;  %v7872_v7 = vsel %vm7292_vm1, %v5718_v11, %v1826_v62  ;;  %v1778_v23 = vld [vmem:[#allocation2 + $0x3c] sm:$0xe] }
 0x10b   : > { %v2637_v4 = vld [vmem:[#allocation2 + $0xc8] sm:$0x1]  ;;  %v5846_v21 = vrot.slane %v3330_v18, 9  ;;  %v1828_v18 = vrot.slane %v1826_v62, 4  ;;  %v6967_v11 = vld [vmem:[#allocation2 + $0x44] sm:$0x1] }
 0x10c   : > { %v3488_v63 = vrot.slane %v3486_v50, 4  ;;  %v3489_v61 = vrot.slane %v2637_v4, 5  ;;  %8902 = vst [vmem:[#allocation8_spill] sm:$0xff] %v7851_v15  ;;  %v5720_v4 = vrot.slane %v1775_v16, 9  ;;  %v6921_v15 = vld [vmem:[#allocation2 + $0x9c] sm:$0xff]  }
 0x10d   : > { %v3487_v0 = vsel %vm7292_vm1, %v5846_v21, %v3486_v50  ;;  %v1835_v50 = vrot.slane %v1833_v45, 4  ;;  %v1776_v21 = vld [vmem:[#allocation2 + $0x24] sm:$0xe]  ;;  %v7880_v27 = vsel %vm7292_vm1, %v1828_v18, %v1829_v25  ;;  %v4146_v18 = vld [vmem:[#allocation2 + $0x18] sm:$0xf] }
 0x10e   : > { %v3490_v22 = vsel %vm7292_vm1, %v3488_v63, %v3489_v61  ;;  %v1847_v63 = vrot.slane %v7794_v42, 5  ;;  %v1777_v61 = vld [vmem:[#allocation2 + $0x30] sm:$0xe]  ;;  %v7888_v59 = vsel %vm7292_vm1, %v5720_v4, %v1840_v49  ;;  %v6913_v4 = vld [vmem:[#allocation2 + $0x48] sm:$0xff]  }
 0x10f   : > { %6355 = vmatmul.mubr.msk.bf16.gmra.mrb[8].mxu1 %vm1267_vm13, %v5691_v26  ;;  %v5862_v30 = vcombine.low %v3487_v0, %v3490_v22  ;;  %v1836_v26 = vrot.slane %v6962_v33, 5  ;;  %v5698_v0 = vcombine.low %v7625_v53, %v7627_v17  ;;  %v1842_v22 = vrot.slane %v1840_v49, 4  ;;  %v6912_v33 = vld [vmem:[#allocation2 + $0x3c] sm:$0xff]  }
 0x110   : > { %6358 = vmatprep.mubr.msk.bf16.mxu1 %vm1267_vm13, %v5692_v51  ;;  %v5719_v51 = vrot.slane %v1774_v13, 9  ;;  %v1849_v62 = vrot.slane %v1847_v63, 4  ;;  %v6965_v13 = vld [vmem:[#allocation2 + $0x2c] sm:$0x1]  ;;  %v5722_v36 = vrot.slane %v1777_v61, 9  ;;  %v5723_v49 = vrot.slane %v1778_v23, 9 }
 0x111   : > { %6511 = vmatmul.mubr.msk.bf16.gmra.mrb[28].mxu0 %vm1267_vm13, %v5862_v30  ;;  %v1854_v30 = vrot.slane %v7802_v47, 5  ;;  %v7884_v31 = vsel %vm7292_vm1, %v1835_v50, %v1836_v26  ;;  %v1861_v47 = vrot.slane %v7819_v39, 5  ;;  %v1850_v35 = vrot.slane %v6965_v13, 5  ;;  %v6966_v39 = vld [vmem:[#allocation2 + $0x38] sm:$0x1] }
 0x112   : > { %6516 = vmatprep.mubr.msk.bf16.mxu0 %vm1267_vm13, %v6908_v19  ;;  %v6964_v19 = vld [vmem:[#allocation2 + $0x20] sm:$0x1]  ;;  %v7876_v42 = vsel %vm7292_vm1, %v5719_v51, %v1833_v45  ;;  %v5721_v45 = vrot.slane %v1776_v21, 9  ;;  %v1857_v25 = vrot.slane %v6966_v39, 5  ;;  %v5700_v26 = vcombine.low %v7688_v37, %v7693_v14  ;;  %v4147_v50 = vld [vmem:[#allocation2 + $0x1c] sm:$0xf] }
 0x113   : > { %v1843_v24 = vrot.slane %v6964_v19, 5  ;;  %v1856_v46 = vrot.slane %v1854_v30, 4  ;;  %v1864_v51 = vrot.slane %v6967_v11, 5  ;;  %v1863_v32 = vrot.slane %v1861_v47, 4  ;;  %v6969_v61 = vld [vmem:[#allocation2 + $0x5c] sm:$0x1] }
 0x114   : > { %v7931_v19 = vsel %vm7292_vm1, %v5722_v36, %v1854_v30  ;;  %v1875_v23 = vrot.slane %v7839_v29, 5  ;;  %v4195_v13 = vshrl.u32 %v4146_v18, 16  ;;  %v4198_v30 = vshll.u32 %v4146_v18, 16 }
 0x115   : > { %v7899_v16 = vsel %vm7292_vm1, %v1842_v22, %v1843_v24  ;;  %v7923_v22 = vsel %vm7292_vm1, %v5721_v45, %v1847_v63  ;;  %v1780_v24 = vld [vmem:[#allocation2 + $0x54] sm:$0xe]  ;;  %v4150_v45 = vld [vmem:[#allocation2 + $0x28] sm:$0xf]  ;;  %v4208_v36 = vshrl.u32 %v4147_v50, 16  ;;  %v1878_v21 = vrot.slane %v6969_v61, 5 }
 0x116   : > { %v4228_v11 = vshll.u32 %v4150_v45, 16  ;;  %v1877_v39 = vrot.slane %v1875_v23, 4  ;;  %v4200_v9 = vrot.slane %v4198_v30, 5  ;;  %v4151_v30 = vld [vmem:[#allocation2 + $0x2c] sm:$0x1] }
 0x117   : > { %6359 = vmatmul.mubr.msk.bf16.gmra.mrb[12].mxu1 %vm1267_vm13, %v5693_v56  ;;  %v7891_v56 = vld [vmem:[#allocation3 + $0x10] sm:$0x3] }
 0x118   : > { %6362 = vmatprep.mubr.msk.bf16.mxu1 %vm1267_vm13, %v5694_v20  ;;  %v7894_v20 = vld [vmem:[#allocation2 + $0x48] sm:$0xe] }
 0x119   : > { %6517 = vmatmul.mubr.msk.bf16.vlgmr.msra.gmra.mrb[0].mxu0 %vm1267_vm13, %v6910_v41  ;;  %v7908_v41 = vsel %vm1316_vm4, %v2345_v28, 0  ;;  %v1868_v28 = vrot.slane %v7824_v55, 5  ;;  %v7935_v55 = vsel %vm7292_vm1, %v1856_v46, %v1857_v25  ;;  %v5724_v63 = vrot.slane %v7894_v20, 9  ;;  %v6968_v25 = vld [vmem:[#allocation2 + $0x50] sm:$0x1] }
 0x11a   : > { %6549 = vmatpush3.bf16.msra.mxu0 %v4680_v52  ;;  %6520 = vmatprep.mubr.msk.bf16.mxu0 %vm1267_vm13, %v6911_v12  ;;  %v4149_v52 = vld [vmem:[#allocation2 + $0x24] sm:$0xf]  ;;  %v7949_v46 = vsel %vm7292_vm1, %v1863_v32, %v1864_v51  ;;  %v4232_v12 = vshrl.u32 %v4150_v45, 16  ;;  %v7955_v51 = vld [vmem:[#allocation2 + $0x6c] sm:$0xe]  ;;  %v4197_v32 = vrot.slane %v4195_v13, 4 }
 0x11b   : > { %6883 = vmatprep.subr.msk.bf16.mxu0 %vm1316_vm4, %v7891_v56  ;;  %v4219_v29 = vshrl.u32 %v4149_v52, 16  ;;  %v4222_v20 = vshll.u32 %v4149_v52, 16  ;;  %v4148_v13 = vld [vmem:[#allocation2 + $0x20] sm:$0x1] }
 0x11d   : > { %v4221_v10 = vrot.slane %v4219_v29, 4  ;;  %v4224_v34 = vrot.slane %v4222_v20, 5  ;;  %v1783_v29 = vld [vmem:[#allocation2 + $0x78] sm:$0xe]  ;;  %v6971_v20 = vld [vmem:[#allocation2 + $0x68] sm:$0x1] }
 0x11f   : > { %6363 = vmatmul.mubr.msk.bf16.gmra.mrb[16].mxu1 %vm1267_vm13, %v5695_v43  ;;  %v7927_v43 = vsel %vm7292_vm1, %v1849_v62, %v1850_v35  ;;  %v7943_v62 = vld [vmem:[#allocation2 + $0x60] sm:$0xe]  ;;  %v4204_v35 = vshll.u32 %v4147_v50, 16  ;;  %v5725_v50 = vrot.slane %v1780_v24, 9  ;;  %v7967_v24 = vsel %vm7292_vm1, %v5724_v63, %v1868_v28 }
 0x120   : > { %6366 = vmatprep.mubr.msk.bf16.mxu1 %vm1267_vm13, %v5696_v2  ;;  %v7939_v2 = vsel %vm7292_vm1, %v5723_v49, %v1861_v47  ;;  %v1870_v47 = vrot.slane %v1868_v28, 4  ;;  %v1871_v49 = vrot.slane %v6968_v25, 5  ;;  %v5726_v45 = vrot.slane %v7943_v62, 9  ;;  %v6915_v28 = vld [vmem:[#allocation2 + $0x60] sm:$0xff]  }
 0x121   : > { %6521 = vmatmul.mubr.msk.bf16.gmra.mrb[4].mxu0 %vm1267_vm13, %v6912_v33  ;;  %v7957_v25 = vrot.slane %v4204_v35, 5  ;;  %v4210_v33 = vrot.slane %v4208_v36, 4  ;;  %v4234_v35 = vrot.slane %v4232_v12, 4  ;;  %v7982_v63 = vsel %vm7292_vm1, %v5725_v50, %v1875_v23  ;;  %v6972_v50 = vld [vmem:[#allocation2 + $0x74] sm:$0x1] }
 0x122   : > { %6524 = vmatprep.mubr.msk.bf16.mxu0 %vm1267_vm13, %v6913_v4  ;;  %v6914_v4 = vld [vmem:[#allocation2 + $0x54] sm:$0xff]   ;;  %v7971_v61 = vsel %vm7292_vm1, %v1870_v47, %v1871_v49  ;;  %v7986_v62 = vsel %vm7292_vm1, %v1877_v39, %v1878_v21  ;;  %v1882_v36 = vrot.slane %v7845_v1, 5  ;;  %v6970_v47 = vld [vmem:[#allocation2 + $0x70] sm:$0xf]  ;;  %v4214_v12 = vshll.u32 %v4148_v13, 16 }
 0x123   : > { %v1889_v53 = vrot.slane %v6970_v47, 5  ;;  %v4211_v49 = vor.u32 %v4210_v33, %v7957_v25  ;;  %v5727_v23 = vrot.slane %v7955_v51, 9  ;;  %v1892_v52 = vrot.slane %v6972_v50, 5  ;;  %v4152_v33 = vld [vmem:[#allocation2 + $0x30] sm:$0xf] }
 0x124   : > { %v4238_v21 = vshll.u32 %v4151_v30, 16  ;;  %v4225_v39 = vor.u32 %v4224_v34, %v4221_v10  ;;  %v8000_v13 = vsel %vm7292_vm1, %v5726_v45, %v1882_v36  ;;  %v1884_v51 = vrot.slane %v1882_v36, 4  ;;  %v1784_v30 = vld [vmem:[#allocation2 + $0x84] sm:$0xe]  ;;  %v6974_v50 = vld [vmem:[#allocation2 + $0x88] sm:$0xf] }
 0x125   : > { %v4212_v18 = vrot.slane %v4211_v49, 4  ;;  %v4216_v1 = vrot.slane %v4214_v12, 5  ;;  %v5728_v10 = vrot.slane %v1783_v29, 9  ;;  %v4243_v45 = vshrl.u32 %v4152_v33, 16 }
 0x126   : > { %v4240_v34 = vrot.slane %v4238_v21, 5  ;;  %v4246_v36 = vshll.u32 %v4152_v33, 16  ;;  %v4226_v49 = vrot.slane %v4225_v39, 4  ;;  %v6976_v33 = vld [vmem:[#allocation2 + $0x8c] sm:$0x1] }
 0x127   : > { %6367 = vmatmul.mubr.msk.bf16.gmra.mrb[20].mxu1 %vm1267_vm13, %v5697_v54  ;;  %v7978_v54 = vrot.slane %v4228_v11, 5  ;;  %v1885_v11 = vrot.slane %v6971_v20, 5  ;;  %v1891_v20 = vrot.slane %v1889_v53, 4 }
 0x128   : > { %6370 = vmatprep.mubr.msk.bf16.mxu1 %vm1267_vm13, %v5698_v0  ;;  %v4201_v0 = vor.u32 %v4200_v9, %v4197_v32  ;;  %v6973_v9 = vld [vmem:[#allocation2 + $0x7c] sm:$0xf] }
 0x129   : > { %6525 = vmatmul.mubr.msk.bf16.gmra.mrb[8].mxu0 %vm1267_vm13, %v6914_v4  ;;  %v4235_v47 = vor.u32 %v4234_v35, %v7978_v54  ;;  %v1896_v32 = vrot.slane %v6973_v9, 5  ;;  %v1903_v4 = vrot.slane %v6974_v50, 5  ;;  %v6975_v35 = vld [vmem:[#allocation2 + $0x80] sm:$0x1]  ;;  %v8006_v9 = vld [vmem:[#allocation2 + $0x34] sm:$0xf]  ;;  %v8014_v6 = vsel %vm7292_vm1, %v1884_v51, %v1885_v11 }
 0x12a   : > { %6528 = vmatprep.mubr.msk.bf16.mxu0 %vm1267_vm13, %v6915_v28  ;;  %v4202_v17 = vrot.slane %v4201_v0, 4  ;;  %v1899_v28 = vrot.slane %v6975_v35, 5  ;;  %8904 = vst [vmem:[#allocation10_spill] sm:$0xff] %v8006_v9  ;;  %v6916_v0 = vld [vmem:[#allocation2 + $0x6c] sm:$0xff]   ;;  %v5729_v50 = vrot.slane %v1784_v30, 9  ;;  %v1906_v35 = vrot.slane %v6976_v33, 5 }
 0x12b   : > { %v4236_v12 = vrot.slane %v4235_v47, 4  ;;  %v1898_v29 = vrot.slane %v1896_v32, 4  ;;  %v1905_v21 = vrot.slane %v1903_v4, 4  ;;  %v8022_v37 = vsel %vm7292_vm1, %v1891_v20, %v1892_v52  ;;  %v4155_v47 = vld [vmem:[#allocation2 + $0x3c] sm:$0xf] }
 0x12c   : > { %v4252_v39 = vshll.u32 %v8006_v9, 16  ;;  %v4256_v11 = vshrl.u32 %v8006_v9, 16  ;;  %v8029_v51 = vld [vmem:[#allocation2 + $0x40] sm:$0xf]  ;;  %v4245_v52 = vrot.slane %v4243_v45, 4  ;;  %v4248_v20 = vrot.slane %v4246_v36, 5 }
 0x12d   : > { %8905 = vst [vmem:[#allocation11_spill] sm:$0xff] %v8029_v51  ;;  %v8045_v30 = vsel %vm7292_vm1, %v1898_v29, %v1899_v28  ;;  %v4158_v33 = vld [vmem:[#allocation2 + $0x48] sm:$0xf] }
 0x12e   : > { %v8061_v45 = vrot.slane %v4252_v39, 5  ;;  %v4258_v36 = vrot.slane %v4256_v11, 4 }
 0x12f   : > { %6371 = vmatmul.mubr.msk.bf16.gmra.mrb[24].mxu1 %vm1267_vm13, %v5699_v58  ;;  %v8018_v58 = vsel %vm7292_vm1, %v5727_v23, %v1889_v53  ;;  %v4217_v53 = vsel %vm7188_vm12, %v4212_v18, %v4216_v1  ;;  %v8035_v23 = vsel %vm7292_vm1, %v5728_v10, %v1896_v32  ;;  %v8049_v18 = vsel %vm7292_vm1, %v5729_v50, %v1903_v4  ;;  %v8051_v1 = vld [vmem:[#allocation2 + $0x38] sm:$0x1]  ;;  %v8063_v4 = vld [vmem:[#allocation2 + $0x44] sm:$0x1] }
 0x130   : > { %6374 = vmatprep.mubr.msk.bf16.mxu1 %vm1267_vm13, %v5700_v26  ;;  %v4207_v26 = vsel %vm7188_vm12, %v4202_v17, %v7957_v25  ;;  %v4231_v25 = vsel %vm7188_vm12, %v4226_v49, %v7978_v54  ;;  %v4241_v17 = vsel %vm7188_vm12, %v4236_v12, %v4240_v34  ;;  %8906 = vst [vmem:[#allocation12_spill] sm:$0xff] %v8051_v1  ;;  %v4267_v54 = vshrl.u32 %v4155_v47, 16  ;;  %v6919_v12 = vld [vmem:[#allocation2 + $0x84] sm:$0xff]  }
 0x131   : > { %6529 = vmatmul.mubr.msk.bf16.gmra.mrb[12].mxu0 %vm1267_vm13, %v6916_v0  ;;  %v8056_v32 = vsel %vm7292_vm1, %v1905_v21, %v1906_v35  ;;  %v4270_v10 = vshll.u32 %v4155_v47, 16  ;;  %v4276_v34 = vshll.u32 %v8029_v51, 16  ;;  %8907 = vst [vmem:[#allocation13_spill] sm:$0xff] %v8063_v4  ;;  %v4280_v0 = vshrl.u32 %v8029_v51, 16 }
 0x132   : > { %6532 = vmatprep.mubr.msk.bf16.mxu0 %vm1267_vm13, %v6918_v57  ;;  %v8908_v49 = vcombine.low %v7707_v38, %v7716_v44  ;;  %v8074_v50 = vsel %vm1316_vm4, %v7891_v56, 0  ;;  %v4249_v57 = vor.u32 %v4248_v20, %v4245_v52  ;;  %v4262_v21 = vshll.u32 %v8051_v1, 16  ;;  %v6920_v38 = vld [vmem:[#allocation2 + $0x90] sm:$0xff]   ;;  %v8089_v52 = vld [vmem:[#allocation2 + $0x4c] sm:$0xf] }
 0x133   : > { %v8909_v35 = vcombine.low %v7872_v7, %v7880_v27  ;;  %v8081_v39 = vcombine.low %v4207_v26, %v4217_v53  ;;  %v8083_v11 = vcombine.low %v4231_v25, %v4241_v17  ;;  %v4161_v20 = vld [vmem:[#allocation2 + $0x54] sm:$0xf]  ;;  %v4272_v29 = vrot.slane %v4270_v10, 5  ;;  %v8094_v27 = vld [vmem:[#allocation2 + $0x58] sm:$0xf] }
 0x134   : > { %v8091_v28 = vrot.slane %v4276_v34, 5  ;;  %v4286_v7 = vshll.u32 %v8063_v4, 16  ;;  %v4259_v26 = vor.u32 %v4258_v36, %v8061_v45  ;;  %v4282_v53 = vrot.slane %v4280_v0, 4  ;;  %v1785_v25 = vld [vmem:[#allocation2 + $0x90] sm:$0xe] }
 0x135   : > { %v4291_v17 = vshrl.u32 %v4158_v33, 16  ;;  %v4250_v47 = vrot.slane %v4249_v57, 4  ;;  %v4264_v51 = vrot.slane %v4262_v21, 5  ;;  %v4300_v56 = vshll.u32 %v8089_v52, 16  ;;  %v6977_v21 = vld [vmem:[#allocation2 + $0x94] sm:$0xf] }
 0x136   : > { %v4304_v1 = vshrl.u32 %v8089_v52, 16  ;;  %v4315_v10 = vshrl.u32 %v4161_v20, 16  ;;  %v4318_v34 = vshll.u32 %v4161_v20, 16  ;;  %v4324_v4 = vshll.u32 %v8094_v27, 16 }
 0x137   : > { %6375 = vmatmul.mubr.msk.bf16.gmra.mrb[28].mxu1 %vm1267_vm13, %v8908_v49  ;;  %v4269_v49 = vrot.slane %v4267_v54, 4  ;;  %v1786_v54 = vld [vmem:[#allocation2 + $0x9c] sm:$0xe]  ;;  %v4328_v9 = vshrl.u32 %v8094_v27, 16  ;;  %v8103_v0 = vrot.slane %v4286_v7, 5  ;;  %v5730_v57 = vrot.slane %v1785_v25, 9 }
 0x138   : > { %6380 = vmatprep.mubr.msk.bf16.mxu1 %vm1267_vm13, %v8909_v35  ;;  %v4294_v35 = vshll.u32 %v4158_v33, 16  ;;  %v1910_v33 = vrot.slane %v6977_v21, 5  ;;  %v4260_v8 = vrot.slane %v4259_v26, 4  ;;  %v4283_v48 = vor.u32 %v4282_v53, %v8091_v28  ;;  %v6979_v21 = vld [vmem:[#allocation2 + $0xa0] sm:$0xf] }
 0x139   : > { %6533 = vmatmul.mubr.msk.bf16.gmra.mrb[16].mxu0 %vm1267_vm13, %v6919_v12  ;;  %v4273_v36 = vor.u32 %v4272_v29, %v4269_v49  ;;  %v4293_v5 = vrot.slane %v4291_v17, 4  ;;  %v8910_v20 = vcombine.low %v7876_v42, %v7884_v31  ;;  %v4255_v29 = vsel %vm7188_vm12, %v4250_v47, %v8061_v45  ;;  %v8113_v49 = vld [vmem:[#allocation2 + $0x50] sm:$0x1]  ;;  %v8122_v42 = vld [vmem:[#allocation2 + $0x5c] sm:$0x1]  ;;  %v6922_v47 = vld [vmem:[#allocation2 + $0xa8] sm:$0xff]  }
 0x13a   : > { %6536 = vmatprep.mubr.msk.bf16.mxu0 %vm1267_vm13, %v6920_v38  ;;  %v4296_v12 = vrot.slane %v4294_v35, 5  ;;  %v5731_v38 = vrot.slane %v1786_v54, 9  ;;  %v8115_v7 = vrot.slane %v4300_v56, 5  ;;  %v4306_v26 = vrot.slane %v4304_v1, 4  ;;  %v6978_v54 = vld [vmem:[#allocation2 + $0x98] sm:$0x1] }
 0x13b   : > { %v8911_v53 = vcombine.low %v7888_v59, %v7899_v16  ;;  %v4317_v31 = vrot.slane %v4315_v10, 4  ;;  %v4320_v25 = vrot.slane %v4318_v34, 5  ;;  %v8124_v17 = vrot.slane %v4324_v4, 5  ;;  %v6981_v34 = vld [vmem:[#allocation2 + $0xa4] sm:$0x1] }
 0x13c   : > { %v4330_v45 = vrot.slane %v4328_v9, 4  ;;  %v8126_v35 = vrot.slane %v4273_v36, 4  ;;  %v1912_v56 = vrot.slane %v1910_v33, 4  ;;  %v1913_v1 = vrot.slane %v6978_v54, 5 }
 0x13d   : > { %v4265_v59 = vsel %vm7188_vm12, %v4260_v8, %v4264_v51  ;;  %v8131_v16 = vrot.slane %v4283_v48, 4  ;;  %v4297_v10 = vor.u32 %v4296_v12, %v4293_v5  ;;  %v4310_v4 = vshll.u32 %v8113_v49, 16 }
 0x13e   : > { %v8136_v9 = vsel %vm7292_vm1, %v5730_v57, %v1910_v33  ;;  %v1920_v36 = vrot.slane %v6981_v34, 5  ;;  %v4334_v54 = vshll.u32 %v8122_v42, 16  ;;  %v4321_v48 = vor.u32 %v4320_v25, %v4317_v31  ;;  %v4164_v57 = vld [vmem:[#allocation2 + $0x60] sm:$0xf]  ;;  %v8172_v34 = vld [vmem:[#allocation2 + $0x70] sm:$0xf] }
 0x13f   : > { %6381 = vmatmul.mubr.msk.bf16.vlgmr.msra.gmra.mrb[0].mxu1 %vm1267_vm13, %v8910_v20  ;;  %v6980_v20 = vld [vmem:[#allocation3 + $0x8] sm:$0x3]  ;;  %v4331_v5 = vor.u32 %v4330_v45, %v8124_v17  ;;  %v1924_v51 = vrot.slane %v7693_v14, 5  ;;  %v8148_v33 = vcombine.low %v4255_v29, %v4265_v59  ;;  %v4279_v12 = vsel %vm7188_vm12, %v8126_v35, %v8091_v28  ;;  %v4167_v45 = vld [vmem:[#allocation2 + $0x6c] sm:$0xf]  ;;  %v6923_v28 = vld [vmem:[#allocation2 + $0xb4] sm:$0xff]  }
 0x140   : > { %6413 = vmatpush3.bf16.msra.mxu1 %v7908_v41  ;;  %6384 = vmatprep.mubr.msk.bf16.mxu1 %vm1267_vm13, %v8911_v53  ;;  %v1917_v41 = vrot.slane %v6979_v21, 5  ;;  %v4307_v53 = vor.u32 %v4306_v26, %v8115_v7  ;;  %v1787_v21 = vld [vmem:[#allocation2 + $0xa8] sm:$0xe]  ;;  %v8158_v26 = vld [vmem:[#allocation2 + $0x64] sm:$0xf]  ;;  %v4289_v14 = vsel %vm7188_vm12, %v8131_v16, %v8103_v0  ;;  %v4298_v31 = vrot.slane %v4297_v10, 4 }
 0x141   : > { %6879 = vmatprep.subr.msk.bf16.mxu1 %vm1316_vm4, %v6980_v20  ;;  %6537 = vmatmul.mubr.msk.bf16.gmra.mrb[20].mxu0 %vm1267_vm13, %v6921_v15  ;;  %v8156_v15 = vsel %vm7292_vm1, %v1912_v56, %v1913_v1  ;;  %v4312_v29 = vrot.slane %v4310_v4, 5  ;;  %v5732_v25 = vrot.slane %v1787_v21, 9  ;;  %v4336_v56 = vrot.slane %v4334_v54, 5  ;;  %v6982_v10 = vld [vmem:[#allocation2 + $0xb0] sm:$0x1]  ;;  %8914 = vst [vmem:[#allocation14_spill] sm:$0xff] %v8172_v34 }
 0x142   : > { %v8143_v8 = vsel %vm7292_vm1, %v5731_v38, %v1917_v41  ;;  %6540 = vmatprep.mubr.msk.bf16.mxu0 %vm1267_vm13, %v6922_v47  ;;  %v1919_v38 = vrot.slane %v1917_v41, 4  ;;  %v8912_v47 = vcombine.low %v7923_v22, %v7927_v43  ;;  %v4308_v35 = vrot.slane %v4307_v53, 4  ;;  %v6924_v22 = vld [vmem:[#allocation2 + $0xc0] sm:$0xff]  }
 0x143   : > { %v4339_v1 = vshrl.u32 %v4164_v57, 16  ;;  %v4342_v41 = vshll.u32 %v4164_v57, 16  ;;  %v8913_v20 = vcombine.low %v7931_v19, %v7935_v55  ;;  %v4322_v0 = vrot.slane %v4321_v48, 4  ;;  %v8255_v57 = vld [vmem:[#allocation2 + $0x94] sm:$0xf] }
 0x144   : > { %v4332_v59 = vrot.slane %v4331_v5, 4  ;;  %v1926_v16 = vrot.slane %v1924_v51, 4  ;;  %v1927_v4 = vrot.slane %v6982_v10, 5  ;;  %v4348_v43 = vshll.u32 %v8158_v26, 16  ;;  %8923 = vst [vmem:[#allocation21_spill] sm:$0xff] %v8255_v57 }
 0x145   : > { %v4352_v53 = vshrl.u32 %v8158_v26, 16  ;;  %v4363_v54 = vshrl.u32 %v4167_v45, 16  ;;  %v4366_v21 = vshll.u32 %v4167_v45, 16  ;;  %v8180_v19 = vsel %vm7292_vm1, %v1919_v38, %v1920_v36  ;;  %v8202_v38 = vld [vmem:[#allocation2 + $0x68] sm:$0x1] }
 0x146   : > { %v4303_v55 = vsel %vm7188_vm12, %v4298_v31, %v8115_v7  ;;  %v8187_v48 = vsel %vm7292_vm1, %v5732_v25, %v1924_v51  ;;  %v4313_v5 = vsel %vm7188_vm12, %v4308_v35, %v4312_v29  ;;  %v1931_v45 = vrot.slane %v7716_v44, 5  ;;  %8917 = vst [vmem:[#allocation17_spill] sm:$0xff] %v8202_v38 }
 0x147   : > { %6385 = vmatmul.mubr.msk.bf16.gmra.mrb[4].mxu1 %vm1267_vm13, %v8912_v47  ;;  %8915 = vst [vmem:[#allocation15_spill] sm:$0xff] %v8187_v48  ;;  %v1788_v47 = vld [vmem:[#allocation2 + $0xb4] sm:$0xe]  ;;  %v4344_v10 = vrot.slane %v4342_v41, 5  ;;  %v4327_v36 = vsel %vm7188_vm12, %v4322_v0, %v8124_v17  ;;  %v4337_v7 = vsel %vm7188_vm12, %v4332_v59, %v4336_v56  ;;  %v8200_v51 = vsel %vm7292_vm1, %v1926_v16, %v1927_v4  ;;  %v4170_v0 = vld [vmem:[#allocation2 + $0x78] sm:$0xf] }
 0x148   : > { %6388 = vmatprep.mubr.msk.bf16.mxu1 %vm1267_vm13, %v8913_v20  ;;  %v4341_v20 = vrot.slane %v4339_v1, 4  ;;  %8916 = vst [vmem:[#allocation16_spill] sm:$0xff] %v8200_v51  ;;  %v4372_v31 = vshll.u32 %v8172_v34, 16  ;;  %v8206_v44 = vrot.slane %v4348_v43, 5  ;;  %v4354_v29 = vrot.slane %v4352_v53, 4 }
 0x149   : > { %6541 = vmatmul.mubr.msk.bf16.gmra.mrb[24].mxu0 %vm1267_vm13, %v6923_v28  ;;  %v4365_v25 = vrot.slane %v4363_v54, 4  ;;  %v4368_v28 = vrot.slane %v4366_v21, 5  ;;  %v8208_v35 = vcombine.low %v4279_v12, %v4289_v14  ;;  %v5733_v56 = vrot.slane %v1788_v47, 9  ;;  %v8212_v1 = vld [vmem:[#allocation2 + $0x74] sm:$0x1]  ;;  %v6925_v54 = vld [vmem:[#allocation2 + $0xcc] sm:$0xff]  }
 0x14a   : > { %6544 = vmatprep.mubr.msk.bf16.mxu0 %vm1267_vm13, %v6924_v22  ;;  %8918 = vst [vmem:[#allocation18_spill] sm:$0xff] %v8212_v1  ;;  %v4376_v41 = vshrl.u32 %v8172_v34, 16  ;;  %v8919_v59 = vcombine.low %v7939_v2, %v7949_v46  ;;  %v1933_v16 = vrot.slane %v1931_v45, 4  ;;  %v6983_v4 = vld [vmem:[#allocation2 + $0xbc] sm:$0x1]  ;;  %v4345_v43 = vor.u32 %v4344_v10, %v4341_v20 }
 0x14b   : > { %v1934_v22 = vrot.slane %v6983_v4, 5  ;;  %v4358_v12 = vshll.u32 %v8202_v38, 16  ;;  %v8220_v14 = vld [vmem:[#allocation2 + $0x7c] sm:$0xf]  ;;  %v8921_v53 = vcombine.low %v7967_v24, %v7971_v61  ;;  %v8226_v21 = vcombine.low %v4303_v55, %v4313_v5  ;;  %v4173_v17 = vld [vmem:[#allocation2 + $0x84] sm:$0xf] }
 0x14c   : > { %8920 = vst [vmem:[#allocation19_spill] sm:$0xff] %v8220_v14  ;;  %v8228_v47 = vcombine.low %v4327_v36, %v4337_v7  ;;  %v8232_v46 = vrot.slane %v4372_v31, 5  ;;  %v4355_v20 = vor.u32 %v4354_v29, %v8206_v44  ;;  %v4369_v10 = vor.u32 %v4368_v28, %v4365_v25  ;;  %v8236_v24 = vld [vmem:[#allocation2 + $0x88] sm:$0xf]  ;;  %v4176_v25 = vld [vmem:[#allocation2 + $0x90] sm:$0xf] }
 0x14d   : > { %v4387_v4 = vshrl.u32 %v4170_v0, 16  ;;  %8922 = vst [vmem:[#allocation20_spill] sm:$0xff] %v8236_v24  ;;  %v4378_v61 = vrot.slane %v4376_v41, 4  ;;  %v4396_v55 = vshll.u32 %v8220_v14, 16  ;;  %v4400_v5 = vshrl.u32 %v8220_v14, 16 }
 0x14e   : > { %v8242_v36 = vsel %vm7292_vm1, %v5733_v56, %v1931_v45  ;;  %v8246_v7 = vsel %vm7292_vm1, %v1933_v16, %v1934_v22  ;;  %v8248_v31 = vrot.slane %v4345_v43, 4  ;;  %v8250_v29 = vrot.slane %v4358_v12, 5  ;;  %v4179_v43 = vld [vmem:[#allocation2 + $0x9c] sm:$0xf] }
 0x14f   : > { %6389 = vmatmul.mubr.msk.bf16.gmra.mrb[8].mxu1 %vm1267_vm13, %v8919_v59  ;;  %v4382_v59 = vshll.u32 %v8212_v1, 16  ;;  %v4411_v28 = vshrl.u32 %v4173_v17, 16  ;;  %v4414_v41 = vshll.u32 %v4173_v17, 16  ;;  %v4424_v2 = vshrl.u32 %v8236_v24, 16 }
 0x150   : > { %6392 = vmatprep.mubr.msk.bf16.mxu1 %vm1267_vm13, %v8921_v53  ;;  %v4390_v53 = vshll.u32 %v4170_v0, 16  ;;  %v4420_v0 = vshll.u32 %v8236_v24, 16  ;;  %v8259_v45 = vrot.slane %v4355_v20, 4  ;;  %v8261_v56 = vrot.slane %v4369_v10, 4  ;;  %v8268_v24 = vld [vmem:[#allocation2 + $0xa0] sm:$0xf] }
 0x151   : > { %6545 = vmatmul.mubr.msk.bf16.gmra.mrb[28].mxu0 %vm1267_vm13, %v6925_v54  ;;  %v8263_v16 = vrot.slane %v4382_v59, 5  ;;  %v4389_v22 = vrot.slane %v4387_v4, 4  ;;  %v4379_v12 = vor.u32 %v4378_v61, %v8232_v46  ;;  %v8266_v54 = vrot.slane %v4396_v55, 5  ;;  %8924 = vst [vmem:[#allocation22_spill] sm:$0xff] %v8268_v24 }
 0x152   : > { %6550 = vmatprep.mubr.msk.bf16.mxu0 %vm1267_vm13, %v8081_v39  ;;  %v4392_v17 = vrot.slane %v4390_v53, 5  ;;  %v4402_v14 = vrot.slane %v4400_v5, 4  ;;  %v8925_v1 = vcombine.low %v7982_v63, %v7986_v62  ;;  %v8274_v39 = vld [vmem:[#allocation2 + $0x80] sm:$0x1]  ;;  %v4435_v20 = vshrl.u32 %v4176_v25, 16 }
 0x153   : > { %v4438_v10 = vshll.u32 %v4176_v25, 16  ;;  %v4444_v59 = vshll.u32 %v8255_v57, 16  ;;  %v4448_v4 = vshrl.u32 %v8255_v57, 16  ;;  %v8926_v61 = vcombine.low %v8000_v13, %v8014_v6  ;;  %v8284_v62 = vld [vmem:[#allocation2 + $0x8c] sm:$0x1] }
 0x154   : > { %v4413_v53 = vrot.slane %v4411_v28, 4  ;;  %v4416_v55 = vrot.slane %v4414_v41, 5  ;;  %v8282_v5 = vrot.slane %v4420_v0, 5  ;;  %v4426_v63 = vrot.slane %v4424_v2, 4  ;;  %8927 = vst [vmem:[#allocation23_spill] sm:$0xff] %v8284_v62 }
 0x155   : > { %v4462_v34 = vshll.u32 %v4179_v43, 16  ;;  %v4468_v25 = vshll.u32 %v8268_v24, 16  ;;  %v4472_v38 = vshrl.u32 %v8268_v24, 16  ;;  %v8292_v6 = vrot.slane %v4379_v12, 4  ;;  %v8302_v13 = vld [vmem:[#allocation2 + $0x98] sm:$0x1] }
 0x156   : > { %v4393_v28 = vor.u32 %v4392_v17, %v4389_v22  ;;  %v4406_v41 = vshll.u32 %v8274_v39, 16  ;;  %v4437_v0 = vrot.slane %v4435_v20, 4  ;;  %v4440_v2 = vrot.slane %v4438_v10, 5  ;;  %v306_v22 = vld [vmem:[#allocation2 + $0xd4] sm:$0x1] }
 0x157   : > { %6393 = vmatmul.mubr.msk.bf16.gmra.mrb[12].mxu1 %vm1267_vm13, %v8925_v1  ;;  %v4459_v1 = vshrl.u32 %v4179_v43, 16  ;;  %v4450_v57 = vrot.slane %v4448_v4, 4  ;;  %v4182_v43 = vld [vmem:[#allocation2 + $0xa8] sm:$0xf]  ;;  %v4403_v24 = vor.u32 %v4402_v14, %v8266_v54  ;;  %v4417_v51 = vor.u32 %v4416_v55, %v4413_v53  ;;  %v8309_v4 = vld [vmem:[#allocation2 + $0xa4] sm:$0x1] }
 0x158   : > { %6396 = vmatprep.mubr.msk.bf16.mxu1 %vm1267_vm13, %v8926_v61  ;;  %v8295_v61 = vrot.slane %v4444_v59, 5  ;;  %v4427_v48 = vor.u32 %v4426_v63, %v8282_v5  ;;  %v4430_v12 = vshll.u32 %v8284_v62, 16  ;;  %v4464_v20 = vrot.slane %v4462_v34, 5 }
 0x159   : > { %6551 = vmatmul.mubr.msk.bf16.vlgmr.msra.gmra.mrb[0].mxu0 %vm1267_vm13, %v8083_v11  ;;  %v4461_v17 = vrot.slane %v4459_v1, 4  ;;  %v8307_v10 = vrot.slane %v4468_v25, 5  ;;  %v4474_v11 = vrot.slane %v4472_v38, 4  ;;  %v4394_v59 = vrot.slane %v4393_v28, 4 }
 0x15a   : > { %6583 = vmatpush3.bf16.msra.mxu0 %v8074_v50  ;;  %6554 = vmatprep.mubr.msk.bf16.mxu0 %vm1267_vm13, %v8148_v33  ;;  %v4408_v14 = vrot.slane %v4406_v41, 5  ;;  %v4483_v53 = vshrl.u32 %v4182_v43, 16  ;;  %v4486_v55 = vshll.u32 %v4182_v43, 16  ;;  %v8928_v63 = vcombine.low %v8018_v58, %v8022_v37  ;;  %v8342_v43 = vld [vmem:[#allocation2 + $0xb0] sm:$0x1] }
 0x15b   : > { %v4441_v50 = vor.u32 %v4440_v2, %v4437_v0  ;;  %v4451_v62 = vor.u32 %v4450_v57, %v8295_v61  ;;  %v4454_v33 = vshll.u32 %v8302_v13, 16  ;;  %v307_v34 = vsel %vm7130_vm7, 0, %v306_v22  ;;  %v8329_v0 = vld [vmem:[#allocation2 + $0xac] sm:$0xf] }
 0x15c   : > { %v8929_v38 = vcombine.low %v8035_v23, %v8045_v30  ;;  %v4404_v1 = vrot.slane %v4403_v24, 4  ;;  %v4418_v25 = vrot.slane %v4417_v51, 4  ;;  %v4428_v28 = vrot.slane %v4427_v48, 4  ;;  %308 = vst [vmem:[#allocation2 + $0xd4] sm:$0x1] %v307_v34 }
 0x15d   : > { %v4432_v41 = vrot.slane %v4430_v12, 5  ;;  %v4361_v58 = vsel %vm7188_vm12, %v8259_v45, %v8250_v29  ;;  %v4465_v37 = vor.u32 %v4464_v20, %v4461_v17  ;;  %v4475_v57 = vor.u32 %v4474_v11, %v8307_v10  ;;  %v8357_v17 = vld [vmem:[#allocation2 + $0xb8] sm:$0xf] }
 0x15e   : > { %v4478_v3 = vshll.u32 %v8309_v4, 16  ;;  %v4375_v23 = vsel %vm7188_vm12, %v8261_v56, %v8232_v46  ;;  %v4385_v30 = vsel %vm7188_vm12, %v8292_v6, %v8263_v16  ;;  %v4485_v48 = vrot.slane %v4483_v53, 4  ;;  %v4185_v6 = vld [vmem:[#allocation2 + $0xb4] sm:$0xf] }
 0x15f   : > { %6397 = vmatmul.mubr.msk.bf16.gmra.mrb[16].mxu1 %vm1267_vm13, %v8928_v63  ;;  %v4488_v51 = vrot.slane %v4486_v55, 5  ;;  %v4399_v24 = vsel %vm7188_vm12, %v4394_v59, %v8266_v54  ;;  %v4442_v29 = vrot.slane %v4441_v50, 4  ;;  %v4452_v45 = vrot.slane %v4451_v62, 4 }
 0x160   : > { %6400 = vmatprep.mubr.msk.bf16.mxu1 %vm1267_vm13, %v8929_v38  ;;  %v4456_v2 = vrot.slane %v4454_v33, 5  ;;  %v4409_v46 = vsel %vm7188_vm12, %v4404_v1, %v4408_v14  ;;  %v4423_v56 = vsel %vm7188_vm12, %v4418_v25, %v8282_v5  ;;  %v4433_v16 = vsel %vm7188_vm12, %v4428_v28, %v4432_v41  ;;  %v4880_v38 = vld [vmem:[#allocation2 + $0x54] sm:$0xe] }
 0x161   : > { %6555 = vmatmul.mubr.msk.bf16.gmra.mrb[4].mxu0 %vm1267_vm13, %v8208_v35  ;;  %v4492_v54 = vshll.u32 %v8329_v0, 16  ;;  %v4466_v62 = vrot.slane %v4465_v37, 4  ;;  %v4476_v12 = vrot.slane %v4475_v57, 4  ;;  %v4480_v22 = vrot.slane %v4478_v3, 5 }
 0x162   : > { %6558 = vmatprep.mubr.msk.bf16.mxu0 %vm1267_vm13, %v8226_v21  ;;  %v4496_v35 = vshrl.u32 %v8329_v0, 16  ;;  %v5749_v20 = vcombine.low %v8242_v36, %v8246_v7  ;;  %v8930_v5 = vsel %vm7188_vm12, %v8248_v31, %v8206_v44  ;;  %v4489_v59 = vor.u32 %v4488_v51, %v4485_v48  ;;  %v4879_v44 = vld [vmem:[#allocation2 + $0x48] sm:$0xe]  ;;  %v8505_v7 = vld [vmem:[#allocation2 + $0xd0] sm:$0xf] }
 0x163   : > { %v5918_v11 = vcombine.low %v8930_v5, %v4361_v58  ;;  %v4502_v14 = vshll.u32 %v8342_v43, 16  ;;  %v8931_v21 = vcombine.low %v8049_v18, %v8056_v32  ;;  %v8371_v53 = vcombine.low %v4375_v23, %v4385_v30  ;;  %v4188_v58 = vld [vmem:[#allocation2 + $0xc0] sm:$0xf] }
 0x164   : > { %v4447_v55 = vsel %vm7188_vm12, %v4442_v29, %v8295_v61  ;;  %v4457_v63 = vsel %vm7188_vm12, %v4452_v45, %v4456_v2  ;;  %v4507_v50 = vshrl.u32 %v4185_v6, 16  ;;  %v8932_v31 = vcombine.low %v8136_v9, %v8156_v15  ;;  %v4881_v30 = vld [vmem:[#allocation2 + $0x60] sm:$0xe] }
 0x165   : > { %v8382_v33 = vcombine.low %v4399_v24, %v4409_v46  ;;  %v8384_v18 = vcombine.low %v4423_v56, %v4433_v16  ;;  %v4510_v32 = vshll.u32 %v4185_v6, 16  ;;  %v4516_v34 = vshll.u32 %v8357_v17, 16 }
 0x166   : > { %v4471_v61 = vsel %vm7188_vm12, %v4466_v62, %v8307_v10  ;;  %v4481_v1 = vsel %vm7188_vm12, %v4476_v12, %v4480_v22  ;;  %v8392_v25 = vrot.slane %v4492_v54, 5  ;;  %v4498_v9 = vrot.slane %v4496_v35, 4  ;;  %v4882_v54 = vld [vmem:[#allocation2 + $0x6c] sm:$0xe]  ;;  %v8426_v62 = vld [vmem:[#allocation2 + $0xc4] sm:$0xf] }
 0x167   : > { %6401 = vmatmul.mubr.msk.bf16.gmra.mrb[20].mxu1 %vm1267_vm13, %v8931_v21  ;;  %v8394_v15 = vcombine.low %v4447_v55, %v4457_v63  ;;  %v8396_v28 = vrot.slane %v4489_v59, 4  ;;  %v8398_v41 = vrot.slane %v4502_v14, 5  ;;  %v5949_v37 = vrot.slane %v4879_v44, 9  ;;  %v8934_v35 = vld [vmem:[#allocation15_spill] sm:$0xff]  ;;  %v8937_v59 = vld [vmem:[#allocation17_spill] sm:$0xff] }
 0x168   : > { %6404 = vmatprep.mubr.msk.bf16.mxu1 %vm1267_vm13, %v8932_v31  ;;  %v8400_v57 = vrot.slane %v4507_v50, 4  ;;  %v4969_v3 = vrot.slane %v8089_v52, 5  ;;  %v4972_v10 = vrot.slane %v8113_v49, 5  ;;  %v5950_v23 = vrot.slane %v4880_v38, 9  ;;  %v8447_v21 = vld [vmem:[#allocation2 + $0xbc] sm:$0x1] }
 0x169   : > { %6559 = vmatmul.mubr.msk.bf16.gmra.mrb[8].mxu0 %vm1267_vm13, %v8228_v47  ;;  %v8406_v48 = vcombine.low %v4471_v61, %v4481_v1  ;;  %v8408_v51 = vrot.slane %v4510_v32, 5  ;;  %v8410_v24 = vrot.slane %v4516_v34, 5  ;;  %v4520_v29 = vshrl.u32 %v8357_v17, 16  ;;  %v8938_v50 = vld [vmem:[#allocation14_spill] sm:$0xff] }
 0x16a   : > { %6562 = vmatprep.mubr.msk.bf16.mxu0 %vm1267_vm13, %v5918_v11  ;;  %v4499_v45 = vor.u32 %v4498_v9, %v8392_v25  ;;  %v8417_v52 = vsel %vm7292_vm1, %v5949_v37, %v4969_v3  ;;  %v4971_v49 = vrot.slane %v4969_v3, 4  ;;  %v4976_v2 = vrot.slane %v8094_v27, 5  ;;  %v8939_v31 = vld [vmem:[#allocation18_spill] sm:$0xff]  ;;  %v2617_v9 = vld [vmem:[#allocation2 + $0x78] sm:$0xf] }
 0x16b   : > { %v4531_v47 = vshrl.u32 %v4188_v58, 16  ;;  %v4979_v46 = vrot.slane %v8122_v42, 5  ;;  %v5951_v56 = vrot.slane %v4881_v30, 9  ;;  %v4983_v16 = vrot.slane %v8158_v26, 5  ;;  %v8935_v26 = vld [vmem:[#allocation16_spill] sm:$0xff] }
 0x16c   : > { %v8933_v6 = vcombine.low %v8143_v8, %v8180_v19  ;;  %v4534_v12 = vshll.u32 %v4188_v58, 16  ;;  %v8430_v22 = vsel %vm7292_vm1, %v4971_v49, %v4972_v10  ;;  %v8434_v27 = vsel %vm7292_vm1, %v5950_v23, %v4976_v2  ;;  %v6926_v23 = vld [vmem:[#allocation2 + $0xc] sm:$0xff]  }
 0x16d   : > { %v4978_v42 = vrot.slane %v4976_v2, 4  ;;  %v8936_v5 = vcombine.low %v8934_v35, %v8935_v26  ;;  %v5965_v8 = vcombine.low %v8417_v52, %v8430_v22  ;;  %v8444_v19 = vsel %vm7292_vm1, %v5951_v56, %v4983_v16  ;;  %v4883_v56 = vld [vmem:[#allocation2 + $0x78] sm:$0xe]  ;;  %v8940_v26 = vld [vmem:[#allocation8_spill] sm:$0xff]  ;;  %v6939_v52 = vld [vmem:[#allocation2 + $0xa8] sm:$0xff]  }
 0x16e   : > { %v4985_v11 = vrot.slane %v4983_v16, 4  ;;  %v4986_v14 = vrot.slane %v8937_v59, 5  ;;  %v5952_v63 = vrot.slane %v4882_v54, 9  ;;  %v4990_v44 = vrot.slane %v8938_v50, 5  ;;  %v8482_v16 = vld [vmem:[#allocation2 + $0xc8] sm:$0x1] }
 0x16f   : > { %6405 = vmatmul.mubr.msk.bf16.gmra.mrb[24].mxu1 %vm1267_vm13, %v8933_v6  ;;  %v8451_v55 = vsel %vm7292_vm1, %v4978_v42, %v4979_v46  ;;  %v4993_v32 = vrot.slane %v8939_v31, 5  ;;  %v4540_v34 = vshll.u32 %v8426_v62, 16  ;;  %v4544_v38 = vshrl.u32 %v8426_v62, 16  ;;  %v8942_v50 = vld [vmem:[#allocation19_spill] sm:$0xff] }
 0x170   : > { %6408 = vmatprep.mubr.msk.bf16.mxu1 %vm1267_vm13, %v8936_v5  ;;  %v5966_v61 = vcombine.low %v8434_v27, %v8451_v55  ;;  %v8461_v1 = vsel %vm7292_vm1, %v4985_v11, %v4986_v14  ;;  %v4495_v58 = vsel %vm7188_vm12, %v8396_v28, %v8392_v25  ;;  %v8471_v3 = vsel %vm7292_vm1, %v5952_v63, %v4990_v44  ;;  %v8941_v5 = vld [vmem:[#allocation9_spill] sm:$0xff]  ;;  %v4191_v63 = vld [vmem:[#allocation2 + $0xcc] sm:$0xf]  ;;  %v6930_v25 = vld [vmem:[#allocation2 + $0x3c] sm:$0xff]  }
 0x171   : > { %v5967_v37 = vcombine.low %v8444_v19, %v8461_v1  ;;  %v4992_v10 = vrot.slane %v4990_v44, 4  ;;  %6563 = vmatmul.mubr.msk.bf16.gmra.mrb[12].mxu0 %vm1267_vm13, %v8371_v53  ;;  %v8475_v30 = vrot.slane %v4499_v45, 4  ;;  %v4513_v49 = vor.u32 %v8408_v51, %v8400_v57  ;;  %v6940_v22 = vld [vmem:[#allocation2 + $0xb4] sm:$0xff]   ;;  %v6991_v27 = vld [vmem:[#allocation2 + $0x8c] sm:$0x1] }
 0x172   : > { %v4522_v2 = vrot.slane %v4520_v29, 4  ;;  %v4526_v46 = vshll.u32 %v8447_v21, 16  ;;  %6566 = vmatprep.mubr.msk.bf16.mxu0 %vm1267_vm13, %v8382_v33  ;;  %v4533_v54 = vrot.slane %v4531_v47, 4  ;;  %v2855_v53 = vshrl.u32 %v2617_v9, 16  ;;  %v4884_v29 = vld [vmem:[#allocation2 + $0x84] sm:$0xe] }
 0x173   : > { %v8486_v6 = vsel %vm7292_vm1, %v4992_v10, %v4993_v32  ;;  %v2858_v45 = vshll.u32 %v2617_v9, 16  ;;  %v4536_v42 = vrot.slane %v4534_v12, 5  ;;  %v8488_v35 = vrot.slane %v4540_v34, 5  ;;  %v8943_v32 = vld [vmem:[#allocation20_spill] sm:$0xff] }
 0x174   : > { %v4546_v57 = vrot.slane %v4544_v38, 4  ;;  %v5968_v51 = vcombine.low %v8471_v3, %v8486_v6  ;;  %v2857_v33 = vrot.slane %v2855_v53, 4  ;;  %v2877_v11 = vsel %vm7188_vm12, %v8941_v5, %v8940_v26  ;;  %v8944_v38 = vld [vmem:[#allocation23_spill] sm:$0xff] }
 0x175   : > { %v2860_v47 = vrot.slane %v2858_v45, 5  ;;  %v5953_v12 = vrot.slane %v4883_v56, 9  ;;  %v4523_v59 = vor.u32 %v4522_v2, %v8410_v24  ;;  %v4550_v14 = vshll.u32 %v8482_v16, 16  ;;  %v6927_v53 = vld [vmem:[#allocation2 + $0x18] sm:$0xff]  }
 0x176   : > { %v4997_v44 = vrot.slane %v8942_v50, 5  ;;  %v5000_v36 = vrot.slane %v8274_v39, 5  ;;  %v5954_v31 = vrot.slane %v4884_v29, 9  ;;  %v5004_v34 = vrot.slane %v8943_v32, 5 }
 0x177   : > { %6409 = vmatmul.mubr.msk.bf16.gmra.mrb[28].mxu1 %vm1267_vm13, %v5749_v20  ;;  %v2861_v20 = vor.u32 %v2860_v47, %v2857_v33  ;;  %v5007_v9 = vrot.slane %v8944_v38, 5  ;;  %v4537_v10 = vor.u32 %v4536_v42, %v4533_v54  ;;  %v4555_v45 = vshrl.u32 %v4191_v63, 16  ;;  %v6928_v33 = vld [vmem:[#allocation2 + $0x24] sm:$0xff]   ;;  %v8946_v38 = vld [vmem:[#allocation6_spill] sm:$0xff] }
 0x178   : > { %6414 = vmatprep.mubr.msk.bf16.mxu1 %vm1267_vm13, %v6926_v23  ;;  %v4547_v23 = vor.u32 %v4546_v57, %v8488_v35  ;;  %v8512_v2 = vsel %vm7292_vm1, %v5953_v12, %v4997_v44  ;;  %v4999_v56 = vrot.slane %v4997_v44, 4  ;;  %v8516_v39 = vsel %vm7292_vm1, %v5954_v31, %v5004_v34  ;;  %v8945_v12 = vld [vmem:[#allocation7_spill] sm:$0xff] }
 0x179   : > { %v2862_v26 = vrot.slane %v2861_v20, 4  ;;  %v5006_v29 = vrot.slane %v5004_v34, 4  ;;  %6567 = vmatmul.mubr.msk.bf16.gmra.mrb[16].mxu0 %vm1267_vm13, %v8384_v18  ;;  %v4558_v54 = vshll.u32 %v4191_v63, 16  ;;  %v4564_v42 = vshll.u32 %v8505_v7, 16 }
 0x17a   : > { %v4568_v57 = vshrl.u32 %v8505_v7, 16  ;;  %v8524_v47 = vsel %vm7292_vm1, %v4999_v56, %v5000_v36  ;;  %6570 = vmatprep.mubr.msk.bf16.mxu0 %vm1267_vm13, %v8394_v15  ;;  %v4528_v5 = vrot.slane %v4526_v46, 5  ;;  %v4505_v44 = vsel %vm7188_vm12, %v8475_v30, %v8398_v41  ;;  %v4885_v30 = vld [vmem:[#allocation2 + $0x90] sm:$0xe] }
 0x17b   : > { %v2867_v50 = vsel %vm7188_vm12, %v2862_v26, %v8945_v12  ;;  %v5969_v18 = vcombine.low %v8512_v2, %v8524_v47  ;;  %v8535_v63 = vsel %vm7292_vm1, %v5006_v29, %v5007_v9  ;;  %v4514_v36 = vrot.slane %v4513_v49, 4  ;;  %v8947_v29 = vld [vmem:[#allocation21_spill] sm:$0xff] }
 0x17c   : > { %v8541_v20 = vcombine.low %v2867_v50, %v2877_v11  ;;  %v5970_v15 = vcombine.low %v8516_v39, %v8535_v63  ;;  %v4524_v46 = vrot.slane %v4523_v59, 4  ;;  %v4538_v31 = vrot.slane %v4537_v10, 4  ;;  %v8558_v59 = vld [vmem:[#allocation2 + $0xd4] sm:$0x1]  ;;  %v8948_v50 = vld [vmem:[#allocation22_spill] sm:$0xff] }
 0x17d   : > { %v4548_v32 = vrot.slane %v4547_v23, 4  ;;  %v4552_v34 = vrot.slane %v4550_v14, 5  ;;  %v4557_v9 = vrot.slane %v4555_v45, 4  ;;  %v4560_v56 = vrot.slane %v4558_v54, 5  ;;  %v4886_v14 = vld [vmem:[#allocation2 + $0x9c] sm:$0xe] }
 0x17e   : > { %v8548_v26 = vrot.slane %v4564_v42, 5  ;;  %v4570_v41 = vrot.slane %v4568_v57, 4  ;;  %v5924_v49 = vcombine.low %v4495_v58, %v4505_v44  ;;  %v4519_v11 = vsel %vm7188_vm12, %v4514_v36, %v8410_v24  ;;  %v6929_v10 = vld [vmem:[#allocation2 + $0x30] sm:$0xff]   ;;  %v4875_v36 = vld [vmem:[#allocation2 + $0x18] sm:$0xe] }
 0x17f   : > { %6415 = vmatmul.mubr.msk.bf16.vlgmr.msra.gmra.mrb[0].mxu1 %vm1267_vm13, %v6927_v53  ;;  %v4529_v23 = vsel %vm7188_vm12, %v4524_v46, %v4528_v5  ;;  %v4543_v53 = vsel %vm7188_vm12, %v4538_v31, %v8488_v35  ;;  %v5955_v45 = vrot.slane %v4885_v30, 9  ;;  %v4553_v28 = vsel %vm7188_vm12, %v4548_v32, %v4552_v34  ;;  %v6998_v63 = vld [vmem:[#allocation2 + $0xb0] sm:$0x1] }
 0x180   : > { %6617 = vmatpush3.bf16.msra.mxu1 %v8946_v38  ;;  %6418 = vmatprep.mubr.msk.bf16.mxu1 %vm1267_vm13, %v6928_v33  ;;  %v5011_v33 = vrot.slane %v8947_v29, 5  ;;  %v4561_v24 = vor.u32 %v4560_v56, %v4557_v9  ;;  %v4571_v58 = vor.u32 %v4570_v41, %v8548_v26  ;;  %v5014_v54 = vrot.slane %v8302_v13, 5  ;;  %v6986_v29 = vld [vmem:[#allocation2 + $0x28] sm:$0xf] }
 0x181   : > { %6571 = vmatmul.mubr.msk.bf16.gmra.mrb[20].mxu0 %vm1267_vm13, %v8406_v48  ;;  %v4574_v42 = vshll.u32 %v8558_v59, 16  ;;  %v5956_v5 = vrot.slane %v4886_v14, 9  ;;  %v6984_v48 = vld [vmem:[#allocation2 + $0x1c] sm:$0xf]  ;;  %v5018_v44 = vrot.slane %v8948_v50, 5  ;;  %v5021_v46 = vrot.slane %v8309_v4, 5 }
 0x182   : > { %6574 = vmatprep.mubr.msk.bf16.mxu0 %vm1267_vm13, %v5924_v49  ;;  %v8576_v35 = vsel %vm7292_vm1, %v5955_v45, %v5011_v33  ;;  %v5013_v57 = vrot.slane %v5011_v33, 4  ;;  %v4941_v12 = vrot.slane %v6984_v48, 5  ;;  %v5925_v31 = vcombine.low %v4519_v11, %v4529_v23  ;;  %v6931_v4 = vld [vmem:[#allocation2 + $0x48] sm:$0xff]   ;;  %v6932_v23 = vld [vmem:[#allocation2 + $0x54] sm:$0xff]  }
 0x183   : > { %v5926_v32 = vcombine.low %v4543_v53, %v4553_v28  ;;  %v4562_v34 = vrot.slane %v4561_v24, 4  ;;  %v4572_v9 = vrot.slane %v4571_v58, 4  ;;  %v4576_v56 = vrot.slane %v4574_v42, 5  ;;  %v4876_v53 = vld [vmem:[#allocation2 + $0x24] sm:$0xe] }
 0x184   : > { %v8582_v13 = vsel %vm7292_vm1, %v5013_v57, %v5014_v54  ;;  %v8590_v41 = vsel %vm7292_vm1, %v5956_v5, %v5018_v44  ;;  %v5020_v30 = vrot.slane %v5018_v44, 4  ;;  %v5945_v49 = vrot.slane %v4875_v36, 9  ;;  %v4887_v28 = vld [vmem:[#allocation2 + $0xa8] sm:$0xe]  ;;  %v4877_v54 = vld [vmem:[#allocation2 + $0x30] sm:$0xe] }
 0x185   : > { %v5971_v38 = vcombine.low %v8576_v35, %v8582_v13  ;;  %v4943_v14 = vrot.slane %v4941_v12, 4  ;;  %v4948_v33 = vrot.slane %v6986_v29, 5  ;;  %v4567_v24 = vsel %vm7188_vm12, %v4562_v34, %v8548_v26  ;;  %v8949_v5 = vld [vmem:[#allocation10_spill] sm:$0xff]  ;;  %v4888_v50 = vld [vmem:[#allocation2 + $0xb4] sm:$0xe] }
 0x186   : > { %v8594_v11 = vsel %vm7292_vm1, %v5020_v30, %v5021_v46  ;;  %v4577_v58 = vsel %vm7188_vm12, %v4572_v9, %v4576_v56  ;;  %v4942_v42 = vsel %vm7292_vm1, %v5945_v49, %v4941_v12  ;;  %v4955_v48 = vrot.slane %v8949_v5, 5  ;;  %v6987_v34 = vld [vmem:[#allocation2 + $0x2c] sm:$0x1] }
 0x187   : > { %6419 = vmatmul.mubr.msk.bf16.gmra.mrb[4].mxu1 %vm1267_vm13, %v6929_v10  ;;  %v6985_v10 = vld [vmem:[#allocation2 + $0x20] sm:$0x1]  ;;  %v5946_v44 = vrot.slane %v4876_v53, 9  ;;  %v5957_v36 = vrot.slane %v4887_v28, 9  ;;  %v5025_v46 = vrot.slane %v8329_v0, 5  ;;  %v5028_v26 = vrot.slane %v8342_v43, 5 }
 0x188   : > { %6422 = vmatprep.mubr.msk.bf16.mxu1 %vm1267_vm13, %v6930_v25  ;;  %v4944_v45 = vrot.slane %v6985_v10, 5  ;;  %v5972_v25 = vcombine.low %v8590_v41, %v8594_v11  ;;  %v4951_v12 = vrot.slane %v6987_v34, 5  ;;  %v5947_v9 = vrot.slane %v4877_v54, 9  ;;  %v6934_v29 = vld [vmem:[#allocation2 + $0x6c] sm:$0xff]   ;;  %v8951_v28 = vld [vmem:[#allocation11_spill] sm:$0xff] }
 0x189   : > { %6575 = vmatmul.mubr.msk.bf16.gmra.mrb[24].mxu0 %vm1267_vm13, %v5925_v31  ;;  %v5927_v31 = vcombine.low %v4567_v24, %v4577_v58  ;;  %v8616_v30 = vsel %vm7292_vm1, %v5957_v36, %v5025_v46  ;;  %v5027_v49 = vrot.slane %v5025_v46, 4  ;;  %v4957_v10 = vrot.slane %v4955_v48, 4 }
 0x18a   : > { %6578 = vmatprep.mubr.msk.bf16.mxu0 %vm1267_vm13, %v5926_v32  ;;  %v4945_v57 = vsel %vm7292_vm1, %v4943_v14, %v4944_v45  ;;  %v4950_v32 = vrot.slane %v4948_v33, 4  ;;  %v5958_v14 = vrot.slane %v4888_v50, 9  ;;  %v8950_v45 = vld [vmem:[#allocation12_spill] sm:$0xff]  ;;  %v5032_v0 = vrot.slane %v8357_v17, 5 }
 0x18b   : > { %v5961_v56 = vcombine.low %v4942_v42, %v4945_v57  ;;  %v5035_v43 = vrot.slane %v8447_v21, 5  ;;  %v8623_v53 = vsel %vm7292_vm1, %v5027_v49, %v5028_v26  ;;  %v4962_v24 = vrot.slane %v8951_v28, 5  ;;  %v4878_v57 = vld [vmem:[#allocation2 + $0x3c] sm:$0xe]  ;;  %v4890_v49 = vld [vmem:[#allocation2 + $0xcc] sm:$0xe] }
 0x18c   : > { %v5973_v58 = vcombine.low %v8616_v30, %v8623_v53  ;;  %v8631_v54 = vsel %vm7292_vm1, %v5958_v14, %v5032_v0  ;;  %v5034_v17 = vrot.slane %v5032_v0, 4  ;;  %v4949_v21 = vsel %vm7292_vm1, %v5946_v44, %v4948_v33  ;;  %v4889_v33 = vld [vmem:[#allocation2 + $0xc0] sm:$0xe]  ;;  %v6935_v14 = vld [vmem:[#allocation2 + $0x78] sm:$0xff]  }
 0x18d   : > { %v4952_v42 = vsel %vm7292_vm1, %v4950_v32, %v4951_v12  ;;  %v4956_v5 = vsel %vm7292_vm1, %v5947_v9, %v4955_v48  ;;  %v5948_v26 = vrot.slane %v4878_v57, 9  ;;  %v8952_v32 = vld [vmem:[#allocation13_spill] sm:$0xff]  ;;  %v2614_v12 = vld [vmem:[#allocation2 + $0x6c] sm:$0xf]  ;;  %v5959_v9 = vrot.slane %v4889_v33, 9 }
 0x18e   : > { %v8644_v36 = vsel %vm7292_vm1, %v5034_v17, %v5035_v43  ;;  %v5962_v44 = vcombine.low %v4949_v21, %v4952_v42  ;;  %v4965_v48 = vrot.slane %v8952_v32, 5  ;;  %v2831_v0 = vshrl.u32 %v2614_v12, 16  ;;  %v6988_v17 = vld [vmem:[#allocation2 + $0x70] sm:$0xf] }
 0x18f   : > { %6423 = vmatmul.mubr.msk.bf16.gmra.mrb[8].mxu1 %vm1267_vm13, %v6931_v4  ;;  %v4958_v4 = vrot.slane %v8950_v45, 5  ;;  %v5974_v46 = vcombine.low %v8631_v54, %v8644_v36  ;;  %v4963_v45 = vsel %vm7292_vm1, %v5948_v26, %v4962_v24  ;;  %v5960_v28 = vrot.slane %v4890_v49, 9 }
 0x190   : > { %6426 = vmatprep.mubr.msk.bf16.mxu1 %vm1267_vm13, %v6932_v23  ;;  %v6933_v23 = vld [vmem:[#allocation2 + $0x60] sm:$0xff]   ;;  %v2840_v21 = vshll.u32 %v6988_v17, 16  ;;  %v2844_v42 = vshrl.u32 %v6988_v17, 16  ;;  %v5049_v57 = vrot.slane %v8558_v59, 5  ;;  %v2898_v55 = vshll.u32 %v6991_v27, 16 }
 0x191   : > { %6579 = vmatmul.mubr.msk.bf16.gmra.mrb[28].mxu0 %vm1267_vm13, %v5927_v31  ;;  %v4959_v50 = vsel %vm7292_vm1, %v4957_v10, %v4958_v4  ;;  %v4964_v31 = vrot.slane %v4962_v24, 4  ;;  %v6936_v10 = vld [vmem:[#allocation2 + $0x84] sm:$0xff]   ;;  %v5046_v24 = vrot.slane %v8505_v7, 5  ;;  %v2833_v7 = vrot.slane %v2831_v0, 4  ;;  %v2632_v27 = vld [vmem:[#allocation2 + $0xb4] sm:$0xf] }
 0x192   : > { %6584 = vmatprep.mubr.msk.bf16.mxu0 %vm1267_vm13, %v5961_v56  ;;  %v5963_v34 = vcombine.low %v4956_v5, %v4959_v50  ;;  %v5039_v56 = vrot.slane %v8426_v62, 5  ;;  %v5042_v62 = vrot.slane %v8482_v16, 5  ;;  %v2842_v59 = vrot.slane %v2840_v21, 5 }
 0x193   : > { %v4966_v4 = vsel %vm7292_vm1, %v4964_v31, %v4965_v48  ;;  %v8675_v33 = vsel %vm7292_vm1, %v5960_v28, %v5046_v24  ;;  %v2846_v31 = vrot.slane %v2844_v42, 4  ;;  %v6937_v48 = vld [vmem:[#allocation2 + $0x90] sm:$0xff]  }
 0x194   : > { %v5041_v43 = vrot.slane %v5039_v56, 4  ;;  %v5964_v50 = vcombine.low %v4963_v45, %v4966_v4  ;;  %v6990_v4 = vld [vmem:[#allocation2 + $0x88] sm:$0xf] }
 0x195   : > { %v2847_v49 = vor.u32 %v2846_v31, %v2842_v59  ;;  %v2888_v0 = vshll.u32 %v6990_v4, 16 }
 0x196   : > { %v8668_v5 = vsel %vm7292_vm1, %v5041_v43, %v5042_v62  ;;  %v2892_v43 = vshrl.u32 %v6990_v4, 16  ;;  %v2623_v62 = vld [vmem:[#allocation2 + $0x90] sm:$0xf] }
 0x197   : > { %6427 = vmatmul.mubr.msk.bf16.gmra.mrb[12].mxu1 %vm1267_vm13, %v6933_v23  ;;  %v2834_v23 = vshll.u32 %v2614_v12, 16  ;;  %v6938_v12 = vld [vmem:[#allocation2 + $0x9c] sm:$0xff]   ;;  %v2848_v28 = vrot.slane %v2847_v49, 4  ;;  %v8694_v42 = vrot.slane %v2888_v0, 5 }
 0x198   : > { %6430 = vmatprep.mubr.msk.bf16.mxu1 %vm1267_vm13, %v6934_v29  ;;  %v8660_v29 = vsel %vm7292_vm1, %v5959_v9, %v5039_v56  ;;  %v2620_v9 = vld [vmem:[#allocation2 + $0x84] sm:$0xf] }
 0x199   : > { %6585 = vmatmul.mubr.msk.bf16.vlgmr.msra.gmra.mrb[0].mxu0 %vm1267_vm13, %v5962_v44  ;;  %v5975_v16 = vcombine.low %v8660_v29, %v8668_v5  ;;  %v5048_v44 = vrot.slane %v5046_v24, 4  ;;  %v2836_v26 = vrot.slane %v2834_v23, 5  ;;  %v2879_v40 = vshrl.u32 %v2620_v9, 16 }
 0x19a   : > { %6588 = vmatprep.mubr.msk.bf16.mxu0 %vm1267_vm13, %v5963_v34  ;;  %v2882_v45 = vshll.u32 %v2620_v9, 16  ;;  %v2894_v24 = vrot.slane %v2892_v43, 4 }
 0x19b   : > { %v8679_v32 = vsel %vm7292_vm1, %v5048_v44, %v5049_v57  ;;  %v2837_v56 = vor.u32 %v2836_v26, %v2833_v7  ;;  %v2903_v57 = vshrl.u32 %v2623_v62, 16  ;;  %v2626_v44 = vld [vmem:[#allocation2 + $0x9c] sm:$0xf] }
 0x19c   : > { %v5976_v34 = vcombine.low %v8675_v33, %v8679_v32  ;;  %v2884_v21 = vrot.slane %v2882_v45, 5  ;;  %v2930_v9 = vshll.u32 %v2626_v44, 16  ;;  %v2900_v45 = vrot.slane %v2898_v55, 5 }
 0x19d   : > { %v2838_v23 = vrot.slane %v2837_v56, 4  ;;  %v6993_v56 = vld [vmem:[#allocation2 + $0xa0] sm:$0xf] }
 0x19e   : > { %v2936_v49 = vshll.u32 %v6993_v56, 16  ;;  %v2940_v19 = vshrl.u32 %v6993_v56, 16 }
 0x19f   : > { %6431 = vmatmul.mubr.msk.bf16.gmra.mrb[16].mxu1 %vm1267_vm13, %v6935_v14  ;;  %v6989_v14 = vld [vmem:[#allocation2 + $0x74] sm:$0x1]  ;;  %v2843_v7 = vsel %vm7188_vm12, %v2838_v23, %v2842_v59  ;;  %v2905_v59 = vrot.slane %v2903_v57, 4  ;;  %v2932_v23 = vrot.slane %v2930_v9, 5  ;;  %v6997_v9 = vld [vmem:[#allocation2 + $0xb8] sm:$0xf] }
 0x1a0   : > { %6434 = vmatprep.mubr.msk.bf16.mxu1 %vm1267_vm13, %v6936_v10  ;;  %v2850_v10 = vshll.u32 %v6989_v14, 16  ;;  %v2984_v56 = vshll.u32 %v6997_v9, 16 }
 0x1a1   : > { %6589 = vmatmul.mubr.msk.bf16.gmra.mrb[4].mxu0 %vm1267_vm13, %v5964_v50  ;;  %v2906_v50 = vshll.u32 %v2623_v62, 16  ;;  %v8709_v62 = vrot.slane %v2936_v49, 5  ;;  %v2988_v49 = vshrl.u32 %v6997_v9, 16 }
 0x1a2   : > { %6592 = vmatprep.mubr.msk.bf16.mxu0 %vm1267_vm13, %v5965_v8  ;;  %v2852_v17 = vrot.slane %v2850_v10, 5  ;;  %v2881_v8 = vrot.slane %v2879_v40, 4  ;;  %v6941_v10 = vld [vmem:[#allocation2 + $0xc0] sm:$0xff]  }
 0x1a3   : > { %v2908_v14 = vrot.slane %v2906_v50, 5  ;;  %v6995_v50 = vld [vmem:[#allocation2 + $0xa4] sm:$0x1] }
 0x1a4   : > { %v2853_v26 = vsel %vm7188_vm12, %v2848_v28, %v2852_v17  ;;  %v2885_v1 = vor.u32 %v2884_v21, %v2881_v8  ;;  %v2942_v28 = vrot.slane %v2940_v19, 4  ;;  %v2629_v17 = vld [vmem:[#allocation2 + $0xa8] sm:$0xf]  ;;  %v6994_v21 = vld [vmem:[#allocation2 + $0x98] sm:$0x1] }
 0x1a5   : > { %v5807_v40 = vcombine.low %v2843_v7, %v2853_v26  ;;  %v2909_v8 = vor.u32 %v2908_v14, %v2905_v59  ;;  %v2951_v7 = vshrl.u32 %v2629_v17, 16  ;;  %v2954_v26 = vshll.u32 %v2629_v17, 16  ;;  %v2635_v17 = vld [vmem:[#allocation2 + $0xc0] sm:$0xf] }
 0x1a6   : > { %v2943_v6 = vor.u32 %v2942_v28, %v8709_v62  ;;  %v2990_v28 = vrot.slane %v2988_v49, 4 }
 0x1a7   : > { %6435 = vmatmul.mubr.msk.bf16.gmra.mrb[20].mxu1 %vm1267_vm13, %v6937_v48  ;;  %v2956_v59 = vrot.slane %v2954_v26, 5 }
 0x1a8   : > { %6438 = vmatprep.mubr.msk.bf16.mxu1 %vm1267_vm13, %v6938_v12  ;;  %v2927_v12 = vshrl.u32 %v2626_v44, 16  ;;  %v2946_v44 = vshll.u32 %v6995_v50, 16 }
 0x1a9   : > { %6593 = vmatmul.mubr.msk.bf16.gmra.mrb[8].mxu0 %vm1267_vm13, %v5966_v61  ;;  %v6992_v61 = vld [vmem:[#allocation2 + $0x94] sm:$0xf] }
 0x1aa   : > { %6596 = vmatprep.mubr.msk.bf16.mxu0 %vm1267_vm13, %v5967_v37  ;;  %v2912_v31 = vshll.u32 %v6992_v61, 16  ;;  %v2916_v48 = vshrl.u32 %v6992_v61, 16  ;;  %v2895_v37 = vor.u32 %v2894_v24, %v8694_v42  ;;  %v2929_v43 = vrot.slane %v2927_v12, 4 }
 0x1ab   : > { %v2922_v24 = vshll.u32 %v6994_v21, 16  ;;  %v2978_v12 = vshll.u32 %v2632_v27, 16  ;;  %v6999_v21 = vld [vmem:[#allocation2 + $0xc4] sm:$0xf] }
 0x1ac   : > { %v8707_v4 = vrot.slane %v2912_v31, 5  ;;  %v2918_v0 = vrot.slane %v2916_v48, 4  ;;  %v2933_v3 = vor.u32 %v2932_v23, %v2929_v43  ;;  %v2975_v48 = vshrl.u32 %v2632_v27, 16 }
 0x1ad   : > { %v2924_v31 = vrot.slane %v2922_v24, 5  ;;  %v2980_v43 = vrot.slane %v2978_v12, 5  ;;  %v2986_v23 = vrot.slane %v2984_v56, 5  ;;  %v3008_v24 = vshll.u32 %v6999_v21, 16  ;;  %v7001_v12 = vld [vmem:[#allocation2 + $0xc8] sm:$0x1] }
 0x1ae   : > { %v2919_v57 = vor.u32 %v2918_v0, %v8707_v4  ;;  %v2934_v14 = vrot.slane %v2933_v3, 4  ;;  %v3018_v9 = vshll.u32 %v7001_v12, 16 }
 0x1af   : > { %6439 = vmatmul.mubr.msk.bf16.gmra.mrb[24].mxu1 %vm1267_vm13, %v6939_v52  ;;  %v2886_v52 = vrot.slane %v2885_v1, 4  ;;  %v2948_v1 = vrot.slane %v2946_v44, 5  ;;  %v2991_v44 = vor.u32 %v2990_v28, %v2986_v23  ;;  %v8797_v28 = vld [vmem:[%s8863_s2] ss:$0 sm:$0xff] }
 0x1b0   : > { %6442 = vmatprep.mubr.msk.bf16.mxu1 %vm1267_vm13, %v6940_v22  ;;  %v2896_v22 = vrot.slane %v2895_v37, 4  ;;  %v2920_v19 = vrot.slane %v2919_v57, 4  ;;  %v2953_v37 = vrot.slane %v2951_v7, 4  ;;  %v2939_v35 = vsel %vm7188_vm12, %v2934_v14, %v8709_v62  ;;  %v7000_v7 = vld [vmem:[#allocation2 + $0xbc] sm:$0x1] }
 0x1b1   : > { %6597 = vmatmul.mubr.msk.bf16.gmra.mrb[12].mxu0 %vm1267_vm13, %v5968_v51  ;;  %v6996_v51 = vld [vmem:[#allocation2 + $0xac] sm:$0xf]  ;;  %v2891_v2 = vsel %vm7188_vm12, %v2886_v52, %v8694_v42  ;;  %v3012_v57 = vshrl.u32 %v6999_v21, 16 }
 0x1b2   : > { %6600 = vmatprep.mubr.msk.bf16.mxu0 %vm1267_vm13, %v5969_v18  ;;  %v2960_v55 = vshll.u32 %v6996_v51, 16  ;;  %v2964_v61 = vshrl.u32 %v6996_v51, 16  ;;  %v2901_v47 = vsel %vm7188_vm12, %v2896_v22, %v2900_v45  ;;  %v2910_v18 = vrot.slane %v2909_v8, 4 }
 0x1b3   : > { %v5809_v42 = vcombine.low %v2891_v2, %v2901_v47  ;;  %v2977_v45 = vrot.slane %v2975_v48, 4  ;;  %v2925_v39 = vsel %vm7188_vm12, %v2920_v19, %v2924_v31  ;;  %v3002_v8 = vshll.u32 %v2635_v17, 16 }
 0x1b4   : > { %v2966_v0 = vrot.slane %v2964_v61, 4  ;;  %v2915_v52 = vsel %vm7188_vm12, %v2910_v18, %v8707_v4  ;;  %v2999_v4 = vshrl.u32 %v2635_v17, 16  ;;  %v3010_v61 = vrot.slane %v3008_v24, 5 }
 0x1b5   : > { %v2981_v50 = vor.u32 %v2980_v43, %v2977_v45  ;;  %v5810_v26 = vcombine.low %v2915_v52, %v2925_v39  ;;  %v3014_v2 = vrot.slane %v3012_v57, 4  ;;  %v2992_v18 = vrot.slane %v2991_v44, 4 }
 0x1b6   : > { %v3001_v51 = vrot.slane %v2999_v4, 4 }
 0x1b7   : > { %6443 = vmatmul.mubr.msk.bf16.gmra.mrb[28].mxu1 %vm1267_vm13, %v6941_v10  ;;  %v2944_v10 = vrot.slane %v2943_v6, 4  ;;  %v2982_v47 = vrot.slane %v2981_v50, 4 }
 0x1b8   : > { %6464 = vmatprep.mubr.msk.bf16.mxu1 %vm1267_vm13, %v5807_v40  ;;  %v2962_v40 = vrot.slane %v2960_v55, 5  ;;  %v3004_v55 = vrot.slane %v3002_v8, 5 }
 0x1b9   : > { %6601 = vmatmul.mubr.msk.bf16.gmra.mrb[16].mxu0 %vm1267_vm13, %v5970_v15  ;;  %v2970_v15 = vshll.u32 %v6998_v63, 16  ;;  %v2949_v13 = vsel %vm7188_vm12, %v2944_v10, %v2948_v1  ;;  %v2987_v30 = vsel %vm7188_vm12, %v2982_v47, %v2986_v23  ;;  %v3020_v1 = vrot.slane %v3018_v9, 5 }
 0x1ba   : > { %6604 = vmatprep.mubr.msk.bf16.mxu0 %vm1267_vm13, %v5971_v38  ;;  %v2957_v38 = vor.u32 %v2956_v59, %v2953_v37  ;;  %v2967_v22 = vor.u32 %v2966_v0, %v2962_v40  ;;  %v5811_v27 = vcombine.low %v2939_v35, %v2949_v13  ;;  %v3005_v11 = vor.u32 %v3004_v55, %v3001_v51 }
 0x1bb   : > { %v2972_v6 = vrot.slane %v2970_v15, 5 }
 0x1bc   : > { %v2958_v3 = vrot.slane %v2957_v38, 4  ;;  %v2968_v62 = vrot.slane %v2967_v22, 4  ;;  %v3006_v49 = vrot.slane %v3005_v11, 4 }
 0x1be   : > { %v2963_v48 = vsel %vm7188_vm12, %v2958_v3, %v2962_v40  ;;  %v2973_v41 = vsel %vm7188_vm12, %v2968_v62, %v2972_v6  ;;  %v3011_v37 = vsel %vm7188_vm12, %v3006_v49, %v3010_v61 }
 0x1bf   : > { %6465 = vmatmul.mubr.msk.bf16.vlgmr.msra.gmra.mrb[16].mxu1 %vm1267_vm13, %v8541_v20  ;;  %v2994_v20 = vshll.u32 %v7000_v7, 16 }
 0x1c0   : > { %6468 = vmatprep.mubr.msk.bf16.mxu1 %vm1267_vm13, %v5809_v42 }
 0x1c1   : > { %6605 = vmatmul.mubr.msk.bf16.gmra.mrb[20].mxu0 %vm1267_vm13, %v5972_v25  ;;  %v2996_v31 = vrot.slane %v2994_v20, 5  ;;  %v3015_v25 = vor.u32 %v3014_v2, %v3010_v61 }
 0x1c2   : > { %6608 = vmatprep.mubr.msk.bf16.mxu0 %vm1267_vm13, %v5973_v58  ;;  %v5812_v58 = vcombine.low %v2963_v48, %v2973_v41 }
 0x1c3   : > { %v2997_v53 = vsel %vm7188_vm12, %v2992_v18, %v2996_v31  ;;  %v3016_v19 = vrot.slane %v3015_v25, 4 }
 0x1c4   : > { %v5813_v56 = vcombine.low %v2987_v30, %v2997_v53 }
 0x1c5   : > { %v3021_v54 = vsel %vm7188_vm12, %v3016_v19, %v3020_v1 }
 0x1c6   : > { %v5814_v36 = vcombine.low %v3011_v37, %v3021_v54 }
 0x1c7   : > { %6469 = vmatmul.mubr.msk.bf16.gmra.mrb[20].mxu1 %vm1267_vm13, %v5810_v26 }
 0x1c8   : > { %6472 = vmatprep.mubr.msk.bf16.mxu1 %vm1267_vm13, %v5811_v27 }
 0x1c9   : > { %6609 = vmatmul.mubr.msk.bf16.gmra.mrb[24].mxu0 %vm1267_vm13, %v5974_v46 }
 0x1ca   : > { %6612 = vmatprep.mubr.msk.bf16.mxu0 %vm1267_vm13, %v5975_v16 }
 0x1cf   : > { %6473 = vmatmul.mubr.msk.bf16.gmra.mrb[24].mxu1 %vm1267_vm13, %v5812_v58 }
 0x1d0   : > { %6476 = vmatprep.mubr.msk.bf16.mxu1 %vm1267_vm13, %v5813_v56 }
 0x1d1   : > { %6613 = vmatmul.mubr.msk.bf16.gmra.mrb[28].mxu0 %vm1267_vm13, %v5976_v34 }
 0x1d7   : > { %6477 = vmatmul.mubr.msk.bf16.gmra.mrb[28].mxu1 %vm1267_vm13, %v5814_v36 }
 0x252   : > { %v6416_v46 = vpop.f32.mrb[0].mxu1 }
 0x253   : > { %v2431_v29 = vpop.f32.mrb[1].mxu1 }
 0x254   : > { %v6417_v5 = vpop.f32.mrb[2].mxu1 }
 0x255   : > { %v2434_v16 = vpop.f32.mrb[3].mxu1 }
 0x25a   : > { %v6420_v59 = vpop.f32.mrb[4].mxu1 }
 0x25b   : > { %v2447_v14 = vpop.f32.mrb[5].mxu1 }
 0x25c   : > { %v6421_v10 = vpop.f32.mrb[6].mxu1 }
 0x25d   : > { %v2450_v40 = vpop.f32.mrb[7].mxu1 }
 0x262   : > { %v6424_v0 = vpop.f32.mrb[8].mxu1 }
 0x263   : > { %v2463_v42 = vpop.f32.mrb[9].mxu1 }
 0x264   : > { %v6425_v60 = vpop.f32.mrb[10].mxu1 }
 0x265   : > { %v2466_v45 = vpop.f32.mrb[11].mxu1 }
 0x26a   : > { %v8786_v43 = vpop.f32.mrb[12].mxu1 }
 0x26b   : > { %v8788_v23 = vpop.f32.mrb[13].mxu1 }
 0x26c   : > { %v8790_v33 = vpop.f32.mrb[14].mxu1  ;;  %v6586_v34 = vpop.f32.mrb[0].mxu0 }
 0x26d   : > { %v8792_v32 = vpop.f32.mrb[15].mxu1  ;;  %v6618_v17 = vadd.f32 %v6586_v34, %v6416_v46  ;;  %v5185_v52 = vpop.f32.mrb[1].mxu0 }
 0x26e   : > { %v6619_v39 = vadd.f32 %v5185_v52, %v2431_v29  ;;  %v6587_v63 = vpop.f32.mrb[2].mxu0 }
 0x26f   : > { %v5353_v15 = vadd.f32 %v6618_v17, %v8797_v28  ;;  %v6620_v35 = vadd.f32 %v6587_v63, %v6417_v5  ;;  %v5188_v13 = vpop.f32.mrb[3].mxu0 }
 0x270   : > { %v5351_v38 = vadd.f32 %v6619_v39, %v8797_v28  ;;  %v6621_v22 = vadd.f32 %v5188_v13, %v2434_v16 }
 0x271   : > { %v5354_v4 = vadd.f32 %v6620_v35, %v8797_v28  ;;  %v5385_v21 = vmax.f32 %v5353_v15, 0.0 }
 0x272   : > { %v5352_v8 = vadd.f32 %v6621_v22, %v8797_v28  ;;  %v5383_v57 = vmax.f32 %v5351_v38, 0.0 }
 0x273   : > { %v5386_v24 = vmax.f32 %v5354_v4, 0.0 }
 0x274   : > { %v5384_v50 = vmax.f32 %v5352_v8, 0.0  ;;  %v6590_v44 = vpop.f32.mrb[4].mxu0 }
 0x275   : > { %v6070_v7 = vpack.c.bf16 %v5386_v24, %v5385_v21  ;;  %v6622_v20 = vadd.f32 %v6590_v44, %v6420_v59  ;;  %v5201_v26 = vpop.f32.mrb[5].mxu0 }
 0x276   : > { %v6065_v27 = vpack.c.bf16 %v5384_v50, %v5383_v57  ;;  %v6623_v3 = vadd.f32 %v5201_v26, %v2447_v14  ;;  %v6591_v62 = vpop.f32.mrb[6].mxu0 }
 0x277   : > { %6142 = vst [vmem:[%s8808_s11 + $0x8] sm:$0xff] %v6070_v7   ;;  %v5357_v6 = vadd.f32 %v6622_v20, %v8797_v28  ;;  %v6624_v51 = vadd.f32 %v6591_v62, %v6421_v10  ;;  %v5204_v55 = vpop.f32.mrb[7].mxu0 }
 0x278   : > { %6066 = vst [vmem:[%s8808_s11] sm:$0xff] %v6065_v27   ;;  %v5355_v61 = vadd.f32 %v6623_v3, %v8797_v28  ;;  %v6625_v2 = vadd.f32 %v5204_v55, %v2450_v40 }
 0x279   : > { %v5358_v47 = vadd.f32 %v6624_v51, %v8797_v28  ;;  %v5389_v31 = vmax.f32 %v5357_v6, 0.0 }
 0x27a   : > { %v5356_v18 = vadd.f32 %v6625_v2, %v8797_v28  ;;  %v5387_v41 = vmax.f32 %v5355_v61, 0.0 }
 0x27b   : > { %v5390_v48 = vmax.f32 %v5358_v47, 0.0 }
 0x27c   : > { %v5388_v11 = vmax.f32 %v5356_v18, 0.0  ;;  %v6594_v25 = vpop.f32.mrb[8].mxu0 }
 0x27d   : > { %v6080_v12 = vpack.c.bf16 %v5390_v48, %v5389_v31  ;;  %v6626_v9 = vadd.f32 %v6594_v25, %v6424_v0  ;;  %v5217_v30 = vpop.f32.mrb[9].mxu0 }
 0x27e   : > { %v6075_v53 = vpack.c.bf16 %v5388_v11, %v5387_v41  ;;  %v6627_v58 = vadd.f32 %v5217_v30, %v2463_v42  ;;  %v6595_v56 = vpop.f32.mrb[10].mxu0 }
 0x27f   : > { %6144 = vst [vmem:[%s8808_s11 + $0x18] sm:$0xff] %v6080_v12   ;;  %v5361_v49 = vadd.f32 %v6626_v9, %v8797_v28  ;;  %v6628_v19 = vadd.f32 %v6595_v56, %v6425_v60  ;;  %v5220_v1 = vpop.f32.mrb[11].mxu0 }
 0x280   : > { %6143 = vst [vmem:[%s8808_s11 + $0x10] sm:$0xff] %v6075_v53   ;;  %v5359_v37 = vadd.f32 %v6627_v58, %v8797_v28  ;;  %v6629_v54 = vadd.f32 %v5220_v1, %v2466_v45 }
 0x281   : > { %v5362_v36 = vadd.f32 %v6628_v19, %v8797_v28  ;;  %v5393_v29 = vmax.f32 %v5361_v49, 0.0 }
 0x282   : > { %v5360_v46 = vadd.f32 %v6629_v54, %v8797_v28  ;;  %v5391_v16 = vmax.f32 %v5359_v37, 0.0 }
 0x283   : > { %v5394_v5 = vmax.f32 %v5362_v36, 0.0 }
 0x284   : > { %v5392_v59 = vmax.f32 %v5360_v46, 0.0  ;;  %v6598_v14 = vpop.f32.mrb[12].mxu0 }
 0x285   : > { %v6090_v10 = vpack.c.bf16 %v5394_v5, %v5393_v29  ;;  %v6630_v40 = vadd.f32 %v6598_v14, %v8786_v43  ;;  %v5233_v0 = vpop.f32.mrb[13].mxu0 }
 0x286   : > { %v6085_v42 = vpack.c.bf16 %v5392_v59, %v5391_v16  ;;  %v6631_v60 = vadd.f32 %v5233_v0, %v8788_v23  ;;  %v6599_v34 = vpop.f32.mrb[14].mxu0 }
 0x287   : > { %6146 = vst [vmem:[%s8808_s11 + $0x28] sm:$0xff] %v6090_v10   ;;  %v5365_v45 = vadd.f32 %v6630_v40, %v8797_v28  ;;  %v6632_v17 = vadd.f32 %v6599_v34, %v8790_v33  ;;  %v5236_v52 = vpop.f32.mrb[15].mxu0 }
 0x288   : > { %6145 = vst [vmem:[%s8808_s11 + $0x20] sm:$0xff] %v6085_v42   ;;  %v5363_v39 = vadd.f32 %v6631_v60, %v8797_v28  ;;  %v6633_v63 = vadd.f32 %v5236_v52, %v8792_v32 }
 0x289   : > { %v5366_v43 = vadd.f32 %v6632_v17, %v8797_v28  ;;  %v5397_v35 = vmax.f32 %v5365_v45, 0.0 }
 0x28a   : > { %v5364_v15 = vadd.f32 %v6633_v63, %v8797_v28  ;;  %v5395_v13 = vmax.f32 %v5363_v39, 0.0 }
 0x28b   : > { %v5398_v23 = vmax.f32 %v5366_v43, 0.0 }
 0x28c   : > { %v5396_v38 = vmax.f32 %v5364_v15, 0.0  ;;  %v6602_v22 = vpop.f32.mrb[16].mxu0 }
 0x28d   : > { %v6100_v4 = vpack.c.bf16 %v5398_v23, %v5397_v35  ;;  %v5249_v8 = vpop.f32.mrb[17].mxu0 }
 0x28e   : > { %v6095_v33 = vpack.c.bf16 %v5396_v38, %v5395_v13  ;;  %v6603_v21 = vpop.f32.mrb[18].mxu0 }
 0x28f   : > { %6148 = vst [vmem:[%s8808_s11 + $0x38] sm:$0xff] %v6100_v4   ;;  %v5252_v57 = vpop.f32.mrb[19].mxu0 }
 0x290   : > { %6147 = vst [vmem:[%s8808_s11 + $0x30] sm:$0xff] %v6095_v33  }
 0x292   : > { %v6466_v24 = vpop.f32.mrb[16].mxu1 }
 0x293   : > { %v3220_v50 = vpop.f32.mrb[17].mxu1  ;;  %v6634_v44 = vadd.f32 %v6602_v22, %v6466_v24 }
 0x294   : > { %v6467_v32 = vpop.f32.mrb[18].mxu1  ;;  %v6635_v7 = vadd.f32 %v5249_v8, %v3220_v50  ;;  %v6606_v51 = vpop.f32.mrb[20].mxu0 }
 0x295   : > { %v5369_v20 = vadd.f32 %v6634_v44, %v8797_v28  ;;  %v3223_v26 = vpop.f32.mrb[19].mxu1  ;;  %v6636_v27 = vadd.f32 %v6603_v21, %v6467_v32  ;;  %v5265_v61 = vpop.f32.mrb[21].mxu0 }
 0x296   : > { %v5367_v3 = vadd.f32 %v6635_v7, %v8797_v28  ;;  %v6637_v62 = vadd.f32 %v5252_v57, %v3223_v26  ;;  %v6607_v18 = vpop.f32.mrb[22].mxu0 }
 0x297   : > { %v5370_v6 = vadd.f32 %v6636_v27, %v8797_v28  ;;  %v5401_v2 = vmax.f32 %v5369_v20, 0.0  ;;  %v5268_v11 = vpop.f32.mrb[23].mxu0 }
 0x298   : > { %v5368_v55 = vadd.f32 %v6637_v62, %v8797_v28  ;;  %v5399_v31 = vmax.f32 %v5367_v3, 0.0 }
 0x299   : > { %v5402_v47 = vmax.f32 %v5370_v6, 0.0 }
 0x29a   : > { %v5400_v48 = vmax.f32 %v5368_v55, 0.0  ;;  %v6470_v41 = vpop.f32.mrb[20].mxu1 }
 0x29b   : > { %v6110_v25 = vpack.c.bf16 %v5402_v47, %v5401_v2  ;;  %v3236_v12 = vpop.f32.mrb[21].mxu1  ;;  %v6638_v9 = vadd.f32 %v6606_v51, %v6470_v41 }
 0x29c   : > { %v6105_v30 = vpack.c.bf16 %v5400_v48, %v5399_v31  ;;  %v6471_v53 = vpop.f32.mrb[22].mxu1  ;;  %v6639_v58 = vadd.f32 %v5265_v61, %v3236_v12  ;;  %v6610_v36 = vpop.f32.mrb[24].mxu0 }
 0x29d   : > { %6150 = vst [vmem:[%s8808_s11 + $0x48] sm:$0xff] %v6110_v25   ;;  %v5373_v56 = vadd.f32 %v6638_v9, %v8797_v28  ;;  %v3239_v49 = vpop.f32.mrb[23].mxu1  ;;  %v6640_v19 = vadd.f32 %v6607_v18, %v6471_v53  ;;  %v5281_v29 = vpop.f32.mrb[25].mxu0 }
 0x29e   : > { %6149 = vst [vmem:[%s8808_s11 + $0x40] sm:$0xff] %v6105_v30   ;;  %v5371_v1 = vadd.f32 %v6639_v58, %v8797_v28  ;;  %v6641_v37 = vadd.f32 %v5268_v11, %v3239_v49  ;;  %v6611_v59 = vpop.f32.mrb[26].mxu0 }
 0x29f   : > { %v5374_v54 = vadd.f32 %v6640_v19, %v8797_v28  ;;  %v5405_v5 = vmax.f32 %v5373_v56, 0.0  ;;  %v5284_v0 = vpop.f32.mrb[27].mxu0 }
 0x2a0   : > { %v5372_v46 = vadd.f32 %v6641_v37, %v8797_v28  ;;  %v5403_v14 = vmax.f32 %v5371_v1, 0.0 }
 0x2a1   : > { %v5406_v16 = vmax.f32 %v5374_v54, 0.0 }
 0x2a2   : > { %v5404_v10 = vmax.f32 %v5372_v46, 0.0  ;;  %v6474_v40 = vpop.f32.mrb[24].mxu1 }
 0x2a3   : > { %v6120_v42 = vpack.c.bf16 %v5406_v16, %v5405_v5  ;;  %v3252_v60 = vpop.f32.mrb[25].mxu1  ;;  %v6642_v34 = vadd.f32 %v6610_v36, %v6474_v40 }
 0x2a4   : > { %v6115_v45 = vpack.c.bf16 %v5404_v10, %v5403_v14  ;;  %v6475_v17 = vpop.f32.mrb[26].mxu1  ;;  %v6643_v52 = vadd.f32 %v5281_v29, %v3252_v60  ;;  %v6614_v13 = vpop.f32.mrb[28].mxu0 }
 0x2a5   : > { %6152 = vst [vmem:[%s8808_s11 + $0x58] sm:$0xff] %v6120_v42   ;;  %v5377_v39 = vadd.f32 %v6642_v34, %v8797_v28  ;;  %v3255_v63 = vpop.f32.mrb[27].mxu1  ;;  %v6644_v43 = vadd.f32 %v6611_v59, %v6475_v17  ;;  %v5297_v22 = vpop.f32.mrb[29].mxu0 }
 0x2a6   : > { %6151 = vst [vmem:[%s8808_s11 + $0x50] sm:$0xff] %v6115_v45   ;;  %v5375_v15 = vadd.f32 %v6643_v52, %v8797_v28  ;;  %v6645_v35 = vadd.f32 %v5284_v0, %v3255_v63  ;;  %v6615_v33 = vpop.f32.mrb[30].mxu0 }
 0x2a7   : > { %v5378_v23 = vadd.f32 %v6644_v43, %v8797_v28  ;;  %v5409_v4 = vmax.f32 %v5377_v39, 0.0  ;;  %v5300_v50 = vpop.f32.mrb[31].mxu0 }
 0x2a8   : > { %v5376_v38 = vadd.f32 %v6645_v35, %v8797_v28  ;;  %v5407_v21 = vmax.f32 %v5375_v15, 0.0 }
 0x2a9   : > { %v5410_v8 = vmax.f32 %v5378_v23, 0.0 }
 0x2aa   : > { %v5408_v24 = vmax.f32 %v5376_v38, 0.0  ;;  %v6478_v57 = vpop.f32.mrb[28].mxu1 }
 0x2ab   : > { %v6130_v44 = vpack.c.bf16 %v5410_v8, %v5409_v4  ;;  %v3268_v32 = vpop.f32.mrb[29].mxu1  ;;  %v6646_v7 = vadd.f32 %v6614_v13, %v6478_v57 }
 0x2ac   : > { %v6125_v20 = vpack.c.bf16 %v5408_v24, %v5407_v21  ;;  %v6479_v26 = vpop.f32.mrb[30].mxu1  ;;  %v6647_v27 = vadd.f32 %v5297_v22, %v3268_v32 }
 0x2ad   : > { %6154 = vst [vmem:[%s8808_s11 + $0x68] sm:$0xff] %v6130_v44   ;;  %v5381_v3 = vadd.f32 %v6646_v7, %v8797_v28  ;;  %v3271_v62 = vpop.f32.mrb[31].mxu1  ;;  %v6648_v6 = vadd.f32 %v6615_v33, %v6479_v26 }
 0x2ae   : > { %6153 = vst [vmem:[%s8808_s11 + $0x60] sm:$0xff] %v6125_v20   ;;  %v5379_v51 = vadd.f32 %v6647_v27, %v8797_v28  ;;  %v6649_v55 = vadd.f32 %v5300_v50, %v3271_v62 }
 0x2af   : > { %v5382_v61 = vadd.f32 %v6648_v6, %v8797_v28  ;;  %v5413_v47 = vmax.f32 %v5381_v3, 0.0 }
 0x2b0   : > { %v5380_v2 = vadd.f32 %v6649_v55, %v8797_v28  ;;  %v5411_v31 = vmax.f32 %v5379_v51, 0.0 }
 0x2b1   : > { %v5414_v18 = vmax.f32 %v5382_v61, 0.0 }
 0x2b2   : > { %v5412_v48 = vmax.f32 %v5380_v2, 0.0 }
 0x2b3   : > { %v6140_v41 = vpack.c.bf16 %v5414_v18, %v5413_v47 }
 0x2b4   : > { %v6135_v11 = vpack.c.bf16 %v5412_v48, %v5411_v31 }
 0x2b5   : > { %6156 = vst [vmem:[%s8808_s11 + $0x78] sm:$0xff] %v6140_v41  }
 0x2b6   : > { %6155 = vst [vmem:[%s8808_s11 + $0x70] sm:$0xff] %v6135_v11  }
 0x2b7 PF: > { %s14_s12 = sadd.s32 1, %s7040_s12  }
 0x2b8   : > { %p11_p3 = scmp.ge.s32.totalorder %s14_s12, 4  }
 0x2ba   :  { %13 = sbr.rel (!%p11_p3) target bundleno = 1 (0x1), region = 70 }
 0x2c1   :  { %5596 = vsyncpa [#allocation4], 1 }
 0x2c2   :  { %5598 = vsyncpa [#allocation4 + $0x1], 1 }

// kernel: _lambda_.4
= control target key start
LH: loop header
LB: loop body
LE: loop exit
PB: predicated region body
PF: predicated region fallthrough
CT: control target
= control target key end

     0   :  { %s8863_s12 = smov 0   ;;  %s11059_s0 = inlined_call_operand.vmem [shape: bf16[2,16,16,128], index: 0, kind: input, shape index: {}]   ;;  %s11060_s1 = inlined_call_operand.vmem [shape: bf16[1152,128], index: 1, kind: input, shape index: {}]   ;;  %s11061_s2 = inlined_call_operand.vmem [shape: f32[1,128], index: 2, kind: input, shape index: {}]   ;;  %s11062_s3 = inlined_call_operand.vmem [shape: bf16[2,8,8,128], index: 3, kind: output, shape index: {}]  }
   0x1 LB: > { %s7238_s13 = sadd.s32 4294967295, %s8839_s12   ;;  %p7242_p0 = scmp.ge.s32.totalorder %s8839_s12, 1  ;;  %s8839_s12 = sphi %s8863_s12, %s13_s12  }
   0x2   : > { %p137_p1 = scmp.lt.s32.totalorder %s8839_s12, 3 }
   0x4   : > { %p138_p2 = pnand %p7242_p0, %p137_p1 }
   0x6   : > { %141 = sbr.rel (%p138_p2) target bundleno = 780 (0x30c), region = 32 }
   0xd   : > { %v8638_v0 = vld [vmem:[%s11060_s1 + $0x40] sm:$0xff]   ;;  %v8841_v2 = vmov 0   ;;  %v8640_v3 = vld [vmem:[%s11060_s1 + $0x48] sm:$0xff]   ;;  %v8642_v5 = vld [vmem:[%s11060_s1 + $0x50] sm:$0xff]   ;;  %p161_p3 = scmp.lt.s32.totalorder %s7238_s13, 1  ;;  %vm179_vm0 = vcmask 1040384  }
   0xe   : > { %v8639_v1 = vld [vmem:[%s11060_s1 + $0x100] sm:$0xff]   ;;  %172 = vst [vmem:[#allocation2] sm:$0xf] %v8841_v2  ;;  %173 = vst [vmem:[#allocation2 + $0x4] sm:$0xf] %v8841_v2  ;;  %7924 = vmatprep.subr.bf16.mxu1 %v8638_v0  ;;  %v8641_v4 = vld [vmem:[%s11060_s1 + $0x108] sm:$0xff]  }
   0xf   : > { %174 = vst [vmem:[#allocation2 + $0x8] sm:$0x1] %v8841_v2  ;;  %176 = vst [vmem:[#allocation2 + $0xcc] sm:$0xf] %v8841_v2  ;;  %8116 = vmatprep.subr.bf16.mxu0 %v8639_v1  ;;  %7925 = vmatpush3.bf16.msra.mxu1 %v8638_v0  ;;  %v8643_v6 = vld [vmem:[%s11060_s1 + $0x110] sm:$0xff]   ;;  %v8644_v7 = vld [vmem:[%s11060_s1 + $0x58] sm:$0xff]  }
  0x10   : > { %177 = vst [vmem:[#allocation2 + $0xd0] sm:$0xf] %v8841_v2  ;;  %178 = vst [vmem:[#allocation2 + $0xd4] sm:$0x1] %v8841_v2  ;;  %8117 = vmatpush3.bf16.msra.mxu0 %v8639_v1  ;;  %7926 = vmatprep.subr.bf16.mxu1 %v8640_v3  ;;  %v8645_v8 = vld [vmem:[%s11060_s1 + $0x118] sm:$0xff]   ;;  %s11179_s13 = smov (!%p161_p3, %s7238_s13), 1 }
  0x11   : > { %8118 = vmatprep.subr.bf16.mxu0 %v8641_v4  ;;  %v8646_v9 = vld [vmem:[%s11060_s1 + $0x60] sm:$0xff]   ;;  %v8648_v11 = vld [vmem:[%s11060_s1 + $0x68] sm:$0xff]   ;;  %s7642_s9 = sshll.u32 %s11179_s13, 7  ;;  %vm180_vm1 = vsmask.f32 256  ;;  %v8650_v17 = vld [vmem:[%s11060_s1 + $0x70] sm:$0xff]  }
  0x12   : > { %v8647_v10 = vld [vmem:[%s11060_s1 + $0x120] sm:$0xff]   ;;  %v8649_v12 = vld [vmem:[%s11060_s1 + $0x128] sm:$0xff]   ;;  %vm236_vm2 = vsmask.f32 7938  ;;  %vm8916_vm3 = vmand %vm179_vm0, %vm180_vm1  ;;  %s8923_s16 = scalar_lea.vmem %s11059_s0, %s7642_s9  ;;  %vm647_vm5 = vcmask 1043456   ;;  %vm1854_vm12 = vcmask 1042432  }
  0x13   : > { %7927 = vmatpush3.bf16.msra.mxu1 %v8640_v3  ;;  %vm8932_vm4 = vmand %vm179_vm0, %vm236_vm2  ;;  %v8651_v22 = vld [vmem:[%s11060_s1 + $0x130] sm:$0xff]   ;;  %vm825_vm6 = vsmask.f32 3328  ;;  %v185_v24 = vld [vmem:[#allocation2 + $0xc] sm:$0x1]  ;;  %vm1855_vm13 = vcmask 1046532  }
  0x14   : > { %8119 = vmatpush3.bf16.msra.mxu0 %v8641_v4  ;;  %7928 = vmatprep.subr.bf16.mxu1 %v8642_v5  ;;  %v241_v25 = vld [vmem:[#allocation2 + $0x14] sm:$0x1]  ;;  %v186_v28 = vsel %vm8916_vm3, 0, %v185_v24  ;;  %v292_v30 = vld [vmem:[%s8923_s16] sm:$0xf]  ;;  %v8652_v36 = vld [vmem:[%s11060_s1 + $0x78] sm:$0xff]  }
  0x15   : > { %8120 = vmatprep.subr.bf16.mxu0 %v8643_v6  ;;  %v182_v13 = vld [vmem:[#allocation2] sm:$0x1]  ;;  %v762_v16 = vld [vmem:[#allocation2 + $0x4] sm:$0xf]  ;;  %v242_v29 = vsel %vm8932_vm4, 0, %v241_v25  ;;  %v327_v32 = vshrl.u32 %v292_v30, 16  ;;  %vm8970_vm10 = vmand %vm647_vm5, %vm236_vm2 }
  0x16   : > { %v238_v15 = vld [vmem:[#allocation2 + $0x8] sm:$0x1]  ;;  %v183_v18 = vsel %vm8916_vm3, 0, %v182_v13  ;;  %v838_v20 = vshll.u32 %v762_v16, 16  ;;  %v842_v21 = vshrl.u32 %v762_v16, 16  ;;  %v330_v33 = vshll.u32 %v292_v30, 16  ;;  %vm9111_vm14 = vmor %vm1854_vm12, %vm1855_vm13 }
  0x17   : > { %7929 = vmatpush3.bf16.msra.mxu1 %v8642_v5  ;;  %184 = vst [vmem:[#allocation2] sm:$0x1] %v183_v18  ;;  %v239_v23 = vsel %vm8932_vm4, 0, %v238_v15  ;;  %187 = vst [vmem:[#allocation2 + $0xc] sm:$0x1] %v186_v28  ;;  %v329_v38 = vrot.slane %v327_v32, 7 }
  0x18   : > { %8121 = vmatpush3.bf16.msra.mxu0 %v8643_v6  ;;  %7930 = vmatprep.subr.bf16.mxu1 %v8644_v7  ;;  %240 = vst [vmem:[#allocation2 + $0x8] sm:$0x1] %v239_v23  ;;  %v8941_v26 = vrot.slane %v838_v20, 5  ;;  %v844_v27 = vrot.slane %v842_v21, 4  ;;  %243 = vst [vmem:[#allocation2 + $0x14] sm:$0x1] %v242_v29 }
  0x19   : > { %8122 = vmatprep.subr.bf16.mxu0 %v8645_v8  ;;  %v293_v31 = vld [vmem:[%s8923_s16 + $0x4] sm:$0xf]  ;;  %vm324_vm7 = vsmask.f32 4368  ;;  %v188_v39 = vld [vmem:[#allocation2 + $0x18] sm:$0x1]  ;;  %v332_v47 = vor.u32 %v330_v33, %v329_v38 }
  0x1a   : > { %v335_v34 = vshrl.u32 %v293_v31, 16  ;;  %v338_v35 = vshll.u32 %v293_v31, 16  ;;  %v845_v37 = vor.u32 %v844_v27, %v8941_v26  ;;  %v244_v40 = vld [vmem:[#allocation2 + $0x20] sm:$0x1]  ;;  %v8653_v41 = vld [vmem:[%s11060_s1 + $0x138] sm:$0xff]   ;;  %v189_v43 = vsel %vm8916_vm3, 0, %v188_v39  ;;  %vm8963_vm9 = vmor %vm180_vm1, %vm324_vm7 }
  0x1b   : > { %7931 = vmatpush3.bf16.msra.mxu1 %v8644_v7  ;;  %v245_v44 = vsel %vm8932_vm4, 0, %v244_v40  ;;  %v294_v45 = vld [vmem:[%s8923_s16 + $0x8] sm:$0xf]  ;;  %vm826_vm8 = vsmask.f32 7440  ;;  %v333_v48 = vrot.slane %v329_v38, 4 }
  0x1c   : > { %8123 = vmatpush3.bf16.msra.mxu0 %v8645_v8  ;;  %7932 = vmatprep.subr.bf16.mxu1 %v8646_v9  ;;  %v337_v42 = vrot.slane %v335_v34, 7  ;;  %190 = vst [vmem:[#allocation2 + $0x18] sm:$0x1] %v189_v43  ;;  %246 = vst [vmem:[#allocation2 + $0x20] sm:$0x1] %v245_v44  ;;  %v344_v50 = vshrl.u32 %v294_v45, 16 }
  0x1d   : > { %8124 = vmatprep.subr.bf16.mxu0 %v8647_v10  ;;  %v295_v49 = vld [vmem:[%s8923_s16 + $0xc] sm:$0xf]  ;;  %v8977_v55 = vld [vmem:[%s11060_s1] sm:$0xff]   ;;  %v347_v56 = vshll.u32 %v294_v45, 16  ;;  %v846_v61 = vrot.slane %v845_v37, 4  ;;  %vm8992_vm11 = vmor %vm825_vm6, %vm826_vm8  ;;  %vm7041_vm15 = vcmask 1041409  }
  0x1e   : > { %v761_v51 = vld [vmem:[#allocation2] sm:$0xf]  ;;  %v340_v52 = vor.u32 %v338_v35, %v337_v42  ;;  %v342_v53 = vrot.slane %v337_v42, 4  ;;  %v352_v57 = vshrl.u32 %v295_v49, 16  ;;  %v346_v62 = vrot.slane %v344_v50, 7  ;;  %v8684_v46 = vld [vmem:[%s11060_s1 + $0x90] sm:$0xff]  }
  0x1f   : > { %7933 = vmatpush3.bf16.msra.mxu1 %v8646_v9  ;;  %v809_v58 = vld [vmem:[#allocation2 + $0x8] sm:$0x1]  ;;  %v829_v59 = vshrl.u32 %v761_v51, 16  ;;  %v832_v60 = vshll.u32 %v761_v51, 16  ;;  %v8982_v63 = vld [vmem:[%s11060_s1 + $0x140] sm:$0xff]   ;;  %v355_v4 = vshll.u32 %v295_v49, 16 }
  0x20   : > { %8125 = vmatpush3.bf16.msra.mxu0 %v8647_v10  ;;  %7934 = vmatprep.subr.bf16.mxu1 %v8648_v11  ;;  %v848_v0 = vshll.u32 %v809_v58, 16  ;;  %v341_v1 = vsel %vm8963_vm9, %v333_v48, %v340_v52  ;;  %v649_v2 = vld [vmem:[#allocation2 + $0xc] sm:$0xf]  ;;  %v653_v3 = vld [vmem:[#allocation2 + $0x14] sm:$0x1]  ;;  %v354_v13 = vrot.slane %v352_v57, 7 }
  0x21   : > { %8126 = vmatprep.subr.bf16.mxu0 %v8649_v12  ;;  %v831_v5 = vrot.slane %v829_v59, 4  ;;  %v834_v6 = vrot.slane %v832_v60, 5  ;;  %v650_v7 = vsel %vm8970_vm10, %v332_v47, %v649_v2  ;;  %652 = vst [vmem:[#allocation2 + $0x10] sm:$0xf] %v341_v1  ;;  %v654_v8 = vsel %vm8916_vm3, %v342_v53, %v653_v3  ;;  %v191_v16 = vld [vmem:[#allocation2 + $0x24] sm:$0x1] }
  0x22   : > { %v850_v10 = vrot.slane %v848_v0, 5  ;;  %651 = vst [vmem:[#allocation2 + $0xc] sm:$0xf] %v650_v7  ;;  %655 = vst [vmem:[#allocation2 + $0x14] sm:$0x1] %v654_v8  ;;  %v357_v18 = vor.u32 %v355_v4, %v354_v13  ;;  %v359_v20 = vrot.slane %v354_v13, 4 }
  0x23   : > { %7935 = vmatpush3.bf16.msra.mxu1 %v8648_v11  ;;  %v349_v11 = vor.u32 %v347_v56, %v346_v62  ;;  %v835_v15 = vor.u32 %v834_v6, %v831_v5  ;;  %v656_v21 = vld [vmem:[#allocation2 + $0x18] sm:$0xf]  ;;  %v192_v23 = vsel %vm8916_vm3, 0, %v191_v16  ;;  %v9007_v29 = vld [vmem:[%s8923_s16 + $0x10] sm:$0xf]  ;;  %vm7044_vm0 = vcmask 1042434  }
  0x24   : > { %8127 = vmatpush3.bf16.msra.mxu0 %v8649_v12  ;;  %7936 = vmatprep.subr.bf16.mxu1 %v8650_v17  ;;  %v350_v12 = vrot.slane %v346_v62, 4  ;;  %v851_v25 = vsel %vm8992_vm11, %v846_v61, %v850_v10  ;;  %193 = vst [vmem:[#allocation2 + $0x24] sm:$0x1] %v192_v23  ;;  %v9010_v30 = vld [vmem:[%s8923_s16 + $0x14] sm:$0xf]  ;;  %v361_v34 = vshrl.u32 %v9007_v29, 16 }
  0x25   : > { %8128 = vmatprep.subr.bf16.mxu0 %v8651_v22  ;;  %v836_v24 = vrot.slane %v835_v15, 4  ;;  %v657_v27 = vsel %vm8970_vm10, %v349_v11, %v656_v21  ;;  %v364_v35 = vshll.u32 %v9007_v29, 16  ;;  %v369_v40 = vshrl.u32 %v9010_v30, 16  ;;  %v8660_v29 = vld [vmem:[%s11060_s1 + $0x10] sm:$0xff]   ;;  %s7643_s6 = sshll.u32 %s11179_s13, 5 }
  0x26   : > { %v358_v31 = vsel %vm8963_vm9, %v350_v12, %v357_v18  ;;  %658 = vst [vmem:[#allocation2 + $0x18] sm:$0xf] %v657_v27  ;;  %v372_v50 = vshll.u32 %v9010_v30, 16  ;;  %v9034_v8 = vrot.slane %v361_v34, 7  ;;  %v9092_v30 = vld [vmem:[%s8923_s16 + $0x24] sm:$0xf]  ;;  %s10771_s8 = scalar_lea.vmem %s11062_s3, %s7643_s6 }
  0x27   : > { %7937 = vmatpush3.bf16.msra.mxu1 %v8650_v17  ;;  %v247_v17 = vld [vmem:[#allocation2 + $0x2c] sm:$0x1]  ;;  %v841_v33 = vsel %vm8992_vm11, %v836_v24, %v8941_v26  ;;  %659 = vst [vmem:[#allocation2 + $0x1c] sm:$0xf] %v358_v31  ;;  %vm7047_vm1 = vcmask 1043459   ;;  %vm7050_vm2 = vcmask 1044484  }
  0x28   : > { %8129 = vmatpush3.bf16.msra.mxu0 %v8651_v22  ;;  %7938 = vmatprep.subr.bf16.mxu1 %v8652_v36  ;;  %v660_v22 = vld [vmem:[#allocation2 + $0x20] sm:$0x1]  ;;  %v248_v28 = vsel %vm8932_vm4, 0, %v247_v17  ;;  %v7247_v37 = vcombine.low %v841_v33, %v851_v25  ;;  %v9021_v38 = vld [vmem:[#allocation2 + $0x10] sm:$0xf]  ;;  %vm7059_vm5 = vcmask 1047559  }
  0x29   : > { %8130 = vmatprep.subr.bf16.mxu0 %v8653_v41  ;;  %v661_v32 = vsel %vm8916_vm3, %v359_v20, %v660_v22  ;;  %249 = vst [vmem:[#allocation2 + $0x2c] sm:$0x1] %v248_v28  ;;  %v764_v39 = vld [vmem:[#allocation2 + $0x10] sm:$0xf]  ;;  %v2675_v42 = vld [vmem:[#allocation2 + $0xc] sm:$0xf] }
  0x2a   : > { %662 = vst [vmem:[#allocation2 + $0x20] sm:$0x1] %v661_v32  ;;  %v9026_v43 = vld [vmem:[#allocation2 + $0x14] sm:$0x1]  ;;  %v2733_v26 = vshll.u32 %v9021_v38, 16  ;;  %v2737_v44 = vshrl.u32 %v9021_v38, 16  ;;  %7940 = vmatprep.mubr.bf16.mxu1 %v7247_v37 }
  0x2b   : > { %7939 = vmatpush3.bf16.msra.mxu1 %v8652_v36  ;;  %v194_v36 = vld [vmem:[#allocation2 + $0x30] sm:$0x1]  ;;  %v2724_v45 = vshrl.u32 %v2675_v42, 16  ;;  %v2727_v47 = vshll.u32 %v2675_v42, 16  ;;  %v2743_v48 = vshll.u32 %v9026_v43, 16  ;;  %v862_v61 = vshll.u32 %v764_v39, 16 }
  0x2c   : > { %8131 = vmatpush3.bf16.msra.mxu0 %v8653_v41  ;;  %7972 = vmatprep.subr.bf16.mxu1 %v8977_v55  ;;  %v195_v41 = vsel %vm8916_vm3, 0, %v194_v36  ;;  %v763_v49 = vld [vmem:[#allocation2 + $0xc] sm:$0xf]  ;;  %v2735_v51 = vrot.slane %v2733_v26, 5  ;;  %v2739_v52 = vrot.slane %v2737_v44, 4  ;;  %v866_v2 = vshrl.u32 %v764_v39, 16 }
  0x2d   : > { %8164 = vmatprep.subr.bf16.mxu0 %v8982_v63  ;;  %196 = vst [vmem:[#allocation2 + $0x30] sm:$0x1] %v195_v41  ;;  %v810_v53 = vld [vmem:[#allocation2 + $0x14] sm:$0x1]  ;;  %v853_v56 = vshrl.u32 %v763_v49, 16  ;;  %v856_v57 = vshll.u32 %v763_v49, 16 }
  0x2e   : > { %v2726_v58 = vrot.slane %v2724_v45, 4  ;;  %v2729_v59 = vrot.slane %v2727_v47, 5  ;;  %v2745_v60 = vrot.slane %v2743_v48, 5  ;;  %v2740_v62 = vor.u32 %v2739_v52, %v2735_v51  ;;  %v2678_v3 = vld [vmem:[#allocation2 + $0x18] sm:$0xf] }
  0x2f   : > { %v855_v0 = vrot.slane %v853_v56, 4  ;;  %v858_v1 = vrot.slane %v856_v57, 5  ;;  %v864_v5 = vrot.slane %v862_v61, 5  ;;  %v872_v6 = vshll.u32 %v810_v53, 16  ;;  %v9032_v7 = vld [vmem:[#allocation2 + $0x1c] sm:$0xf] }
  0x30   : > { %v2730_v4 = vor.u32 %v2729_v59, %v2726_v58  ;;  %v2741_v10 = vrot.slane %v2740_v62, 4  ;;  %v868_v12 = vrot.slane %v866_v2, 4  ;;  %v2748_v13 = vshrl.u32 %v2678_v3, 16  ;;  %v765_v32 = vld [vmem:[#allocation2 + $0x18] sm:$0xf]  ;;  %v8657_v53 = vld [vmem:[%s11060_s1 + $0x8] sm:$0xff]  }
  0x31   : > { %v859_v11 = vor.u32 %v858_v1, %v855_v0  ;;  %v874_v16 = vrot.slane %v872_v6, 5  ;;  %v9036_v17 = vld [vmem:[#allocation2 + $0x20] sm:$0x1]  ;;  %v2751_v18 = vshll.u32 %v2678_v3, 16  ;;  %v2757_v20 = vshll.u32 %v9032_v7, 16 }
  0x32   : > { %v2731_v15 = vrot.slane %v2730_v4, 4  ;;  %v2746_v21 = vsel %vm8992_vm11, %v2741_v10, %v2745_v60  ;;  %v869_v23 = vor.u32 %v868_v12, %v864_v5  ;;  %v2750_v24 = vrot.slane %v2748_v13, 4  ;;  %v766_v39 = vld [vmem:[#allocation2 + $0x1c] sm:$0xf]  ;;  %v811_v45 = vld [vmem:[#allocation2 + $0x20] sm:$0x1] }
  0x33   : > { %v860_v22 = vrot.slane %v859_v11, 4  ;;  %v2753_v27 = vrot.slane %v2751_v18, 5  ;;  %v2759_v28 = vrot.slane %v2757_v20, 5  ;;  %v2761_v31 = vshrl.u32 %v9032_v7, 16  ;;  %v663_v52 = vld [vmem:[#allocation2 + $0x24] sm:$0xf] }
  0x34   : > { %v2736_v25 = vsel %vm8992_vm11, %v2731_v15, %v2735_v51  ;;  %v870_v36 = vrot.slane %v869_v23, 4  ;;  %v2767_v37 = vshll.u32 %v9036_v17, 16  ;;  %v3501_v26 = vrot.slane %v9032_v7, 5  ;;  %v298_v6 = vld [vmem:[%s8923_s16 + $0x18] sm:$0xf]  ;;  %v8656_v10 = vld [vmem:[%s11060_s1 + $0x148] sm:$0xff]  }
  0x35   : > { %v7359_v33 = vcombine.low %v2736_v25, %v2746_v21  ;;  %v865_v34 = vsel %vm8992_vm11, %v860_v22, %v864_v5  ;;  %v2754_v41 = vor.u32 %v2753_v27, %v2750_v24  ;;  %v2763_v42 = vrot.slane %v2761_v31, 4  ;;  %v250_v5 = vld [vmem:[#allocation2 + $0x38] sm:$0x1]  ;;  %v299_v18 = vld [vmem:[%s8923_s16 + $0x1c] sm:$0xf] }
  0x36   : > { %v3504_v44 = vrot.slane %v9036_v17, 5  ;;  %v875_v47 = vsel %vm8992_vm11, %v870_v36, %v874_v16  ;;  %v2769_v48 = vrot.slane %v2767_v37, 5  ;;  %v877_v49 = vshrl.u32 %v765_v32, 16  ;;  %v667_v16 = vld [vmem:[#allocation2 + $0x2c] sm:$0x1] }
  0x37   : > { %8132 = vmatprep.mubr.bf16.mxu0 %v7359_v33  ;;  %v880_v51 = vshll.u32 %v765_v32, 16  ;;  %v7248_v56 = vcombine.low %v865_v34, %v875_v47  ;;  %v2755_v57 = vrot.slane %v2754_v41, 4  ;;  %v2764_v58 = vor.u32 %v2763_v42, %v2759_v28  ;;  %v197_v22 = vld [vmem:[#allocation2 + $0x3c] sm:$0x1]  ;;  %v253_v27 = vld [vmem:[#allocation2 + $0x44] sm:$0x1] }
  0x38   : > { %v9056_v59 = vrot.slane %v3501_v26, 4  ;;  %v879_v60 = vrot.slane %v877_v49, 4  ;;  %v886_v62 = vshll.u32 %v766_v39, 16  ;;  %v890_v0 = vshrl.u32 %v766_v39, 16  ;;  %v9084_v33 = vld [vmem:[%s8923_s16 + $0x20] sm:$0xf] }
  0x39   : > { %v882_v61 = vrot.slane %v880_v51, 5  ;;  %7941 = vmatmul.mubr.bf16.vlgmr.msra.gmra.mrb[0].mxu1 %v7248_v56  ;;  %v2760_v1 = vsel %vm8992_vm11, %v2755_v57, %v2759_v28  ;;  %v2765_v2 = vrot.slane %v2764_v58, 4  ;;  %v896_v3 = vshll.u32 %v811_v45, 16  ;;  %v670_v41 = vld [vmem:[#allocation2 + $0x30] sm:$0xf]  ;;  %v8663_v56 = vld [vmem:[%s11060_s1 + $0x18] sm:$0xff]  }
  0x3a   : > { %v366_v4 = vor.u32 %v364_v35, %v9034_v8  ;;  %7973 = vmatpush3.bf16.msra.mxu1 %v8977_v55  ;;  %v888_v12 = vrot.slane %v886_v62, 5  ;;  %v892_v13 = vrot.slane %v890_v0, 4  ;;  %v367_v15 = vrot.slane %v9034_v8, 4  ;;  %v8658_v42 = vld [vmem:[%s11060_s1 + $0x150] sm:$0xff]   ;;  %v200_v49 = vld [vmem:[#allocation2 + $0x48] sm:$0x1] }
  0x3b   : > { %v883_v11 = vor.u32 %v882_v61, %v879_v60  ;;  %v2770_v35 = vsel %vm8992_vm11, %v2765_v2, %v2769_v48  ;;  %v898_v20 = vrot.slane %v896_v3, 5  ;;  %v371_v55 = vrot.slane %v369_v40, 7  ;;  %7974 = vmatprep.subr.bf16.mxu1 %v8657_v53  ;;  %v1807_v14 = vld [vmem:[#allocation2 + $0xc] sm:$0xe] }
  0x3c   : > { %v664_v21 = vsel %vm8970_vm10, %v366_v4, %v663_v52  ;;  %v7360_v8 = vcombine.low %v2760_v1, %v2770_v35  ;;  %v893_v24 = vor.u32 %v892_v13, %v888_v12  ;;  %v251_v25 = vsel %vm8932_vm4, 0, %v250_v5  ;;  %v8659_v1 = vld [vmem:[%s11060_s1 + $0x158] sm:$0xff]   ;;  %v8666_v4 = vld [vmem:[%s11060_s1 + $0x20] sm:$0xff]  }
  0x3d   : > { %v884_v23 = vrot.slane %v883_v11, 4  ;;  %665 = vst [vmem:[#allocation2 + $0x24] sm:$0xf] %v664_v21  ;;  %v374_v28 = vor.u32 %v372_v50, %v371_v55  ;;  %v376_v31 = vrot.slane %v371_v55, 4  ;;  %252 = vst [vmem:[#allocation2 + $0x38] sm:$0x1] %v251_v25 }
  0x3e   : > { %v378_v40 = vshrl.u32 %v298_v6, 16  ;;  %v381_v32 = vshll.u32 %v298_v6, 16  ;;  %8133 = vmatmul.mubr.bf16.vlgmr.msra.gmra.mrb[0].mxu0 %v7360_v8  ;;  %v894_v36 = vrot.slane %v893_v24, 4  ;;  %v386_v37 = vshrl.u32 %v299_v18, 16  ;;  %7975 = vmatpush3.bf16.msra.mxu1 %v8657_v53 }
  0x3f   : > { %v889_v34 = vsel %vm8992_vm11, %v884_v23, %v888_v12  ;;  %v389_v39 = vshll.u32 %v299_v18, 16  ;;  %8165 = vmatpush3.bf16.msra.mxu0 %v8982_v63  ;;  %v375_v50 = vsel %vm8963_vm9, %v367_v15, %v374_v28  ;;  %v668_v45 = vsel %vm8916_vm3, %v376_v31, %v667_v16  ;;  %7976 = vmatprep.subr.bf16.mxu1 %v8660_v29  ;;  %v8668_v23 = vld [vmem:[%s11060_s1 + $0x28] sm:$0xff]  }
  0x40   : > { %v380_v47 = vrot.slane %v378_v40, 7  ;;  %v198_v48 = vsel %vm8916_vm3, 0, %v197_v22  ;;  %8166 = vmatprep.subr.bf16.mxu0 %v8656_v10  ;;  %v899_v51 = vsel %vm8992_vm11, %v894_v36, %v898_v20  ;;  %666 = vst [vmem:[#allocation2 + $0x28] sm:$0xf] %v375_v50  ;;  %669 = vst [vmem:[#allocation2 + $0x2c] sm:$0x1] %v668_v45  ;;  %v9134_v15 = vsel %vm9111_vm14, %v9056_v59, %v3504_v44 }
  0x41   : > { %v388_v52 = vrot.slane %v386_v37, 7  ;;  %199 = vst [vmem:[#allocation2 + $0x3c] sm:$0x1] %v198_v48  ;;  %v254_v63 = vsel %vm8932_vm4, 0, %v253_v27  ;;  %v395_v53 = vshrl.u32 %v9084_v33, 16  ;;  %v7249_v58 = vcombine.low %v889_v34, %v899_v51  ;;  %v8661_v36 = vld [vmem:[%s11060_s1 + $0x160] sm:$0xff]  }
  0x42   : > { %v383_v60 = vor.u32 %v381_v32, %v380_v47  ;;  %v384_v61 = vrot.slane %v380_v47, 4  ;;  %255 = vst [vmem:[#allocation2 + $0x44] sm:$0x1] %v254_v63  ;;  %v398_v3 = vshll.u32 %v9084_v33, 16  ;;  %7977 = vmatpush3.bf16.msra.mxu1 %v8660_v29  ;;  %v403_v12 = vshrl.u32 %v9092_v30, 16 }
  0x43   : > { %v391_v62 = vor.u32 %v389_v39, %v388_v52  ;;  %v393_v0 = vrot.slane %v388_v52, 4  ;;  %v9118_v2 = vrot.slane %v395_v53, 7  ;;  %8167 = vmatpush3.bf16.msra.mxu0 %v8656_v10  ;;  %7944 = vmatprep.mubr.bf16.mxu1 %v7249_v58  ;;  %v201_v13 = vsel %vm8916_vm3, 0, %v200_v49  ;;  %v8670_v49 = vld [vmem:[%s11060_s1 + $0x30] sm:$0xff]  }
  0x44   : > { %v2681_v5 = vld [vmem:[#allocation2 + $0x24] sm:$0xf]  ;;  %v671_v11 = vsel %vm8970_vm10, %v383_v60, %v670_v41  ;;  %v674_v35 = vld [vmem:[#allocation2 + $0x38] sm:$0x1]  ;;  %8168 = vmatprep.subr.bf16.mxu0 %v8658_v42  ;;  %202 = vst [vmem:[#allocation2 + $0x48] sm:$0x1] %v201_v13  ;;  %7978 = vmatprep.subr.bf16.mxu1 %v8663_v56 }
  0x45   : > { %v767_v6 = vld [vmem:[#allocation2 + $0x24] sm:$0xf]  ;;  %v2772_v16 = vshrl.u32 %v2681_v5, 16  ;;  %v2775_v10 = vshll.u32 %v2681_v5, 16  ;;  %672 = vst [vmem:[#allocation2 + $0x30] sm:$0xf] %v671_v11  ;;  %v392_v20 = vsel %vm8963_vm9, %v384_v61, %v391_v62  ;;  %v675_v17 = vsel %vm8916_vm3, %v393_v0, %v674_v35 }
  0x46   : > { %v901_v18 = vshrl.u32 %v767_v6, 16  ;;  %v904_v29 = vshll.u32 %v767_v6, 16  ;;  %v401_v55 = vrot.slane %v9118_v2, 4  ;;  %v406_v44 = vshll.u32 %v9092_v30, 16  ;;  %673 = vst [vmem:[#allocation2 + $0x34] sm:$0xf] %v392_v20  ;;  %7979 = vmatpush3.bf16.msra.mxu1 %v8663_v56 }
  0x47   : > { %v2774_v59 = vrot.slane %v2772_v16, 4  ;;  %v2777_v21 = vrot.slane %v2775_v10, 5  ;;  %676 = vst [vmem:[#allocation2 + $0x38] sm:$0x1] %v675_v17  ;;  %v9145_v24 = vld [vmem:[#allocation2 + $0x28] sm:$0xf]  ;;  %8169 = vmatpush3.bf16.msra.mxu0 %v8658_v42  ;;  %v400_v28 = vor.u32 %v398_v3, %v9118_v2  ;;  %7980 = vmatprep.subr.bf16.mxu1 %v8666_v4 }
  0x48   : > { %v903_v22 = vrot.slane %v901_v18, 4  ;;  %v906_v8 = vrot.slane %v904_v29, 5  ;;  %v9147_v25 = vld [vmem:[#allocation2 + $0x2c] sm:$0x1]  ;;  %v768_v27 = vld [vmem:[#allocation2 + $0x28] sm:$0xf]  ;;  %8170 = vmatprep.subr.bf16.mxu0 %v8659_v1 }
  0x49   : > { %v2778_v31 = vor.u32 %v2777_v21, %v2774_v59  ;;  %v2781_v40 = vshll.u32 %v9145_v24, 16  ;;  %v2785_v32 = vshrl.u32 %v9145_v24, 16  ;;  %v2791_v33 = vshll.u32 %v9147_v25, 16  ;;  %v812_v34 = vld [vmem:[#allocation2 + $0x2c] sm:$0x1]  ;;  %v8664_v20 = vld [vmem:[%s11060_s1 + $0x170] sm:$0xff]  }
  0x4a   : > { %v907_v37 = vor.u32 %v906_v8, %v903_v22  ;;  %v910_v39 = vshll.u32 %v768_v27, 16  ;;  %v914_v41 = vshrl.u32 %v768_v27, 16  ;;  %v920_v42 = vshll.u32 %v812_v34, 16  ;;  %v677_v48 = vld [vmem:[#allocation2 + $0x3c] sm:$0xf]  ;;  %7981 = vmatpush3.bf16.msra.mxu1 %v8666_v4  ;;  %v8662_v3 = vld [vmem:[%s11060_s1 + $0x168] sm:$0xff]  }
  0x4b   : > { %v2779_v50 = vrot.slane %v2778_v31, 4  ;;  %v2783_v45 = vrot.slane %v2781_v40, 5  ;;  %v2787_v47 = vrot.slane %v2785_v32, 4  ;;  %v2793_v51 = vrot.slane %v2791_v33, 5  ;;  %8171 = vmatpush3.bf16.msra.mxu0 %v8659_v1  ;;  %7982 = vmatprep.subr.bf16.mxu1 %v8668_v23 }
  0x4c   : > { %v908_v52 = vrot.slane %v907_v37, 4  ;;  %v912_v63 = vrot.slane %v910_v39, 5  ;;  %v916_v53 = vrot.slane %v914_v41, 4  ;;  %v2684_v56 = vld [vmem:[#allocation2 + $0x30] sm:$0xf]  ;;  %v922_v60 = vrot.slane %v920_v42, 5  ;;  %8172 = vmatprep.subr.bf16.mxu0 %v8661_v36 }
  0x4d   : > { %v2788_v58 = vor.u32 %v2787_v47, %v2783_v45  ;;  %v2796_v61 = vshrl.u32 %v2684_v56, 16  ;;  %v2799_v62 = vshll.u32 %v2684_v56, 16  ;;  %v769_v0 = vld [vmem:[#allocation2 + $0x30] sm:$0xf]  ;;  %v2784_v4 = vsel %vm8992_vm11, %v2779_v50, %v2783_v45  ;;  %v9166_v11 = vld [vmem:[#allocation2 + $0x34] sm:$0xf] }
  0x4e   : > { %v913_v5 = vsel %vm8992_vm11, %v908_v52, %v912_v63  ;;  %v917_v6 = vor.u32 %v916_v53, %v912_v63  ;;  %v9168_v1 = vld [vmem:[#allocation2 + $0x38] sm:$0x1]  ;;  %v678_v13 = vsel %vm8970_vm10, %v400_v28, %v677_v48  ;;  %v2805_v29 = vshll.u32 %v9166_v11, 16  ;;  %v770_v35 = vld [vmem:[#allocation2 + $0x34] sm:$0xf]  ;;  %7983 = vmatpush3.bf16.msra.mxu1 %v8668_v23 }
  0x4f   : > { %v2789_v16 = vrot.slane %v2788_v58, 4  ;;  %v2798_v10 = vrot.slane %v2796_v61, 4  ;;  %v2801_v18 = vrot.slane %v2799_v62, 5  ;;  %679 = vst [vmem:[#allocation2 + $0x3c] sm:$0xf] %v678_v13  ;;  %v2809_v59 = vshrl.u32 %v9166_v11, 16  ;;  %8173 = vmatpush3.bf16.msra.mxu0 %v8661_v36  ;;  %7984 = vmatprep.subr.bf16.mxu1 %v8670_v49 }
  0x50   : > { %v918_v17 = vrot.slane %v917_v6, 4  ;;  %v2815_v21 = vshll.u32 %v9168_v1, 16  ;;  %v925_v22 = vshrl.u32 %v769_v0, 16  ;;  %v2807_v28 = vrot.slane %v2805_v29, 5  ;;  %v813_v31 = vld [vmem:[#allocation2 + $0x38] sm:$0x1]  ;;  %8174 = vmatprep.subr.bf16.mxu0 %v8662_v3 }
  0x51   : > { %v2794_v8 = vsel %vm8992_vm11, %v2789_v16, %v2793_v51  ;;  %v2802_v27 = vor.u32 %v2801_v18, %v2798_v10  ;;  %v928_v40 = vshll.u32 %v769_v0, 16  ;;  %v2811_v33 = vrot.slane %v2809_v59, 4  ;;  %v256_v37 = vld [vmem:[#allocation2 + $0x50] sm:$0x1]  ;;  %v681_v51 = vld [vmem:[#allocation2 + $0x44] sm:$0x1] }
  0x52   : > { %v7361_v32 = vcombine.low %v2784_v4, %v2794_v8  ;;  %v923_v23 = vsel %vm8992_vm11, %v918_v17, %v922_v60  ;;  %v2817_v34 = vrot.slane %v2815_v21, 5  ;;  %v927_v42 = vrot.slane %v925_v22, 4  ;;  %7985 = vmatpush3.bf16.msra.mxu1 %v8670_v49  ;;  %v8665_v52 = vld [vmem:[%s11060_s1 + $0x178] sm:$0xff]   ;;  %v203_v21 = vld [vmem:[#allocation2 + $0x54] sm:$0x1]  ;;  %v9208_v8 = vld [vmem:[%s11060_s1 + $0x180] sm:$0xff]  }
  0x53   : > { %v7250_v39 = vcombine.low %v913_v5, %v923_v23  ;;  %v2803_v41 = vrot.slane %v2802_v27, 4  ;;  %v930_v36 = vrot.slane %v928_v40, 5  ;;  %v2812_v50 = vor.u32 %v2811_v33, %v2807_v28  ;;  %8175 = vmatpush3.bf16.msra.mxu0 %v8662_v3  ;;  %v302_v3 = vld [vmem:[%s8923_s16 + $0x28] sm:$0xf]  ;;  %v259_v22 = vld [vmem:[#allocation2 + $0x5c] sm:$0x1] }
  0x54   : > { %8136 = vmatprep.mubr.bf16.mxu0 %v7361_v32  ;;  %v934_v45 = vshll.u32 %v770_v35, 16  ;;  %v938_v47 = vshrl.u32 %v770_v35, 16  ;;  %v944_v48 = vshll.u32 %v813_v31, 16  ;;  %v405_v49 = vrot.slane %v403_v12, 7  ;;  %8176 = vmatprep.subr.bf16.mxu0 %v8664_v20  ;;  %v303_v35 = vld [vmem:[%s8923_s16 + $0x2c] sm:$0xf] }
  0x55   : > { %7945 = vmatmul.mubr.bf16.gmra.mrb[4].mxu1 %v7250_v39  ;;  %v2808_v63 = vsel %vm8992_vm11, %v2803_v41, %v2807_v28  ;;  %v931_v53 = vor.u32 %v930_v36, %v927_v42  ;;  %v257_v56 = vsel %vm8932_vm4, 0, %v256_v37  ;;  %v2813_v58 = vrot.slane %v2812_v50, 4  ;;  %v304_v31 = vld [vmem:[%s8923_s16 + $0x30] sm:$0xf] }
  0x56   : > { %v936_v60 = vrot.slane %v934_v45, 5  ;;  %v940_v61 = vrot.slane %v938_v47, 4  ;;  %v946_v62 = vrot.slane %v944_v48, 5  ;;  %v2687_v0 = vld [vmem:[#allocation2 + $0x3c] sm:$0xf]  ;;  %v408_v5 = vor.u32 %v406_v44, %v405_v49 }
  0x57   : > { %258 = vst [vmem:[#allocation2 + $0x50] sm:$0x1] %v257_v56  ;;  %v932_v4 = vrot.slane %v931_v53, 4  ;;  %v410_v6 = vrot.slane %v405_v49, 4  ;;  %v2820_v13 = vshrl.u32 %v2687_v0, 16  ;;  %v2818_v12 = vsel %vm8992_vm11, %v2813_v58, %v2817_v34  ;;  %8177 = vmatpush3.bf16.msra.mxu0 %v8664_v20  ;;  %v8672_v45 = vld [vmem:[%s11060_s1 + $0x38] sm:$0xff]  }
  0x58   : > { %v771_v16 = vld [vmem:[#allocation2 + $0x3c] sm:$0xf]  ;;  %v941_v10 = vor.u32 %v940_v61, %v936_v60  ;;  %v2823_v18 = vshll.u32 %v2687_v0, 16  ;;  %v7362_v17 = vcombine.low %v2808_v63, %v2818_v12  ;;  %v409_v30 = vsel %vm8963_vm9, %v401_v55, %v408_v5  ;;  %8178 = vmatprep.subr.bf16.mxu0 %v8665_v52  ;;  %v684_v47 = vld [vmem:[#allocation2 + $0x48] sm:$0xf]  ;;  %7986 = vmatprep.subr.bf16.mxu1 %v8672_v45 }
  0x59   : > { %v949_v29 = vshrl.u32 %v771_v16, 16  ;;  %v937_v59 = vsel %vm8992_vm11, %v932_v4, %v936_v60  ;;  %v682_v44 = vsel %vm8916_vm3, %v410_v6, %v681_v51  ;;  %680 = vst [vmem:[#allocation2 + $0x40] sm:$0xf] %v409_v30  ;;  %v2822_v27 = vrot.slane %v2820_v13, 4  ;;  %v305_v49 = vld [vmem:[%s8923_s16 + $0x34] sm:$0xf]  ;;  %7987 = vmatpush3.bf16.msra.mxu1 %v8672_v45 }
  0x5a   : > { %v942_v20 = vrot.slane %v941_v10, 4  ;;  %683 = vst [vmem:[#allocation2 + $0x44] sm:$0x1] %v682_v44  ;;  %v2825_v28 = vrot.slane %v2823_v18, 5  ;;  %8137 = vmatmul.mubr.bf16.gmra.mrb[4].mxu0 %v7362_v17  ;;  %v952_v55 = vshll.u32 %v771_v16, 16  ;;  %v412_v40 = vshrl.u32 %v302_v3, 16 }
  0x5b   : > { %v951_v2 = vrot.slane %v949_v29, 4  ;;  %v415_v32 = vshll.u32 %v302_v3, 16  ;;  %v420_v23 = vshrl.u32 %v303_v35, 16  ;;  %v423_v37 = vshll.u32 %v303_v35, 16  ;;  %8179 = vmatpush3.bf16.msra.mxu0 %v8665_v52  ;;  %v206_v35 = vld [vmem:[#allocation2 + $0x60] sm:$0x1] }
  0x5c   : > { %v947_v33 = vsel %vm8992_vm11, %v942_v20, %v946_v62  ;;  %v2826_v34 = vor.u32 %v2825_v28, %v2822_v27  ;;  %v204_v39 = vsel %vm8916_vm3, 0, %v203_v21  ;;  %v954_v42 = vrot.slane %v952_v55, 5  ;;  %8212 = vmatprep.subr.bf16.mxu0 %v9208_v8  ;;  %v262_v21 = vld [vmem:[#allocation2 + $0x68] sm:$0x1]  ;;  %v8767_v54 = vld [vmem:[#allocation2 + $0x30] sm:$0xf] }
  0x5d   : > { %v7251_v41 = vcombine.low %v937_v59, %v947_v33  ;;  %v414_v36 = vrot.slane %v412_v40, 7  ;;  %v422_v50 = vrot.slane %v420_v23, 7  ;;  %205 = vst [vmem:[#allocation2 + $0x54] sm:$0x1] %v204_v39  ;;  %v260_v48 = vsel %vm8932_vm4, 0, %v259_v22  ;;  %v8676_v22 = vld [vmem:[%s11060_s1 + $0x80] sm:$0xff]  }
  0x5e   : > { %v429_v51 = vshrl.u32 %v304_v31, 16  ;;  %261 = vst [vmem:[#allocation2 + $0x5c] sm:$0x1] %v260_v48  ;;  %v9222_v56 = vrot.slane %v2826_v34, 4  ;;  %v688_v60 = vld [vmem:[#allocation2 + $0x50] sm:$0x1]  ;;  %v955_v5 = vor.u32 %v954_v42, %v951_v2  ;;  %8020 = vmatprep.subr.bf16.mxu1 %v8676_v22 }
  0x5f   : > { %7948 = vmatprep.mubr.bf16.mxu1 %v7251_v41  ;;  %v417_v63 = vor.u32 %v415_v32, %v414_v36  ;;  %v418_v52 = vrot.slane %v414_v36, 4  ;;  %v425_v53 = vor.u32 %v423_v37, %v422_v50  ;;  %v427_v58 = vrot.slane %v422_v50, 4  ;;  %v9244_v33 = vld [vmem:[%s8923_s16 + $0x38] sm:$0xf] }
  0x60   : > { %v9224_v61 = vrot.slane %v429_v51, 7  ;;  %v432_v62 = vshll.u32 %v304_v31, 16  ;;  %v9226_v0 = vld [vmem:[#allocation2 + $0x40] sm:$0xf]  ;;  %v437_v29 = vshrl.u32 %v305_v49, 16  ;;  %v440_v2 = vshll.u32 %v305_v49, 16 }
  0x61   : > { %v9228_v3 = vld [vmem:[#allocation2 + $0x44] sm:$0x1]  ;;  %v772_v4 = vld [vmem:[#allocation2 + $0x40] sm:$0xf]  ;;  %v426_v6 = vsel %vm8963_vm9, %v418_v52, %v425_v53  ;;  %v685_v13 = vsel %vm8970_vm10, %v417_v63, %v684_v47  ;;  %v2829_v16 = vshll.u32 %v9226_v0, 16  ;;  %v2833_v12 = vshrl.u32 %v9226_v0, 16 }
  0x62   : > { %v2839_v10 = vshll.u32 %v9228_v3, 16  ;;  %v814_v18 = vld [vmem:[#allocation2 + $0x44] sm:$0x1]  ;;  %686 = vst [vmem:[#allocation2 + $0x48] sm:$0xf] %v685_v13  ;;  %v958_v17 = vshll.u32 %v772_v4, 16  ;;  %v689_v44 = vsel %vm8916_vm3, %v427_v58, %v688_v60  ;;  %v434_v28 = vor.u32 %v432_v62, %v9224_v61 }
  0x63   : > { %687 = vst [vmem:[#allocation2 + $0x4c] sm:$0xf] %v426_v6  ;;  %v962_v59 = vshrl.u32 %v772_v4, 16  ;;  %v968_v30 = vshll.u32 %v814_v18, 16  ;;  %v2831_v20 = vrot.slane %v2829_v16, 5  ;;  %v2835_v27 = vrot.slane %v2833_v12, 4 }
  0x64   : > { %690 = vst [vmem:[#allocation2 + $0x50] sm:$0x1] %v689_v44  ;;  %v691_v31 = vld [vmem:[#allocation2 + $0x54] sm:$0xf]  ;;  %v2841_v55 = vrot.slane %v2839_v10, 5  ;;  %v956_v40 = vrot.slane %v955_v5, 4 }
  0x65   : > { %v960_v32 = vrot.slane %v958_v17, 5  ;;  %v964_v23 = vrot.slane %v962_v59, 4  ;;  %v2836_v34 = vor.u32 %v2835_v27, %v2831_v20  ;;  %v970_v37 = vrot.slane %v968_v30, 5 }
  0x66   : > { %v439_v39 = vrot.slane %v437_v29, 7  ;;  %v692_v41 = vsel %vm8970_vm10, %v434_v28, %v691_v31  ;;  %v435_v36 = vrot.slane %v9224_v61, 4  ;;  %v207_v50 = vsel %vm8916_vm3, 0, %v206_v35  ;;  %v695_v28 = vld [vmem:[#allocation2 + $0x5c] sm:$0x1] }
  0x67   : > { %v965_v42 = vor.u32 %v964_v23, %v960_v32  ;;  %693 = vst [vmem:[#allocation2 + $0x54] sm:$0xf] %v692_v41  ;;  %v263_v45 = vsel %vm8932_vm4, 0, %v262_v21  ;;  %v2832_v47 = vsel %vm8992_vm11, %v9222_v56, %v2831_v20  ;;  %v2837_v48 = vrot.slane %v2836_v34, 4  ;;  %208 = vst [vmem:[#allocation2 + $0x60] sm:$0x1] %v207_v50 }
  0x68   : > { %v444_v51 = vrot.slane %v439_v39, 4  ;;  %264 = vst [vmem:[#allocation2 + $0x68] sm:$0x1] %v263_v45  ;;  %v446_v63 = vshrl.u32 %v9244_v33, 16  ;;  %v961_v52 = vsel %vm8992_vm11, %v956_v40, %v960_v32  ;;  %v442_v60 = vor.u32 %v440_v2, %v439_v39 }
  0x69   : > { %v966_v53 = vrot.slane %v965_v42, 4  ;;  %v2690_v49 = vld [vmem:[#allocation2 + $0x48] sm:$0xf]  ;;  %v449_v61 = vshll.u32 %v9244_v33, 16  ;;  %v2842_v62 = vsel %vm8992_vm11, %v2837_v48, %v2841_v55  ;;  %v209_v33 = vld [vmem:[#allocation2 + $0x6c] sm:$0x1] }
  0x6a   : > { %v9259_v58 = vld [vmem:[#allocation2 + $0x4c] sm:$0xf]  ;;  %v2844_v56 = vshrl.u32 %v2690_v49, 16  ;;  %v2847_v4 = vshll.u32 %v2690_v49, 16  ;;  %v773_v6 = vld [vmem:[#allocation2 + $0x48] sm:$0xf]  ;;  %v7363_v13 = vcombine.low %v2832_v47, %v2842_v62  ;;  %v443_v39 = vsel %vm8963_vm9, %v435_v36, %v442_v60 }
  0x6b   : > { %v2853_v5 = vshll.u32 %v9259_v58, 16  ;;  %v971_v16 = vsel %vm8992_vm11, %v966_v53, %v970_v37  ;;  %v9267_v12 = vld [vmem:[#allocation2 + $0x50] sm:$0x1]  ;;  %v2857_v10 = vshrl.u32 %v9259_v58, 16  ;;  %v774_v18 = vld [vmem:[#allocation2 + $0x4c] sm:$0xf]  ;;  %v696_v53 = vsel %vm8916_vm3, %v444_v51, %v695_v28 }
  0x6c   : > { %v973_v29 = vshrl.u32 %v773_v6, 16  ;;  %v7252_v35 = vcombine.low %v961_v52, %v971_v16  ;;  %v2846_v17 = vrot.slane %v2844_v56, 4  ;;  %v2849_v59 = vrot.slane %v2847_v4, 5  ;;  %v815_v44 = vld [vmem:[#allocation2 + $0x50] sm:$0x1]  ;;  %8140 = vmatprep.mubr.bf16.mxu0 %v7363_v13 }
  0x6d   : > { %v2855_v30 = vrot.slane %v2853_v5, 5  ;;  %v2859_v21 = vrot.slane %v2857_v10, 4  ;;  %v2863_v22 = vshll.u32 %v9267_v12, 16  ;;  %v976_v27 = vshll.u32 %v773_v6, 16  ;;  %694 = vst [vmem:[#allocation2 + $0x58] sm:$0xf] %v443_v39 }
  0x6e   : > { %v975_v20 = vrot.slane %v973_v29, 4  ;;  %7949 = vmatmul.mubr.bf16.gmra.mrb[8].mxu1 %v7252_v35  ;;  %v2850_v2 = vor.u32 %v2849_v59, %v2846_v17  ;;  %v982_v31 = vshll.u32 %v774_v18, 16  ;;  %v986_v55 = vshrl.u32 %v774_v18, 16  ;;  %v2693_v32 = vld [vmem:[#allocation2 + $0x54] sm:$0xf] }
  0x6f   : > { %v992_v40 = vshll.u32 %v815_v44, 16  ;;  %v2860_v23 = vor.u32 %v2859_v21, %v2855_v30  ;;  %v2865_v34 = vrot.slane %v2863_v22, 5  ;;  %v978_v37 = vrot.slane %v976_v27, 5  ;;  %v775_v41 = vld [vmem:[#allocation2 + $0x54] sm:$0xf] }
  0x70   : > { %v2851_v42 = vrot.slane %v2850_v2, 4  ;;  %v984_v50 = vrot.slane %v982_v31, 5  ;;  %v988_v45 = vrot.slane %v986_v55, 4  ;;  %v2868_v49 = vshrl.u32 %v2693_v32, 16  ;;  %697 = vst [vmem:[#allocation2 + $0x5c] sm:$0x1] %v696_v53 }
  0x71   : > { %v994_v47 = vrot.slane %v992_v40, 5  ;;  %v2861_v48 = vrot.slane %v2860_v23, 4  ;;  %v979_v52 = vor.u32 %v978_v37, %v975_v20  ;;  %v2871_v4 = vshll.u32 %v2693_v32, 16  ;;  %v307_v60 = vld [vmem:[%s8923_s16 + $0x3c] sm:$0xf] }
  0x72   : > { %v2856_v62 = vsel %vm8992_vm11, %v2851_v42, %v2855_v30  ;;  %v989_v56 = vor.u32 %v988_v45, %v984_v50  ;;  %v997_v36 = vshrl.u32 %v775_v41, 16  ;;  %v2870_v13 = vrot.slane %v2868_v49, 4  ;;  %v698_v20 = vld [vmem:[#allocation2 + $0x60] sm:$0xf]  ;;  %v3428_v37 = vld [vmem:[#allocation2 + $0xc] sm:$0xe] }
  0x73   : > { %v2866_v5 = vsel %vm8992_vm11, %v2861_v48, %v2865_v34  ;;  %v980_v6 = vrot.slane %v979_v52, 4  ;;  %v1000_v16 = vshll.u32 %v775_v41, 16  ;;  %v2873_v29 = vrot.slane %v2871_v4, 5  ;;  %v265_v53 = vld [vmem:[#allocation2 + $0x74] sm:$0x1] }
  0x74   : > { %v7364_v10 = vcombine.low %v2856_v62, %v2866_v5  ;;  %v990_v18 = vrot.slane %v989_v56, 4  ;;  %v999_v35 = vrot.slane %v997_v36, 4  ;;  %v448_v59 = vrot.slane %v446_v63, 7  ;;  %v9287_v28 = vld [vmem:[#allocation2 + $0x58] sm:$0xf] }
  0x75   : > { %v985_v51 = vsel %vm8992_vm11, %v980_v6, %v984_v50  ;;  %v1002_v17 = vrot.slane %v1000_v16, 5  ;;  %v3497_v30 = vrot.slane %v9026_v43, 5  ;;  %v2874_v21 = vor.u32 %v2873_v29, %v2870_v13  ;;  %v776_v2 = vld [vmem:[#allocation2 + $0x58] sm:$0xf]  ;;  %v308_v36 = vld [vmem:[%s8923_s16 + $0x40] sm:$0xf] }
  0x76   : > { %8141 = vmatmul.mubr.bf16.gmra.mrb[8].mxu0 %v7364_v10  ;;  %v995_v44 = vsel %vm8992_vm11, %v990_v18, %v994_v47  ;;  %v454_v22 = vshrl.u32 %v307_v60, 16  ;;  %v451_v55 = vor.u32 %v449_v61, %v448_v59  ;;  %v457_v40 = vshll.u32 %v307_v60, 16  ;;  %v702_v6 = vld [vmem:[#allocation2 + $0x68] sm:$0x1] }
  0x77   : > { %v7253_v27 = vcombine.low %v985_v51, %v995_v44  ;;  %v1003_v31 = vor.u32 %v1002_v17, %v999_v35  ;;  %v2875_v32 = vrot.slane %v2874_v21, 4  ;;  %v2877_v63 = vshll.u32 %v9287_v28, 16  ;;  %v9293_v39 = vld [vmem:[#allocation2 + $0x5c] sm:$0x1]  ;;  %v309_v21 = vld [vmem:[%s8923_s16 + $0x44] sm:$0xf] }
  0x78   : > { %v2881_v23 = vshrl.u32 %v9287_v28, 16  ;;  %v1006_v34 = vshll.u32 %v776_v2, 16  ;;  %v816_v41 = vld [vmem:[#allocation2 + $0x5c] sm:$0x1]  ;;  %v1010_v50 = vshrl.u32 %v776_v2, 16  ;;  %v699_v45 = vsel %vm8970_vm10, %v451_v55, %v698_v20 }
  0x79   : > { %7952 = vmatprep.mubr.bf16.mxu1 %v7253_v27  ;;  %v1004_v42 = vrot.slane %v1003_v31, 4  ;;  %v2879_v61 = vrot.slane %v2877_v63, 5  ;;  %v2887_v48 = vshll.u32 %v9293_v39, 16  ;;  %700 = vst [vmem:[#allocation2 + $0x60] sm:$0xf] %v699_v45  ;;  %v1016_v62 = vshll.u32 %v816_v41, 16 }
  0x7a   : > { %v2883_v47 = vrot.slane %v2881_v23, 4  ;;  %v1008_v52 = vrot.slane %v1006_v34, 5  ;;  %v1012_v49 = vrot.slane %v1010_v50, 4  ;;  %v452_v56 = vrot.slane %v448_v59, 4 }
  0x7b   : > { %v456_v4 = vrot.slane %v454_v22, 7  ;;  %v2889_v5 = vrot.slane %v2887_v48, 5  ;;  %v7383_v13 = vrot.slane %v3428_v37, 9  ;;  %v3494_v16 = vrot.slane %v9021_v38, 5 }
  0x7c   : > { %v2884_v60 = vor.u32 %v2883_v47, %v2879_v61  ;;  %v1013_v10 = vor.u32 %v1012_v49, %v1008_v52  ;;  %v1018_v18 = vrot.slane %v1016_v62, 5  ;;  %v2880_v51 = vsel %vm8992_vm11, %v2875_v32, %v2879_v61  ;;  %v3429_v32 = vld [vmem:[#allocation2 + $0x18] sm:$0xe]  ;;  %v212_v49 = vld [vmem:[#allocation2 + $0x78] sm:$0x1] }
  0x7d   : > { %v459_v29 = vor.u32 %v457_v40, %v456_v4  ;;  %v461_v35 = vrot.slane %v456_v4, 4  ;;  %v1009_v59 = vsel %vm8992_vm11, %v1004_v42, %v1008_v52  ;;  %v210_v44 = vsel %vm8916_vm3, 0, %v209_v33 }
  0x7e   : > { %v2885_v17 = vrot.slane %v2884_v60, 4  ;;  %v1014_v22 = vrot.slane %v1013_v10, 4  ;;  %211 = vst [vmem:[#allocation2 + $0x6c] sm:$0x1] %v210_v44  ;;  %v266_v27 = vsel %vm8932_vm4, 0, %v265_v53  ;;  %v9317_v31 = vsel %vm9111_vm14, %v7383_v13, %v3494_v16 }
  0x7f   : > { %v460_v20 = vsel %vm8963_vm9, %v452_v56, %v459_v29  ;;  %v703_v38 = vsel %vm8916_vm3, %v461_v35, %v702_v6  ;;  %v3496_v55 = vrot.slane %v3494_v16, 4  ;;  %267 = vst [vmem:[#allocation2 + $0x74] sm:$0x1] %v266_v27  ;;  %v463_v40 = vshrl.u32 %v308_v36, 16 }
  0x80   : > { %v2890_v2 = vsel %vm8992_vm11, %v2885_v17, %v2889_v5  ;;  %701 = vst [vmem:[#allocation2 + $0x64] sm:$0xf] %v460_v20  ;;  %704 = vst [vmem:[#allocation2 + $0x68] sm:$0x1] %v703_v38  ;;  %v1019_v23 = vsel %vm8992_vm11, %v1014_v22, %v1018_v18  ;;  %v2696_v34 = vld [vmem:[#allocation2 + $0x60] sm:$0xf] }
  0x81   : > { %v7365_v63 = vcombine.low %v2880_v51, %v2890_v2  ;;  %v777_v37 = vld [vmem:[#allocation2 + $0x60] sm:$0xf]  ;;  %v466_v41 = vshll.u32 %v308_v36, 16  ;;  %v471_v42 = vshrl.u32 %v309_v21, 16  ;;  %v7254_v50 = vcombine.low %v1009_v59, %v1019_v23  ;;  %v310_v20 = vld [vmem:[%s8923_s16 + $0x48] sm:$0xf] }
  0x82   : > { %v2892_v45 = vshrl.u32 %v2696_v34, 16  ;;  %v2895_v33 = vshll.u32 %v2696_v34, 16  ;;  %v1021_v61 = vshrl.u32 %v777_v37, 16  ;;  %v1024_v47 = vshll.u32 %v777_v37, 16  ;;  %v268_v51 = vld [vmem:[#allocation2 + $0x80] sm:$0x1] }
  0x83   : > { %8144 = vmatprep.mubr.bf16.mxu0 %v7365_v63  ;;  %v465_v48 = vrot.slane %v463_v40, 7  ;;  %v473_v52 = vrot.slane %v471_v42, 7  ;;  %v474_v53 = vshll.u32 %v309_v21, 16  ;;  %7953 = vmatmul.mubr.bf16.gmra.mrb[12].mxu1 %v7254_v50  ;;  %v7384_v60 = vrot.slane %v3429_v32, 9  ;;  %v311_v63 = vld [vmem:[%s8923_s16 + $0x4c] sm:$0xf] }
  0x84   : > { %v2894_v62 = vrot.slane %v2892_v45, 4  ;;  %v2897_v56 = vrot.slane %v2895_v33, 5  ;;  %v1023_v4 = vrot.slane %v1021_v61, 4  ;;  %v1026_v5 = vrot.slane %v1024_v47, 5  ;;  %v3430_v47 = vld [vmem:[#allocation2 + $0x24] sm:$0xe] }
  0x85   : > { %v468_v6 = vor.u32 %v466_v41, %v465_v48  ;;  %v469_v13 = vrot.slane %v465_v48, 4  ;;  %v476_v36 = vor.u32 %v474_v53, %v473_v52  ;;  %v478_v10 = vrot.slane %v473_v52, 4  ;;  %v705_v18 = vld [vmem:[#allocation2 + $0x6c] sm:$0xf] }
  0x86   : > { %v2898_v16 = vor.u32 %v2897_v56, %v2894_v62  ;;  %v9325_v29 = vsel %vm9111_vm14, %v7384_v60, %v3501_v26  ;;  %v213_v35 = vsel %vm8916_vm3, 0, %v212_v49  ;;  %v1027_v21 = vor.u32 %v1026_v5, %v1023_v4  ;;  %v709_v42 = vld [vmem:[#allocation2 + $0x74] sm:$0x1] }
  0x87   : > { %v9329_v17 = vld [vmem:[#allocation2 + $0x64] sm:$0xf]  ;;  %v9331_v59 = vld [vmem:[#allocation2 + $0x68] sm:$0x1]  ;;  %v477_v22 = vsel %vm8963_vm9, %v469_v13, %v476_v36  ;;  %v706_v7 = vsel %vm8970_vm10, %v468_v6, %v705_v18  ;;  %v7400_v26 = vcombine.low %v9325_v29, %v9134_v15  ;;  %214 = vst [vmem:[#allocation2 + $0x78] sm:$0x1] %v213_v35  ;;  %v9347_v32 = vsel %vm9111_vm14, %v3496_v55, %v3497_v30 }
  0x88   : > { %v778_v44 = vld [vmem:[#allocation2 + $0x64] sm:$0xf]  ;;  %v2901_v38 = vshll.u32 %v9329_v17, 16  ;;  %v2905_v27 = vshrl.u32 %v9329_v17, 16  ;;  %v2911_v2 = vshll.u32 %v9331_v59, 16  ;;  %v2899_v23 = vrot.slane %v2898_v16, 4 }
  0x89   : > { %v817_v40 = vld [vmem:[#allocation2 + $0x68] sm:$0x1]  ;;  %707 = vst [vmem:[#allocation2 + $0x6c] sm:$0xf] %v706_v7  ;;  %708 = vst [vmem:[#allocation2 + $0x70] sm:$0xf] %v477_v22  ;;  %v710_v61 = vsel %vm8916_vm3, %v478_v10, %v709_v42  ;;  %v7399_v35 = vcombine.low %v9317_v31, %v9347_v32 }
  0x8a   : > { %v1030_v34 = vshll.u32 %v778_v44, 16  ;;  %v1034_v37 = vshrl.u32 %v778_v44, 16  ;;  %v1040_v41 = vshll.u32 %v817_v40, 16  ;;  %v2903_v50 = vrot.slane %v2901_v38, 5  ;;  %711 = vst [vmem:[#allocation2 + $0x74] sm:$0x1] %v710_v61 }
  0x8b   : > { %v2907_v45 = vrot.slane %v2905_v27, 4  ;;  %v1028_v33 = vrot.slane %v1027_v21, 4  ;;  %v2913_v43 = vrot.slane %v2911_v2, 5  ;;  %v269_v30 = vsel %vm8932_vm4, 0, %v268_v51  ;;  %v271_v42 = vld [vmem:[#allocation2 + $0x8c] sm:$0x1] }
  0x8c   : > { %v1032_v48 = vrot.slane %v1030_v34, 5  ;;  %v1036_v52 = vrot.slane %v1034_v37, 4  ;;  %v1042_v53 = vrot.slane %v1040_v41, 5  ;;  %270 = vst [vmem:[#allocation2 + $0x80] sm:$0x1] %v269_v30  ;;  %v480_v49 = vshrl.u32 %v310_v20, 16 }
  0x8d   : > { %v2908_v55 = vor.u32 %v2907_v45, %v2903_v50  ;;  %v483_v62 = vshll.u32 %v310_v20, 16  ;;  %v2904_v56 = vsel %vm8992_vm11, %v2899_v23, %v2903_v50  ;;  %v488_v60 = vshrl.u32 %v311_v63, 16  ;;  %v215_v23 = vld [vmem:[#allocation2 + $0x84] sm:$0x1]  ;;  %v312_v50 = vld [vmem:[%s8923_s16 + $0x50] sm:$0xf] }
  0x8e   : > { %v1037_v4 = vor.u32 %v1036_v52, %v1032_v48  ;;  %v491_v5 = vshll.u32 %v311_v63, 16  ;;  %v482_v13 = vrot.slane %v480_v49, 7  ;;  %v7385_v36 = vrot.slane %v3430_v47, 9  ;;  %v712_v63 = vld [vmem:[#allocation2 + $0x78] sm:$0xf] }
  0x8f   : > { %v2909_v6 = vrot.slane %v2908_v55, 4  ;;  %v3508_v16 = vrot.slane %v9145_v24, 5  ;;  %v1033_v10 = vsel %vm8992_vm11, %v1028_v33, %v1032_v48  ;;  %v490_v21 = vrot.slane %v488_v60, 7  ;;  %v313_v48 = vld [vmem:[%s8923_s16 + $0x54] sm:$0xf] }
  0x90   : > { %v1038_v18 = vrot.slane %v1037_v4, 4  ;;  %v779_v51 = vld [vmem:[#allocation2 + $0x6c] sm:$0xf]  ;;  %v780_v44 = vld [vmem:[#allocation2 + $0x70] sm:$0xf]  ;;  %v485_v40 = vor.u32 %v483_v62, %v482_v13  ;;  %v486_v61 = vrot.slane %v482_v13, 4 }
  0x91   : > { %v2914_v22 = vsel %vm8992_vm11, %v2909_v6, %v2913_v43  ;;  %v1045_v7 = vshrl.u32 %v779_v51, 16  ;;  %v1048_v20 = vshll.u32 %v779_v51, 16  ;;  %v1054_v38 = vshll.u32 %v780_v44, 16  ;;  %v818_v32 = vld [vmem:[#allocation2 + $0x74] sm:$0x1] }
  0x92   : > { %v7366_v27 = vcombine.low %v2904_v56, %v2914_v22  ;;  %v1043_v24 = vsel %vm8992_vm11, %v1038_v18, %v1042_v53  ;;  %v1058_v2 = vshrl.u32 %v780_v44, 16  ;;  %v1064_v33 = vshll.u32 %v818_v32, 16  ;;  %v3431_v49 = vld [vmem:[#allocation2 + $0x30] sm:$0xe]  ;;  %v274_v18 = vld [vmem:[#allocation2 + $0x98] sm:$0x1] }
  0x93   : > { %v7255_v31 = vcombine.low %v1033_v10, %v1043_v24  ;;  %v1047_v34 = vrot.slane %v1045_v7, 4  ;;  %v1050_v37 = vrot.slane %v1048_v20, 5  ;;  %v1056_v41 = vrot.slane %v1054_v38, 5  ;;  %v716_v43 = vld [vmem:[#allocation2 + $0x80] sm:$0x1] }
  0x94   : > { %8145 = vmatmul.mubr.bf16.gmra.mrb[12].mxu0 %v7366_v27  ;;  %v1060_v45 = vrot.slane %v1058_v2, 4  ;;  %v493_v47 = vor.u32 %v491_v5, %v490_v21  ;;  %v495_v30 = vrot.slane %v490_v21, 4  ;;  %v713_v55 = vsel %vm8970_vm10, %v485_v40, %v712_v63  ;;  %v8669_v21 = vld [vmem:[%s11060_s1 + $0x188] sm:$0xff]   ;;  %v9388_v38 = vld [vmem:[%s8923_s16 + $0x58] sm:$0xf] }
  0x95   : > { %7956 = vmatprep.mubr.bf16.mxu1 %v7255_v31  ;;  %8180 = vmatprep.mubr.bf16.mxu0 %v7399_v35  ;;  %v1051_v52 = vor.u32 %v1050_v37, %v1047_v34  ;;  %v3509_v53 = vsel %vm9111_vm14, %v7385_v36, %v3508_v16  ;;  %v1066_v56 = vrot.slane %v1064_v33, 5  ;;  %714 = vst [vmem:[#allocation2 + $0x78] sm:$0xf] %v713_v55  ;;  %v3510_v60 = vrot.slane %v3508_v16, 4  ;;  %v218_v36 = vld [vmem:[#allocation2 + $0x90] sm:$0x1] }
  0x96   : > { %v1061_v62 = vor.u32 %v1060_v45, %v1056_v41  ;;  %v494_v4 = vsel %vm8963_vm9, %v486_v61, %v493_v47  ;;  %v717_v6 = vsel %vm8916_vm3, %v495_v30, %v716_v43  ;;  %v3511_v13 = vrot.slane %v9147_v25, 5  ;;  %v315_v45 = vld [vmem:[%s8923_s16 + $0x5c] sm:$0xf] }
  0x97   : > { %v1052_v5 = vrot.slane %v1051_v52, 4  ;;  %715 = vst [vmem:[#allocation2 + $0x7c] sm:$0xf] %v494_v4  ;;  %v216_v10 = vsel %vm8916_vm3, 0, %v215_v23  ;;  %718 = vst [vmem:[#allocation2 + $0x80] sm:$0x1] %v717_v6 }
  0x98   : > { %v1062_v35 = vrot.slane %v1061_v62, 4  ;;  %217 = vst [vmem:[#allocation2 + $0x84] sm:$0x1] %v216_v10  ;;  %v272_v51 = vsel %vm8932_vm4, 0, %v271_v42  ;;  %v497_v16 = vshrl.u32 %v312_v50, 16  ;;  %v500_v44 = vshll.u32 %v312_v50, 16 }
  0x99   : > { %v1057_v25 = vsel %vm8992_vm11, %v1052_v5, %v1056_v41  ;;  %v3512_v22 = vsel %vm9111_vm14, %v3510_v60, %v3511_v13  ;;  %273 = vst [vmem:[#allocation2 + $0x8c] sm:$0x1] %v272_v51  ;;  %v505_v7 = vshrl.u32 %v313_v48, 16  ;;  %v508_v20 = vshll.u32 %v313_v48, 16  ;;  %v8671_v50 = vld [vmem:[%s11060_s1 + $0x190] sm:$0xff]  }
  0x9a   : > { %v1067_v27 = vsel %vm8992_vm11, %v1062_v35, %v1066_v56  ;;  %v7401_v24 = vcombine.low %v3509_v53, %v3512_v22  ;;  %v499_v2 = vrot.slane %v497_v16, 7  ;;  %v7386_v40 = vrot.slane %v3431_v49, 9  ;;  %v277_v22 = vld [vmem:[#allocation2 + $0xa4] sm:$0x1] }
  0x9b   : > { %v7256_v63 = vcombine.low %v1057_v25, %v1067_v27  ;;  %v507_v23 = vrot.slane %v505_v7, 7  ;;  %v3515_v31 = vrot.slane %v9166_v11, 5  ;;  %v3518_v32 = vrot.slane %v9168_v1, 5  ;;  %v221_v25 = vld [vmem:[#allocation2 + $0x9c] sm:$0x1] }
  0x9c   : > { %8181 = vmatmul.mubr.bf16.vlgmr.msra.gmra.mrb[0].mxu0 %v7400_v26  ;;  %v502_v34 = vor.u32 %v500_v44, %v499_v2  ;;  %v503_v37 = vrot.slane %v499_v2, 4  ;;  %v219_v41 = vsel %vm8916_vm3, 0, %v218_v36  ;;  %v275_v42 = vsel %vm8932_vm4, 0, %v274_v18  ;;  %v781_v11 = vld [vmem:[#allocation2 + $0x78] sm:$0xf] }
  0x9d   : > { %7957 = vmatmul.mubr.bf16.gmra.mrb[16].mxu1 %v7256_v63  ;;  %8213 = vmatpush3.bf16.msra.mxu0 %v9208_v8  ;;  %v510_v1 = vor.u32 %v508_v20, %v507_v23  ;;  %v512_v15 = vrot.slane %v507_v23, 4  ;;  %v3516_v29 = vsel %vm9111_vm14, %v7386_v40, %v3515_v31  ;;  %v3517_v26 = vrot.slane %v3515_v31, 4  ;;  %220 = vst [vmem:[#allocation2 + $0x90] sm:$0x1] %v219_v41  ;;  %v3432_v8 = vld [vmem:[#allocation2 + $0x3c] sm:$0xe] }
  0x9e   : > { %276 = vst [vmem:[#allocation2 + $0x98] sm:$0x1] %v275_v42  ;;  %v782_v33 = vld [vmem:[#allocation2 + $0x7c] sm:$0xf]  ;;  %v1069_v61 = vshrl.u32 %v781_v11, 16  ;;  %v1072_v47 = vshll.u32 %v781_v11, 16  ;;  %8184 = vmatprep.mubr.bf16.mxu0 %v7401_v24  ;;  %8214 = vmatprep.subr.bf16.mxu0 %v8669_v21 }
  0x9f   : > { %v514_v43 = vshrl.u32 %v9388_v38, 16  ;;  %v517_v48 = vshll.u32 %v9388_v38, 16  ;;  %v819_v52 = vld [vmem:[#allocation2 + $0x80] sm:$0x1]  ;;  %v1078_v30 = vshll.u32 %v782_v33, 16  ;;  %v1082_v55 = vshrl.u32 %v782_v33, 16 }
  0xa0   : > { %v511_v53 = vsel %vm8963_vm9, %v503_v37, %v510_v1  ;;  %v719_v49 = vld [vmem:[#allocation2 + $0x84] sm:$0xf]  ;;  %v3519_v62 = vsel %vm9111_vm14, %v3517_v26, %v3518_v32  ;;  %v1071_v56 = vrot.slane %v1069_v61, 4  ;;  %v1074_v4 = vrot.slane %v1072_v47, 5  ;;  %v723_v6 = vld [vmem:[#allocation2 + $0x8c] sm:$0x1] }
  0xa1   : > { %v1088_v60 = vshll.u32 %v819_v52, 16  ;;  %v720_v5 = vsel %vm8970_vm10, %v502_v34, %v719_v49  ;;  %722 = vst [vmem:[#allocation2 + $0x88] sm:$0xf] %v511_v53  ;;  %v1080_v13 = vrot.slane %v1078_v30, 5  ;;  %v1084_v10 = vrot.slane %v1082_v55, 4  ;;  %8215 = vmatpush3.bf16.msra.mxu0 %v8669_v21  ;;  %v8673_v7 = vld [vmem:[%s11060_s1 + $0x198] sm:$0xff]  }
  0xa2   : > { %721 = vst [vmem:[#allocation2 + $0x84] sm:$0xf] %v720_v5  ;;  %v724_v36 = vsel %vm8916_vm3, %v512_v15, %v723_v6  ;;  %v7402_v18 = vcombine.low %v3516_v29, %v3519_v62  ;;  %v1075_v35 = vor.u32 %v1074_v4, %v1071_v56  ;;  %v516_v16 = vrot.slane %v514_v43, 7  ;;  %8216 = vmatprep.subr.bf16.mxu0 %v8671_v50  ;;  %v8677_v15 = vld [vmem:[%s11060_s1 + $0x1a0] sm:$0xff]   ;;  %v8681_v56 = vld [vmem:[%s11060_s1 + $0x1a8] sm:$0xff]  }
  0xa3   : > { %v1090_v51 = vrot.slane %v1088_v60, 5  ;;  %725 = vst [vmem:[#allocation2 + $0x8c] sm:$0x1] %v724_v36  ;;  %v522_v44 = vshrl.u32 %v315_v45, 16  ;;  %v1085_v20 = vor.u32 %v1084_v10, %v1080_v13  ;;  %v525_v38 = vshll.u32 %v315_v45, 16 }
  0xa4   : > { %v7387_v27 = vrot.slane %v3432_v8, 9  ;;  %v3522_v24 = vrot.slane %v9226_v0, 5  ;;  %v1076_v2 = vrot.slane %v1075_v35, 4  ;;  %8185 = vmatmul.mubr.bf16.gmra.mrb[4].mxu0 %v7402_v18  ;;  %v519_v21 = vor.u32 %v517_v48, %v516_v16  ;;  %v726_v23 = vld [vmem:[#allocation2 + $0x90] sm:$0xf] }
  0xa5   : > { %v520_v40 = vrot.slane %v516_v16, 4  ;;  %v524_v63 = vrot.slane %v522_v44, 7  ;;  %v1086_v31 = vrot.slane %v1085_v20, 4  ;;  %v3525_v37 = vrot.slane %v9228_v3, 5  ;;  %8217 = vmatpush3.bf16.msra.mxu0 %v8671_v50  ;;  %v730_v1 = vld [vmem:[#allocation2 + $0x98] sm:$0x1] }
  0xa6   : > { %v3523_v32 = vsel %vm9111_vm14, %v7387_v27, %v3522_v24  ;;  %v3524_v34 = vrot.slane %v3522_v24, 4  ;;  %v1081_v41 = vsel %vm8992_vm11, %v1076_v2, %v1080_v13  ;;  %v727_v11 = vsel %vm8970_vm10, %v519_v21, %v726_v23  ;;  %8218 = vmatprep.subr.bf16.mxu0 %v8673_v7  ;;  %v316_v33 = vld [vmem:[%s8923_s16 + $0x60] sm:$0xf]  ;;  %v317_v52 = vld [vmem:[%s8923_s16 + $0x64] sm:$0xf] }
  0xa7   : > { %v527_v42 = vor.u32 %v525_v38, %v524_v63  ;;  %v529_v0 = vrot.slane %v524_v63, 4  ;;  %v1091_v29 = vsel %vm8992_vm11, %v1086_v31, %v1090_v51  ;;  %728 = vst [vmem:[#allocation2 + $0x90] sm:$0xf] %v727_v11  ;;  %v222_v26 = vsel %vm8916_vm3, 0, %v221_v25  ;;  %v3433_v13 = vld [vmem:[#allocation2 + $0x48] sm:$0xe] }
  0xa8   : > { %v9434_v3 = vld [vmem:[#allocation2 + $0x88] sm:$0xf]  ;;  %v3526_v50 = vsel %vm9111_vm14, %v3524_v34, %v3525_v37  ;;  %v278_v45 = vsel %vm8932_vm4, 0, %v277_v22  ;;  %v7257_v61 = vcombine.low %v1081_v41, %v1091_v29  ;;  %223 = vst [vmem:[#allocation2 + $0x9c] sm:$0x1] %v222_v26  ;;  %v531_v6 = vshrl.u32 %v316_v33, 16 }
  0xa9   : > { %v9443_v47 = vld [vmem:[#allocation2 + $0x84] sm:$0xf]  ;;  %v1102_v43 = vshll.u32 %v9434_v3, 16  ;;  %v1106_v48 = vshrl.u32 %v9434_v3, 16  ;;  %v528_v8 = vsel %vm8963_vm9, %v520_v40, %v527_v42  ;;  %279 = vst [vmem:[#allocation2 + $0xa4] sm:$0x1] %v278_v45  ;;  %v731_v49 = vsel %vm8916_vm3, %v529_v0, %v730_v1  ;;  %8219 = vmatpush3.bf16.msra.mxu0 %v8673_v7 }
  0xaa   : > { %v820_v30 = vld [vmem:[#allocation2 + $0x8c] sm:$0x1]  ;;  %v1093_v55 = vshrl.u32 %v9443_v47, 16  ;;  %v1096_v53 = vshll.u32 %v9443_v47, 16  ;;  %729 = vst [vmem:[#allocation2 + $0x94] sm:$0xf] %v528_v8  ;;  %v7403_v62 = vcombine.low %v3523_v32, %v3526_v50  ;;  %7960 = vmatprep.mubr.bf16.mxu1 %v7257_v61  ;;  %8220 = vmatprep.subr.bf16.mxu0 %v8677_v15 }
  0xab   : > { %v1104_v4 = vrot.slane %v1102_v43, 5  ;;  %v1108_v60 = vrot.slane %v1106_v48, 4  ;;  %v1112_v5 = vshll.u32 %v820_v30, 16  ;;  %732 = vst [vmem:[#allocation2 + $0x98] sm:$0x1] %v731_v49  ;;  %v534_v18 = vshll.u32 %v316_v33, 16 }
  0xac   : > { %v1095_v10 = vrot.slane %v1093_v55, 4  ;;  %v1098_v36 = vrot.slane %v1096_v53, 5  ;;  %8188 = vmatprep.mubr.bf16.mxu0 %v7403_v62  ;;  %v539_v35 = vshrl.u32 %v317_v52, 16  ;;  %v533_v44 = vrot.slane %v531_v6, 7  ;;  %v8685_v63 = vld [vmem:[%s11060_s1 + $0x1b0] sm:$0xff]   ;;  %v8689_v43 = vld [vmem:[%s11060_s1 + $0x1b8] sm:$0xff]  }
  0xad   : > { %v1109_v51 = vor.u32 %v1108_v60, %v1104_v4  ;;  %v1114_v16 = vrot.slane %v1112_v5, 5  ;;  %v542_v25 = vshll.u32 %v317_v52, 16  ;;  %v7388_v20 = vrot.slane %v3433_v13, 9  ;;  %8221 = vmatpush3.bf16.msra.mxu0 %v8677_v15  ;;  %v224_v37 = vld [vmem:[#allocation2 + $0xa8] sm:$0x1] }
  0xae   : > { %v1099_v22 = vor.u32 %v1098_v36, %v1095_v10  ;;  %v541_v7 = vrot.slane %v539_v35, 7  ;;  %v3529_v38 = vrot.slane %v9259_v58, 5  ;;  %v9458_v24 = vld [vmem:[#allocation2 + $0x90] sm:$0xf]  ;;  %v536_v2 = vor.u32 %v534_v18, %v533_v44  ;;  %8222 = vmatprep.subr.bf16.mxu0 %v8681_v56  ;;  %v318_v29 = vld [vmem:[%s8923_s16 + $0x68] sm:$0xf] }
  0xaf   : > { %v1110_v27 = vrot.slane %v1109_v51, 4  ;;  %v537_v21 = vrot.slane %v533_v44, 4  ;;  %v3532_v40 = vrot.slane %v9267_v12, 5  ;;  %v1117_v31 = vshrl.u32 %v9458_v24, 16  ;;  %v733_v34 = vld [vmem:[#allocation2 + $0x9c] sm:$0xf] }
  0xb0   : > { %v1100_v23 = vrot.slane %v1099_v22, 4  ;;  %v1120_v32 = vshll.u32 %v9458_v24, 16  ;;  %v544_v58 = vor.u32 %v542_v25, %v541_v7  ;;  %v280_v41 = vld [vmem:[#allocation2 + $0xb0] sm:$0x1]  ;;  %v546_v12 = vrot.slane %v541_v7, 4 }
  0xb1   : > { %v1115_v42 = vsel %vm8992_vm11, %v1110_v27, %v1114_v16  ;;  %v9468_v0 = vld [vmem:[#allocation2 + $0x94] sm:$0xf]  ;;  %v734_v11 = vsel %vm8970_vm10, %v536_v2, %v733_v34  ;;  %v737_v1 = vld [vmem:[#allocation2 + $0xa4] sm:$0x1]  ;;  %v3530_v15 = vsel %vm9111_vm14, %v7388_v20, %v3529_v38  ;;  %v1119_v45 = vrot.slane %v1117_v31, 4  ;;  %8223 = vmatpush3.bf16.msra.mxu0 %v8681_v56 }
  0xb2   : > { %v1105_v50 = vsel %vm8992_vm11, %v1100_v23, %v1104_v4  ;;  %v821_v26 = vld [vmem:[#allocation2 + $0x98] sm:$0x1]  ;;  %v1122_v33 = vrot.slane %v1120_v32, 5  ;;  %v1126_v61 = vshll.u32 %v9468_v0, 16  ;;  %735 = vst [vmem:[#allocation2 + $0x9c] sm:$0xf] %v734_v11  ;;  %v545_v30 = vsel %vm8963_vm9, %v537_v21, %v544_v58  ;;  %8224 = vmatprep.subr.bf16.mxu0 %v8685_v63 }
  0xb3   : > { %v7258_v48 = vcombine.low %v1105_v50, %v1115_v42  ;;  %v1130_v8 = vshrl.u32 %v9468_v0, 16  ;;  %v1136_v52 = vshll.u32 %v821_v26, 16  ;;  %v319_v55 = vld [vmem:[%s8923_s16 + $0x6c] sm:$0xf]  ;;  %v9485_v53 = vld [vmem:[#allocation2 + $0x54] sm:$0xe]  ;;  %v738_v56 = vsel %vm8916_vm3, %v546_v12, %v737_v1 }
  0xb4   : > { %v1123_v49 = vor.u32 %v1122_v33, %v1119_v45  ;;  %v1128_v62 = vrot.slane %v1126_v61, 5  ;;  %736 = vst [vmem:[#allocation2 + $0xa0] sm:$0xf] %v545_v30  ;;  %v3531_v4 = vrot.slane %v3529_v38, 4  ;;  %v227_v60 = vld [vmem:[#allocation2 + $0xb4] sm:$0x1] }
  0xb5   : > { %7961 = vmatmul.mubr.bf16.gmra.mrb[20].mxu1 %v7258_v48  ;;  %v1132_v5 = vrot.slane %v1130_v8, 4  ;;  %v1138_v6 = vrot.slane %v1136_v52, 5  ;;  %739 = vst [vmem:[#allocation2 + $0xa4] sm:$0x1] %v738_v56  ;;  %v225_v13 = vsel %vm8916_vm3, 0, %v224_v37  ;;  %v281_v10 = vsel %vm8932_vm4, 0, %v280_v41  ;;  %8225 = vmatpush3.bf16.msra.mxu0 %v8685_v63 }
  0xb6   : > { %v1124_v36 = vrot.slane %v1123_v49, 4  ;;  %v3533_v18 = vsel %vm9111_vm14, %v3531_v4, %v3532_v40  ;;  %226 = vst [vmem:[#allocation2 + $0xa8] sm:$0x1] %v225_v13  ;;  %282 = vst [vmem:[#allocation2 + $0xb0] sm:$0x1] %v281_v10  ;;  %v548_v35 = vshrl.u32 %v318_v29, 16  ;;  %8226 = vmatprep.subr.bf16.mxu0 %v8689_v43 }
  0xb7   : > { %v551_v51 = vshll.u32 %v318_v29, 16  ;;  %v9498_v16 = vld [vmem:[%s11060_s1 + $0x1c0] sm:$0xff]   ;;  %v1133_v44 = vor.u32 %v1132_v5, %v1128_v62  ;;  %v7404_v25 = vcombine.low %v3530_v15, %v3533_v18  ;;  %v556_v22 = vshrl.u32 %v319_v55, 16  ;;  %v283_v37 = vld [vmem:[#allocation2 + $0xbc] sm:$0x1] }
  0xb8   : > { %v559_v7 = vshll.u32 %v319_v55, 16  ;;  %v1129_v20 = vsel %vm8992_vm11, %v1124_v36, %v1128_v62  ;;  %v550_v38 = vrot.slane %v548_v35, 7  ;;  %v7389_v27 = vrot.slane %v9485_v53, 9  ;;  %v320_v1 = vld [vmem:[%s8923_s16 + $0x70] sm:$0xf] }
  0xb9   : > { %v1134_v2 = vrot.slane %v1133_v44, 4  ;;  %v9503_v21 = vld [vmem:[#allocation2 + $0x9c] sm:$0xf]  ;;  %8189 = vmatmul.mubr.bf16.gmra.mrb[8].mxu0 %v7404_v25  ;;  %v558_v40 = vrot.slane %v556_v22, 7  ;;  %v3536_v63 = vrot.slane %v9287_v28, 5  ;;  %v228_v23 = vsel %vm8916_vm3, 0, %v227_v60 }
  0xba   : > { %v1141_v31 = vshrl.u32 %v9503_v21, 16  ;;  %v1144_v32 = vshll.u32 %v9503_v21, 16  ;;  %v553_v58 = vor.u32 %v551_v51, %v550_v38  ;;  %v554_v34 = vrot.slane %v550_v38, 4  ;;  %229 = vst [vmem:[#allocation2 + $0xb4] sm:$0x1] %v228_v23  ;;  %8227 = vmatpush3.bf16.msra.mxu0 %v8689_v43 }
  0xbb   : > { %v1139_v41 = vsel %vm8992_vm11, %v1134_v2, %v1138_v6  ;;  %v9512_v42 = vld [vmem:[#allocation2 + $0xa0] sm:$0xf]  ;;  %v561_v12 = vor.u32 %v559_v7, %v558_v40  ;;  %v563_v11 = vrot.slane %v558_v40, 4  ;;  %v3539_v28 = vrot.slane %v9293_v39, 5  ;;  %v321_v15 = vld [vmem:[%s8923_s16 + $0x74] sm:$0xf]  ;;  %8260 = vmatprep.subr.bf16.mxu0 %v9498_v16 }
  0xbc   : > { %v7259_v29 = vcombine.low %v1129_v20, %v1139_v41  ;;  %v822_v50 = vld [vmem:[#allocation2 + $0xa4] sm:$0x1]  ;;  %v1143_v26 = vrot.slane %v1141_v31, 4  ;;  %v1146_v45 = vrot.slane %v1144_v32, 5  ;;  %v1150_v33 = vshll.u32 %v9512_v42, 16 }
  0xbd   : > { %v3435_v61 = vld [vmem:[#allocation2 + $0x60] sm:$0xe]  ;;  %v1154_v43 = vshrl.u32 %v9512_v42, 16  ;;  %v1160_v48 = vshll.u32 %v822_v50, 16  ;;  %v562_v8 = vsel %vm8963_vm9, %v554_v34, %v561_v12  ;;  %v740_v52 = vld [vmem:[#allocation2 + $0xa8] sm:$0xf]  ;;  %v3537_v39 = vsel %vm9111_vm14, %v7389_v27, %v3536_v63 }
  0xbe   : > { %v744_v30 = vld [vmem:[#allocation2 + $0xb0] sm:$0x1]  ;;  %7964 = vmatprep.mubr.bf16.mxu1 %v7259_v29  ;;  %v1147_v55 = vor.u32 %v1146_v45, %v1143_v26  ;;  %v1152_v53 = vrot.slane %v1150_v33, 5  ;;  %v741_v49 = vsel %vm8970_vm10, %v553_v58, %v740_v52  ;;  %743 = vst [vmem:[#allocation2 + $0xac] sm:$0xf] %v562_v8  ;;  %v3538_v5 = vrot.slane %v3536_v63, 4 }
  0xbf   : > { %v745_v62 = vsel %vm8916_vm3, %v563_v11, %v744_v30  ;;  %v9528_v56 = vld [vmem:[#allocation2 + $0x6c] sm:$0xe]  ;;  %v1156_v4 = vrot.slane %v1154_v43, 4  ;;  %v1162_v60 = vrot.slane %v1160_v48, 5  ;;  %742 = vst [vmem:[#allocation2 + $0xa8] sm:$0xf] %v741_v49 }
  0xc0   : > { %746 = vst [vmem:[#allocation2 + $0xb0] sm:$0x1] %v745_v62  ;;  %v284_v6 = vsel %vm8932_vm4, 0, %v283_v37  ;;  %v1148_v13 = vrot.slane %v1147_v55, 4  ;;  %v565_v10 = vshrl.u32 %v320_v1, 16  ;;  %v568_v36 = vshll.u32 %v320_v1, 16 }
  0xc1   : > { %285 = vst [vmem:[#allocation2 + $0xbc] sm:$0x1] %v284_v6  ;;  %v573_v18 = vshrl.u32 %v321_v15, 16  ;;  %v1157_v35 = vor.u32 %v1156_v4, %v1152_v53  ;;  %v3540_v51 = vsel %vm9111_vm14, %v3538_v5, %v3539_v28  ;;  %v576_v44 = vshll.u32 %v321_v15, 16  ;;  %v2700_v22 = vld [vmem:[#allocation2 + $0x70] sm:$0xf] }
  0xc2   : > { %v7390_v25 = vrot.slane %v3435_v61, 9  ;;  %v1153_v7 = vsel %vm8992_vm11, %v1148_v13, %v1152_v53  ;;  %v7405_v20 = vcombine.low %v3537_v39, %v3540_v51  ;;  %v567_v38 = vrot.slane %v565_v10, 7  ;;  %v747_v2 = vld [vmem:[#allocation2 + $0xb4] sm:$0xf]  ;;  %v9559_v53 = vld [vmem:[#allocation2 + $0x7c] sm:$0xf] }
  0xc3   : > { %v575_v27 = vrot.slane %v573_v18, 7  ;;  %v1158_v40 = vrot.slane %v1157_v35, 4  ;;  %v3543_v63 = vrot.slane %v9329_v17, 5  ;;  %v3546_v23 = vrot.slane %v9331_v59, 5  ;;  %v2701_v1 = vld [vmem:[#allocation2 + $0x74] sm:$0x1] }
  0xc4   : > { %v7391_v31 = vrot.slane %v9528_v56, 9  ;;  %8192 = vmatprep.mubr.bf16.mxu0 %v7405_v20  ;;  %v570_v32 = vor.u32 %v568_v36, %v567_v38  ;;  %v571_v58 = vrot.slane %v567_v38, 4  ;;  %v3550_v17 = vrot.slane %v2700_v22, 5  ;;  %v3437_v49 = vld [vmem:[#allocation2 + $0x78] sm:$0xe] }
  0xc5   : > { %v578_v34 = vor.u32 %v576_v44, %v575_v27  ;;  %v580_v37 = vrot.slane %v575_v27, 4  ;;  %v1163_v41 = vsel %vm8992_vm11, %v1158_v40, %v1162_v60  ;;  %v9541_v12 = vld [vmem:[#allocation2 + $0xac] sm:$0xf]  ;;  %v3544_v11 = vsel %vm9111_vm14, %v7390_v25, %v3543_v63  ;;  %v3438_v40 = vld [vmem:[#allocation2 + $0x84] sm:$0xe] }
  0xc6   : > { %v3545_v28 = vrot.slane %v3543_v63, 4  ;;  %v7260_v15 = vcombine.low %v1153_v7, %v1163_v41  ;;  %v9545_v59 = vld [vmem:[#allocation2 + $0xa8] sm:$0xf]  ;;  %v1174_v50 = vshll.u32 %v9541_v12, 16  ;;  %v1178_v26 = vshrl.u32 %v9541_v12, 16 }
  0xc7   : > { %v823_v29 = vld [vmem:[#allocation2 + $0xb0] sm:$0x1]  ;;  %v579_v45 = vsel %vm8963_vm9, %v571_v58, %v578_v34  ;;  %v1165_v33 = vshrl.u32 %v9545_v59, 16  ;;  %v1168_v61 = vshll.u32 %v9545_v59, 16  ;;  %v748_v48 = vsel %vm8970_vm10, %v570_v32, %v747_v2  ;;  %v9566_v7 = vld [vmem:[#allocation2 + $0x80] sm:$0x1] }
  0xc8   : > { %v1184_v43 = vshll.u32 %v823_v29, 16  ;;  %750 = vst [vmem:[#allocation2 + $0xb8] sm:$0xf] %v579_v45  ;;  %v751_v8 = vld [vmem:[#allocation2 + $0xbc] sm:$0x1]  ;;  %7965 = vmatmul.mubr.bf16.gmra.mrb[24].mxu1 %v7260_v15  ;;  %v1176_v52 = vrot.slane %v1174_v50, 5  ;;  %v3547_v55 = vsel %vm9111_vm14, %v3545_v28, %v3546_v23  ;;  %v3551_v6 = vsel %vm9111_vm14, %v7391_v31, %v3550_v17 }
  0xc9   : > { %v1180_v30 = vrot.slane %v1178_v26, 4  ;;  %749 = vst [vmem:[#allocation2 + $0xb4] sm:$0xf] %v748_v48  ;;  %v752_v39 = vsel %vm8916_vm3, %v580_v37, %v751_v8  ;;  %v1167_v62 = vrot.slane %v1165_v33, 4  ;;  %v1170_v56 = vrot.slane %v1168_v61, 5 }
  0xca   : > { %v1186_v4 = vrot.slane %v1184_v43, 5  ;;  %753 = vst [vmem:[#allocation2 + $0xbc] sm:$0x1] %v752_v39  ;;  %v7406_v60 = vcombine.low %v3544_v11, %v3547_v55  ;;  %v3552_v13 = vrot.slane %v3550_v17, 4  ;;  %v3553_v10 = vrot.slane %v2701_v1, 5 }
  0xcb   : > { %v1181_v5 = vor.u32 %v1180_v30, %v1176_v52  ;;  %v1171_v36 = vor.u32 %v1170_v56, %v1167_v62  ;;  %v7392_v51 = vrot.slane %v3437_v49, 9  ;;  %v3557_v44 = vrot.slane %v9559_v53, 5  ;;  %v2706_v2 = vld [vmem:[#allocation2 + $0x88] sm:$0xf]  ;;  %v2707_v34 = vld [vmem:[#allocation2 + $0x8c] sm:$0x1] }
  0xcc   : > { %8193 = vmatmul.mubr.bf16.gmra.mrb[12].mxu0 %v7406_v60  ;;  %v3554_v35 = vsel %vm9111_vm14, %v3552_v13, %v3553_v10  ;;  %v2709_v37 = vld [vmem:[#allocation2 + $0x94] sm:$0xf]  ;;  %v3439_v41 = vld [vmem:[#allocation2 + $0x90] sm:$0xe]  ;;  %v3560_v15 = vrot.slane %v9566_v7, 5  ;;  %v7393_v39 = vrot.slane %v3438_v40, 9 }
  0xcd   : > { %v1182_v18 = vrot.slane %v1181_v5, 4  ;;  %v1172_v25 = vrot.slane %v1171_v36, 4  ;;  %v7407_v22 = vcombine.low %v3551_v6, %v3554_v35  ;;  %v3559_v27 = vrot.slane %v3557_v44, 4  ;;  %v2710_v29 = vld [vmem:[#allocation2 + $0x98] sm:$0x1] }
  0xce   : > { %v3558_v58 = vsel %vm9111_vm14, %v7392_v51, %v3557_v44  ;;  %v9583_v33 = vld [vmem:[#allocation2 + $0x4] sm:$0xf]  ;;  %v8759_v61 = vld [vmem:[#allocation2] sm:$0xf]  ;;  %v3440_v48 = vld [vmem:[#allocation2 + $0x9c] sm:$0xe] }
  0xcf   : > { %v1187_v20 = vsel %vm8992_vm11, %v1182_v18, %v1186_v4  ;;  %v9570_v38 = vld [vmem:[#allocation2 + $0xb8] sm:$0xf]  ;;  %v1177_v63 = vsel %vm8992_vm11, %v1172_v25, %v1176_v52  ;;  %8196 = vmatprep.mubr.bf16.mxu0 %v7407_v22  ;;  %v7271_v43 = vcombine.low %v8759_v61, %v9583_v33  ;;  %v3561_v30 = vsel %vm9111_vm14, %v3559_v27, %v3560_v15  ;;  %v2712_v55 = vld [vmem:[#allocation2 + $0xa0] sm:$0xf]  ;;  %v2713_v49 = vld [vmem:[#allocation2 + $0xa4] sm:$0x1] }
  0xd0   : > { %v9574_v23 = vld [vmem:[#allocation2 + $0xb4] sm:$0xf]  ;;  %v1198_v31 = vshll.u32 %v9570_v38, 16  ;;  %v1202_v32 = vshrl.u32 %v9570_v38, 16  ;;  %v7261_v11 = vcombine.low %v1177_v63, %v1187_v20  ;;  %v7408_v4 = vcombine.low %v3558_v58, %v3561_v30  ;;  %v3441_v5 = vld [vmem:[#allocation2 + $0xa8] sm:$0xe] }
  0xd1   : > { %v824_v28 = vld [vmem:[#allocation2 + $0xbc] sm:$0x1]  ;;  %v1189_v1 = vshrl.u32 %v9574_v23, 16  ;;  %v1192_v17 = vshll.u32 %v9574_v23, 16  ;;  %v3564_v60 = vrot.slane %v2706_v2, 5  ;;  %v3567_v13 = vrot.slane %v2707_v34, 5 }
  0xd2   : > { %v1200_v50 = vrot.slane %v1198_v31, 5  ;;  %v1204_v26 = vrot.slane %v1202_v32, 4  ;;  %v1208_v45 = vshll.u32 %v824_v28, 16  ;;  %7968 = vmatprep.mubr.bf16.mxu1 %v7261_v11  ;;  %v7394_v10 = vrot.slane %v3439_v41, 9  ;;  %v2715_v25 = vld [vmem:[#allocation2 + $0xac] sm:$0xf] }
  0xd3   : > { %v1191_v8 = vrot.slane %v1189_v1, 4  ;;  %v1194_v52 = vrot.slane %v1192_v17, 5  ;;  %v3571_v36 = vrot.slane %v2709_v37, 5  ;;  %v3565_v35 = vsel %vm9111_vm14, %v7393_v39, %v3564_v60  ;;  %v2716_v22 = vld [vmem:[#allocation2 + $0xb0] sm:$0x1] }
  0xd4   : > { %v1205_v62 = vor.u32 %v1204_v26, %v1200_v50  ;;  %v1210_v56 = vrot.slane %v1208_v45, 5  ;;  %8197 = vmatmul.mubr.bf16.gmra.mrb[16].mxu0 %v7408_v4  ;;  %v3566_v51 = vrot.slane %v3564_v60, 4  ;;  %v3574_v44 = vrot.slane %v2710_v29, 5  ;;  %v2718_v20 = vld [vmem:[#allocation2 + $0xb8] sm:$0xf] }
  0xd5   : > { %v1195_v6 = vor.u32 %v1194_v52, %v1191_v8  ;;  %v3442_v27 = vld [vmem:[#allocation2 + $0xb4] sm:$0xe]  ;;  %v3572_v2 = vsel %vm9111_vm14, %v7394_v10, %v3571_v36  ;;  %v3573_v63 = vrot.slane %v3571_v36, 4  ;;  %v7395_v31 = vrot.slane %v3440_v48, 9  ;;  %v2719_v32 = vld [vmem:[#allocation2 + $0xbc] sm:$0x1] }
  0xd6   : > { %v1206_v18 = vrot.slane %v1205_v62, 4  ;;  %v230_v58 = vld [vmem:[#allocation2 + $0xc0] sm:$0x1]  ;;  %v286_v34 = vld [vmem:[#allocation2 + $0xc8] sm:$0x1]  ;;  %v3568_v41 = vsel %vm9111_vm14, %v3566_v51, %v3567_v13  ;;  %v3578_v11 = vrot.slane %v2712_v55, 5 }
  0xd7   : > { %v1196_v40 = vrot.slane %v1195_v6, 4  ;;  %v3581_v28 = vrot.slane %v2713_v49, 5  ;;  %v7409_v17 = vcombine.low %v3565_v35, %v3568_v41  ;;  %v3575_v15 = vsel %vm9111_vm14, %v3573_v63, %v3574_v44  ;;  %v322_v26 = vld [vmem:[%s8923_s16 + $0x78] sm:$0xf]  ;;  %v323_v52 = vld [vmem:[%s8923_s16 + $0x7c] sm:$0xf] }
  0xd8   : > { %v1211_v37 = vsel %vm8992_vm11, %v1206_v18, %v1210_v56  ;;  %v7396_v29 = vrot.slane %v3441_v5, 9  ;;  %v7410_v61 = vcombine.low %v3572_v2, %v3575_v15  ;;  %v3579_v48 = vsel %vm9111_vm14, %v7395_v31, %v3578_v11  ;;  %v9612_v35 = vld [vmem:[#allocation2 + $0x10] sm:$0xf]  ;;  %v8761_v51 = vld [vmem:[#allocation2 + $0xc] sm:$0xf] }
  0xd9   : > { %v1201_v1 = vsel %vm8992_vm11, %v1196_v40, %v1200_v50  ;;  %v3580_v8 = vrot.slane %v3578_v11, 4  ;;  %8200 = vmatprep.mubr.bf16.mxu0 %v7409_v17  ;;  %v3585_v30 = vrot.slane %v2715_v25, 5  ;;  %v3588_v39 = vrot.slane %v2716_v22, 5  ;;  %v8762_v2 = vld [vmem:[#allocation2 + $0x18] sm:$0xf] }
  0xda   : > { %v7262_v45 = vcombine.low %v1201_v1, %v1211_v37  ;;  %v7397_v55 = vrot.slane %v3442_v27, 9  ;;  %v3592_v49 = vrot.slane %v2718_v20, 5  ;;  %v3595_v62 = vrot.slane %v2719_v32, 5  ;;  %v9621_v63 = vld [vmem:[#allocation2 + $0x1c] sm:$0xf] }
  0xdb   : > { %v3582_v50 = vsel %vm9111_vm14, %v3580_v8, %v3581_v28  ;;  %v231_v56 = vsel %vm8916_vm3, 0, %v230_v58  ;;  %v287_v4 = vsel %vm8932_vm4, 0, %v286_v34  ;;  %v3586_v5 = vsel %vm9111_vm14, %v7396_v29, %v3585_v30  ;;  %v8680_v58 = vld [vmem:[%s11060_s1 + $0x88] sm:$0xff]   ;;  %v8764_v29 = vld [vmem:[%s11060_s1 + $0x80] sm:$0xff]  }
  0xdc   : > { %7969 = vmatmul.mubr.bf16.gmra.mrb[28].mxu1 %v7262_v45  ;;  %v7411_v60 = vcombine.low %v3579_v48, %v3582_v50  ;;  %v3587_v6 = vrot.slane %v3585_v30, 4  ;;  %232 = vst [vmem:[#allocation2 + $0xc0] sm:$0x1] %v231_v56  ;;  %288 = vst [vmem:[#allocation2 + $0xc8] sm:$0x1] %v287_v4  ;;  %8201 = vmatmul.mubr.bf16.gmra.mrb[20].mxu0 %v7410_v61  ;;  %v3594_v13 = vrot.slane %v3592_v49, 4 }
  0xdd   : > { %7988 = vmatprep.mubr.bf16.mxu1 %v7271_v43  ;;  %v582_v10 = vshrl.u32 %v322_v26, 16  ;;  %v585_v36 = vshll.u32 %v322_v26, 16  ;;  %v590_v18 = vshrl.u32 %v323_v52, 16  ;;  %v7272_v44 = vcombine.low %v8761_v51, %v9612_v35  ;;  %v8765_v61 = vld [vmem:[#allocation2 + $0x24] sm:$0xf] }
  0xde   : > { %8204 = vmatprep.mubr.bf16.mxu0 %v7411_v60  ;;  %v3589_v43 = vsel %vm9111_vm14, %v3587_v6, %v3588_v39  ;;  %v593_v25 = vshll.u32 %v323_v52, 16  ;;  %v3593_v22 = vsel %vm9111_vm14, %v7397_v55, %v3592_v49  ;;  %v3596_v20 = vsel %vm9111_vm14, %v3594_v13, %v3595_v62  ;;  %v9639_v48 = vld [vmem:[#allocation2 + $0x28] sm:$0xf]  ;;  %v9642_v52 = vld [vmem:[#allocation2 + $0x34] sm:$0xf]  ;;  %v8688_v39 = vld [vmem:[%s11060_s1 + $0x98] sm:$0xff]  }
  0xdf   : > { %v584_v27 = vrot.slane %v582_v10, 7  ;;  %v592_v40 = vrot.slane %v590_v18, 7  ;;  %v7273_v31 = vcombine.low %v8762_v2, %v9621_v63  ;;  %v7412_v32 = vcombine.low %v3586_v5, %v3589_v43  ;;  %v8693_v60 = vld [vmem:[%s11060_s1 + $0xa0] sm:$0xff]   ;;  %v8769_v10 = vld [vmem:[#allocation2 + $0x3c] sm:$0xf] }
  0xe0   : > { %v7413_v28 = vcombine.low %v3593_v22, %v3596_v20  ;;  %v7274_v8 = vcombine.low %v8765_v61, %v9639_v48  ;;  %v7275_v30 = vcombine.low %v8767_v54, %v9642_v52  ;;  %v2949_v6 = vshll.u32 %v9559_v53, 16  ;;  %v9658_v43 = vld [vmem:[#allocation2 + $0x4c] sm:$0xf]  ;;  %v8691_v20 = vld [vmem:[#allocation2 + $0x18] sm:$0xff]  }
  0xe1   : > { %v587_v34 = vor.u32 %v585_v36, %v584_v27  ;;  %v588_v37 = vrot.slane %v584_v27, 4  ;;  %v595_v41 = vor.u32 %v593_v25, %v592_v40  ;;  %v597_v11 = vrot.slane %v592_v40, 4  ;;  %v9653_v36 = vld [vmem:[#allocation2 + $0x40] sm:$0xf]  ;;  %v8699_v40 = vld [vmem:[%s11060_s1 + $0xa8] sm:$0xff]  }
  0xe2   : > { %v2953_v13 = vshrl.u32 %v9559_v53, 16  ;;  %v7276_v18 = vcombine.low %v8769_v10, %v9653_v36  ;;  %v233_v53 = vld [vmem:[#allocation2 + $0xcc] sm:$0x1] }
  0xe3   : > { %v596_v1 = vsel %vm8963_vm9, %v588_v37, %v595_v41  ;;  %v754_v17 = vld [vmem:[#allocation2 + $0xc0] sm:$0xf]  ;;  %v758_v15 = vld [vmem:[#allocation2 + $0xc8] sm:$0x1]  ;;  %v234_v2 = vsel %vm8916_vm3, 0, %v233_v53  ;;  %v1859_v41 = vrot.slane %v9583_v33, 5 }
  0xe4   : > { %7989 = vmatmul.mubr.bf16.vlgmr.msra.gmra.mrb[0].mxu1 %v7272_v44  ;;  %v755_v26 = vsel %vm8970_vm10, %v587_v34, %v754_v17  ;;  %757 = vst [vmem:[#allocation2 + $0xc4] sm:$0xf] %v596_v1  ;;  %v759_v45 = vsel %vm8916_vm3, %v597_v11, %v758_v15  ;;  %8205 = vmatmul.mubr.bf16.gmra.mrb[24].mxu0 %v7412_v32  ;;  %v8771_v44 = vld [vmem:[#allocation2 + $0x48] sm:$0xf]  ;;  %v9670_v32 = vrot.slane %v2953_v13, 4  ;;  %v1866_v1 = vrot.slane %v9612_v35, 5 }
  0xe5   : > { %8021 = vmatpush3.bf16.msra.mxu1 %v8764_v29  ;;  %7992 = vmatprep.mubr.bf16.mxu1 %v7273_v31  ;;  %756 = vst [vmem:[#allocation2 + $0xc0] sm:$0xf] %v755_v26  ;;  %760 = vst [vmem:[#allocation2 + $0xc8] sm:$0x1] %v759_v45  ;;  %v7277_v25 = vcombine.low %v8771_v44, %v9658_v43  ;;  %v9668_v31 = vrot.slane %v2949_v6, 5  ;;  %v8694_v11 = vld [vmem:[#allocation2 + $0x24] sm:$0xff]  }
  0xe6   : > { %8022 = vmatprep.subr.bf16.mxu1 %v8680_v58  ;;  %8208 = vmatprep.mubr.bf16.mxu0 %v7413_v28  ;;  %235 = vst [vmem:[#allocation2 + $0xcc] sm:$0x1] %v234_v2  ;;  %v8773_v34 = vld [vmem:[#allocation2 + $0x8] sm:$0x1]  ;;  %v1806_v28 = vld [vmem:[#allocation2] sm:$0xe] }
  0xe7   : > { %11094 = vst [vmem:[#allocation3_spill] sm:$0xff] %v9668_v31  ;;  %v1862_v37 = vrot.slane %v8773_v34, 5  ;;  %v1873_v17 = vrot.slane %v9621_v63, 5  ;;  %v8774_v15 = vld [vmem:[#allocation2 + $0x14] sm:$0x1]  ;;  %v2956_v61 = vor.u32 %v9670_v32, %v9668_v31  ;;  %v1868_v6 = vrot.slane %v1866_v1, 4 }
  0xe8   : > { %v1869_v29 = vrot.slane %v8774_v15, 5  ;;  %v9676_v26 = vld [vmem:[#allocation2 + $0x58] sm:$0xf]  ;;  %v8705_v33 = vld [vmem:[%s11060_s1 + $0xb0] sm:$0xff]   ;;  %v8777_v35 = vld [vmem:[#allocation2 + $0x60] sm:$0xf] }
  0xe9   : > { %8023 = vmatpush3.bf16.msra.mxu1 %v8680_v58  ;;  %v2959_v58 = vshll.u32 %v9566_v7, 16  ;;  %v8775_v7 = vld [vmem:[#allocation2 + $0x54] sm:$0xf]  ;;  %v9686_v63 = vld [vmem:[#allocation2 + $0x64] sm:$0xf]  ;;  %v1875_v10 = vrot.slane %v1873_v17, 4 }
  0xea   : > { %8024 = vmatprep.subr.bf16.mxu1 %v8684_v46  ;;  %v7278_v45 = vcombine.low %v8775_v7, %v9676_v26  ;;  %v7279_v54 = vcombine.low %v8777_v35, %v9686_v63  ;;  %v9704_v44 = vld [vmem:[#allocation2 + $0x78] sm:$0xf]  ;;  %v1810_v53 = vld [vmem:[#allocation2 + $0x30] sm:$0xe]  ;;  %v8784_v34 = vld [vmem:[#allocation2 + $0x2c] sm:$0x1] }
  0xeb   : > { %v2721_v55 = vld [vmem:[#allocation2 + $0xc4] sm:$0xf]  ;;  %v1894_v7 = vrot.slane %v9653_v36, 5  ;;  %v4311_v36 = vld [vmem:[#allocation2 + $0x18] sm:$0xf]  ;;  %v7299_v35 = vrot.slane %v1810_v53, 9 }
  0xec   : > { %7993 = vmatmul.mubr.bf16.gmra.mrb[4].mxu1 %v7274_v8  ;;  %v2722_v49 = vld [vmem:[#allocation2 + $0xc8] sm:$0x1]  ;;  %v3443_v50 = vld [vmem:[#allocation2 + $0xc0] sm:$0xe]  ;;  %v3599_v62 = vrot.slane %v2721_v55, 5  ;;  %v9684_v8 = vrot.slane %v2959_v58, 5 }
  0xed   : > { %7996 = vmatprep.mubr.bf16.mxu1 %v7275_v30  ;;  %8025 = vmatpush3.bf16.msra.mxu1 %v8684_v46  ;;  %v7398_v56 = vrot.slane %v3443_v50, 9  ;;  %v3602_v4 = vrot.slane %v2722_v49, 5  ;;  %v1808_v46 = vld [vmem:[#allocation2 + $0x18] sm:$0xe]  ;;  %v1809_v30 = vld [vmem:[#allocation2 + $0x24] sm:$0xe] }
  0xee   : > { %8026 = vmatprep.subr.bf16.mxu1 %v8688_v39  ;;  %v3601_v5 = vrot.slane %v3599_v62, 4  ;;  %11095 = vst [vmem:[#allocation4_spill] sm:$0xff] %v9684_v8  ;;  %v9690_v55 = vld [vmem:[#allocation2 + $0x6c] sm:$0xf]  ;;  %v9692_v49 = vld [vmem:[#allocation2 + $0x70] sm:$0xf] }
  0xef   : > { %v3600_v51 = vsel %vm9111_vm14, %v7398_v56, %v3599_v62  ;;  %v7280_v50 = vcombine.low %v9690_v55, %v9692_v49  ;;  %v8697_v62 = vld [vmem:[#allocation2 + $0x30] sm:$0xff]   ;;  %v7295_v56 = vrot.slane %v1806_v28, 9  ;;  %v7297_v13 = vrot.slane %v1808_v46, 9  ;;  %v8700_v46 = vld [vmem:[#allocation2 + $0x3c] sm:$0xff]   ;;  %v1815_v32 = vld [vmem:[#allocation2 + $0x6c] sm:$0xe] }
  0xf0   : > { %v3603_v22 = vsel %vm9111_vm14, %v3601_v5, %v3602_v4  ;;  %v1861_v4 = vrot.slane %v1859_v41, 4  ;;  %v8701_v5 = vld [vmem:[%s11060_s1 + $0x1c8] sm:$0xff]   ;;  %v1883_v28 = vrot.slane %v8784_v34, 5  ;;  %v4363_v53 = vshll.u32 %v4311_v36, 16  ;;  %v8713_v34 = vld [vmem:[%s11060_s1 + $0x1d8] sm:$0xff]  }
  0xf1   : > { %8027 = vmatpush3.bf16.msra.mxu1 %v8688_v39  ;;  %v7414_v27 = vcombine.low %v3600_v51, %v3603_v22  ;;  %v1880_v39 = vrot.slane %v9639_v48, 5  ;;  %v9702_v48 = vld [vmem:[%s11060_s1 + $0xb8] sm:$0xff]   ;;  %v9720_v15 = vsel %vm9111_vm14, %v7295_v56, %v1859_v41  ;;  %v9738_v41 = vsel %vm9111_vm14, %v1868_v6, %v1869_v29  ;;  %v4316_v31 = vld [vmem:[#allocation2 + $0x2c] sm:$0x1] }
  0xf2   : > { %8028 = vmatprep.subr.bf16.mxu1 %v8693_v60  ;;  %v4312_v6 = vld [vmem:[#allocation2 + $0x1c] sm:$0xf]  ;;  %v1922_v2 = vrot.slane %v9692_v49, 5  ;;  %vm7053_vm3 = vcmask 1045509  }
  0xf3   : > { %8209 = vmatmul.mubr.bf16.gmra.mrb[28].mxu0 %v7414_v27  ;;  %v7298_v27 = vrot.slane %v1809_v30, 9  ;;  %v1882_v58 = vrot.slane %v1880_v39, 4  ;;  %v8785_v30 = vld [vmem:[#allocation2 + $0x38] sm:$0x1] }
  0xf4   : > { %7997 = vmatmul.mubr.bf16.gmra.mrb[8].mxu1 %v7276_v18  ;;  %8228 = vmatprep.mubr.bf16.mxu0 %v8691_v20  ;;  %v8781_v18 = vld [vmem:[#allocation2 + $0x20] sm:$0x1] }
  0xf5   : > { %8000 = vmatprep.mubr.bf16.mxu1 %v7277_v25  ;;  %8029 = vmatpush3.bf16.msra.mxu1 %v8693_v60  ;;  %v7296_v60 = vrot.slane %v1807_v14, 9  ;;  %v1876_v51 = vrot.slane %v8781_v18, 5  ;;  %v9706_v25 = vld [vmem:[#allocation2 + $0x7c] sm:$0xf] }
  0xf6   : > { %8030 = vmatprep.subr.bf16.mxu1 %v8699_v40  ;;  %v7281_v22 = vcombine.low %v9704_v44, %v9706_v25  ;;  %v1811_v14 = vld [vmem:[#allocation2 + $0x3c] sm:$0xe]  ;;  %v8717_v44 = vld [vmem:[%s11060_s1 + $0x1e0] sm:$0xff]  }
  0xf7   : > { %v7300_v56 = vrot.slane %v1811_v14, 9  ;;  %v4315_v14 = vld [vmem:[#allocation2 + $0x28] sm:$0xf] }
  0xf9   : > { %8031 = vmatpush3.bf16.msra.mxu1 %v8699_v40  ;;  %v1887_v40 = vrot.slane %v9642_v52, 5  ;;  %v9724_v52 = vsel %vm9111_vm14, %v1861_v4, %v1862_v37  ;;  %v9742_v37 = vsel %vm9111_vm14, %v7297_v13, %v1873_v17  ;;  %v9755_v4 = vsel %vm9111_vm14, %v7298_v27, %v1880_v39  ;;  %v4314_v39 = vld [vmem:[#allocation2 + $0x24] sm:$0xf]  ;;  %v8721_v17 = vld [vmem:[%s11060_s1 + $0x1e8] sm:$0xff]  }
  0xfa   : > { %8032 = vmatprep.subr.bf16.mxu1 %v8705_v33  ;;  %v1896_v13 = vrot.slane %v1894_v7, 4  ;;  %v4373_v27 = vshrl.u32 %v4312_v6, 16 }
  0xfb   : > { %8229 = vmatmul.mubr.bf16.vlgmr.msra.gmra.mrb[0].mxu0 %v8694_v11  ;;  %v9728_v11 = vsel %vm9111_vm14, %v7296_v60, %v1866_v1  ;;  %v9746_v1 = vsel %vm9111_vm14, %v1875_v10, %v1876_v51  ;;  %v9761_v60 = vld [vmem:[#allocation2 + $0x48] sm:$0xe]  ;;  %v8786_v10 = vld [vmem:[#allocation2 + $0x44] sm:$0x1]  ;;  %v4360_v51 = vshrl.u32 %v4311_v36, 16  ;;  %v9783_v36 = vsel %vm9111_vm14, %v7299_v35, %v1887_v40 }
  0xfc   : > { %8001 = vmatmul.mubr.bf16.gmra.mrb[12].mxu1 %v7278_v45  ;;  %8261 = vmatpush3.bf16.msra.mxu0 %v9498_v16  ;;  %v9731_v45 = vrot.slane %v2956_v61, 4  ;;  %v8707_v16 = vld [vmem:[%s11060_s1 + $0x1d0] sm:$0xff]   ;;  %v8703_v61 = vld [vmem:[#allocation2 + $0x48] sm:$0xff]   ;;  %v1897_v18 = vrot.slane %v8786_v10, 5  ;;  %v4369_v10 = vshll.u32 %v4312_v6, 16  ;;  %v1908_v35 = vrot.slane %v9676_v26, 5 }
  0xfd   : > { %8004 = vmatprep.mubr.bf16.mxu1 %v7279_v54  ;;  %8232 = vmatprep.mubr.bf16.mxu0 %v8697_v62  ;;  %v1889_v54 = vrot.slane %v1887_v40, 4  ;;  %v1890_v62 = vrot.slane %v8785_v30, 5  ;;  %v1813_v30 = vld [vmem:[#allocation2 + $0x54] sm:$0xe]  ;;  %v7301_v40 = vrot.slane %v9761_v60, 9  ;;  %v4384_v60 = vshrl.u32 %v4314_v39, 16 }
  0xfe   : > { %11096 = vst [vmem:[#allocation5_spill] sm:$0xff] %v9731_v45  ;;  %8262 = vmatprep.subr.bf16.mxu0 %v8701_v5  ;;  %8033 = vmatpush3.bf16.msra.mxu1 %v8705_v33  ;;  %v9759_v33 = vsel %vm9111_vm14, %v1882_v58, %v1883_v28  ;;  %v1901_v28 = vrot.slane %v9658_v43, 5  ;;  %v9803_v55 = vsel %vm9111_vm14, %v1896_v13, %v1897_v18  ;;  %v4313_v26 = vld [vmem:[#allocation2 + $0x20] sm:$0x1]  ;;  %v4387_v6 = vshll.u32 %v4314_v39, 16 }
  0xff   : > { %8034 = vmatprep.subr.bf16.mxu1 %v9702_v48  ;;  %v9790_v43 = vsel %vm9111_vm14, %v1889_v54, %v1890_v62  ;;  %v4362_v54 = vrot.slane %v4360_v51, 4  ;;  %v4365_v62 = vrot.slane %v4363_v53, 5  ;;  %v4393_v13 = vshll.u32 %v4315_v14, 16  ;;  %v8706_v51 = vld [vmem:[#allocation2 + $0x54] sm:$0xff]   ;;  %v8709_v53 = vld [vmem:[#allocation2 + $0x60] sm:$0xff]  }
 0x100   : > { %8263 = vmatpush3.bf16.msra.mxu0 %v8701_v5  ;;  %v9773_v5 = vld [vmem:[%s11060_s1 + $0xc0] sm:$0xff]   ;;  %v4397_v18 = vshrl.u32 %v4315_v14, 16  ;;  %v1915_v39 = vrot.slane %v9686_v63, 5  ;;  %v4379_v14 = vshll.u32 %v4313_v26, 16  ;;  %v4389_v20 = vrot.slane %v4387_v6, 5 }
 0x101   : > { %8264 = vmatprep.subr.bf16.mxu0 %v8707_v16  ;;  %v4366_v29 = vor.u32 %v4365_v62, %v4362_v54  ;;  %v9833_v62 = vrot.slane %v4393_v13, 5  ;;  %v4318_v26 = vld [vmem:[#allocation2 + $0x34] sm:$0xf]  ;;  %v7304_v6 = vrot.slane %v1815_v32, 9  ;;  %v1924_v13 = vrot.slane %v1922_v2, 4 }
 0x102   : > { %8035 = vmatpush3.bf16.msra.mxu1 %v9702_v48  ;;  %v9794_v48 = vsel %vm9111_vm14, %v7300_v56, %v1894_v7  ;;  %v1903_v7 = vrot.slane %v1901_v28, 4  ;;  %v7302_v56 = vrot.slane %v1813_v30, 9  ;;  %v8788_v30 = vld [vmem:[#allocation2 + $0x5c] sm:$0x1]  ;;  %v4399_v49 = vrot.slane %v4397_v18, 4  ;;  %v8725_v32 = vld [vmem:[%s11060_s1 + $0x1f0] sm:$0xff]  }
 0x103   : > { %8233 = vmatmul.mubr.bf16.gmra.mrb[4].mxu0 %v8700_v46  ;;  %8068 = vmatprep.subr.bf16.mxu1 %v9773_v5  ;;  %v1911_v58 = vrot.slane %v8788_v30, 5  ;;  %v4386_v30 = vrot.slane %v4384_v60, 4  ;;  %v8790_v18 = vld [vmem:[#allocation2 + $0x74] sm:$0x1]  ;;  %v10025_v45 = vld [vmem:[#allocation2 + $0x68] sm:$0x1] }
 0x104   : > { %8005 = vmatmul.mubr.bf16.gmra.mrb[16].mxu1 %v7280_v50  ;;  %8236 = vmatprep.mubr.bf16.mxu0 %v8703_v61  ;;  %v8787_v50 = vld [vmem:[#allocation2 + $0x50] sm:$0x1]  ;;  %v4375_v61 = vrot.slane %v4373_v27, 4  ;;  %v1814_v27 = vld [vmem:[#allocation2 + $0x60] sm:$0xe]  ;;  %v9826_v63 = vsel %vm9111_vm14, %v7302_v56, %v1908_v35  ;;  %11116 = vst [vmem:[#allocation16_spill] sm:$0xff] %v10025_v45 }
 0x105   : > { %8008 = vmatprep.mubr.bf16.mxu1 %v7281_v22  ;;  %v1904_v46 = vrot.slane %v8787_v50, 5  ;;  %8265 = vmatpush3.bf16.msra.mxu0 %v8707_v16  ;;  %v9809_v22 = vrot.slane %v4369_v10, 5  ;;  %v1910_v50 = vrot.slane %v1908_v35, 4  ;;  %v9822_v16 = vsel %vm9111_vm14, %v7301_v40, %v1901_v28  ;;  %v8789_v56 = vld [vmem:[#allocation2 + $0x68] sm:$0x1] }
 0x106   : > { %8266 = vmatprep.subr.bf16.mxu0 %v8713_v34  ;;  %v11097_v28 = vcombine.low %v9443_v47, %v9434_v3  ;;  %v7303_v40 = vrot.slane %v1814_v27, 9  ;;  %v1917_v35 = vrot.slane %v1915_v39, 4  ;;  %v1918_v60 = vrot.slane %v8789_v56, 5  ;;  %v9960_v56 = vld [vmem:[#allocation2 + $0x9c] sm:$0xe] }
 0x107   : > { %v9830_v10 = vsel %vm9111_vm14, %v1903_v7, %v1904_v46  ;;  %v4376_v54 = vor.u32 %v4375_v61, %v9809_v22  ;;  %v11098_v46 = vcombine.low %v9458_v24, %v9468_v0  ;;  %v9841_v7 = vrot.slane %v4366_v29, 4 }
 0x108   : > { %v9843_v61 = vrot.slane %v4379_v14, 5  ;;  %v1925_v3 = vrot.slane %v8790_v18, 5  ;;  %v4417_v27 = vshll.u32 %v4318_v26, 16  ;;  %v4390_v0 = vor.u32 %v4389_v20, %v4386_v30  ;;  %v8712_v14 = vld [vmem:[#allocation2 + $0x6c] sm:$0xff]   ;;  %v1816_v20 = vld [vmem:[#allocation2 + $0x78] sm:$0xe] }
 0x109   : > { %8267 = vmatpush3.bf16.msra.mxu0 %v8713_v34  ;;  %v4317_v34 = vld [vmem:[#allocation2 + $0x30] sm:$0xf]  ;;  %v4377_v24 = vrot.slane %v4376_v54, 4  ;;  %v4400_v29 = vor.u32 %v4399_v49, %v9833_v62  ;;  %v4319_v30 = vld [vmem:[#allocation2 + $0x38] sm:$0x1] }
 0x10a   : > { %8268 = vmatprep.subr.bf16.mxu0 %v8717_v44  ;;  %v4408_v47 = vshrl.u32 %v4317_v34, 16  ;;  %v8714_v54 = vld [vmem:[#allocation2 + $0x78] sm:$0xff]  }
 0x10b   : > { %8237 = vmatmul.mubr.bf16.gmra.mrb[8].mxu0 %v8706_v51  ;;  %v4411_v51 = vshll.u32 %v4317_v34, 16  ;;  %v9857_v34 = vsel %vm9111_vm14, %v7303_v40, %v1915_v39  ;;  %v1929_v39 = vrot.slane %v9706_v25, 5  ;;  %v4320_v49 = vld [vmem:[#allocation2 + $0x3c] sm:$0xf]  ;;  %v4321_v40 = vld [vmem:[#allocation2 + $0x40] sm:$0xf] }
 0x10c   : > { %8009 = vmatmul.mubr.bf16.gmra.mrb[20].mxu1 %v11097_v28  ;;  %8240 = vmatprep.mubr.bf16.mxu0 %v8709_v53  ;;  %v4421_v28 = vshrl.u32 %v4318_v26, 16  ;;  %v4403_v53 = vshll.u32 %v4316_v31, 16  ;;  %v9861_v26 = vsel %vm9111_vm14, %v1917_v35, %v1918_v60  ;;  %v4372_v31 = vsel %vm8992_vm11, %v9841_v7, %v9809_v22 }
 0x10d   : > { %8012 = vmatprep.mubr.bf16.mxu1 %v11098_v46  ;;  %8269 = vmatpush3.bf16.msra.mxu0 %v8717_v44  ;;  %v9853_v44 = vsel %vm9111_vm14, %v1910_v50, %v1911_v58  ;;  %v9869_v58 = vsel %vm9111_vm14, %v7304_v6, %v1922_v2  ;;  %v9873_v50 = vsel %vm9111_vm14, %v1924_v13, %v1925_v3  ;;  %v4410_v35 = vrot.slane %v4408_v47, 4  ;;  %v8729_v2 = vld [vmem:[%s11060_s1 + $0x1f8] sm:$0xff]  }
 0x10e   : > { %8270 = vmatprep.subr.bf16.mxu0 %v8721_v17  ;;  %v4413_v60 = vrot.slane %v4411_v51, 5  ;;  %v9876_v46 = vrot.slane %v4417_v27, 5  ;;  %v4423_v18 = vrot.slane %v4421_v28, 4  ;;  %v4382_v22 = vsel %vm8992_vm11, %v4377_v24, %v9843_v61  ;;  %v9893_v61 = vld [vmem:[%s11060_s1 + $0x200] sm:$0xff]  }
 0x10f   : > { %v4391_v6 = vrot.slane %v4390_v0, 4  ;;  %v4401_v7 = vrot.slane %v4400_v29, 4  ;;  %v4405_v25 = vrot.slane %v4403_v53, 5  ;;  %v4432_v13 = vshrl.u32 %v4320_v49, 16  ;;  %v8791_v0 = vld [vmem:[#allocation2 + $0x80] sm:$0x1] }
 0x110   : > { %v4435_v3 = vshll.u32 %v4320_v49, 16  ;;  %v4441_v47 = vshll.u32 %v4321_v40, 16  ;;  %v4445_v51 = vshrl.u32 %v4321_v40, 16  ;;  %v11100_v27 = vcombine.low %v9545_v59, %v9541_v12  ;;  %v8716_v29 = vld [vmem:[#allocation2 + $0x84] sm:$0xff]  }
 0x111   : > { %8271 = vmatpush3.bf16.msra.mxu0 %v8721_v17  ;;  %v11099_v17 = vcombine.low %v9503_v21, %v9512_v42  ;;  %v7305_v28 = vrot.slane %v1816_v20, 9  ;;  %v1931_v24 = vrot.slane %v1929_v39, 4  ;;  %v1932_v21 = vrot.slane %v8791_v0, 5  ;;  %v4323_v49 = vld [vmem:[#allocation2 + $0x48] sm:$0xf]  ;;  %v8718_v0 = vld [vmem:[#allocation2 + $0x90] sm:$0xff]  }
 0x112   : > { %8272 = vmatprep.subr.bf16.mxu0 %v8725_v32  ;;  %v4427_v42 = vshll.u32 %v4319_v30, 16  ;;  %v4414_v59 = vor.u32 %v4413_v60, %v4410_v35  ;;  %v9900_v40 = vcombine.low %v4372_v31, %v4382_v22  ;;  %v4406_v30 = vsel %vm8992_vm11, %v4401_v7, %v4405_v25 }
 0x113   : > { %8241 = vmatmul.mubr.bf16.gmra.mrb[12].mxu0 %v8712_v14  ;;  %v4424_v14 = vor.u32 %v4423_v18, %v9876_v46  ;;  %v4434_v35 = vrot.slane %v4432_v13, 4  ;;  %v4437_v60 = vrot.slane %v4435_v3, 5  ;;  %v9911_v18 = vrot.slane %v4441_v47, 5  ;;  %v1817_v13 = vld [vmem:[#allocation2 + $0x84] sm:$0xe] }
 0x114   : > { %8013 = vmatmul.mubr.bf16.gmra.mrb[24].mxu1 %v11099_v17  ;;  %8244 = vmatprep.mubr.bf16.mxu0 %v8714_v54  ;;  %v4322_v54 = vld [vmem:[#allocation2 + $0x44] sm:$0x1]  ;;  %v9909_v17 = vld [vmem:[#allocation2 + $0x4c] sm:$0xf]  ;;  %v9915_v31 = vsel %vm9111_vm14, %v7305_v28, %v1929_v39  ;;  %v9919_v22 = vsel %vm9111_vm14, %v1931_v24, %v1932_v21  ;;  %v4415_v7 = vrot.slane %v4414_v59, 4  ;;  %v4456_v3 = vshrl.u32 %v4323_v49, 16 }
 0x115   : > { %8016 = vmatprep.mubr.bf16.mxu1 %v11100_v27  ;;  %8273 = vmatpush3.bf16.msra.mxu0 %v8725_v32  ;;  %v4396_v32 = vsel %vm8992_vm11, %v4391_v6, %v9833_v62  ;;  %11101 = vst [vmem:[#allocation6_spill] sm:$0xff] %v9909_v17  ;;  %v4447_v27 = vrot.slane %v4445_v51, 4  ;;  %v4429_v62 = vrot.slane %v4427_v42, 5  ;;  %v8792_v6 = vld [vmem:[#allocation2 + $0x88] sm:$0xf]  ;;  %v4425_v25 = vrot.slane %v4424_v14, 4 }
 0x116   : > { %8274 = vmatprep.subr.bf16.mxu0 %v8729_v2  ;;  %v1936_v20 = vrot.slane %v8792_v6, 5  ;;  %v4459_v47 = vshll.u32 %v4323_v49, 16  ;;  %v9921_v12 = vcombine.low %v4396_v32, %v4406_v30  ;;  %v4451_v51 = vshll.u32 %v4322_v54, 16  ;;  %v1818_v59 = vld [vmem:[#allocation2 + $0x90] sm:$0xe] }
 0x117   : > { %v4465_v39 = vshll.u32 %v9909_v17, 16  ;;  %v4469_v28 = vshrl.u32 %v9909_v17, 16  ;;  %v11102_v24 = vcombine.low %v9574_v23, %v9570_v38  ;;  %v4438_v21 = vor.u32 %v4437_v60, %v4434_v35  ;;  %v8793_v32 = vld [vmem:[#allocation2 + $0x8c] sm:$0x1]  ;;  %v8794_v6 = vld [vmem:[#allocation2 + $0x94] sm:$0xf] }
 0x118   : > { %v4448_v42 = vor.u32 %v4447_v27, %v9911_v18  ;;  %v11103_v14 = vcombine.low %v9720_v15, %v9724_v52  ;;  %v7306_v54 = vrot.slane %v1817_v13, 9  ;;  %v1938_v49 = vrot.slane %v1936_v20, 4  ;;  %v4326_v23 = vld [vmem:[#allocation2 + $0x54] sm:$0xf]  ;;  %v9940_v27 = vld [vmem:[#allocation2 + $0x50] sm:$0x1] }
 0x119   : > { %8275 = vmatpush3.bf16.msra.mxu0 %v8729_v2  ;;  %v1939_v30 = vrot.slane %v8793_v32, 5  ;;  %v1943_v38 = vrot.slane %v8794_v6, 5  ;;  %v4420_v35 = vsel %vm8992_vm11, %v4415_v7, %v9876_v46  ;;  %v4430_v60 = vsel %vm8992_vm11, %v4425_v25, %v4429_v62  ;;  %11104 = vst [vmem:[#allocation7_spill] sm:$0xff] %v9940_v27  ;;  %v8719_v6 = vld [vmem:[%s11060_s1 + $0xc8] sm:$0xff]  }
 0x11a   : > { %8308 = vmatprep.subr.bf16.mxu0 %v9893_v61  ;;  %v4458_v15 = vrot.slane %v4456_v3, 4  ;;  %v4461_v52 = vrot.slane %v4459_v47, 5  ;;  %v9944_v13 = vrot.slane %v4451_v51, 5  ;;  %v4471_v32 = vrot.slane %v4469_v28, 4  ;;  %v8722_v25 = vld [vmem:[#allocation2 + $0xa8] sm:$0xff]  }
 0x11b   : > { %8245 = vmatmul.mubr.bf16.gmra.mrb[16].mxu0 %v8716_v29  ;;  %v8720_v29 = vld [vmem:[#allocation2 + $0x9c] sm:$0xff]   ;;  %v4439_v46 = vrot.slane %v4438_v21, 4  ;;  %v4449_v7 = vrot.slane %v4448_v42, 4  ;;  %v4480_v2 = vshrl.u32 %v4326_v23, 16  ;;  %v4483_v62 = vshll.u32 %v4326_v23, 16 }
 0x11c   : > { %8017 = vmatmul.mubr.bf16.gmra.mrb[28].mxu1 %v11102_v24  ;;  %8248 = vmatprep.mubr.bf16.mxu0 %v8718_v0  ;;  %v9942_v0 = vld [vmem:[#allocation2 + $0x58] sm:$0xf]  ;;  %v7307_v24 = vrot.slane %v1818_v59, 9  ;;  %v9953_v3 = vsel %vm9111_vm14, %v7306_v54, %v1936_v20  ;;  %v1945_v47 = vrot.slane %v1943_v38, 4  ;;  %v9958_v28 = vsel %vm9111_vm14, %v1938_v49, %v1939_v30  ;;  %v9974_v30 = vld [vmem:[#allocation2 + $0x5c] sm:$0x1] }
 0x11d   : > { %8036 = vmatprep.mubr.bf16.mxu1 %v11103_v14  ;;  %11105 = vst [vmem:[#allocation8_spill] sm:$0xff] %v9942_v0  ;;  %v9946_v14 = vrot.slane %v4465_v39, 5  ;;  %11106 = vst [vmem:[#allocation9_spill] sm:$0xff] %v9953_v3  ;;  %v8795_v51 = vld [vmem:[#allocation2 + $0x98] sm:$0x1]  ;;  %v4475_v39 = vshll.u32 %v9940_v27, 16  ;;  %v4462_v59 = vor.u32 %v4461_v52, %v4458_v15  ;;  %v9964_v23 = vcombine.low %v4420_v35, %v4430_v60 }
 0x11e   : > { %v1946_v53 = vrot.slane %v8795_v51, 5  ;;  %11107 = vst [vmem:[#allocation10_spill] sm:$0xff] %v9958_v28  ;;  %v4489_v21 = vshll.u32 %v9942_v0, 16  ;;  %v4493_v42 = vshrl.u32 %v9942_v0, 16  ;;  %v9968_v20 = vsel %vm9111_vm14, %v7307_v24, %v1943_v38  ;;  %v9971_v51 = vld [vmem:[#allocation2 + $0xa0] sm:$0xf] }
 0x11f   : > { %11108 = vst [vmem:[#allocation11_spill] sm:$0xff] %v9968_v20  ;;  %v4472_v54 = vor.u32 %v4471_v32, %v9946_v14  ;;  %11109 = vst [vmem:[#allocation12_spill] sm:$0xff] %v9974_v30  ;;  %v4329_v15 = vld [vmem:[#allocation2 + $0x60] sm:$0xf]  ;;  %v11110_v52 = vcombine.low %v9728_v11, %v9738_v41  ;;  %v4444_v35 = vsel %vm8992_vm11, %v4439_v46, %v9911_v18  ;;  %v4482_v60 = vrot.slane %v4480_v2, 4  ;;  %v8723_v11 = vld [vmem:[%s11060_s1 + $0xd0] sm:$0xff]  }
 0x120   : > { %v4454_v38 = vsel %vm8992_vm11, %v4449_v7, %v9944_v13  ;;  %v4485_v24 = vrot.slane %v4483_v62, 5  ;;  %v9985_v32 = vld [vmem:[#allocation2 + $0x64] sm:$0xf]  ;;  %v11112_v49 = vcombine.low %v9742_v37, %v9746_v1  ;;  %v9996_v41 = vsel %vm9111_vm14, %v1945_v47, %v1946_v53  ;;  %v4332_v62 = vld [vmem:[#allocation2 + $0x6c] sm:$0xf] }
 0x121   : > { %11111 = vst [vmem:[#allocation13_spill] sm:$0xff] %v9985_v32  ;;  %11113 = vst [vmem:[#allocation14_spill] sm:$0xff] %v9996_v41  ;;  %v9998_v18 = vrot.slane %v4475_v39, 5  ;;  %v7308_v2 = vrot.slane %v9960_v56, 9  ;;  %v10001_v46 = vrot.slane %v4462_v59, 4  ;;  %v10003_v37 = vrot.slane %v4489_v21, 5 }
 0x122   : > { %v4495_v1 = vrot.slane %v4493_v42, 4  ;;  %v4499_v7 = vshll.u32 %v9974_v30, 16  ;;  %v11114_v53 = vrot.slane %v9971_v51, 5  ;;  %v10010_v39 = vld [vmem:[#allocation2 + $0xa8] sm:$0xe]  ;;  %v4504_v56 = vshrl.u32 %v4329_v15, 16 }
 0x123   : > { %8249 = vmatmul.mubr.bf16.gmra.mrb[20].mxu0 %v8720_v29  ;;  %v8797_v29 = vld [vmem:[#allocation2 + $0xa4] sm:$0x1]  ;;  %v4486_v21 = vor.u32 %v4485_v24, %v4482_v60  ;;  %v4513_v42 = vshll.u32 %v9985_v32, 16  ;;  %v4528_v8 = vshrl.u32 %v4332_v62, 16  ;;  %v4531_v30 = vshll.u32 %v4332_v62, 16 }
 0x124   : > { %8037 = vmatmul.mubr.bf16.vlgmr.msra.gmra.mrb[0].mxu1 %v11110_v52  ;;  %v1953_v13 = vrot.slane %v8797_v29, 5  ;;  %8252 = vmatprep.mubr.bf16.mxu0 %v8722_v25  ;;  %v1952_v47 = vrot.slane %v11114_v53, 4  ;;  %v4507_v52 = vshll.u32 %v4329_v15, 16  ;;  %v8727_v25 = vld [vmem:[%s11060_s1 + $0xd8] sm:$0xff]   ;;  %v10019_v29 = vld [vmem:[#allocation2 + $0x70] sm:$0xf]  ;;  %v10021_v53 = vcombine.low %v4444_v35, %v4454_v38 }
 0x125   : > { %8069 = vmatpush3.bf16.msra.mxu1 %v9773_v5  ;;  %8040 = vmatprep.mubr.bf16.mxu1 %v11112_v49  ;;  %v8724_v5 = vld [vmem:[#allocation2 + $0xb4] sm:$0xff]   ;;  %v10006_v49 = vrot.slane %v4472_v54, 4  ;;  %v4517_v54 = vshrl.u32 %v9985_v32, 16  ;;  %11115 = vst [vmem:[#allocation15_spill] sm:$0xff] %v10019_v29  ;;  %v8726_v0 = vld [vmem:[#allocation2 + $0xc0] sm:$0xff]   ;;  %v4496_v60 = vor.u32 %v4495_v1, %v10003_v37  ;;  %v10028_v24 = vrot.slane %v4499_v7, 5 }
 0x126   : > { %8070 = vmatprep.subr.bf16.mxu1 %v8719_v6  ;;  %v7309_v59 = vrot.slane %v10010_v39, 9  ;;  %v8798_v32 = vld [vmem:[#allocation2 + $0xac] sm:$0xf]  ;;  %v4509_v35 = vrot.slane %v4507_v52, 5  ;;  %v10031_v38 = vld [vmem:[#allocation2 + $0xb4] sm:$0xe]  ;;  %v11117_v62 = vcombine.low %v9755_v4, %v9759_v33  ;;  %v11119_v4 = vcombine.low %v9783_v36, %v9790_v43 }
 0x127   : > { %v1957_v27 = vrot.slane %v8798_v32, 5  ;;  %v4537_v15 = vshll.u32 %v10019_v29, 16  ;;  %v4541_v17 = vshrl.u32 %v10019_v29, 16  ;;  %v10041_v1 = vld [vmem:[%s11060_s1 + $0xe0] sm:$0xff]   ;;  %v10043_v7 = vrot.slane %v4486_v21, 4 }
 0x128   : > { %v10045_v32 = vld [vmem:[#allocation2 + $0xb0] sm:$0x1]  ;;  %v4519_v52 = vrot.slane %v4517_v54, 4  ;;  %v10050_v29 = vld [vmem:[#allocation2 + $0x74] sm:$0x1]  ;;  %v4468_v33 = vsel %vm8992_vm11, %v10001_v46, %v9946_v14  ;;  %v4533_v54 = vrot.slane %v4531_v30, 5  ;;  %v4478_v36 = vsel %vm8992_vm11, %v10006_v49, %v9998_v18 }
 0x129   : > { %8071 = vmatpush3.bf16.msra.mxu1 %v8719_v6  ;;  %v4506_v6 = vrot.slane %v4504_v56, 4  ;;  %v10048_v56 = vrot.slane %v4513_v42, 5  ;;  %11118 = vst [vmem:[#allocation17_spill] sm:$0xff] %v10050_v29  ;;  %v4530_v42 = vrot.slane %v4528_v8, 4  ;;  %v10071_v43 = vsel %vm9111_vm14, %v1952_v47, %v1953_v13  ;;  %v8728_v46 = vld [vmem:[#allocation2 + $0xcc] sm:$0xff]  }
 0x12a   : > { %8072 = vmatprep.subr.bf16.mxu1 %v8723_v11  ;;  %11122 = vst [vmem:[#allocation19_spill] sm:$0xff] %v10071_v43  ;;  %v10073_v14 = vrot.slane %v4496_v60, 4  ;;  %v10078_v8 = vrot.slane %v1957_v27, 4  ;;  %v4338_v47 = vld [vmem:[#allocation2 + $0x84] sm:$0xf]  ;;  %v8732_v60 = vld [vmem:[%s11060_s1 + $0xe8] sm:$0xff]   ;;  %v11136_v19 = vsel %vm8992_vm11, %v10043_v7, %v10003_v37  ;;  %v11140_v7 = vcombine.low %v9869_v58, %v9873_v50 }
 0x12b   : > { %8253 = vmatmul.mubr.bf16.gmra.mrb[24].mxu0 %v8724_v5  ;;  %v11120_v5 = vrot.slane %v9971_v51, 5  ;;  %v4523_v51 = vshll.u32 %v10025_v45, 16  ;;  %v4510_v30 = vor.u32 %v4509_v35, %v4506_v6  ;;  %v10103_v39 = vld [vmem:[#allocation2 + $0x80] sm:$0x1]  ;;  %v4576_v41 = vshrl.u32 %v4338_v47, 16 }
 0x12c   : > { %8041 = vmatmul.mubr.bf16.gmra.mrb[4].mxu1 %v11117_v62  ;;  %v4335_v62 = vld [vmem:[#allocation2 + $0x78] sm:$0xf]  ;;  %8256 = vmatprep.mubr.bf16.mxu0 %v8726_v0  ;;  %v10080_v0 = vrot.slane %v4537_v15, 5  ;;  %v4534_v15 = vor.u32 %v4533_v54, %v4530_v42  ;;  %11126 = vst [vmem:[#allocation23_spill] sm:$0xff] %v10103_v39  ;;  %v10121_v54 = vld [vmem:[#allocation2 + $0x94] sm:$0xf] }
 0x12d   : > { %8044 = vmatprep.mubr.bf16.mxu1 %v11119_v4  ;;  %8073 = vmatpush3.bf16.msra.mxu1 %v8723_v11  ;;  %v10063_v21 = vsel %vm9111_vm14, %v7308_v2, %v11120_v5  ;;  %v10076_v11 = vld [vmem:[#allocation2 + $0x7c] sm:$0xf]  ;;  %v4543_v2 = vrot.slane %v4541_v17, 4  ;;  %v4520_v4 = vor.u32 %v4519_v52, %v10048_v56  ;;  %v4552_v49 = vshrl.u32 %v4335_v62, 16  ;;  %v10087_v5 = vld [vmem:[#allocation2 + $0xb8] sm:$0xf] }
 0x12e   : > { %11121 = vst [vmem:[#allocation18_spill] sm:$0xff] %v10063_v21  ;;  %8074 = vmatprep.subr.bf16.mxu1 %v8727_v25  ;;  %11123 = vst [vmem:[#allocation20_spill] sm:$0xff] %v10076_v11  ;;  %v4555_v13 = vshll.u32 %v4335_v62, 16  ;;  %v4547_v17 = vshll.u32 %v10050_v29, 16  ;;  %v4561_v35 = vshll.u32 %v10076_v11, 16  ;;  %v10095_v62 = vcombine.low %v4468_v33, %v4478_v36 }
 0x12f   : > { %v10092_v52 = vld [vmem:[#allocation2 + $0x88] sm:$0xf]  ;;  %v10101_v18 = vrot.slane %v4523_v51, 5  ;;  %v4565_v42 = vshrl.u32 %v10076_v11, 16  ;;  %v10110_v6 = vrot.slane %v4510_v30, 4  ;;  %v11127_v36 = vcombine.low %v9794_v48, %v9803_v55  ;;  %11128 = vst [vmem:[#allocation24_spill] sm:$0xff] %v10121_v54 }
 0x130   : > { %11124 = vst [vmem:[#allocation21_spill] sm:$0xff] %v10092_v52  ;;  %v10112_v29 = vld [vmem:[#allocation2 + $0xbc] sm:$0x1]  ;;  %v10119_v51 = vrot.slane %v4520_v4, 4  ;;  %v4554_v11 = vrot.slane %v4552_v49, 4  ;;  %v4557_v45 = vrot.slane %v4555_v13, 5  ;;  %v11129_v30 = vcombine.low %v9822_v16, %v9830_v10 }
 0x131   : > { %8075 = vmatpush3.bf16.msra.mxu1 %v8727_v25  ;;  %v10099_v25 = vsel %vm9111_vm14, %v7309_v59, %v1957_v27  ;;  %v4544_v27 = vor.u32 %v4543_v2, %v10080_v0  ;;  %v4341_v59 = vld [vmem:[#allocation2 + $0x90] sm:$0xf]  ;;  %v11130_v48 = vrot.slane %v10087_v5, 5  ;;  %v10136_v4 = vrot.slane %v4547_v17, 5  ;;  %v4344_v13 = vld [vmem:[#allocation2 + $0x9c] sm:$0xf] }
 0x132   : > { %8076 = vmatprep.subr.bf16.mxu1 %v10041_v1  ;;  %11125 = vst [vmem:[#allocation22_spill] sm:$0xff] %v10099_v25  ;;  %v8734_v2 = vld [vmem:[%s11060_s1 + $0xf0] sm:$0xff]   ;;  %v10138_v49 = vrot.slane %v4561_v35, 5  ;;  %v4567_v16 = vrot.slane %v4565_v42, 4  ;;  %v10141_v10 = vld [vmem:[#allocation2 + $0x8c] sm:$0x1]  ;;  %v4558_v20 = vor.u32 %v4557_v45, %v4554_v11 }
 0x133   : > { %8257 = vmatmul.mubr.bf16.gmra.mrb[28].mxu0 %v8728_v46  ;;  %v10132_v55 = vrot.slane %v11130_v48, 4  ;;  %v10134_v46 = vrot.slane %v4534_v15, 4  ;;  %v10145_v33 = vld [vmem:[#allocation2 + $0xa0] sm:$0xf]  ;;  %v10147_v15 = vrot.slane %v4544_v27, 4  ;;  %v4571_v17 = vshll.u32 %v10103_v39, 16 }
 0x134   : > { %8045 = vmatmul.mubr.bf16.gmra.mrb[8].mxu1 %v11127_v36  ;;  %8276 = vmatprep.mubr.bf16.mxu0 %v9900_v40  ;;  %v4579_v40 = vshll.u32 %v4338_v47, 16  ;;  %v4585_v36 = vshll.u32 %v10092_v52, 16  ;;  %11131 = vst [vmem:[#allocation25_spill] sm:$0xff] %v10145_v33  ;;  %v4600_v35 = vshrl.u32 %v4341_v59, 16  ;;  %v4603_v48 = vshll.u32 %v4341_v59, 16  ;;  %v8733_v47 = vld [vmem:[%s11060_s1 + $0x208] sm:$0xff]  }
 0x135   : > { %8048 = vmatprep.mubr.bf16.mxu1 %v11129_v30  ;;  %8077 = vmatpush3.bf16.msra.mxu1 %v10041_v1  ;;  %v4589_v30 = vshrl.u32 %v10092_v52, 16  ;;  %11132 = vst [vmem:[#allocation26_spill] sm:$0xff] %v10147_v15  ;;  %v4578_v28 = vrot.slane %v4576_v41, 4  ;;  %v4609_v1 = vshll.u32 %v10121_v54, 16  ;;  %v4613_v42 = vshrl.u32 %v10121_v54, 16  ;;  %v8736_v45 = vld [vmem:[%s11060_s1 + $0xf8] sm:$0xff]  }
 0x136   : > { %8078 = vmatprep.subr.bf16.mxu1 %v8732_v60  ;;  %v4624_v52 = vshrl.u32 %v4344_v13, 16  ;;  %v4627_v3 = vshll.u32 %v4344_v13, 16  ;;  %v4633_v25 = vshll.u32 %v10145_v33, 16  ;;  %v4637_v27 = vshrl.u32 %v10145_v33, 16  ;;  %v10163_v39 = vld [vmem:[#allocation2 + $0x98] sm:$0x1] }
 0x137   : > { %v4568_v41 = vor.u32 %v4567_v16, %v10138_v49  ;;  %v4581_v11 = vrot.slane %v4579_v40, 5  ;;  %v10161_v59 = vrot.slane %v4585_v36, 5  ;;  %v4591_v54 = vrot.slane %v4589_v30, 4  ;;  %v8735_v40 = vld [vmem:[%s11060_s1 + $0x210] sm:$0xff]  }
 0x138   : > { %v10165_v21 = vrot.slane %v4571_v17, 5  ;;  %v4595_v13 = vshll.u32 %v10141_v10, 16  ;;  %v4602_v43 = vrot.slane %v4600_v35, 4  ;;  %v4605_v33 = vrot.slane %v4603_v48, 5  ;;  %v4350_v37 = vld [vmem:[#allocation2 + $0xb4] sm:$0xf] }
 0x139   : > { %8079 = vmatpush3.bf16.msra.mxu1 %v8732_v60  ;;  %v10168_v60 = vld [vmem:[#allocation2 + $0xa4] sm:$0x1]  ;;  %v11133_v15 = vcombine.low %v9826_v63, %v9853_v44  ;;  %v4502_v16 = vsel %vm8992_vm11, %v10073_v14, %v10028_v24  ;;  %v11134_v36 = vrot.slane %v10045_v32, 5  ;;  %v10188_v63 = vrot.slane %v4609_v1, 5  ;;  %v289_v32 = vld [vmem:[#allocation2 + $0xd4] sm:$0x1] }
 0x13a   : > { %8080 = vmatprep.subr.bf16.mxu1 %v8734_v2  ;;  %v4615_v44 = vrot.slane %v4613_v42, 4  ;;  %v4626_v24 = vrot.slane %v4624_v52, 4  ;;  %v4629_v14 = vrot.slane %v4627_v3, 5  ;;  %v4639_v17 = vrot.slane %v4637_v27, 4 }
 0x13b   : > { %8277 = vmatmul.mubr.bf16.vlgmr.msra.gmra.mrb[0].mxu0 %v9921_v12  ;;  %v10186_v30 = vsel %vm9111_vm14, %v10078_v8, %v11134_v36  ;;  %v11135_v12 = vcombine.low %v9857_v34, %v9861_v26  ;;  %v10197_v8 = vrot.slane %v4558_v20, 4  ;;  %v10199_v35 = vrot.slane %v4568_v41, 4  ;;  %v4347_v34 = vld [vmem:[#allocation2 + $0xa8] sm:$0xf]  ;;  %v10213_v20 = vld [vmem:[#allocation2 + $0xac] sm:$0xf] }
 0x13c   : > { %8049 = vmatmul.mubr.bf16.gmra.mrb[12].mxu1 %v11133_v15  ;;  %8309 = vmatpush3.bf16.msra.mxu0 %v9893_v61  ;;  %v10194_v15 = vrot.slane %v4633_v25, 5  ;;  %v4582_v48 = vor.u32 %v4581_v11, %v4578_v28  ;;  %v4592_v1 = vor.u32 %v4591_v54, %v10161_v59  ;;  %v4516_v26 = vsel %vm8992_vm11, %v10110_v6, %v10048_v56  ;;  %v11142_v50 = vld [vmem:[#allocation26_spill] sm:$0xff] }
 0x13d   : > { %8052 = vmatprep.mubr.bf16.mxu1 %v11135_v12  ;;  %8280 = vmatprep.mubr.bf16.mxu0 %v9964_v23  ;;  %v4526_v61 = vsel %vm8992_vm11, %v10119_v51, %v10101_v18  ;;  %v10210_v3 = vrot.slane %v4595_v13, 5  ;;  %v4619_v23 = vshll.u32 %v10163_v39, 16  ;;  %v4606_v28 = vor.u32 %v4605_v33, %v4602_v43 }
 0x13e   : > { %8310 = vmatprep.subr.bf16.mxu0 %v8733_v47  ;;  %8081 = vmatpush3.bf16.msra.mxu1 %v8734_v2  ;;  %v4616_v52 = vor.u32 %v4615_v44, %v10188_v63  ;;  %v4643_v25 = vshll.u32 %v10168_v60, 16  ;;  %v290_v56 = vsel %vm8932_vm4, 0, %v289_v32  ;;  %v4630_v6 = vor.u32 %v4629_v14, %v4626_v24  ;;  %v8737_v2 = vld [vmem:[%s11060_s1 + $0x218] sm:$0xff]   ;;  %v10245_v24 = vld [vmem:[#allocation2 + $0xb0] sm:$0x1] }
 0x13f   : > { %8082 = vmatprep.subr.bf16.mxu1 %v8736_v45  ;;  %v4640_v54 = vor.u32 %v4639_v17, %v10194_v15  ;;  %v4648_v18 = vshrl.u32 %v4347_v34, 16  ;;  %v4651_v51 = vshll.u32 %v4347_v34, 16  ;;  %291 = vst [vmem:[#allocation2 + $0xd4] sm:$0x1] %v290_v56  ;;  %v4583_v43 = vrot.slane %v4582_v48, 4 }
 0x140   : > { %8311 = vmatpush3.bf16.msra.mxu0 %v8733_v47  ;;  %v4593_v33 = vrot.slane %v4592_v1, 4  ;;  %v4657_v42 = vshll.u32 %v10213_v20, 16  ;;  %v4661_v27 = vshrl.u32 %v10213_v20, 16  ;;  %v7452_v47 = vcombine.low %v11136_v19, %v4502_v16  ;;  %v10288_v1 = vld [vmem:[#allocation2 + $0xb8] sm:$0xf] }
 0x141   : > { %8312 = vmatprep.subr.bf16.mxu0 %v8735_v40  ;;  %v7453_v41 = vcombine.low %v4516_v26, %v4526_v61  ;;  %v11137_v11 = vrot.slane %v10087_v5, 5  ;;  %v11138_v13 = vrot.slane %v10031_v38, 9  ;;  %v11139_v44 = vrot.slane %v10112_v29, 5 }
 0x142   : > { %8083 = vmatpush3.bf16.msra.mxu1 %v8736_v45  ;;  %v4607_v38 = vrot.slane %v4606_v28, 4  ;;  %v4617_v5 = vrot.slane %v4616_v52, 4  ;;  %v4621_v16 = vrot.slane %v4619_v23, 5  ;;  %v4645_v14 = vrot.slane %v4643_v25, 5  ;;  %v11143_v23 = vld [vmem:[#allocation19_spill] sm:$0xff]  ;;  %v11144_v28 = vld [vmem:[#allocation18_spill] sm:$0xff] }
 0x143   : > { %v10236_v36 = vsel %vm9111_vm14, %v11138_v13, %v11137_v11  ;;  %v10243_v12 = vsel %vm9111_vm14, %v10132_v55, %v11139_v44  ;;  %8281 = vmatmul.mubr.bf16.gmra.mrb[4].mxu0 %v10021_v53  ;;  %v11141_v29 = vcombine.low %v9915_v31, %v9919_v22  ;;  %v4631_v55 = vrot.slane %v4630_v6, 4  ;;  %v10266_v31 = vld [vmem:[%s11060_s1 + $0x100] sm:$0xff]  }
 0x144   : > { %8053 = vmatmul.mubr.bf16.gmra.mrb[16].mxu1 %v11140_v7  ;;  %8284 = vmatprep.mubr.bf16.mxu0 %v10095_v62  ;;  %v4641_v45 = vrot.slane %v4640_v54, 4  ;;  %v4650_v17 = vrot.slane %v4648_v18, 4  ;;  %v4653_v32 = vrot.slane %v4651_v51, 5  ;;  %v4540_v58 = vsel %vm8992_vm11, %v10134_v46, %v10080_v0  ;;  %v8740_v22 = vld [vmem:[%s11060_s1 + $0x220] sm:$0xff]   ;;  %v11149_v7 = vld [vmem:[#allocation11_spill] sm:$0xff] }
 0x145   : > { %8056 = vmatprep.mubr.bf16.mxu1 %v11141_v29  ;;  %8313 = vmatpush3.bf16.msra.mxu0 %v8735_v40  ;;  %v4550_v53 = vsel %vm8992_vm11, %v11142_v50, %v10136_v4  ;;  %v10272_v62 = vrot.slane %v4657_v42, 5  ;;  %v4663_v40 = vrot.slane %v4661_v27, 4  ;;  %v4564_v0 = vsel %vm8992_vm11, %v10197_v8, %v10138_v49  ;;  %v11146_v42 = vld [vmem:[#allocation9_spill] sm:$0xff]  ;;  %v11147_v27 = vld [vmem:[#allocation10_spill] sm:$0xff]  ;;  %v10323_v44 = vld [vmem:[#allocation2 + $0xc0] sm:$0xf] }
 0x146   : > { %8356 = vmatprep.subr.bf16.mxu1 %v10266_v31  ;;  %8314 = vmatprep.subr.bf16.mxu0 %v8737_v2  ;;  %v4574_v46 = vsel %vm8992_vm11, %v10199_v35, %v10165_v21  ;;  %v4588_v4 = vsel %vm8992_vm11, %v4583_v43, %v10161_v59  ;;  %v4598_v48 = vsel %vm8992_vm11, %v4593_v33, %v10210_v3  ;;  %v4667_v49 = vshll.u32 %v10245_v24, 16  ;;  %v5068_v3 = vld [vmem:[#allocation2 + $0x48] sm:$0xe]  ;;  %v5069_v33 = vld [vmem:[#allocation2 + $0x54] sm:$0xe] }
 0x147   : > { %v4612_v34 = vsel %vm8992_vm11, %v4607_v38, %v10188_v63  ;;  %v4672_v8 = vshrl.u32 %v4350_v37, 16  ;;  %v4675_v26 = vshll.u32 %v4350_v37, 16  ;;  %v4622_v21 = vsel %vm8992_vm11, %v4617_v5, %v4621_v16  ;;  %v11145_v63 = vld [vmem:[#allocation22_spill] sm:$0xff]  ;;  %v8743_v43 = vld [vmem:[%s11060_s1 + $0x228] sm:$0xff]  }
 0x148   : > { %v4636_v59 = vsel %vm8992_vm11, %v4631_v55, %v10194_v15  ;;  %v4646_v35 = vsel %vm8992_vm11, %v4641_v45, %v4645_v14  ;;  %v4654_v61 = vor.u32 %v4653_v32, %v4650_v17  ;;  %v7324_v52 = vcombine.low %v11144_v28, %v11143_v23  ;;  %v11150_v38 = vld [vmem:[#allocation14_spill] sm:$0xff]  ;;  %v5070_v45 = vld [vmem:[#allocation2 + $0x60] sm:$0xe] }
 0x149   : > { %v7325_v25 = vcombine.low %v11145_v63, %v10186_v30  ;;  %8315 = vmatpush3.bf16.msra.mxu0 %v8737_v2  ;;  %v4664_v56 = vor.u32 %v4663_v40, %v10272_v62  ;;  %v4681_v6 = vshll.u32 %v10288_v1, 16  ;;  %v7326_v54 = vcombine.low %v10236_v36, %v10243_v12  ;;  %v5071_v40 = vld [vmem:[#allocation2 + $0x6c] sm:$0xe]  ;;  %v11157_v23 = vld [vmem:[#allocation16_spill] sm:$0xff] }
 0x14a   : > { %v7454_v15 = vcombine.low %v4540_v58, %v4550_v53  ;;  %v7455_v18 = vcombine.low %v4564_v0, %v4574_v46  ;;  %v10309_v51 = vcombine.low %v4588_v4, %v4598_v48  ;;  %8316 = vmatprep.subr.bf16.mxu0 %v8740_v22  ;;  %v11148_v2 = vcombine.low %v11146_v42, %v11147_v27  ;;  %v11153_v58 = vld [vmem:[#allocation7_spill] sm:$0xff]  ;;  %v8746_v0 = vld [vmem:[%s11060_s1 + $0x230] sm:$0xff]   ;;  %v4356_v63 = vld [vmem:[#allocation2 + $0xcc] sm:$0xf] }
 0x14b   : > { %8285 = vmatmul.mubr.bf16.gmra.mrb[8].mxu0 %v7452_v47  ;;  %v10317_v19 = vcombine.low %v4612_v34, %v4622_v21  ;;  %v10319_v11 = vcombine.low %v4636_v59, %v4646_v35  ;;  %v10321_v13 = vrot.slane %v4667_v49, 5  ;;  %v7475_v37 = vrot.slane %v5068_v3, 9  ;;  %v11152_v47 = vld [vmem:[#allocation6_spill] sm:$0xff]  ;;  %v11154_v34 = vld [vmem:[#allocation8_spill] sm:$0xff] }
 0x14c   : > { %8057 = vmatmul.mubr.bf16.gmra.mrb[20].mxu1 %v11148_v2  ;;  %v11151_v5 = vcombine.low %v11149_v7, %v11150_v38  ;;  %8288 = vmatprep.mubr.bf16.mxu0 %v7453_v41  ;;  %v10328_v16 = vrot.slane %v4654_v61, 4  ;;  %v10330_v14 = vrot.slane %v4672_v8, 4  ;;  %v10332_v29 = vrot.slane %v4675_v26, 5  ;;  %v11155_v8 = vld [vmem:[#allocation12_spill] sm:$0xff]  ;;  %v11156_v61 = vld [vmem:[#allocation13_spill] sm:$0xff]  ;;  %v11158_v2 = vld [vmem:[#allocation15_spill] sm:$0xff] }
 0x14d   : > { %v5158_v55 = vrot.slane %v11152_v47, 5  ;;  %8317 = vmatpush3.bf16.msra.mxu0 %v8740_v22  ;;  %v10335_v17 = vrot.slane %v4664_v56, 4  ;;  %v10337_v32 = vrot.slane %v4681_v6, 5  ;;  %v5161_v50 = vrot.slane %v11153_v58, 5  ;;  %v10352_v59 = vld [vmem:[#allocation2 + $0xc4] sm:$0xf] }
 0x14e   : > { %8060 = vmatprep.mubr.bf16.mxu1 %v11151_v5  ;;  %v7476_v53 = vrot.slane %v5069_v33, 9  ;;  %8318 = vmatprep.subr.bf16.mxu0 %v8743_v43  ;;  %v4685_v41 = vshrl.u32 %v10288_v1, 16  ;;  %v4696_v46 = vshrl.u32 %v10323_v44, 16  ;;  %v4699_v48 = vshll.u32 %v10323_v44, 16  ;;  %v10360_v6 = vld [vmem:[#allocation2 + $0xbc] sm:$0x1] }
 0x14f   : > { %v10347_v22 = vsel %vm9111_vm14, %v7475_v37, %v5158_v55  ;;  %v5160_v4 = vrot.slane %v5158_v55, 4  ;;  %v5165_v49 = vrot.slane %v11154_v34, 5  ;;  %v5168_v26 = vrot.slane %v11155_v8, 5  ;;  %v8749_v7 = vld [vmem:[%s11060_s1 + $0x238] sm:$0xff]   ;;  %v11159_v5 = vld [vmem:[#allocation17_spill] sm:$0xff] }
 0x150   : > { %v7477_v21 = vrot.slane %v5070_v45, 9  ;;  %v5172_v3 = vrot.slane %v11156_v61, 5  ;;  %v5175_v28 = vrot.slane %v11157_v23, 5  ;;  %v7478_v56 = vrot.slane %v5071_v40, 9  ;;  %v2702_v34 = vld [vmem:[#allocation2 + $0x78] sm:$0xf] }
 0x151   : > { %v10356_v35 = vsel %vm9111_vm14, %v5160_v4, %v5161_v50  ;;  %8319 = vmatpush3.bf16.msra.mxu0 %v8743_v43  ;;  %v10366_v42 = vsel %vm9111_vm14, %v7476_v53, %v5165_v49  ;;  %v5167_v27 = vrot.slane %v5165_v49, 4  ;;  %v5179_v44 = vrot.slane %v11158_v2, 5  ;;  %v5072_v53 = vld [vmem:[#allocation2 + $0x78] sm:$0xe] }
 0x152   : > { %v7491_v33 = vcombine.low %v10347_v22, %v10356_v35  ;;  %v10369_v37 = vrot.slane %v4685_v41, 4  ;;  %8320 = vmatprep.subr.bf16.mxu0 %v8746_v0  ;;  %v10376_v43 = vsel %vm9111_vm14, %v7477_v21, %v5172_v3  ;;  %v5174_v38 = vrot.slane %v5172_v3, 4  ;;  %v11161_v3 = vld [vmem:[#allocation23_spill] sm:$0xff] }
 0x153   : > { %v5182_v47 = vrot.slane %v11159_v5, 5  ;;  %8289 = vmatmul.mubr.bf16.gmra.mrb[12].mxu0 %v7454_v15  ;;  %v4705_v55 = vshll.u32 %v10352_v59, 16  ;;  %v10382_v45 = vsel %vm9111_vm14, %v5167_v27, %v5168_v26  ;;  %v10386_v58 = vsel %vm9111_vm14, %v7478_v56, %v5179_v44  ;;  %v8738_v56 = vld [vmem:[#allocation2 + $0xc] sm:$0xff]  }
 0x154   : > { %8061 = vmatmul.mubr.bf16.gmra.mrb[24].mxu1 %v7324_v52  ;;  %v5181_v50 = vrot.slane %v5179_v44, 4  ;;  %8292 = vmatprep.mubr.bf16.mxu0 %v7455_v18  ;;  %v4660_v52 = vsel %vm8992_vm11, %v10328_v16, %v10272_v62  ;;  %v4691_v15 = vshll.u32 %v10360_v6, 16  ;;  %v7492_v40 = vcombine.low %v10366_v42, %v10382_v45  ;;  %v10419_v27 = vld [vmem:[#allocation2 + $0xd0] sm:$0xf]  ;;  %v11162_v44 = vld [vmem:[#allocation4_spill] sm:$0xff] }
 0x155   : > { %8064 = vmatprep.mubr.bf16.mxu1 %v7325_v25  ;;  %v10400_v41 = vsel %vm9111_vm14, %v5174_v38, %v5175_v28  ;;  %v4678_v4 = vor.u32 %v10332_v29, %v10330_v14  ;;  %8321 = vmatpush3.bf16.msra.mxu0 %v8746_v0  ;;  %v4709_v30 = vshrl.u32 %v10352_v59, 16  ;;  %v4698_v49 = vrot.slane %v4696_v46, 4  ;;  %v11160_v0 = vld [vmem:[#allocation20_spill] sm:$0xff]  ;;  %v11163_v38 = vld [vmem:[#allocation5_spill] sm:$0xff]  ;;  %v5064_v62 = vld [vmem:[#allocation2 + $0x18] sm:$0xe] }
 0x156   : > { %v10409_v18 = vsel %vm9111_vm14, %v5181_v50, %v5182_v47  ;;  %v4701_v8 = vrot.slane %v4699_v48, 5  ;;  %8322 = vmatprep.subr.bf16.mxu0 %v8749_v7  ;;  %v7479_v21 = vrot.slane %v5072_v53, 9  ;;  %v4688_v14 = vor.u32 %v10369_v37, %v10337_v32  ;;  %v5073_v28 = vld [vmem:[#allocation2 + $0x84] sm:$0xe]  ;;  %v10429_v53 = vld [vmem:[#allocation2 + $0xc8] sm:$0x1] }
 0x157   : > { %v10415_v29 = vrot.slane %v4705_v55, 5  ;;  %v5186_v61 = vrot.slane %v11160_v0, 5  ;;  %v5189_v23 = vrot.slane %v11161_v3, 5  ;;  %v4720_v46 = vshrl.u32 %v4356_v63, 16  ;;  %v11164_v25 = vld [vmem:[#allocation21_spill] sm:$0xff] }
 0x158   : > { %v2940_v48 = vshrl.u32 %v2702_v34, 16  ;;  %v2943_v2 = vshll.u32 %v2702_v34, 16  ;;  %v2962_v5 = vsel %vm8992_vm11, %v11163_v38, %v11162_v44  ;;  %v4711_v47 = vrot.slane %v4709_v30, 4  ;;  %v2711_v45 = vld [vmem:[#allocation2 + $0x9c] sm:$0xf] }
 0x159   : > { %v4723_v37 = vshll.u32 %v4356_v63, 16  ;;  %8323 = vmatpush3.bf16.msra.mxu0 %v8749_v7  ;;  %v10427_v55 = vsel %vm9111_vm14, %v7479_v21, %v5186_v61  ;;  %v5188_v50 = vrot.slane %v5186_v61, 4  ;;  %v7480_v26 = vrot.slane %v5073_v28, 9  ;;  %v5074_v28 = vld [vmem:[#allocation2 + $0x90] sm:$0xe] }
 0x15a   : > { %v2942_v0 = vrot.slane %v2940_v48, 4  ;;  %v2945_v3 = vrot.slane %v2943_v2, 5  ;;  %v5193_v34 = vrot.slane %v11164_v25, 5  ;;  %v4729_v7 = vshll.u32 %v10419_v27, 16 }
 0x15b   : > { %8293 = vmatmul.mubr.bf16.gmra.mrb[16].mxu0 %v10309_v51  ;;  %v4733_v30 = vshrl.u32 %v10419_v27, 16  ;;  %v10440_v63 = vsel %vm9111_vm14, %v5188_v50, %v5189_v23  ;;  %v5196_v21 = vrot.slane %v10141_v10, 5  ;;  %v4670_v51 = vsel %vm8992_vm11, %v10335_v17, %v10321_v13  ;;  %v8741_v17 = vld [vmem:[#allocation2 + $0x24] sm:$0xff]  }
 0x15c   : > { %8065 = vmatmul.mubr.bf16.gmra.mrb[28].mxu1 %v7326_v54  ;;  %8296 = vmatprep.mubr.bf16.mxu0 %v10317_v19  ;;  %v7495_v25 = vcombine.low %v10427_v55, %v10440_v63  ;;  %v2946_v36 = vor.u32 %v2945_v3, %v2942_v0  ;;  %v10448_v12 = vsel %vm9111_vm14, %v7480_v26, %v5193_v34  ;;  %v5195_v54 = vrot.slane %v5193_v34, 4  ;;  %v8739_v26 = vld [vmem:[#allocation2 + $0x18] sm:$0xff]  }
 0x15d   : > { %8084 = vmatprep.mubr.bf16.mxu1 %v8738_v56  ;;  %v4679_v61 = vrot.slane %v4678_v4, 4  ;;  %v4693_v23 = vrot.slane %v4691_v15, 5  ;;  %v4715_v10 = vshll.u32 %v10429_v53, 16  ;;  %v4702_v19 = vor.u32 %v4701_v8, %v4698_v49  ;;  %v11165_v0 = vld [vmem:[#allocation3_spill] sm:$0xff] }
 0x15e   : > { %v4712_v56 = vor.u32 %v4711_v47, %v10415_v29  ;;  %v2947_v48 = vrot.slane %v2946_v36, 4  ;;  %v10458_v2 = vsel %vm9111_vm14, %v5195_v54, %v5196_v21  ;;  %v4689_v44 = vrot.slane %v4688_v14, 4  ;;  %v8824_v63 = vld [vmem:[#allocation2 + $0x98] sm:$0x1] }
 0x15f   : > { %v4722_v38 = vrot.slane %v4720_v46, 4  ;;  %v4725_v50 = vrot.slane %v4723_v37, 5  ;;  %v7496_v13 = vcombine.low %v10448_v12, %v10458_v2  ;;  %v10462_v15 = vrot.slane %v4729_v7, 5  ;;  %v10472_v46 = vld [vmem:[#allocation2 + $0xd4] sm:$0x1]  ;;  %v11166_v37 = vld [vmem:[#allocation24_spill] sm:$0xff] }
 0x160   : > { %v4735_v4 = vrot.slane %v4733_v30, 4  ;;  %v2952_v49 = vsel %vm8992_vm11, %v2947_v48, %v11165_v0  ;;  %v7481_v8 = vrot.slane %v5074_v28, 9  ;;  %v7459_v14 = vcombine.low %v4660_v52, %v4670_v51  ;;  %v5075_v51 = vld [vmem:[#allocation2 + $0x9c] sm:$0xe]  ;;  %v8742_v48 = vld [vmem:[#allocation2 + $0x30] sm:$0xff]  }
 0x161   : > { %v10474_v47 = vcombine.low %v2952_v49, %v2962_v5  ;;  %v5200_v3 = vrot.slane %v11166_v37, 5  ;;  %v5203_v34 = vrot.slane %v10163_v39, 5  ;;  %v4703_v7 = vrot.slane %v4702_v19, 4  ;;  %v8744_v0 = vld [vmem:[#allocation2 + $0x3c] sm:$0xff]   ;;  %v8806_v37 = vld [vmem:[%s11060_s1 + $0x110] sm:$0xff]  }
 0x162   : > { %v4713_v30 = vrot.slane %v4712_v56, 4  ;;  %v4717_v21 = vrot.slane %v4715_v10, 5  ;;  %v4684_v36 = vsel %vm8992_vm11, %v4679_v61, %v10337_v32  ;;  %v4694_v39 = vsel %vm8992_vm11, %v4689_v44, %v4693_v23  ;;  %v8803_v32 = vld [vmem:[%s11060_s1 + $0x108] sm:$0xff]   ;;  %v8804_v61 = vld [vmem:[#allocation2 + $0x1c] sm:$0xf] }
 0x163   : > { %8297 = vmatmul.mubr.bf16.gmra.mrb[20].mxu0 %v10319_v11  ;;  %v10484_v16 = vsel %vm9111_vm14, %v7481_v8, %v5200_v3  ;;  %v5202_v52 = vrot.slane %v5200_v3, 4  ;;  %v4726_v5 = vor.u32 %v4725_v50, %v4722_v38  ;;  %v4736_v54 = vor.u32 %v4735_v4, %v10462_v15  ;;  %v8805_v44 = vld [vmem:[#allocation2 + $0x20] sm:$0x1] }
 0x164   : > { %8085 = vmatmul.mubr.bf16.vlgmr.msra.gmra.mrb[0].mxu1 %v8739_v26  ;;  %v4739_v11 = vshll.u32 %v10472_v46, 16  ;;  %8300 = vmatprep.mubr.bf16.mxu0 %v7459_v14  ;;  %v5130_v10 = vrot.slane %v8804_v61, 5  ;;  %v4708_v23 = vsel %vm8992_vm11, %v4703_v7, %v10415_v29  ;;  %v4718_v28 = vsel %vm8992_vm11, %v4713_v30, %v4717_v21  ;;  %v5076_v21 = vld [vmem:[#allocation2 + $0xa8] sm:$0xe]  ;;  %v8809_v61 = vld [vmem:[#allocation2 + $0x34] sm:$0xf] }
 0x165   : > { %8364 = vmatpush3.bf16.msra.mxu1 %v10266_v31  ;;  %8088 = vmatprep.mubr.bf16.mxu1 %v8741_v17  ;;  %v10496_v31 = vsel %vm9111_vm14, %v5202_v52, %v5203_v34  ;;  %v7471_v19 = vrot.slane %v5064_v62, 9  ;;  %v7460_v26 = vcombine.low %v4684_v36, %v4694_v39  ;;  %v5133_v38 = vrot.slane %v8805_v44, 5  ;;  %v11167_v17 = vld [vmem:[#allocation25_spill] sm:$0xff] }
 0x166   : > { %8357 = vmatprep.subr.bf16.mxu1 %v8803_v32  ;;  %v7497_v56 = vcombine.low %v10484_v16, %v10496_v31  ;;  %v7482_v50 = vrot.slane %v5075_v51, 9  ;;  %v5207_v4 = vrot.slane %v11167_v17, 5  ;;  %v4727_v49 = vrot.slane %v4726_v5, 4  ;;  %v8807_v36 = vld [vmem:[#allocation2 + $0x28] sm:$0xf] }
 0x167   : > { %v4737_v8 = vrot.slane %v4736_v54, 4  ;;  %v4741_v14 = vrot.slane %v4739_v11, 5  ;;  %v5210_v29 = vrot.slane %v10168_v60, 5  ;;  %v7461_v3 = vcombine.low %v4708_v23, %v4718_v28  ;;  %v8808_v11 = vld [vmem:[%s11060_s1 + $0x118] sm:$0xff]   ;;  %v8745_v44 = vld [vmem:[#allocation2 + $0x48] sm:$0xff]  }
 0x168   : > { %v5132_v34 = vrot.slane %v5130_v10, 4  ;;  %v10512_v7 = vsel %vm9111_vm14, %v7482_v50, %v5207_v4  ;;  %v5209_v30 = vrot.slane %v5207_v4, 4  ;;  %v5137_v62 = vrot.slane %v8807_v36, 5 }
 0x169   : > { %8365 = vmatpush3.bf16.msra.mxu1 %v8803_v32  ;;  %v4732_v52 = vsel %vm8992_vm11, %v4727_v49, %v10462_v15  ;;  %v4742_v39 = vsel %vm8992_vm11, %v4737_v8, %v4741_v14  ;;  %v7483_v54 = vrot.slane %v5076_v21, 9  ;;  %v5131_v51 = vsel %vm9111_vm14, %v7471_v19, %v5130_v10  ;;  %v5065_v15 = vld [vmem:[#allocation2 + $0x24] sm:$0xe]  ;;  %v8810_v49 = vld [vmem:[#allocation2 + $0x2c] sm:$0x1] }
 0x16a   : > { %8358 = vmatprep.subr.bf16.mxu1 %v8806_v37  ;;  %v10516_v60 = vsel %vm9111_vm14, %v5209_v30, %v5210_v29  ;;  %v5134_v32 = vsel %vm9111_vm14, %v5132_v34, %v5133_v38  ;;  %v5144_v23 = vrot.slane %v8809_v61, 5  ;;  %v5214_v28 = vrot.slane %v10213_v20, 5  ;;  %v5077_v14 = vld [vmem:[#allocation2 + $0xb4] sm:$0xe]  ;;  %v8811_v20 = vld [vmem:[%s11060_s1 + $0x120] sm:$0xff]  }
 0x16b   : > { %8301 = vmatmul.mubr.bf16.gmra.mrb[24].mxu0 %v7460_v26  ;;  %v7498_v5 = vcombine.low %v10512_v7, %v10516_v60  ;;  %v5217_v26 = vrot.slane %v10245_v24, 5  ;;  %v7462_v50 = vcombine.low %v4732_v52, %v4742_v39  ;;  %v7487_v10 = vcombine.low %v5131_v51, %v5134_v32  ;;  %v8830_v60 = vld [vmem:[#allocation2 + $0xbc] sm:$0x1] }
 0x16c   : > { %8089 = vmatmul.mubr.bf16.gmra.mrb[4].mxu1 %v8742_v48  ;;  %8304 = vmatprep.mubr.bf16.mxu0 %v7461_v3  ;;  %v5066_v48 = vld [vmem:[#allocation2 + $0x30] sm:$0xe]  ;;  %v10536_v17 = vsel %vm9111_vm14, %v7483_v54, %v5214_v28  ;;  %v5216_v4 = vrot.slane %v5214_v28, 4  ;;  %v7472_v19 = vrot.slane %v5065_v15, 9  ;;  %v5139_v38 = vrot.slane %v5137_v62, 4 }
 0x16d   : > { %8092 = vmatprep.mubr.bf16.mxu1 %v8744_v0  ;;  %8366 = vmatpush3.bf16.msra.mxu1 %v8806_v37  ;;  %v8747_v0 = vld [vmem:[#allocation2 + $0x54] sm:$0xff]   ;;  %v5140_v8 = vrot.slane %v8810_v49, 5  ;;  %v7473_v24 = vrot.slane %v5066_v48, 9  ;;  %v5146_v29 = vrot.slane %v5144_v23, 4  ;;  %v7484_v21 = vrot.slane %v5077_v14, 9  ;;  %v8814_v48 = vld [vmem:[%s11060_s1 + $0x128] sm:$0xff]  }
 0x16e   : > { %8359 = vmatprep.subr.bf16.mxu1 %v8808_v11  ;;  %v8812_v37 = vld [vmem:[#allocation2 + $0x38] sm:$0x1]  ;;  %v10543_v34 = vsel %vm9111_vm14, %v5216_v4, %v5217_v26  ;;  %v5221_v36 = vrot.slane %v10288_v1, 5  ;;  %v5138_v52 = vsel %vm9111_vm14, %v7472_v19, %v5137_v62  ;;  %v5067_v54 = vld [vmem:[#allocation2 + $0x3c] sm:$0xe]  ;;  %v5224_v32 = vrot.slane %v10360_v6, 5 }
 0x16f   : > { %v5147_v3 = vrot.slane %v8812_v37, 5  ;;  %v7499_v30 = vcombine.low %v10536_v17, %v10543_v34  ;;  %v5141_v39 = vsel %vm9111_vm14, %v5139_v38, %v5140_v8  ;;  %v5145_v15 = vsel %vm9111_vm14, %v7473_v24, %v5144_v23  ;;  %v5078_v28 = vld [vmem:[#allocation2 + $0xc0] sm:$0xe]  ;;  %v8816_v14 = vld [vmem:[%s11060_s1 + $0x130] sm:$0xff]  }
 0x170   : > { %v10559_v61 = vsel %vm9111_vm14, %v7484_v21, %v5221_v36  ;;  %v5223_v62 = vrot.slane %v5221_v36, 4  ;;  %v8748_v26 = vld [vmem:[#allocation2 + $0x60] sm:$0xff]   ;;  %v7488_v6 = vcombine.low %v5138_v52, %v5141_v39  ;;  %v7485_v49 = vrot.slane %v5078_v28, 9  ;;  %v8817_v21 = vld [vmem:[%s11060_s1 + $0x138] sm:$0xff]  }
 0x171   : > { %8367 = vmatpush3.bf16.msra.mxu1 %v8808_v11  ;;  %v8813_v11 = vld [vmem:[#allocation2 + $0x40] sm:$0xf]  ;;  %v5148_v1 = vsel %vm9111_vm14, %v5146_v29, %v5147_v3  ;;  %v5228_v8 = vrot.slane %v10352_v59, 5  ;;  %v5079_v3 = vld [vmem:[#allocation2 + $0xcc] sm:$0xe]  ;;  %v8751_v52 = vld [vmem:[#allocation2 + $0x78] sm:$0xff]  }
 0x172   : > { %8360 = vmatprep.subr.bf16.mxu1 %v8811_v20  ;;  %v5151_v51 = vrot.slane %v8813_v11, 5  ;;  %v10566_v23 = vsel %vm9111_vm14, %v5223_v62, %v5224_v32  ;;  %v7486_v11 = vrot.slane %v5079_v3, 9  ;;  %v8752_v32 = vld [vmem:[#allocation2 + $0x84] sm:$0xff]   ;;  %vm7056_vm4 = vcmask 1046534  }
 0x173   : > { %8305 = vmatmul.mubr.bf16.gmra.mrb[28].mxu0 %v7462_v50  ;;  %v8815_v50 = vld [vmem:[#allocation2 + $0x44] sm:$0x1]  ;;  %v7500_v38 = vcombine.low %v10559_v61, %v10566_v23  ;;  %v10577_v24 = vsel %vm9111_vm14, %v7485_v49, %v5228_v8  ;;  %v5230_v29 = vrot.slane %v5228_v8, 4  ;;  %v8754_v49 = vld [vmem:[#allocation2 + $0x9c] sm:$0xff]  }
 0x174   : > { %8093 = vmatmul.mubr.bf16.gmra.mrb[8].mxu1 %v8745_v44  ;;  %8324 = vmatprep.mubr.bf16.mxu0 %v7487_v10  ;;  %v7474_v44 = vrot.slane %v5067_v54, 9  ;;  %v5154_v4 = vrot.slane %v8815_v50, 5  ;;  %v7489_v10 = vcombine.low %v5145_v15, %v5148_v1  ;;  %v5153_v19 = vrot.slane %v5151_v51, 4  ;;  %v2699_v54 = vld [vmem:[#allocation2 + $0x6c] sm:$0xf] }
 0x175   : > { %8096 = vmatprep.mubr.bf16.mxu1 %v8747_v0  ;;  %8368 = vmatpush3.bf16.msra.mxu1 %v8811_v20  ;;  %v8750_v0 = vld [vmem:[#allocation2 + $0x6c] sm:$0xff]   ;;  %v5231_v20 = vrot.slane %v10429_v53, 5  ;;  %v5238_v15 = vrot.slane %v10472_v46, 5  ;;  %v2916_v28 = vshrl.u32 %v2699_v54, 16  ;;  %v2705_v8 = vld [vmem:[#allocation2 + $0x84] sm:$0xf] }
 0x176   : > { %8361 = vmatprep.subr.bf16.mxu1 %v8814_v48  ;;  %v5152_v37 = vsel %vm9111_vm14, %v7474_v44, %v5151_v51  ;;  %v5155_v59 = vsel %vm9111_vm14, %v5153_v19, %v5154_v4  ;;  %v5235_v51 = vrot.slane %v10419_v27, 5  ;;  %v8753_v46 = vld [vmem:[#allocation2 + $0x90] sm:$0xff]   ;;  %v2964_v35 = vshrl.u32 %v2705_v8, 16 }
 0x177   : > { %v10585_v53 = vsel %vm9111_vm14, %v5230_v29, %v5231_v20  ;;  %v7490_v39 = vcombine.low %v5152_v37, %v5155_v59  ;;  %v2918_v4 = vrot.slane %v2916_v28, 4  ;;  %v11168_v29 = vcombine.low %v10376_v43, %v10400_v41  ;;  %v8820_v37 = vld [vmem:[#allocation2 + $0x88] sm:$0xf] }
 0x178   : > { %v7501_v36 = vcombine.low %v10577_v24, %v10585_v53  ;;  %v10596_v1 = vsel %vm9111_vm14, %v7486_v11, %v5235_v51  ;;  %v5237_v62 = vrot.slane %v5235_v51, 4  ;;  %v2973_v59 = vshll.u32 %v8820_v37, 16 }
 0x179   : > { %8369 = vmatpush3.bf16.msra.mxu1 %v8814_v48  ;;  %v2919_v48 = vshll.u32 %v2699_v54, 16  ;;  %v2977_v3 = vshrl.u32 %v8820_v37, 16  ;;  %v2966_v51 = vrot.slane %v2964_v35, 4 }
 0x17a   : > { %8362 = vmatprep.subr.bf16.mxu1 %v8816_v14  ;;  %v10600_v50 = vsel %vm9111_vm14, %v5237_v62, %v5238_v15 }
 0x17b   : > { %8325 = vmatmul.mubr.bf16.vlgmr.msra.gmra.mrb[0].mxu0 %v7488_v6  ;;  %v7502_v27 = vcombine.low %v10596_v1, %v10600_v50  ;;  %v2979_v15 = vrot.slane %v2977_v3, 4 }
 0x17c   : > { %8097 = vmatmul.mubr.bf16.gmra.mrb[12].mxu1 %v8748_v26  ;;  %8328 = vmatprep.mubr.bf16.mxu0 %v7489_v10  ;;  %v8818_v26 = vld [vmem:[#allocation2 + $0x70] sm:$0xf] }
 0x17d   : > { %8100 = vmatprep.mubr.bf16.mxu1 %v8750_v0  ;;  %8370 = vmatpush3.bf16.msra.mxu1 %v8816_v14  ;;  %v2925_v6 = vshll.u32 %v8818_v26, 16  ;;  %v2929_v44 = vshrl.u32 %v8818_v26, 16  ;;  %v2921_v0 = vrot.slane %v2919_v48, 5  ;;  %v8819_v14 = vld [vmem:[#allocation2 + $0x74] sm:$0x1]  ;;  %v3012_v26 = vshrl.u32 %v2711_v45, 16 }
 0x17e   : > { %8363 = vmatprep.subr.bf16.mxu1 %v8817_v21  ;;  %v2935_v20 = vshll.u32 %v8819_v14, 16  ;;  %v8821_v48 = vld [vmem:[#allocation2 + $0x94] sm:$0xf] }
 0x17f   : > { %v2927_v10 = vrot.slane %v2925_v6, 5  ;;  %v2931_v19 = vrot.slane %v2929_v44, 4  ;;  %v2922_v57 = vor.u32 %v2921_v0, %v2918_v4  ;;  %v2997_v43 = vshll.u32 %v8821_v48, 16  ;;  %v8822_v44 = vld [vmem:[#allocation2 + $0xa0] sm:$0xf] }
 0x180   : > { %v3001_v41 = vshrl.u32 %v8821_v48, 16  ;;  %v3015_v6 = vshll.u32 %v2711_v45, 16  ;;  %v3025_v4 = vshrl.u32 %v8822_v44, 16  ;;  %v11169_v0 = vcombine.low %v10386_v58, %v10409_v18  ;;  %v8825_v45 = vld [vmem:[#allocation2 + $0xa4] sm:$0x1] }
 0x181   : > { %8371 = vmatpush3.bf16.msra.mxu1 %v8817_v21  ;;  %v2932_v22 = vor.u32 %v2931_v19, %v2927_v10  ;;  %v2708_v21 = vld [vmem:[#allocation2 + $0x90] sm:$0xf]  ;;  %v2923_v54 = vrot.slane %v2922_v57, 4  ;;  %v10626_v58 = vrot.slane %v2997_v43, 5  ;;  %v8826_v48 = vld [vmem:[#allocation2 + $0xac] sm:$0xf] }
 0x182   : > { %v2988_v62 = vshrl.u32 %v2708_v21, 16  ;;  %v2991_v28 = vshll.u32 %v2708_v21, 16  ;;  %v3003_v18 = vrot.slane %v3001_v41, 4  ;;  %v3027_v37 = vrot.slane %v3025_v4, 4 }
 0x183   : > { %8329 = vmatmul.mubr.bf16.gmra.mrb[4].mxu0 %v7490_v39  ;;  %v2937_v39 = vrot.slane %v2935_v20, 5  ;;  %v2933_v11 = vrot.slane %v2932_v22, 4  ;;  %v2928_v19 = vsel %vm8992_vm11, %v2923_v54, %v2927_v10  ;;  %v3017_v10 = vrot.slane %v3015_v6, 5  ;;  %v2714_v54 = vld [vmem:[#allocation2 + $0xa8] sm:$0xf] }
 0x184   : > { %8101 = vmatmul.mubr.bf16.gmra.mrb[16].mxu1 %v8751_v52  ;;  %8332 = vmatprep.mubr.bf16.mxu0 %v7491_v33  ;;  %v2967_v33 = vshll.u32 %v2705_v8, 16  ;;  %v8755_v52 = vld [vmem:[#allocation2 + $0xa8] sm:$0xff]   ;;  %v2990_v22 = vrot.slane %v2988_v62, 4  ;;  %v2993_v35 = vrot.slane %v2991_v28, 5  ;;  %v3036_v62 = vshrl.u32 %v2714_v54, 16 }
 0x185   : > { %8104 = vmatprep.mubr.bf16.mxu1 %v8752_v32  ;;  %v10613_v32 = vrot.slane %v2973_v59, 5  ;;  %v8823_v8 = vld [vmem:[#allocation2 + $0x8c] sm:$0x1]  ;;  %v8757_v59 = vld [vmem:[#allocation2 + $0xc0] sm:$0xff]   ;;  %v3039_v28 = vshll.u32 %v2714_v54, 16  ;;  %v3045_v43 = vshll.u32 %v8826_v48, 16 }
 0x186   : > { %v2969_v42 = vrot.slane %v2967_v33, 5  ;;  %v2983_v14 = vshll.u32 %v8823_v8, 16  ;;  %v3014_v33 = vrot.slane %v3012_v26, 4  ;;  %v2994_v55 = vor.u32 %v2993_v35, %v2990_v22 }
 0x187   : > { %v2980_v57 = vor.u32 %v2979_v15, %v10613_v32  ;;  %v2717_v15 = vld [vmem:[#allocation2 + $0xb4] sm:$0xf]  ;;  %v3049_v41 = vshrl.u32 %v8826_v48, 16 }
 0x188   : > { %v2970_v20 = vor.u32 %v2969_v42, %v2966_v51  ;;  %v2985_v21 = vrot.slane %v2983_v14, 5  ;;  %v3018_v51 = vor.u32 %v3017_v10, %v3014_v33  ;;  %v3060_v2 = vshrl.u32 %v2717_v15, 16 }
 0x189   : > { %v3051_v22 = vrot.slane %v3049_v41, 4 }
 0x18b   : > { %8333 = vmatmul.mubr.bf16.gmra.mrb[8].mxu0 %v7492_v40  ;;  %v8756_v40 = vld [vmem:[#allocation2 + $0xb4] sm:$0xff]  }
 0x18c   : > { %8105 = vmatmul.mubr.bf16.gmra.mrb[20].mxu1 %v8753_v46  ;;  %8336 = vmatprep.mubr.bf16.mxu0 %v11168_v29  ;;  %v3021_v46 = vshll.u32 %v8822_v44, 16  ;;  %v2995_v44 = vrot.slane %v2994_v55, 4 }
 0x18d   : > { %8108 = vmatprep.mubr.bf16.mxu1 %v8754_v49  ;;  %v2938_v49 = vsel %vm8992_vm11, %v2933_v11, %v2937_v39  ;;  %v2981_v39 = vrot.slane %v2980_v57, 4  ;;  %v3004_v11 = vor.u32 %v3003_v18, %v10626_v58  ;;  %v3047_v57 = vrot.slane %v3045_v43, 5 }
 0x18e   : > { %v10628_v29 = vrot.slane %v3021_v46, 5  ;;  %v7367_v3 = vcombine.low %v2928_v19, %v2938_v49  ;;  %v8827_v46 = vld [vmem:[#allocation2 + $0xb8] sm:$0xf]  ;;  %v3019_v49 = vrot.slane %v3018_v51, 4  ;;  %v3062_v18 = vrot.slane %v3060_v2, 4 }
 0x18f   : > { %v2986_v6 = vsel %vm8992_vm11, %v2981_v39, %v2985_v21  ;;  %v3069_v4 = vshll.u32 %v8827_v46, 16  ;;  %v3005_v19 = vrot.slane %v3004_v11, 4  ;;  %v3000_v10 = vsel %vm8992_vm11, %v2995_v44, %v10626_v58  ;;  %v8828_v39 = vld [vmem:[#allocation2 + $0xb0] sm:$0x1]  ;;  %v8831_v44 = vld [vmem:[#allocation2 + $0xc8] sm:$0x1] }
 0x190   : > { %v3028_v42 = vor.u32 %v3027_v37, %v10628_v29  ;;  %v3055_v58 = vshll.u32 %v8828_v39, 16 }
 0x191   : > { %v3071_v16 = vrot.slane %v3069_v4, 5 }
 0x192   : > { %v3029_v8 = vrot.slane %v3028_v42, 4 }
 0x193   : > { %8337 = vmatmul.mubr.bf16.gmra.mrb[12].mxu0 %v11169_v0  ;;  %v3073_v0 = vshrl.u32 %v8827_v46, 16 }
 0x194   : > { %8109 = vmatmul.mubr.bf16.gmra.mrb[24].mxu1 %v8755_v52  ;;  %8340 = vmatprep.mubr.bf16.mxu0 %v7495_v25  ;;  %v2971_v52 = vrot.slane %v2970_v20, 4  ;;  %v3007_v25 = vshll.u32 %v8824_v63, 16  ;;  %v3038_v20 = vrot.slane %v3036_v62, 4  ;;  %v8829_v63 = vld [vmem:[#allocation2 + $0xc4] sm:$0xf] }
 0x195   : > { %8112 = vmatprep.mubr.bf16.mxu1 %v8756_v40  ;;  %v3031_v40 = vshll.u32 %v8825_v45, 16  ;;  %v3075_v31 = vrot.slane %v3073_v0, 4 }
 0x196   : > { %v2976_v26 = vsel %vm8992_vm11, %v2971_v52, %v10613_v32  ;;  %v3009_v12 = vrot.slane %v3007_v25, 5  ;;  %v3041_v32 = vrot.slane %v3039_v28, 5  ;;  %v3052_v52 = vor.u32 %v3051_v22, %v3047_v57 }
 0x197   : > { %v3033_v14 = vrot.slane %v3031_v40, 5  ;;  %v7369_v35 = vcombine.low %v2976_v26, %v2986_v6  ;;  %v3097_v25 = vshrl.u32 %v8829_v63, 16  ;;  %v3076_v7 = vor.u32 %v3075_v31, %v3071_v16 }
 0x198   : > { %v3010_v37 = vsel %vm8992_vm11, %v3005_v19, %v3009_v12  ;;  %v3042_v21 = vor.u32 %v3041_v32, %v3038_v20  ;;  %v3053_v45 = vrot.slane %v3052_v52, 4  ;;  %v3057_v40 = vrot.slane %v3055_v58, 5 }
 0x199   : > { %v7370_v11 = vcombine.low %v3000_v10, %v3010_v37  ;;  %v3099_v48 = vrot.slane %v3097_v25, 4  ;;  %v3077_v34 = vrot.slane %v3076_v7, 4  ;;  %v3103_v12 = vshll.u32 %v8831_v44, 16  ;;  %v10702_v10 = vld [vmem:[%s11061_s2] ss:$0 sm:$0xff] }
 0x19a   : > { %v3043_v42 = vrot.slane %v3042_v21, 4  ;;  %v3058_v41 = vsel %vm8992_vm11, %v3053_v45, %v3057_v40  ;;  %v8842_v22 = vmov 1983009808  }
 0x19b   : > { %8341 = vmatmul.mubr.bf16.gmra.mrb[16].mxu0 %v7496_v13  ;;  %v3063_v13 = vshll.u32 %v2717_v15, 16  ;;  %v3105_v4 = vrot.slane %v3103_v12, 5 }
 0x19c   : > { %8113 = vmatmul.mubr.bf16.gmra.mrb[28].mxu1 %v8757_v59  ;;  %8344 = vmatprep.mubr.bf16.mxu0 %v7497_v56  ;;  %v2720_v56 = vld [vmem:[#allocation2 + $0xc0] sm:$0xf]  ;;  %v3024_v59 = vsel %vm8992_vm11, %v3019_v49, %v10628_v29  ;;  %v3048_v43 = vsel %vm8992_vm11, %v3043_v42, %v3047_v57 }
 0x19d   : > { %8148 = vmatprep.mubr.bf16.mxu1 %v7367_v3  ;;  %v3065_v33 = vrot.slane %v3063_v13, 5  ;;  %v3034_v3 = vsel %vm8992_vm11, %v3029_v8, %v3033_v14  ;;  %v3084_v55 = vshrl.u32 %v2720_v56, 16  ;;  %v3087_v29 = vshll.u32 %v2720_v56, 16 }
 0x19e   : > { %v7371_v51 = vcombine.low %v3024_v59, %v3034_v3  ;;  %v7372_v61 = vcombine.low %v3048_v43, %v3058_v41 }
 0x19f   : > { %v3066_v54 = vor.u32 %v3065_v33, %v3062_v18  ;;  %v3086_v15 = vrot.slane %v3084_v55, 4  ;;  %v3089_v62 = vrot.slane %v3087_v29, 5  ;;  %v5668_v18 = vlaneseq }
 0x1a1   : > { %v3067_v17 = vrot.slane %v3066_v54, 4  ;;  %v3090_v26 = vor.u32 %v3089_v62, %v3086_v15 }
 0x1a3   : > { %8345 = vmatmul.mubr.bf16.gmra.mrb[20].mxu0 %v7498_v5  ;;  %v3079_v5 = vshll.u32 %v8830_v60, 16  ;;  %v3072_v2 = vsel %vm8992_vm11, %v3067_v17, %v3071_v16  ;;  %v5669_v16 = vshrl.u32 %v5668_v18, 7 }
 0x1a4   : > { %8149 = vmatmul.mubr.bf16.vlgmr.msra.gmra.mrb[16].mxu1 %v10474_v47  ;;  %8348 = vmatprep.mubr.bf16.mxu0 %v7499_v30  ;;  %v3093_v47 = vshll.u32 %v8829_v63, 16 }
 0x1a5   : > { %8152 = vmatprep.mubr.bf16.mxu1 %v7369_v35  ;;  %v3081_v30 = vrot.slane %v3079_v5, 5  ;;  %v5666_v35 = vunpack.c.l.s4 %v8842_v22 }
 0x1a6   : > { %v3095_v28 = vrot.slane %v3093_v47, 5 }
 0x1a7   : > { %v3082_v13 = vsel %vm8992_vm11, %v3077_v34, %v3081_v30  ;;  %v5667_v33 = vunpack.c.0.s8 %v5666_v35 }
 0x1a8   : > { %v3100_v6 = vor.u32 %v3099_v48, %v3095_v28  ;;  %v7373_v23 = vcombine.low %v3072_v2, %v3082_v13 }
 0x1a9   : > { %v10711_v29 = vsub.s32 %v5667_v33, %v5669_v16 }
 0x1aa   : > { %v3101_v46 = vrot.slane %v3100_v6, 4 }
 0x1ab   : > { %8349 = vmatmul.mubr.bf16.gmra.mrb[24].mxu0 %v7500_v38  ;;  %v3091_v38 = vrot.slane %v3090_v26, 4 }
 0x1ac   : > { %8153 = vmatmul.mubr.bf16.gmra.mrb[20].mxu1 %v7370_v11  ;;  %8352 = vmatprep.mubr.bf16.mxu0 %v7501_v36  ;;  %v3106_v53 = vsel %vm8992_vm11, %v3101_v46, %v3105_v4 }
 0x1ad   : > { %8156 = vmatprep.mubr.bf16.mxu1 %v7371_v51  ;;  %v3096_v24 = vsel %vm8992_vm11, %v3091_v38, %v3095_v28 }
 0x1ae   : > { %v7374_v36 = vcombine.low %v3096_v24, %v3106_v53 }
 0x1b3   : > { %8353 = vmatmul.mubr.bf16.gmra.mrb[28].mxu0 %v7502_v27 }
 0x1b4   : > { %8157 = vmatmul.mubr.bf16.gmra.mrb[24].mxu1 %v7372_v61 }
 0x1b5   : > { %8160 = vmatprep.mubr.bf16.mxu1 %v7373_v23 }
 0x1bc   : > { %8161 = vmatmul.mubr.bf16.gmra.mrb[28].mxu1 %v7374_v36 }
 0x237   : > { %v8086_v0 = vpop.f32.mrb[0].mxu1 }
 0x238   : > { %v2516_v19 = vpop.f32.mrb[1].mxu1 }
 0x239   : > { %v8087_v49 = vpop.f32.mrb[2].mxu1 }
 0x23a   : > { %v2519_v8 = vpop.f32.mrb[3].mxu1 }
 0x23f   : > { %v10681_v14 = vpop.f32.mrb[4].mxu1 }
 0x240   : > { %v10683_v20 = vpop.f32.mrb[5].mxu1 }
 0x241   : > { %v10685_v32 = vpop.f32.mrb[6].mxu1 }
 0x242   : > { %v10687_v1 = vpop.f32.mrb[7].mxu1 }
 0x247   : > { %v10689_v50 = vpop.f32.mrb[8].mxu1 }
 0x248   : > { %v10691_v27 = vpop.f32.mrb[9].mxu1 }
 0x249   : > { %v10693_v9 = vpop.f32.mrb[10].mxu1 }
 0x24a   : > { %v10695_v57 = vpop.f32.mrb[11].mxu1 }
 0x24e   : > { %v8326_v56 = vpop.f32.mrb[0].mxu0 }
 0x24f   : > { %v10697_v31 = vpop.f32.mrb[12].mxu1  ;;  %v8372_v59 = vadd.f32 %v8326_v56, %v8086_v0  ;;  %v5402_v3 = vpop.f32.mrb[1].mxu0 }
 0x250   : > { %v10704_v37 = vpop.f32.mrb[13].mxu1  ;;  %v8373_v52 = vadd.f32 %v5402_v3, %v2516_v19  ;;  %v8327_v39 = vpop.f32.mrb[2].mxu0 }
 0x251   : > { %v10706_v21 = vpop.f32.mrb[14].mxu1  ;;  %v5570_v55 = vadd.f32 %v8372_v59, %v10702_v10  ;;  %v8374_v63 = vadd.f32 %v8327_v39, %v8087_v49  ;;  %v5405_v47 = vpop.f32.mrb[3].mxu0 }
 0x252   : > { %v10708_v58 = vpop.f32.mrb[15].mxu1  ;;  %v5568_v25 = vadd.f32 %v8373_v52, %v10702_v10  ;;  %v8375_v54 = vadd.f32 %v5405_v47, %v2519_v8 }
 0x253   : > { %v5602_v7 = vmax.f32 %v5570_v55, 0.0  ;;  %v5571_v60 = vadd.f32 %v8374_v63, %v10702_v10 }
 0x254   : > { %v5600_v5 = vmax.f32 %v5568_v25, 0.0  ;;  %v5569_v11 = vadd.f32 %v8375_v54, %v10702_v10 }
 0x255   : > { %v5698_v51 = vcombine.high %v5602_v7, %v5602_v7  ;;  %v5705_v42 = vrot.slane %v5602_v7, %v10711_v29  ;;  %v5603_v45 = vmax.f32 %v5571_v60, 0.0 }
 0x256   : > { %v5664_v40 = vcombine.high %v5600_v5, %v5600_v5  ;;  %v5671_v15 = vrot.slane %v5600_v5, %v10711_v29  ;;  %v5601_v62 = vmax.f32 %v5569_v11, 0.0  ;;  %v8330_v28 = vpop.f32.mrb[4].mxu0 }
 0x257   : > { %v5712_v48 = vrot.slane %v5698_v51, %v10711_v29  ;;  %v5713_v17 = vcombine.high %v5705_v42, %v5705_v42  ;;  %v5715_v34 = vcombine.high %v5603_v45, %v5603_v45  ;;  %v5722_v30 = vrot.slane %v5603_v45, %v10711_v29  ;;  %v10720_v43 = vpop.f32.mrb[5].mxu0 }
 0x258   : > { %v5678_v41 = vrot.slane %v5664_v40, %v10711_v29  ;;  %v5679_v26 = vcombine.high %v5671_v15, %v5671_v15  ;;  %v6336_v6 = vmax.f32 %v5671_v15, %v5705_v42  ;;  %v5681_v44 = vcombine.high %v5601_v62, %v5601_v62  ;;  %v10723_v12 = vpop.f32.mrb[6].mxu0 }
 0x259   : > { %v5714_v2 = vcombine.high %v5712_v48, %v5712_v48  ;;  %v5729_v13 = vrot.slane %v5715_v34, %v10711_v29  ;;  %v5730_v61 = vcombine.high %v5722_v30, %v5722_v30  ;;  %v5688_v23 = vrot.slane %v5601_v62, %v10711_v29  ;;  %v10727_v38 = vpop.f32.mrb[7].mxu0 }
 0x25a   : > { %v5680_v46 = vcombine.high %v5678_v41, %v5678_v41  ;;  %v6337_v4 = vmax.f32 %v5679_v26, %v5713_v17  ;;  %v6338_v24 = vmax.f32 %v5678_v41, %v5712_v48  ;;  %v7512_v53 = vrot.slane %v6336_v6, 9 }
 0x25b   : > { %v5731_v36 = vcombine.high %v5729_v13, %v5729_v13  ;;  %v5695_v0 = vrot.slane %v5681_v44, %v10711_v29  ;;  %v5696_v19 = vcombine.high %v5688_v23, %v5688_v23  ;;  %v6340_v49 = vmax.f32 %v5688_v23, %v5722_v30 }
 0x25c   : > { %v6339_v8 = vmax.f32 %v5680_v46, %v5714_v2  ;;  %v7513_v22 = vrot.slane %v6337_v4, 9  ;;  %v7514_v35 = vrot.slane %v6338_v24, 9  ;;  %v6656_v18 = vmax.f32 %v6336_v6, %v7512_v53 }
 0x25d   : > { %v5697_v33 = vcombine.high %v5695_v0, %v5695_v0  ;;  %v6341_v16 = vmax.f32 %v5696_v19, %v5730_v61  ;;  %v6342_v56 = vmax.f32 %v5695_v0, %v5729_v13  ;;  %v7516_v59 = vrot.slane %v6340_v49, 9 }
 0x25e   : > { %v7515_v3 = vrot.slane %v6339_v8, 9  ;;  %v6657_v52 = vmax.f32 %v6337_v4, %v7513_v22  ;;  %v6658_v39 = vmax.f32 %v6338_v24, %v7514_v35  ;;  %v7644_v55 = vpack.c.bf16 %v6656_v18, %v6656_v18  ;;  %v10730_v63 = vpop.f32.mrb[8].mxu0 }
 0x25f   : > { %v6343_v47 = vmax.f32 %v5697_v33, %v5731_v36  ;;  %v7517_v25 = vrot.slane %v6341_v16, 9  ;;  %v7518_v54 = vrot.slane %v6342_v56, 9  ;;  %v6660_v7 = vmax.f32 %v6340_v49, %v7516_v59  ;;  %v10732_v60 = vpop.f32.mrb[9].mxu0 }
 0x260   : > { %v6659_v5 = vmax.f32 %v6339_v8, %v7515_v3  ;;  %v7645_v11 = vpack.c.bf16 %v6657_v52, %v6657_v52  ;;  %v7646_v51 = vpack.c.bf16 %v6658_v39, %v6658_v39  ;;  %v6976_v42 = vunpack.c.l.b16 %v7644_v55  ;;  %v10734_v45 = vpop.f32.mrb[10].mxu0 }
 0x261   : > { %v7519_v40 = vrot.slane %v6343_v47, 9  ;;  %v6661_v15 = vmax.f32 %v6341_v16, %v7517_v25  ;;  %v6662_v62 = vmax.f32 %v6342_v56, %v7518_v54  ;;  %v7648_v48 = vpack.c.bf16 %v6660_v7, %v6660_v7  ;;  %v10736_v17 = vpop.f32.mrb[11].mxu0 }
 0x262   : > { %v7647_v34 = vpack.c.bf16 %v6659_v5, %v6659_v5  ;;  %v6977_v30 = vunpack.c.l.b16 %v7645_v11  ;;  %v6978_v41 = vunpack.c.l.b16 %v7646_v51  ;;  %v8376_v26 = vadd.f32 %v8330_v28, %v10681_v14 }
 0x263   : > { %v6663_v6 = vmax.f32 %v6343_v47, %v7519_v40  ;;  %v7649_v44 = vpack.c.bf16 %v6661_v15, %v6661_v15  ;;  %v7650_v2 = vpack.c.bf16 %v6662_v62, %v6662_v62  ;;  %v6980_v13 = vunpack.c.l.b16 %v7648_v48 }
 0x264   : > { %v6979_v61 = vunpack.c.l.b16 %v7647_v34  ;;  %v7040_v23 = vrot.slane %v6977_v30, 7  ;;  %v7043_v46 = vrot.slane %v6978_v41, 6  ;;  %v5574_v4 = vadd.f32 %v8376_v26, %v10702_v10 }
 0x265   : > { %v7651_v24 = vpack.c.bf16 %v6663_v6, %v6663_v6  ;;  %v6981_v53 = vunpack.c.l.b16 %v7649_v44  ;;  %v6982_v36 = vunpack.c.l.b16 %v7650_v2  ;;  %v7049_v0 = vrot.slane %v6980_v13, 4 }
 0x266   : > { %v7042_v19 = vsel %vm7041_vm15, %v7040_v23, %v6976_v42  ;;  %v7046_v49 = vrot.slane %v6979_v61, 5  ;;  %v5606_v8 = vmax.f32 %v5574_v4, 0.0  ;;  %v8377_v14 = vadd.f32 %v10720_v43, %v10683_v20  ;;  %v10743_v28 = vpop.f32.mrb[12].mxu0 }
 0x267   : > { %v7045_v22 = vsel %vm7044_vm0, %v7043_v46, %v7042_v19  ;;  %v6983_v35 = vunpack.c.l.b16 %v7651_v24  ;;  %v7052_v18 = vrot.slane %v6981_v53, 3  ;;  %v7055_v33 = vrot.slane %v6982_v36, 2  ;;  %v10746_v16 = vpop.f32.mrb[13].mxu0 }
 0x268   : > { %v7048_v56 = vsel %vm7047_vm1, %v7046_v49, %v7045_v22  ;;  %v5766_v59 = vcombine.high %v5606_v8, %v5606_v8  ;;  %v5773_v3 = vrot.slane %v5606_v8, %v10711_v29  ;;  %v5572_v52 = vadd.f32 %v8377_v14, %v10702_v10  ;;  %v10751_v39 = vpop.f32.mrb[14].mxu0 }
 0x269   : > { %v7051_v20 = vsel %vm7050_vm2, %v7049_v0, %v7048_v56  ;;  %v7058_v43 = vrot.slane %v6983_v35, 1  ;;  %v8378_v55 = vadd.f32 %v10723_v12, %v10685_v32  ;;  %v8379_v47 = vadd.f32 %v10727_v38, %v10687_v1  ;;  %v10759_v25 = vpop.f32.mrb[15].mxu0 }
 0x26a   : > { %v7054_v54 = vsel %vm7053_vm3, %v7052_v18, %v7051_v20  ;;  %v5780_v7 = vrot.slane %v5766_v59, %v10711_v29  ;;  %v5781_v5 = vcombine.high %v5773_v3, %v5773_v3  ;;  %v5604_v11 = vmax.f32 %v5572_v52, 0.0 }
 0x26b   : > { %v7057_v51 = vsel %vm7056_vm4, %v7055_v33, %v7054_v54  ;;  %v5575_v42 = vadd.f32 %v8378_v55, %v10702_v10  ;;  %v5573_v40 = vadd.f32 %v8379_v47, %v10702_v10  ;;  %v8380_v32 = vadd.f32 %v10730_v63, %v10689_v50 }
 0x26c   : > { %v7060_v1 = vsel %vm7059_vm5, %v7058_v43, %v7057_v51  ;;  %v5782_v12 = vcombine.high %v5780_v7, %v5780_v7  ;;  %v5732_v38 = vcombine.high %v5604_v11, %v5604_v11  ;;  %v5739_v15 = vrot.slane %v5604_v11, %v10711_v29 }
 0x26d   : > { %v7159_v62 = vpack.c.b16 %v7060_v1, %v7060_v1  ;;  %v5607_v48 = vmax.f32 %v5575_v42, 0.0  ;;  %v5605_v34 = vmax.f32 %v5573_v40, 0.0  ;;  %v5578_v30 = vadd.f32 %v8380_v32, %v10702_v10 }
 0x26e   : > { %v5746_v41 = vrot.slane %v5732_v38, %v10711_v29  ;;  %v5747_v50 = vcombine.high %v5739_v15, %v5739_v15  ;;  %v6344_v63 = vmax.f32 %v5739_v15, %v5773_v3  ;;  %v10779_v26 = vadd.f32 %v10732_v60, %v10691_v27  ;;  %v10781_v6 = vpop.f32.mrb[16].mxu0 }
 0x26f   : > { %7175 = vst [vmem:[%s10771_s8] sm:$0xf] %v7159_v62  ;;  %v5783_v44 = vcombine.high %v5607_v48, %v5607_v48  ;;  %v5790_v2 = vrot.slane %v5607_v48, %v10711_v29  ;;  %v5749_v13 = vcombine.high %v5605_v34, %v5605_v34  ;;  %v5756_v61 = vrot.slane %v5605_v34, %v10711_v29  ;;  %v10786_v23 = vpop.f32.mrb[17].mxu0 }
 0x270   : > { %v5748_v46 = vcombine.high %v5746_v41, %v5746_v41  ;;  %v6345_v4 = vmax.f32 %v5747_v50, %v5781_v5  ;;  %v6346_v24 = vmax.f32 %v5746_v41, %v5780_v7  ;;  %v7520_v53 = vrot.slane %v6344_v63, 9  ;;  %v10788_v36 = vpop.f32.mrb[18].mxu0 }
 0x271   : > { %v5797_v27 = vrot.slane %v5783_v44, %v10711_v29  ;;  %v5798_v60 = vcombine.high %v5790_v2, %v5790_v2  ;;  %v5763_v0 = vrot.slane %v5749_v13, %v10711_v29  ;;  %v5764_v19 = vcombine.high %v5756_v61, %v5756_v61  ;;  %v10792_v49 = vpop.f32.mrb[19].mxu0 }
 0x272   : > { %v6347_v8 = vmax.f32 %v5748_v46, %v5782_v12  ;;  %v7521_v14 = vrot.slane %v6345_v4, 9  ;;  %v7522_v22 = vrot.slane %v6346_v24, 9  ;;  %v6664_v35 = vmax.f32 %v6344_v63, %v7520_v53 }
 0x273   : > { %v5799_v18 = vcombine.high %v5797_v27, %v5797_v27  ;;  %v5765_v33 = vcombine.high %v5763_v0, %v5763_v0  ;;  %v6348_v56 = vmax.f32 %v5756_v61, %v5790_v2  ;;  %v6349_v59 = vmax.f32 %v5764_v19, %v5798_v60 }
 0x274   : > { %v7523_v3 = vrot.slane %v6347_v8, 9  ;;  %v6665_v52 = vmax.f32 %v6345_v4, %v7521_v14  ;;  %v6666_v20 = vmax.f32 %v6346_v24, %v7522_v22  ;;  %v7652_v43 = vpack.c.bf16 %v6664_v35, %v6664_v35 }
 0x275   : > { %v6350_v55 = vmax.f32 %v5763_v0, %v5797_v27  ;;  %v6351_v47 = vmax.f32 %v5765_v33, %v5799_v18  ;;  %v7524_v54 = vrot.slane %v6348_v56, 9  ;;  %v7525_v7 = vrot.slane %v6349_v59, 9 }
 0x276   : > { %v6667_v5 = vmax.f32 %v6347_v8, %v7523_v3  ;;  %v7653_v11 = vpack.c.bf16 %v6665_v52, %v6665_v52  ;;  %v7654_v51 = vpack.c.bf16 %v6666_v20, %v6666_v20  ;;  %v6984_v42 = vunpack.c.l.b16 %v7652_v43  ;;  %v10796_v32 = vpop.f32.mrb[20].mxu0 }
 0x277   : > { %v10794_v40 = vpop.f32.mrb[16].mxu1  ;;  %v7526_v1 = vrot.slane %v6350_v55, 9  ;;  %v7527_v12 = vrot.slane %v6351_v47, 9  ;;  %v6668_v38 = vmax.f32 %v6348_v56, %v7524_v54  ;;  %v6669_v15 = vmax.f32 %v6349_v59, %v7525_v7  ;;  %v10800_v48 = vpop.f32.mrb[21].mxu0 }
 0x278   : > { %v10798_v62 = vpop.f32.mrb[17].mxu1  ;;  %v7655_v34 = vpack.c.bf16 %v6667_v5, %v6667_v5  ;;  %v6985_v41 = vunpack.c.l.b16 %v7653_v11  ;;  %v6986_v50 = vunpack.c.l.b16 %v7654_v51  ;;  %v5610_v63 = vmax.f32 %v5578_v30, 0.0  ;;  %v10804_v2 = vpop.f32.mrb[22].mxu0 }
 0x279   : > { %v10802_v44 = vpop.f32.mrb[18].mxu1  ;;  %v6670_v13 = vmax.f32 %v6350_v55, %v7526_v1  ;;  %v6671_v61 = vmax.f32 %v6351_v47, %v7527_v12  ;;  %v7656_v46 = vpack.c.bf16 %v6668_v38, %v6668_v38  ;;  %v7657_v4 = vpack.c.bf16 %v6669_v15, %v6669_v15  ;;  %v10808_v53 = vpop.f32.mrb[23].mxu0 }
 0x27a   : > { %v10806_v24 = vpop.f32.mrb[19].mxu1  ;;  %v6987_v27 = vunpack.c.l.b16 %v7655_v34  ;;  %v7061_v60 = vrot.slane %v6985_v41, 7  ;;  %v7063_v0 = vrot.slane %v6986_v50, 6  ;;  %v5834_v19 = vcombine.high %v5610_v63, %v5610_v63 }
 0x27b   : > { %v7658_v8 = vpack.c.bf16 %v6670_v13, %v6670_v13  ;;  %v7659_v14 = vpack.c.bf16 %v6671_v61, %v6671_v61  ;;  %v6988_v22 = vunpack.c.l.b16 %v7656_v46  ;;  %v6989_v30 = vunpack.c.l.b16 %v7657_v4 }
 0x27c   : > { %v7062_v35 = vsel %vm7041_vm15, %v7061_v60, %v6984_v42  ;;  %v7065_v18 = vrot.slane %v6987_v27, 5  ;;  %v5841_v33 = vrot.slane %v5610_v63, %v10711_v29  ;;  %v10813_v56 = vrot.slane %v5834_v19, %v10711_v29 }
 0x27d   : > { %v7064_v59 = vsel %vm7044_vm0, %v7063_v0, %v7062_v35  ;;  %v6990_v3 = vunpack.c.l.b16 %v7658_v8  ;;  %v6991_v52 = vunpack.c.l.b16 %v7659_v14  ;;  %v7067_v20 = vrot.slane %v6988_v22, 4 }
 0x27e   : > { %v7066_v43 = vsel %vm7047_vm1, %v7065_v18, %v7064_v59  ;;  %v7069_v55 = vrot.slane %v6989_v30, 3  ;;  %v5849_v47 = vcombine.high %v5841_v33, %v5841_v33  ;;  %v5850_v54 = vcombine.high %v10813_v56, %v10813_v56  ;;  %v10821_v5 = vpop.f32.mrb[24].mxu0 }
 0x27f   : > { %v10819_v7 = vpop.f32.mrb[20].mxu1  ;;  %v7068_v11 = vsel %vm7050_vm2, %v7067_v20, %v7066_v43  ;;  %v7071_v51 = vrot.slane %v6990_v3, 2  ;;  %v7073_v42 = vrot.slane %v6991_v52, 1  ;;  %v5576_v1 = vadd.f32 %v10779_v26, %v10702_v10  ;;  %v10828_v38 = vpop.f32.mrb[25].mxu0 }
 0x280   : > { %v10826_v12 = vpop.f32.mrb[21].mxu1  ;;  %v7070_v15 = vsel %vm7053_vm3, %v7069_v55, %v7068_v11  ;;  %v8382_v34 = vadd.f32 %v10734_v45, %v10693_v9  ;;  %v8383_v41 = vadd.f32 %v10736_v17, %v10695_v57  ;;  %v8384_v50 = vadd.f32 %v10743_v28, %v10697_v31  ;;  %v10839_v13 = vpop.f32.mrb[26].mxu0 }
 0x281   : > { %v10837_v63 = vpop.f32.mrb[22].mxu1  ;;  %v7072_v26 = vsel %vm7056_vm4, %v7071_v51, %v7070_v15  ;;  %v5608_v61 = vmax.f32 %v5576_v1, 0.0  ;;  %v8385_v46 = vadd.f32 %v10746_v16, %v10704_v37  ;;  %v8386_v9 = vadd.f32 %v10751_v39, %v10706_v21  ;;  %v10848_v57 = vpop.f32.mrb[27].mxu0 }
 0x282   : > { %v10846_v45 = vpop.f32.mrb[23].mxu1  ;;  %v7074_v31 = vsel %vm7059_vm5, %v7073_v42, %v7072_v26  ;;  %v5579_v17 = vadd.f32 %v8382_v34, %v10702_v10  ;;  %v5577_v28 = vadd.f32 %v8383_v41, %v10702_v10  ;;  %v5582_v4 = vadd.f32 %v8384_v50, %v10702_v10 }
 0x283   : > { %v7160_v27 = vpack.c.b16 %v7074_v31, %v7074_v31  ;;  %v5800_v60 = vcombine.high %v5608_v61, %v5608_v61  ;;  %v5807_v37 = vrot.slane %v5608_v61, %v10711_v29  ;;  %v5580_v16 = vadd.f32 %v8385_v46, %v10702_v10 }
 0x284   : > { %v5611_v0 = vmax.f32 %v5579_v17, 0.0  ;;  %v5609_v21 = vmax.f32 %v5577_v28, 0.0  ;;  %v10856_v39 = vmax.f32 %v5582_v4, 0.0  ;;  %v10859_v19 = vadd.f32 %v8386_v9, %v10702_v10 }
 0x285   : > { %7176 = vst [vmem:[%s10771_s8 + $0x4] sm:$0xf] %v7160_v27  ;;  %v5814_v8 = vrot.slane %v5800_v60, %v10711_v29  ;;  %v5815_v14 = vcombine.high %v5807_v37, %v5807_v37  ;;  %v6352_v22 = vmax.f32 %v5807_v37, %v5841_v33  ;;  %v10863_v30 = vmax.f32 %v5580_v16, 0.0 }
 0x286   : > { %v5851_v35 = vcombine.high %v5611_v0, %v5611_v0  ;;  %v5858_v18 = vrot.slane %v5611_v0, %v10711_v29  ;;  %v5817_v59 = vcombine.high %v5609_v21, %v5609_v21  ;;  %v5824_v3 = vrot.slane %v5609_v21, %v10711_v29  ;;  %v10869_v20 = vpop.f32.mrb[28].mxu0 }
 0x287   : > { %v10867_v52 = vpop.f32.mrb[24].mxu1  ;;  %11170 = vst [vmem:[#allocation26_spill] sm:$0xff] %v10869_v20  ;;  %v5816_v43 = vcombine.high %v5814_v8, %v5814_v8  ;;  %v6353_v55 = vmax.f32 %v5815_v14, %v5849_v47  ;;  %v6354_v11 = vmax.f32 %v5814_v8, %v10813_v56  ;;  %v7528_v51 = vrot.slane %v6352_v22, 9  ;;  %v10874_v33 = vpop.f32.mrb[29].mxu0 }
 0x288   : > { %v10872_v42 = vpop.f32.mrb[25].mxu1  ;;  %11171 = vst [vmem:[#allocation19_spill] sm:$0xff] %v10874_v33  ;;  %v5865_v1 = vrot.slane %v5851_v35, %v10711_v29  ;;  %v5866_v15 = vcombine.high %v5858_v18, %v5858_v18  ;;  %v5831_v34 = vrot.slane %v5817_v59, %v10711_v29  ;;  %v5832_v41 = vcombine.high %v5824_v3, %v5824_v3  ;;  %v10880_v26 = vpop.f32.mrb[30].mxu0 }
 0x289   : > { %v10878_v50 = vpop.f32.mrb[26].mxu1  ;;  %11172 = vst [vmem:[#allocation18_spill] sm:$0xff] %v10880_v26  ;;  %v6355_v61 = vmax.f32 %v5816_v43, %v5850_v54  ;;  %v7529_v46 = vrot.slane %v6353_v55, 9  ;;  %v7530_v47 = vrot.slane %v6354_v11, 9  ;;  %v6672_v9 = vmax.f32 %v6352_v22, %v7528_v51  ;;  %v10884_v31 = vpop.f32.mrb[31].mxu0 }
 0x28a   : > { %v10882_v56 = vpop.f32.mrb[27].mxu1  ;;  %11173 = vst [vmem:[#allocation22_spill] sm:$0xff] %v10884_v31  ;;  %v5867_v17 = vcombine.high %v5865_v1, %v5865_v1  ;;  %v5833_v28 = vcombine.high %v5831_v34, %v5831_v34  ;;  %v6356_v4 = vmax.f32 %v5824_v3, %v5858_v18  ;;  %v6357_v27 = vmax.f32 %v5832_v41, %v5866_v15 }
 0x28b   : > { %v7531_v60 = vrot.slane %v6355_v61, 9  ;;  %v6673_v37 = vmax.f32 %v6353_v55, %v7529_v46  ;;  %v6674_v16 = vmax.f32 %v6354_v11, %v7530_v47  ;;  %v7660_v0 = vpack.c.bf16 %v6672_v9, %v6672_v9 }
 0x28c   : > { %v6358_v21 = vmax.f32 %v5831_v34, %v5865_v1  ;;  %v6359_v8 = vmax.f32 %v5833_v28, %v5867_v17  ;;  %v7532_v14 = vrot.slane %v6356_v4, 9  ;;  %v7533_v35 = vrot.slane %v6357_v27, 9 }
 0x28d   : > { %v6675_v54 = vmax.f32 %v6355_v61, %v7531_v60  ;;  %v7661_v59 = vpack.c.bf16 %v6673_v37, %v6673_v37  ;;  %v7662_v43 = vpack.c.bf16 %v6674_v16, %v6674_v16  ;;  %v6992_v22 = vunpack.c.l.b16 %v7660_v0 }
 0x28e   : > { %v7534_v51 = vrot.slane %v6358_v21, 9  ;;  %v7535_v26 = vrot.slane %v6359_v8, 9  ;;  %v6676_v33 = vmax.f32 %v6356_v4, %v7532_v14  ;;  %v6677_v31 = vmax.f32 %v6357_v27, %v7533_v35 }
 0x28f   : > { %v10886_v20 = vpop.f32.mrb[28].mxu1  ;;  %v7663_v18 = vpack.c.bf16 %v6675_v54, %v6675_v54  ;;  %v6993_v3 = vunpack.c.l.b16 %v7661_v59  ;;  %v6994_v15 = vunpack.c.l.b16 %v7662_v43  ;;  %v5902_v55 = vcombine.high %v10856_v39, %v10856_v39 }
 0x290   : > { %v10890_v11 = vpop.f32.mrb[29].mxu1  ;;  %v6678_v1 = vmax.f32 %v6358_v21, %v7534_v51  ;;  %v6679_v34 = vmax.f32 %v6359_v8, %v7535_v26  ;;  %v7664_v41 = vpack.c.bf16 %v6676_v33, %v6676_v33  ;;  %v7665_v61 = vpack.c.bf16 %v6677_v31, %v6677_v31 }
 0x291   : > { %v10892_v46 = vpop.f32.mrb[30].mxu1  ;;  %v6995_v47 = vunpack.c.l.b16 %v7663_v18  ;;  %v7075_v9 = vrot.slane %v6993_v3, 7  ;;  %v7077_v17 = vrot.slane %v6994_v15, 6  ;;  %v5909_v28 = vrot.slane %v10856_v39, %v10711_v29 }
 0x292   : > { %v10896_v4 = vpop.f32.mrb[31].mxu1  ;;  %v7666_v27 = vpack.c.bf16 %v6678_v1, %v6678_v1  ;;  %v7667_v60 = vpack.c.bf16 %v6679_v34, %v6679_v34  ;;  %v6996_v37 = vunpack.c.l.b16 %v7664_v41  ;;  %v6997_v16 = vunpack.c.l.b16 %v7665_v61 }
 0x293   : > { %v7076_v0 = vsel %vm7041_vm15, %v7075_v9, %v6992_v22  ;;  %v7079_v21 = vrot.slane %v6995_v47, 5  ;;  %v5916_v33 = vrot.slane %v5902_v55, %v10711_v29  ;;  %v5917_v26 = vcombine.high %v5909_v28, %v5909_v28 }
 0x294   : > { %v7078_v31 = vsel %vm7044_vm0, %v7077_v17, %v7076_v0  ;;  %v6998_v8 = vunpack.c.l.b16 %v7666_v27  ;;  %v6999_v14 = vunpack.c.l.b16 %v7667_v60  ;;  %v7081_v35 = vrot.slane %v6996_v37, 4 }
 0x295   : > { %v7080_v54 = vsel %vm7047_vm1, %v7079_v21, %v7078_v31  ;;  %v7083_v39 = vrot.slane %v6997_v16, 3  ;;  %v5918_v59 = vcombine.high %v5916_v33, %v5916_v33  ;;  %v5868_v43 = vcombine.high %v10863_v30, %v10863_v30 }
 0x296   : > { %v7082_v51 = vsel %vm7050_vm2, %v7081_v35, %v7080_v54  ;;  %v7085_v18 = vrot.slane %v6998_v8, 2  ;;  %v7087_v22 = vrot.slane %v6999_v14, 1  ;;  %v5875_v3 = vrot.slane %v10863_v30, %v10711_v29 }
 0x297   : > { %v7084_v15 = vsel %vm7053_vm3, %v7083_v39, %v7082_v51  ;;  %v5882_v55 = vrot.slane %v5868_v43, %v10711_v29  ;;  %v5615_v1 = vmax.f32 %v10859_v19, 0.0  ;;  %v8387_v34 = vadd.f32 %v10759_v25, %v10708_v58 }
 0x298   : > { %v7086_v41 = vsel %vm7056_vm4, %v7085_v18, %v7084_v15  ;;  %v5883_v61 = vcombine.high %v5875_v3, %v5875_v3  ;;  %v6360_v47 = vmax.f32 %v5875_v3, %v5909_v28  ;;  %v8388_v9 = vadd.f32 %v10781_v6, %v10794_v40 }
 0x299   : > { %v7088_v17 = vsel %vm7059_vm5, %v7087_v22, %v7086_v41  ;;  %v5884_v30 = vcombine.high %v5882_v55, %v5882_v55  ;;  %v6362_v27 = vmax.f32 %v5882_v55, %v5916_v33  ;;  %v5919_v60 = vcombine.high %v5615_v1, %v5615_v1 }
 0x29a   : > { %v7161_v37 = vpack.c.b16 %v7088_v17, %v7088_v17  ;;  %v6361_v16 = vmax.f32 %v5883_v61, %v5917_v26  ;;  %v7536_v0 = vrot.slane %v6360_v47, 9  ;;  %v5926_v19 = vrot.slane %v5615_v1, %v10711_v29 }
 0x29b   : > { %v6363_v21 = vmax.f32 %v5884_v30, %v5918_v59  ;;  %v7538_v58 = vrot.slane %v6362_v27, 9  ;;  %v5933_v25 = vrot.slane %v5919_v60, %v10711_v29  ;;  %v5581_v31 = vadd.f32 %v8387_v34, %v10702_v10 }
 0x29c   : > { %7177 = vst [vmem:[%s10771_s8 + $0x8] sm:$0xf] %v7161_v37  ;;  %v7537_v28 = vrot.slane %v6361_v16, 9  ;;  %v6680_v8 = vmax.f32 %v6360_v47, %v7536_v0  ;;  %v5934_v6 = vcombine.high %v5926_v19, %v5926_v19  ;;  %v5586_v40 = vadd.f32 %v8388_v9, %v10702_v10 }
 0x29d   : > { %v7539_v14 = vrot.slane %v6363_v21, 9  ;;  %v6682_v33 = vmax.f32 %v6362_v27, %v7538_v58  ;;  %v5935_v35 = vcombine.high %v5933_v25, %v5933_v25  ;;  %v5613_v54 = vmax.f32 %v5581_v31, 0.0 }
 0x29e   : > { %v6681_v26 = vmax.f32 %v6361_v16, %v7537_v28  ;;  %v7668_v39 = vpack.c.bf16 %v6680_v8, %v6680_v8  ;;  %v5618_v43 = vmax.f32 %v5586_v40, 0.0  ;;  %v8389_v59 = vadd.f32 %v10786_v23, %v10798_v62 }
 0x29f   : > { %v6683_v51 = vmax.f32 %v6363_v21, %v7539_v14  ;;  %v7670_v18 = vpack.c.bf16 %v6682_v33, %v6682_v33  ;;  %v5885_v22 = vcombine.high %v5613_v54, %v5613_v54  ;;  %v5892_v3 = vrot.slane %v5613_v54, %v10711_v29 }
 0x2a0   : > { %v7669_v15 = vpack.c.bf16 %v6681_v26, %v6681_v26  ;;  %v7000_v55 = vunpack.c.l.b16 %v7668_v39  ;;  %v5970_v1 = vcombine.high %v5618_v43, %v5618_v43  ;;  %v5977_v34 = vrot.slane %v5618_v43, %v10711_v29 }
 0x2a1   : > { %v7671_v41 = vpack.c.bf16 %v6683_v51, %v6683_v51  ;;  %v7002_v61 = vunpack.c.l.b16 %v7670_v18  ;;  %v5899_v47 = vrot.slane %v5885_v22, %v10711_v29  ;;  %v5900_v9 = vcombine.high %v5892_v3, %v5892_v3 }
 0x2a2   : > { %v7001_v17 = vunpack.c.l.b16 %v7669_v15  ;;  %v6364_v30 = vmax.f32 %v5892_v3, %v5926_v19  ;;  %v5984_v27 = vrot.slane %v5970_v1, %v10711_v29  ;;  %v5985_v23 = vcombine.high %v5977_v34, %v5977_v34 }
 0x2a3   : > { %v7003_v62 = vunpack.c.l.b16 %v7671_v41  ;;  %v7091_v60 = vrot.slane %v7002_v61, 6  ;;  %v5901_v37 = vcombine.high %v5899_v47, %v5899_v47  ;;  %v6365_v16 = vmax.f32 %v5900_v9, %v5934_v6 }
 0x2a4   : > { %v7089_v0 = vrot.slane %v7001_v17, 7  ;;  %v6366_v21 = vmax.f32 %v5899_v47, %v5933_v25  ;;  %v7540_v58 = vrot.slane %v6364_v30, 9  ;;  %v5986_v31 = vcombine.high %v5984_v27, %v5984_v27 }
 0x2a5   : > { %v7093_v28 = vrot.slane %v7003_v62, 5  ;;  %v6367_v8 = vmax.f32 %v5901_v37, %v5935_v35  ;;  %v7541_v40 = vrot.slane %v6365_v16, 9  ;;  %v5584_v14 = vadd.f32 %v8389_v59, %v10702_v10 }
 0x2a6   : > { %v7090_v33 = vsel %vm7041_vm15, %v7089_v0, %v7000_v55  ;;  %v7542_v54 = vrot.slane %v6366_v21, 9  ;;  %v6684_v19 = vmax.f32 %v6364_v30, %v7540_v58  ;;  %v8390_v26 = vadd.f32 %v10788_v36, %v10802_v44 }
 0x2a7   : > { %v7092_v39 = vsel %vm7044_vm0, %v7091_v60, %v7090_v33  ;;  %v7543_v43 = vrot.slane %v6367_v8, 9  ;;  %v6685_v6 = vmax.f32 %v6365_v16, %v7541_v40  ;;  %v5616_v51 = vmax.f32 %v5584_v14, 0.0 }
 0x2a8   : > { %v6686_v25 = vmax.f32 %v6366_v21, %v7542_v54  ;;  %v7672_v18 = vpack.c.bf16 %v6684_v19, %v6684_v19  ;;  %v7094_v22 = vsel %vm7047_vm1, %v7093_v28, %v7092_v39  ;;  %v5587_v35 = vadd.f32 %v8390_v26, %v10702_v10 }
 0x2a9   : > { %v6687_v3 = vmax.f32 %v6367_v8, %v7543_v43  ;;  %v7673_v59 = vpack.c.bf16 %v6685_v6, %v6685_v6  ;;  %v5936_v15 = vcombine.high %v5616_v51, %v5616_v51  ;;  %v5943_v55 = vrot.slane %v5616_v51, %v10711_v29 }
 0x2aa   : > { %v7674_v1 = vpack.c.bf16 %v6686_v25, %v6686_v25  ;;  %v7004_v41 = vunpack.c.l.b16 %v7672_v18  ;;  %v5619_v61 = vmax.f32 %v5587_v35, 0.0  ;;  %v8391_v36 = vadd.f32 %v10792_v49, %v10806_v24 }
 0x2ab   : > { %v7675_v44 = vpack.c.bf16 %v6687_v3, %v6687_v3  ;;  %v7005_v47 = vunpack.c.l.b16 %v7673_v59  ;;  %v5950_v9 = vrot.slane %v5936_v15, %v10711_v29  ;;  %v5951_v17 = vcombine.high %v5943_v55, %v5943_v55 }
 0x2ac   : > { %v7006_v30 = vunpack.c.l.b16 %v7674_v1  ;;  %v7095_v62 = vrot.slane %v7004_v41, 4  ;;  %v6368_v60 = vmax.f32 %v5943_v55, %v5977_v34  ;;  %v5987_v37 = vcombine.high %v5619_v61, %v5619_v61 }
 0x2ad   : > { %v7007_v16 = vunpack.c.l.b16 %v7675_v44  ;;  %v7097_v0 = vrot.slane %v7005_v47, 3  ;;  %v5952_v21 = vcombine.high %v5950_v9, %v5950_v9  ;;  %v6369_v58 = vmax.f32 %v5951_v17, %v5985_v23 }
 0x2ae   : > { %v7096_v28 = vsel %vm7050_vm2, %v7095_v62, %v7094_v22  ;;  %v7099_v8 = vrot.slane %v7006_v30, 2  ;;  %v6370_v40 = vmax.f32 %v5950_v9, %v5984_v27  ;;  %v7544_v14 = vrot.slane %v6368_v60, 9 }
 0x2af   : > { %v7098_v49 = vsel %vm7053_vm3, %v7097_v0, %v7096_v28  ;;  %v7101_v24 = vrot.slane %v7007_v16, 1  ;;  %v6371_v33 = vmax.f32 %v5952_v21, %v5986_v31  ;;  %v7545_v54 = vrot.slane %v6369_v58, 9 }
 0x2b0   : > { %v7100_v19 = vsel %vm7056_vm4, %v7099_v8, %v7098_v49  ;;  %v7546_v26 = vrot.slane %v6370_v40, 9  ;;  %v6688_v34 = vmax.f32 %v6368_v60, %v7544_v14  ;;  %v5994_v39 = vrot.slane %v5619_v61, %v10711_v29 }
 0x2b1   : > { %v7102_v43 = vsel %vm7059_vm5, %v7101_v24, %v7100_v19  ;;  %v7547_v23 = vrot.slane %v6371_v33, 9  ;;  %v6689_v6 = vmax.f32 %v6369_v58, %v7545_v54  ;;  %v6001_v51 = vrot.slane %v5987_v37, %v10711_v29 }
 0x2b2   : > { %v7162_v27 = vpack.c.b16 %v7102_v43, %v7102_v43  ;;  %v6690_v25 = vmax.f32 %v6370_v40, %v7546_v26  ;;  %v7676_v18 = vpack.c.bf16 %v6688_v34, %v6688_v34  ;;  %v6002_v22 = vcombine.high %v5994_v39, %v5994_v39 }
 0x2b3   : > { %v6691_v35 = vmax.f32 %v6371_v33, %v7547_v23  ;;  %v7677_v31 = vpack.c.bf16 %v6689_v6, %v6689_v6  ;;  %v6003_v3 = vcombine.high %v6001_v51, %v6001_v51  ;;  %v5585_v59 = vadd.f32 %v8391_v36, %v10702_v10 }
 0x2b4   : > { %7178 = vst [vmem:[%s10771_s8 + $0xc] sm:$0xf] %v7162_v27  ;;  %v7678_v15 = vpack.c.bf16 %v6690_v25, %v6690_v25  ;;  %v7008_v55 = vunpack.c.l.b16 %v7676_v18  ;;  %v8392_v1 = vadd.f32 %v10796_v32, %v10819_v7  ;;  %v8393_v41 = vadd.f32 %v10800_v48, %v10826_v12 }
 0x2b5   : > { %v7679_v61 = vpack.c.bf16 %v6691_v35, %v6691_v35  ;;  %v7009_v44 = vunpack.c.l.b16 %v7677_v31  ;;  %v5617_v47 = vmax.f32 %v5585_v59, 0.0  ;;  %v8394_v9 = vadd.f32 %v10804_v2, %v10837_v63 }
 0x2b6   : > { %v7010_v17 = vunpack.c.l.b16 %v7678_v15  ;;  %v5590_v30 = vadd.f32 %v8392_v1, %v10702_v10  ;;  %v5588_v36 = vadd.f32 %v8393_v41, %v10702_v10  ;;  %v10956_v62 = vadd.f32 %v10808_v53, %v10846_v45 }
 0x2b7   : > { %v7011_v60 = vunpack.c.l.b16 %v7679_v61  ;;  %v7103_v32 = vrot.slane %v7009_v44, 7  ;;  %v5953_v7 = vcombine.high %v5617_v47, %v5617_v47  ;;  %v5960_v48 = vrot.slane %v5617_v47, %v10711_v29 }
 0x2b8   : > { %v7105_v12 = vrot.slane %v7010_v17, 6  ;;  %v5622_v37 = vmax.f32 %v5590_v30, 0.0  ;;  %v5620_v16 = vmax.f32 %v5588_v36, 0.0  ;;  %v5591_v0 = vadd.f32 %v8394_v9, %v10702_v10 }
 0x2b9   : > { %v7104_v2 = vsel %vm7041_vm15, %v7103_v32, %v7008_v55  ;;  %v7107_v63 = vrot.slane %v7011_v60, 5  ;;  %v5967_v21 = vrot.slane %v5953_v7, %v10711_v29  ;;  %v5968_v58 = vcombine.high %v5960_v48, %v5960_v48 }
 0x2ba   : > { %v7106_v28 = vsel %vm7044_vm0, %v7105_v12, %v7104_v2  ;;  %v6372_v53 = vmax.f32 %v5960_v48, %v5994_v39  ;;  %v6038_v45 = vcombine.high %v5622_v37, %v5622_v37  ;;  %v6045_v8 = vrot.slane %v5622_v37, %v10711_v29 }
 0x2bb   : > { %v5969_v40 = vcombine.high %v5967_v21, %v5967_v21  ;;  %v6373_v14 = vmax.f32 %v5968_v58, %v6002_v22  ;;  %v6374_v49 = vmax.f32 %v5967_v21, %v6001_v51  ;;  %v7108_v24 = vsel %vm7047_vm1, %v7107_v63, %v7106_v28 }
 0x2bc   : > { %v7548_v33 = vrot.slane %v6372_v53, 9  ;;  %v6052_v10 = vrot.slane %v6038_v45, %v10711_v29  ;;  %v6053_v54 = vcombine.high %v6045_v8, %v6045_v8  ;;  %v6004_v19 = vcombine.high %v5620_v16, %v5620_v16 }
 0x2bd   : > { %v6375_v26 = vmax.f32 %v5969_v40, %v6003_v3  ;;  %v7549_v34 = vrot.slane %v6373_v14, 9  ;;  %v7550_v43 = vrot.slane %v6374_v49, 9  ;;  %v6011_v23 = vrot.slane %v5620_v16, %v10711_v29 }
 0x2be   : > { %v6692_v6 = vmax.f32 %v6372_v53, %v7548_v33  ;;  %v6054_v39 = vcombine.high %v6052_v10, %v6052_v10  ;;  %v6018_v27 = vrot.slane %v6004_v19, %v10711_v29  ;;  %v5623_v25 = vmax.f32 %v5591_v0, 0.0 }
 0x2bf   : > { %v7551_v18 = vrot.slane %v6375_v26, 9  ;;  %v6693_v22 = vmax.f32 %v6373_v14, %v7549_v34  ;;  %v6694_v51 = vmax.f32 %v6374_v49, %v7550_v43  ;;  %v6019_v35 = vcombine.high %v6011_v23, %v6011_v23 }
 0x2c0   : > { %v7680_v31 = vpack.c.bf16 %v6692_v6, %v6692_v6  ;;  %v6020_v59 = vcombine.high %v6018_v27, %v6018_v27  ;;  %v6376_v15 = vmax.f32 %v6011_v23, %v6045_v8  ;;  %v6378_v55 = vmax.f32 %v6018_v27, %v6052_v10 }
 0x2c1   : > { %v6695_v1 = vmax.f32 %v6375_v26, %v7551_v18  ;;  %v7681_v41 = vpack.c.bf16 %v6693_v22, %v6693_v22  ;;  %v7682_v3 = vpack.c.bf16 %v6694_v51, %v6694_v51  ;;  %v6377_v61 = vmax.f32 %v6019_v35, %v6053_v54 }
 0x2c2   : > { %v7012_v44 = vunpack.c.l.b16 %v7680_v31  ;;  %v6379_v47 = vmax.f32 %v6020_v59, %v6054_v39  ;;  %v7552_v9 = vrot.slane %v6376_v15, 9  ;;  %v7554_v17 = vrot.slane %v6378_v55, 9  ;;  %v10977_v39 = vld [vmem:[%s11061_s2] ss:$0 sm:$0xff] }
 0x2c3   : > { %v7683_v30 = vpack.c.bf16 %v6695_v1, %v6695_v1  ;;  %v7013_v36 = vunpack.c.l.b16 %v7681_v41  ;;  %v7014_v60 = vunpack.c.l.b16 %v7682_v3  ;;  %v7553_v32 = vrot.slane %v6377_v61, 9  ;;  %v11174_v41 = vld [vmem:[#allocation26_spill] sm:$0xff] }
 0x2c4   : > { %v7109_v7 = vrot.slane %v7012_v44, 4  ;;  %v7555_v48 = vrot.slane %v6379_v47, 9  ;;  %v6696_v12 = vmax.f32 %v6376_v15, %v7552_v9  ;;  %v6698_v37 = vmax.f32 %v6378_v55, %v7554_v17 }
 0x2c5   : > { %v7015_v16 = vunpack.c.l.b16 %v7683_v30  ;;  %v7111_v0 = vrot.slane %v7013_v36, 3  ;;  %v7113_v2 = vrot.slane %v7014_v60, 2  ;;  %v6697_v63 = vmax.f32 %v6377_v61, %v7553_v32 }
 0x2c6   : > { %v7110_v21 = vsel %vm7050_vm2, %v7109_v7, %v7108_v24  ;;  %v6699_v58 = vmax.f32 %v6379_v47, %v7555_v48  ;;  %v7684_v28 = vpack.c.bf16 %v6696_v12, %v6696_v12  ;;  %v7686_v53 = vpack.c.bf16 %v6698_v37, %v6698_v37 }
 0x2c7   : > { %v7112_v45 = vsel %vm7053_vm3, %v7111_v0, %v7110_v21  ;;  %v7115_v8 = vrot.slane %v7015_v16, 1  ;;  %v7685_v40 = vpack.c.bf16 %v6697_v63, %v6697_v63  ;;  %v6055_v14 = vcombine.high %v5623_v25, %v5623_v25 }
 0x2c8   : > { %v7114_v49 = vsel %vm7056_vm4, %v7113_v2, %v7112_v45  ;;  %v7687_v33 = vpack.c.bf16 %v6699_v58, %v6699_v58  ;;  %v7016_v10 = vunpack.c.l.b16 %v7684_v28  ;;  %v7018_v54 = vunpack.c.l.b16 %v7686_v53 }
 0x2c9   : > { %v7116_v19 = vsel %vm7059_vm5, %v7115_v8, %v7114_v49  ;;  %v7017_v26 = vunpack.c.l.b16 %v7685_v40  ;;  %v6062_v34 = vrot.slane %v5623_v25, %v10711_v29  ;;  %v6069_v24 = vrot.slane %v6055_v14, %v10711_v29 }
 0x2ca   : > { %v7163_v43 = vpack.c.b16 %v7116_v19, %v7116_v19  ;;  %v7019_v23 = vunpack.c.l.b16 %v7687_v33  ;;  %v7119_v6 = vrot.slane %v7018_v54, 6  ;;  %v5589_v27 = vadd.f32 %v10977_v39, %v10956_v62 }
 0x2cb   : > { %v7117_v18 = vrot.slane %v7017_v26, 7  ;;  %v6070_v22 = vcombine.high %v6062_v34, %v6062_v34  ;;  %v6071_v51 = vcombine.high %v6069_v24, %v6069_v24  ;;  %v8396_v35 = vadd.f32 %v10821_v5, %v10867_v52 }
 0x2cc   : > { %7179 = vst [vmem:[%s10771_s8 + $0x10] sm:$0xf] %v7163_v43  ;;  %v7121_v25 = vrot.slane %v7019_v23, 5  ;;  %v5621_v31 = vmax.f32 %v5589_v27, 0.0  ;;  %v8397_v59 = vadd.f32 %v10828_v38, %v10872_v42  ;;  %v8398_v15 = vadd.f32 %v10839_v13, %v10878_v50 }
 0x2cd   : > { %v7118_v55 = vsel %vm7041_vm15, %v7117_v18, %v7016_v10  ;;  %v5594_v1 = vadd.f32 %v10977_v39, %v8396_v35  ;;  %v8399_v62 = vadd.f32 %v10848_v57, %v10882_v56  ;;  %v10994_v3 = vadd.f32 %v11174_v41, %v10886_v20 }
 0x2ce   : > { %v7120_v5 = vsel %vm7044_vm0, %v7119_v6, %v7118_v55  ;;  %v6021_v52 = vcombine.high %v5621_v31, %v5621_v31  ;;  %v6028_v61 = vrot.slane %v5621_v31, %v10711_v29  ;;  %v5592_v38 = vadd.f32 %v10977_v39, %v8397_v59 }
 0x2cf   : > { %v7122_v13 = vsel %vm7047_vm1, %v7121_v25, %v7120_v5  ;;  %v5626_v42 = vmax.f32 %v5594_v1, 0.0  ;;  %v5595_v50 = vadd.f32 %v10977_v39, %v8398_v15  ;;  %v5593_v44 = vadd.f32 %v10977_v39, %v8399_v62 }
 0x2d0   : > { %v6035_v57 = vrot.slane %v6021_v52, %v10711_v29  ;;  %v6036_v56 = vcombine.high %v6028_v61, %v6028_v61  ;;  %v6380_v47 = vmax.f32 %v6028_v61, %v6062_v34  ;;  %v5624_v20 = vmax.f32 %v5592_v38, 0.0 }
 0x2d1   : > { %v6106_v9 = vcombine.high %v5626_v42, %v5626_v42  ;;  %v6113_v17 = vrot.slane %v5626_v42, %v10711_v29  ;;  %v5627_v30 = vmax.f32 %v5595_v50, 0.0  ;;  %v11004_v36 = vmax.f32 %v5593_v44, 0.0 }
 0x2d2   : > { %v6037_v60 = vcombine.high %v6035_v57, %v6035_v57  ;;  %v6381_v32 = vmax.f32 %v6036_v56, %v6070_v22  ;;  %v6382_v7 = vmax.f32 %v6035_v57, %v6069_v24  ;;  %v7556_v48 = vrot.slane %v6380_v47, 9 }
 0x2d3   : > { %v6120_v12 = vrot.slane %v6106_v9, %v10711_v29  ;;  %v6121_v37 = vcombine.high %v6113_v17, %v6113_v17  ;;  %v6072_v16 = vcombine.high %v5624_v20, %v5624_v20  ;;  %v6079_v0 = vrot.slane %v5624_v20, %v10711_v29 }
 0x2d4   : > { %v6383_v2 = vmax.f32 %v6037_v60, %v6071_v51  ;;  %v7557_v63 = vrot.slane %v6381_v32, 9  ;;  %v7558_v21 = vrot.slane %v6382_v7, 9  ;;  %v6700_v58 = vmax.f32 %v6380_v47, %v7556_v48 }
 0x2d5   : > { %v6122_v28 = vcombine.high %v6120_v12, %v6120_v12  ;;  %v6086_v53 = vrot.slane %v6072_v16, %v10711_v29  ;;  %v6087_v45 = vcombine.high %v6079_v0, %v6079_v0  ;;  %v6384_v8 = vmax.f32 %v6079_v0, %v6113_v17 }
 0x2d6   : > { %v7559_v40 = vrot.slane %v6383_v2, 9  ;;  %v6701_v14 = vmax.f32 %v6381_v32, %v7557_v63  ;;  %v6702_v49 = vmax.f32 %v6382_v7, %v7558_v21  ;;  %v7688_v33 = vpack.c.bf16 %v6700_v58, %v6700_v58 }
 0x2d7   : > { %v6088_v10 = vcombine.high %v6086_v53, %v6086_v53  ;;  %v6385_v54 = vmax.f32 %v6087_v45, %v6121_v37  ;;  %v6386_v19 = vmax.f32 %v6086_v53, %v6120_v12  ;;  %v7560_v26 = vrot.slane %v6384_v8, 9  ;;  %v11175_v53 = vld [vmem:[#allocation19_spill] sm:$0xff] }
 0x2d8   : > { %v6703_v34 = vmax.f32 %v6383_v2, %v7559_v40  ;;  %v7689_v24 = vpack.c.bf16 %v6701_v14, %v6701_v14  ;;  %v7690_v43 = vpack.c.bf16 %v6702_v49, %v6702_v49  ;;  %v7020_v23 = vunpack.c.l.b16 %v7688_v33 }
 0x2d9   : > { %v6387_v6 = vmax.f32 %v6088_v10, %v6122_v28  ;;  %v7561_v27 = vrot.slane %v6385_v54, 9  ;;  %v7562_v18 = vrot.slane %v6386_v19, 9  ;;  %v6704_v22 = vmax.f32 %v6384_v8, %v7560_v26  ;;  %v11176_v8 = vld [vmem:[#allocation18_spill] sm:$0xff] }
 0x2da   : > { %v7691_v51 = vpack.c.bf16 %v6703_v34, %v6703_v34  ;;  %v7021_v35 = vunpack.c.l.b16 %v7689_v24  ;;  %v7022_v25 = vunpack.c.l.b16 %v7690_v43  ;;  %v7123_v31 = vrot.slane %v7020_v23, 4 }
 0x2db   : > { %v7563_v59 = vrot.slane %v6387_v6, 9  ;;  %v6705_v15 = vmax.f32 %v6385_v54, %v7561_v27  ;;  %v6706_v55 = vmax.f32 %v6386_v19, %v7562_v18  ;;  %v7692_v1 = vpack.c.bf16 %v6704_v22, %v6704_v22 }
 0x2dc   : > { %v7023_v62 = vunpack.c.l.b16 %v7691_v51  ;;  %v7124_v41 = vsel %vm7050_vm2, %v7123_v31, %v7122_v13  ;;  %v7125_v5 = vrot.slane %v7021_v35, 3  ;;  %v7127_v52 = vrot.slane %v7022_v25, 2 }
 0x2dd   : > { %v6707_v61 = vmax.f32 %v6387_v6, %v7563_v59  ;;  %v7693_v38 = vpack.c.bf16 %v6705_v15, %v6705_v15  ;;  %v7694_v42 = vpack.c.bf16 %v6706_v55, %v6706_v55  ;;  %v7024_v50 = vunpack.c.l.b16 %v7692_v1 }
 0x2de   : > { %v7126_v44 = vsel %vm7053_vm3, %v7125_v5, %v7124_v41  ;;  %v7129_v57 = vrot.slane %v7023_v62, 1  ;;  %v6123_v56 = vcombine.high %v5627_v30, %v5627_v30  ;;  %v6130_v47 = vrot.slane %v5627_v30, %v10711_v29 }
 0x2df   : > { %v7128_v20 = vsel %vm7056_vm4, %v7127_v52, %v7126_v44  ;;  %v7695_v9 = vpack.c.bf16 %v6707_v61, %v6707_v61  ;;  %v7025_v17 = vunpack.c.l.b16 %v7693_v38  ;;  %v7026_v60 = vunpack.c.l.b16 %v7694_v42 }
 0x2e0   : > { %v7130_v13 = vsel %vm7059_vm5, %v7129_v57, %v7128_v20  ;;  %v6137_v32 = vrot.slane %v6123_v56, %v10711_v29  ;;  %v6138_v7 = vcombine.high %v6130_v47, %v6130_v47  ;;  %v6089_v48 = vcombine.high %v11004_v36, %v11004_v36 }
 0x2e1   : > { %v7164_v12 = vpack.c.b16 %v7130_v13, %v7130_v13  ;;  %v7027_v37 = vunpack.c.l.b16 %v7695_v9  ;;  %v7131_v16 = vrot.slane %v7025_v17, 7  ;;  %v7133_v0 = vrot.slane %v7026_v60, 6 }
 0x2e2   : > { %v6139_v2 = vcombine.high %v6137_v32, %v6137_v32  ;;  %v6096_v30 = vrot.slane %v11004_v36, %v10711_v29  ;;  %v6103_v63 = vrot.slane %v6089_v48, %v10711_v29  ;;  %v5598_v21 = vadd.f32 %v10977_v39, %v10994_v3 }
 0x2e3   : > { %7180 = vst [vmem:[%s10771_s8 + $0x14] sm:$0xf] %v7164_v12  ;;  %v7132_v58 = vsel %vm7041_vm15, %v7131_v16, %v7024_v50  ;;  %v7135_v28 = vrot.slane %v7027_v37, 5  ;;  %v8401_v45 = vadd.f32 %v11175_v53, %v10890_v11  ;;  %v8402_v40 = vadd.f32 %v11176_v8, %v10892_v46 }
 0x2e4   : > { %v7134_v14 = vsel %vm7044_vm0, %v7133_v0, %v7132_v58  ;;  %v6104_v49 = vcombine.high %v6096_v30, %v6096_v30  ;;  %v6105_v33 = vcombine.high %v6103_v63, %v6103_v63  ;;  %v6388_v36 = vmax.f32 %v6096_v30, %v6130_v47 }
 0x2e5   : > { %v6390_v10 = vmax.f32 %v6103_v63, %v6137_v32  ;;  %v7136_v54 = vsel %vm7047_vm1, %v7135_v28, %v7134_v14  ;;  %v5630_v19 = vmax.f32 %v5598_v21, 0.0  ;;  %v5596_v3 = vadd.f32 %v10977_v39, %v8401_v45  ;;  %v11177_v28 = vld [vmem:[#allocation22_spill] sm:$0xff] }
 0x2e6   : > { %v6389_v26 = vmax.f32 %v6104_v49, %v6138_v7  ;;  %v6391_v34 = vmax.f32 %v6105_v33, %v6139_v2  ;;  %v7564_v24 = vrot.slane %v6388_v36, 9  ;;  %v5599_v5 = vadd.f32 %v10977_v39, %v8402_v40 }
 0x2e7   : > { %v7566_v43 = vrot.slane %v6390_v10, 9  ;;  %v6174_v23 = vcombine.high %v5630_v19, %v5630_v19  ;;  %v6181_v11 = vrot.slane %v5630_v19, %v10711_v29  ;;  %v5628_v6 = vmax.f32 %v5596_v3, 0.0 }
 0x2e8   : > { %v7565_v46 = vrot.slane %v6389_v26, 9  ;;  %v7567_v27 = vrot.slane %v6391_v34, 9  ;;  %v6708_v18 = vmax.f32 %v6388_v36, %v7564_v24  ;;  %v5631_v7 = vmax.f32 %v5599_v5, 0.0 }
 0x2e9   : > { %v6710_v22 = vmax.f32 %v6390_v10, %v7566_v43  ;;  %v6188_v51 = vrot.slane %v6174_v23, %v10711_v29  ;;  %v6189_v35 = vcombine.high %v6181_v11, %v6181_v11  ;;  %v6140_v25 = vcombine.high %v5628_v6, %v5628_v6 }
 0x2ea   : > { %v6709_v31 = vmax.f32 %v6389_v26, %v7565_v46  ;;  %v6711_v59 = vmax.f32 %v6391_v34, %v7567_v27  ;;  %v7696_v15 = vpack.c.bf16 %v6708_v18, %v6708_v18  ;;  %v6147_v55 = vrot.slane %v5628_v6, %v10711_v29 }
 0x2eb   : > { %v7698_v1 = vpack.c.bf16 %v6710_v22, %v6710_v22  ;;  %v6190_v62 = vcombine.high %v6188_v51, %v6188_v51  ;;  %v6154_v41 = vrot.slane %v6140_v25, %v10711_v29  ;;  %v8403_v53 = vadd.f32 %v11177_v28, %v10896_v4 }
 0x2ec   : > { %v7697_v52 = vpack.c.bf16 %v6709_v31, %v6709_v31  ;;  %v7699_v61 = vpack.c.bf16 %v6711_v59, %v6711_v59  ;;  %v7028_v38 = vunpack.c.l.b16 %v7696_v15  ;;  %v6155_v42 = vcombine.high %v6147_v55, %v6147_v55 }
 0x2ed   : > { %v7030_v50 = vunpack.c.l.b16 %v7698_v1  ;;  %v6156_v44 = vcombine.high %v6154_v41, %v6154_v41  ;;  %v6392_v57 = vmax.f32 %v6147_v55, %v6181_v11  ;;  %v6394_v56 = vmax.f32 %v6154_v41, %v6188_v51 }
 0x2ee   : > { %v7029_v47 = vunpack.c.l.b16 %v7697_v52  ;;  %v7031_v20 = vunpack.c.l.b16 %v7699_v61  ;;  %v7137_v9 = vrot.slane %v7028_v38, 4  ;;  %v6393_v17 = vmax.f32 %v6155_v42, %v6189_v35 }
 0x2ef   : > { %v6395_v60 = vmax.f32 %v6156_v44, %v6190_v62  ;;  %v7568_v13 = vrot.slane %v6392_v57, 9  ;;  %v7570_v32 = vrot.slane %v6394_v56, 9  ;;  %v7141_v16 = vrot.slane %v7030_v50, 2 }
 0x2f0   : > { %v7138_v48 = vsel %vm7050_vm2, %v7137_v9, %v7136_v54  ;;  %v7139_v12 = vrot.slane %v7029_v47, 3  ;;  %v7569_v37 = vrot.slane %v6393_v17, 9  ;;  %v7143_v21 = vrot.slane %v7031_v20, 1 }
 0x2f1   : > { %v7571_v0 = vrot.slane %v6395_v60, 9  ;;  %v6712_v2 = vmax.f32 %v6392_v57, %v7568_v13  ;;  %v6714_v30 = vmax.f32 %v6394_v56, %v7570_v32  ;;  %v6191_v14 = vcombine.high %v5631_v7, %v5631_v7 }
 0x2f2   : > { %v7140_v63 = vsel %vm7053_vm3, %v7139_v12, %v7138_v48  ;;  %v6713_v58 = vmax.f32 %v6393_v17, %v7569_v37  ;;  %v6198_v26 = vrot.slane %v5631_v7, %v10711_v29  ;;  %v5597_v34 = vadd.f32 %v10977_v39, %v8403_v53 }
 0x2f3   : > { %v7142_v45 = vsel %vm7056_vm4, %v7141_v16, %v7140_v63  ;;  %v6715_v8 = vmax.f32 %v6395_v60, %v7571_v0  ;;  %v7702_v40 = vpack.c.bf16 %v6714_v30, %v6714_v30  ;;  %v7700_v33 = vpack.c.bf16 %v6712_v2, %v6712_v2 }
 0x2f4   : > { %v7144_v49 = vsel %vm7059_vm5, %v7143_v21, %v7142_v45  ;;  %v7701_v36 = vpack.c.bf16 %v6713_v58, %v6713_v58  ;;  %v6205_v43 = vrot.slane %v6191_v14, %v10711_v29  ;;  %v5629_v6 = vmax.f32 %v5597_v34, 0.0 }
 0x2f5   : > { %v7165_v10 = vpack.c.b16 %v7144_v49, %v7144_v49  ;;  %v7703_v54 = vpack.c.bf16 %v6715_v8, %v6715_v8  ;;  %v7034_v19 = vunpack.c.l.b16 %v7702_v40  ;;  %v7032_v23 = vunpack.c.l.b16 %v7700_v33 }
 0x2f6   : > { %v7033_v3 = vunpack.c.l.b16 %v7701_v36  ;;  %v6206_v18 = vcombine.high %v6198_v26, %v6198_v26  ;;  %v6157_v22 = vcombine.high %v5629_v6, %v5629_v6  ;;  %v6164_v51 = vrot.slane %v5629_v6, %v10711_v29 }
 0x2f7   : > { %7181 = vst [vmem:[%s10771_s8 + $0x18] sm:$0xf] %v7165_v10  ;;  %v7035_v24 = vunpack.c.l.b16 %v7703_v54  ;;  %v7147_v4 = vrot.slane %v7034_v19, 6  ;;  %v6207_v25 = vcombine.high %v6205_v43, %v6205_v43 }
 0x2f8   : > { %v7145_v11 = vrot.slane %v7033_v3, 7  ;;  %v6171_v39 = vrot.slane %v6157_v22, %v10711_v29  ;;  %v6172_v31 = vcombine.high %v6164_v51, %v6164_v51  ;;  %v6396_v59 = vmax.f32 %v6164_v51, %v6198_v26 }
 0x2f9   : > { %v7149_v46 = vrot.slane %v7035_v24, 5 }
 0x2fa   : > { %v7146_v27 = vsel %vm7041_vm15, %v7145_v11, %v7032_v23  ;;  %v6173_v55 = vcombine.high %v6171_v39, %v6171_v39  ;;  %v6397_v1 = vmax.f32 %v6172_v31, %v6206_v18  ;;  %v6398_v62 = vmax.f32 %v6171_v39, %v6205_v43 }
 0x2fb   : > { %v7148_v35 = vsel %vm7044_vm0, %v7147_v4, %v7146_v27  ;;  %v7572_v41 = vrot.slane %v6396_v59, 9 }
 0x2fc   : > { %v7150_v15 = vsel %vm7047_vm1, %v7149_v46, %v7148_v35  ;;  %v6399_v5 = vmax.f32 %v6173_v55, %v6207_v25  ;;  %v7573_v52 = vrot.slane %v6397_v1, 9  ;;  %v7574_v61 = vrot.slane %v6398_v62, 9 }
 0x2fd   : > { %v6716_v38 = vmax.f32 %v6396_v59, %v7572_v41 }
 0x2fe   : > { %v7575_v42 = vrot.slane %v6399_v5, 9  ;;  %v6717_v50 = vmax.f32 %v6397_v1, %v7573_v52  ;;  %v6718_v44 = vmax.f32 %v6398_v62, %v7574_v61 }
 0x2ff   : > { %v7704_v57 = vpack.c.bf16 %v6716_v38, %v6716_v38 }
 0x300   : > { %v6719_v56 = vmax.f32 %v6399_v5, %v7575_v42  ;;  %v7705_v47 = vpack.c.bf16 %v6717_v50, %v6717_v50  ;;  %v7706_v29 = vpack.c.bf16 %v6718_v44, %v6718_v44 }
 0x301   : > { %v7036_v20 = vunpack.c.l.b16 %v7704_v57 }
 0x302   : > { %v7707_v9 = vpack.c.bf16 %v6719_v56, %v6719_v56  ;;  %v7037_v17 = vunpack.c.l.b16 %v7705_v47  ;;  %v7038_v60 = vunpack.c.l.b16 %v7706_v29 }
 0x303   : > { %v7151_v13 = vrot.slane %v7036_v20, 4 }
 0x304   : > { %v7039_v32 = vunpack.c.l.b16 %v7707_v9  ;;  %v7153_v48 = vrot.slane %v7037_v17, 3  ;;  %v7155_v12 = vrot.slane %v7038_v60, 2 }
 0x305   : > { %v7152_v7 = vsel %vm7050_vm2, %v7151_v13, %v7150_v15 }
 0x306   : > { %v7154_v37 = vsel %vm7053_vm3, %v7153_v48, %v7152_v7  ;;  %v7157_v16 = vrot.slane %v7039_v32, 1 }
 0x307   : > { %v7156_v0 = vsel %vm7056_vm4, %v7155_v12, %v7154_v37 }
 0x308   : > { %v7158_v2 = vsel %vm7059_vm5, %v7157_v16, %v7156_v0 }
 0x309   : > { %v7166_v30 = vpack.c.b16 %v7158_v2, %v7158_v2 }
 0x30b   : > { %7182 = vst [vmem:[%s10771_s8 + $0x1c] sm:$0xf] %v7166_v30 }
 0x30c PF: > { %s13_s12 = sadd.s32 1, %s8839_s12  }
 0x30d   : > { %p10_p4 = scmp.ge.s32.totalorder %s13_s12, 4  }
 0x30f   :  { %12 = sbr.rel (!%p10_p4) target bundleno = 1 (0x1), region = 65 }

</bundles_post_ra>
